<compile_context>
chip_gen: v7x
topology: tpu7x:2x2x1
jax: 0.10.0
libtpu: 0.0.40
codegen_flags: <defaults>
</compile_context>

<pallas_src>
import functools

import numpy as np

import jax
import jax.numpy as jnp
from jax.experimental import pallas as pl
from jax.experimental.pallas import tpu as pltpu


# -----------------------------------------------------------------------------
# Fused Pallas kernel
# -----------------------------------------------------------------------------
def _fused_mnist_kernel(cols1_ref, w1_ref, b1_ref, w2_ref, b2_ref, rsel_ref,
                        wf1_ref, bf1_ref, wf2_ref, bf2_ref,
                        out_ref, p1_ref, flat_ref):
    f32 = jnp.float32
    B = p1_ref.shape[0]

    # ---- conv1 as a parity-grouped im2col matmul; 2x2 maxpool == max over the 4
    #      parity groups; then bias + relu (bias/relu commute with the max). -------
    w1 = w1_ref[...]                                               # (128, 128)
    m1 = jnp.dot(cols1_ref[0], w1, preferred_element_type=f32)     # (B*192, 128)
    for p in range(1, 4):
        m1 = jnp.maximum(m1, jnp.dot(cols1_ref[p], w1,
                                     preferred_element_type=f32))
    p1 = jnp.maximum(m1 + b1_ref[...], 0.0)                        # rows=(b,io,jo16)
    p1_ref[...] = p1.reshape(B, 12, 16, 128)                       # jo padded 12->16

    # ---- conv2 as 25 shifted matmuls accumulated in f32 (in-kernel im2col). ------
    acc2 = None                                                    # (B*64, 128)
    for kh in range(5):
        for kw in range(5):
            blk = p1_ref[:, kh:kh + 8, kw:kw + 8, :]               # (B, 8, 8, 128)
            d = jnp.dot(blk.reshape(B * 64, 128), w2_ref[kh * 5 + kw],
                        preferred_element_type=f32)
            acc2 = d if acc2 is None else acc2 + d

    # ---- 2x2 maxpool via 4 constant row-selection matmuls, then bias + relu. -----
    m2 = jnp.dot(rsel_ref[0], acc2, preferred_element_type=f32)    # (B*16, 128)
    for p in range(1, 4):
        m2 = jnp.maximum(m2, jnp.dot(rsel_ref[p], acc2,
                                     preferred_element_type=f32))
    p2 = jnp.maximum(m2 + b2_ref[...], 0.0)                        # rows=(b,io2,jo2)

    # ---- flatten to (B, 2048) in VMEM: lane index = s*128 + c (fc1 weight is
    #      pre-permuted to match torch's NCHW view(-1, 320) ordering). -------------
    p2_3d = p2.reshape(B, 16, 128)
    for s in range(16):
        flat_ref[:, s * 128:(s + 1) * 128] = p2_3d[:, s, :]

    # ---- fc1 + relu, fc2 (+ bias with -1e9 on padded classes), log_softmax. ------
    h = jnp.dot(flat_ref[...], wf1_ref[...], preferred_element_type=f32)
    h = jnp.maximum(h + bf1_ref[...], 0.0)                         # (B, 128)
    logits = jnp.dot(h, wf2_ref[...], preferred_element_type=f32) + bf2_ref[...]
    mx = jnp.max(logits, axis=-1, keepdims=True)
    sh = logits - mx
    lse = jnp.log(jnp.sum(jnp.exp(sh), axis=-1, keepdims=True))
    out_ref[...] = (sh - lse)[:, :10].astype(out_ref.dtype)


# -----------------------------------------------------------------------------
# Wrapper glue (per-forward): parity-grouped, zero-padded im2col of the input,
# pooling row-selection constants, and the single pallas_call.
# -----------------------------------------------------------------------------
def _build_cols1(x_nchw):
    """(B,1,28,28) -> (4, B*192, 128): rows ordered (parity, b, io, jo16), K 25->128."""
    B = x_nchw.shape[0]
    x2 = x_nchw[:, 0, :, :].astype(jnp.float32)                    # (B, 28, 28)
    pats = jnp.stack([x2[:, kh:kh + 24, kw:kw + 24]
                      for kh in range(5) for kw in range(5)], axis=-1)  # (B,24,24,25)
    pp = pats.reshape(B, 12, 2, 12, 2, 25).transpose(2, 4, 0, 1, 3, 5)  # (2,2,B,12,12,25)
    pp = pp.reshape(4, B, 12, 12, 25)
    pp = jnp.pad(pp, ((0, 0), (0, 0), (0, 0), (0, 4), (0, 103)))        # jo->16, K->128
    return pp.reshape(4, B * 192, 128)


def _make_pool_select(B):
    """Constant 0/1 matrices selecting the 4 pooling corners of the conv2 output."""
    r = np.zeros((4, B * 16, B * 64), np.float32)
    for di in range(2):
        for dj in range(2):
            p = di * 2 + dj
            for b in range(B):
                for io in range(4):
                    for jo in range(4):
                        m = b * 16 + io * 4 + jo
                        src = b * 64 + (2 * io + di) * 8 + (2 * jo + dj)
                        r[p, m, src] = 1.0
    return jnp.asarray(r)


@jax.jit
def mnist_forward(kp, x_nchw):
    """Pallas implementation of MyMNISTModel.forward (eval mode)."""
    B = x_nchw.shape[0]
    cols1 = _build_cols1(x_nchw)
    rsel = _make_pool_select(B)
    return pl.pallas_call(
        _fused_mnist_kernel,
        out_shape=jax.ShapeDtypeStruct((B, 10), jnp.float32),
        in_specs=[pl.BlockSpec(memory_space=pltpu.MemorySpace.VMEM)] * 10,
        out_specs=pl.BlockSpec(memory_space=pltpu.MemorySpace.VMEM),
        scratch_shapes=[
            pltpu.VMEM((B, 12, 16, 128), jnp.float32),   # pooled conv1 activation
            pltpu.VMEM((B, 2048), jnp.float32),          # flattened fc1 input
        ],
    )(cols1, kp["w1"], kp["b1"], kp["w2"], kp["b2"], rsel,
      kp["wf1"], kp["bf1"], kp["wf2"], kp["bf2"])


# -----------------------------------------------------------------------------
# One-time parameter packing (hoisted out of the forward path): transpose,
# permute and zero-pad all weights/biases to lane-dense 128-wide layouts.
# -----------------------------------------------------------------------------
def pack_params(p):
    f32 = jnp.float32
    # conv1: (10,1,5,5) -> (25,10) -> (128,128); rows = kh*5+kw, cols = cout.
    w1 = jnp.zeros((128, 128), f32).at[:25, :10].set(
        p["conv1_w"].astype(f32).reshape(10, 25).T)
    b1 = jnp.zeros((1, 128), f32).at[0, :10].set(p["conv1_b"].astype(f32))
    # conv2: (20,10,5,5) -> per-(kh,kw) (cin,cout) blocks -> (25,128,128).
    w2k = jnp.transpose(p["conv2_w"].astype(f32), (2, 3, 1, 0)).reshape(25, 10, 20)
    w2 = jnp.zeros((25, 128, 128), f32).at[:, :10, :20].set(w2k)
    b2 = jnp.zeros((1, 128), f32).at[0, :20].set(p["conv2_b"].astype(f32))
    # fc1: (50,320); torch flat index = c*16 + s; kernel flat index = s*128 + c.
    wf1_scn = jnp.transpose(p["fc1_w"].astype(f32).reshape(50, 20, 16), (2, 1, 0))
    wf1 = jnp.zeros((16, 128, 128), f32).at[:, :20, :50].set(wf1_scn).reshape(2048, 128)
    bf1 = jnp.zeros((1, 128), f32).at[0, :50].set(p["fc1_b"].astype(f32))
    # fc2: (10,50) -> (128,128); padded class biases = -1e9 so log_softmax ignores them.
    wf2 = jnp.zeros((128, 128), f32).at[:50, :10].set(p["fc2_w"].astype(f32).T)
    bf2 = jnp.full((1, 128), -1e9, f32).at[0, :10].set(p["fc2_b"].astype(f32))
    return dict(w1=w1, b1=b1, w2=w2, b2=b2, wf1=wf1, bf1=bf1, wf2=wf2, bf2=bf2)


def init_params(key):
    """Deterministic synthetic parameters with PyTorch-native shapes."""
    ks = jax.random.split(key, 8)

    def u(k, shape, fan_in):
        bound = 1.0 / jnp.sqrt(jnp.float32(fan_in))
        return jax.random.uniform(k, shape, jnp.float32, -bound, bound)

    return {
        "conv1_w": u(ks[0], (10, 1, 5, 5), 1 * 5 * 5),
        "conv1_b": u(ks[1], (10,), 1 * 5 * 5),
        "conv2_w": u(ks[2], (20, 10, 5, 5), 10 * 5 * 5),
        "conv2_b": u(ks[3], (20,), 10 * 5 * 5),
        "fc1_w": u(ks[4], (50, 320), 320),
        "fc1_b": u(ks[5], (50,), 320),
        "fc2_w": u(ks[6], (10, 50), 50),
        "fc2_b": u(ks[7], (10,), 50),
    }


# -----------------------------------------------------------------------------
# Pure-JAX reference for sanity checking
# -----------------------------------------------------------------------------
def reference_forward(params, x_nchw):
    dn = ("NCHW", "OIHW", "NCHW")
    y = jax.lax.conv_general_dilated(x_nchw, params["conv1_w"], (1, 1), "VALID",
                                     dimension_numbers=dn)
    y = y + params["conv1_b"][None, :, None, None]
    y = jax.lax.reduce_window(y, -jnp.inf, jax.lax.max, (1, 1, 2, 2),
                              (1, 1, 2, 2), "VALID")
    y = jnp.maximum(y, 0.0)
    y = jax.lax.conv_general_dilated(y, params["conv2_w"], (1, 1), "VALID",
                                     dimension_numbers=dn)
    y = y + params["conv2_b"][None, :, None, None]
    y = jax.lax.reduce_window(y, -jnp.inf, jax.lax.max, (1, 1, 2, 2),
                              (1, 1, 2, 2), "VALID")
    y = jnp.maximum(y, 0.0)
    flat = y.reshape(x_nchw.shape[0], 320)
    h = jnp.maximum(flat @ params["fc1_w"].T + params["fc1_b"], 0.0)
    logits = h @ params["fc2_w"].T + params["fc2_b"]
    return jax.nn.log_softmax(logits, axis=1)


if __name__ == "__main__":
    key = jax.random.PRNGKey(0)
    k_x, k_p = jax.random.split(key)

    # MNIST-shaped input: batch=2, NCHW (B, 1, 28, 28) -- required by view(-1, 320)
    x = jax.random.normal(k_x, (2, 1, 28, 28), dtype=jnp.float32)
    params = init_params(k_p)
    kparams = pack_params(params)          # hoisted: weight prep done once

    out = jax.block_until_ready(mnist_forward(kparams, x))
    assert out.shape == (2, 10), out.shape

    ref = jax.block_until_ready(reference_forward(params, x))
    assert jnp.allclose(out, ref, atol=5e-2, rtol=5e-2), (
        f"max abs diff {jnp.max(jnp.abs(out - ref))}")

    print("KERNEL_OK")
</pallas_src>

<mosaic_0001>
module attributes {stable_mosaic.version = 11 : i64} {
  func.func @_fused_mnist_kernel(%arg0: memref<4x384x128xf32, #tpu.memory_space<vmem>>, %arg1: memref<128x128xf32, #tpu.memory_space<vmem>>, %arg2: memref<1x128xf32, #tpu.memory_space<vmem>>, %arg3: memref<25x128x128xf32, #tpu.memory_space<vmem>>, %arg4: memref<1x128xf32, #tpu.memory_space<vmem>>, %arg5: memref<4x32x128xf32, #tpu.memory_space<vmem>>, %arg6: memref<2048x128xf32, #tpu.memory_space<vmem>>, %arg7: memref<1x128xf32, #tpu.memory_space<vmem>>, %arg8: memref<128x128xf32, #tpu.memory_space<vmem>>, %arg9: memref<1x128xf32, #tpu.memory_space<vmem>>, %arg10: memref<2x10xf32, #tpu.memory_space<vmem>>, %arg11: memref<2x12x16x128xf32, #tpu.memory_space<vmem>>, %arg12: memref<2x2048xf32, #tpu.memory_space<vmem>>) attributes {dimension_semantics = [], scalar_prefetch = 0 : i64, scratch_operands = 2 : i64, tpu.core_type = #tpu.core_type<tc>} {
    %c0 = arith.constant 0 : index
    %c0_0 = arith.constant 0 : index
    %0 = vector.load %arg1[%c0, %c0_0] : memref<128x128xf32, #tpu.memory_space<vmem>>, vector<128x128xf32>
    %c0_1 = arith.constant 0 : index
    %c0_2 = arith.constant 0 : index
    %c0_3 = arith.constant 0 : index
    %1 = vector.load %arg0[%c0_1, %c0_2, %c0_3] : memref<4x384x128xf32, #tpu.memory_space<vmem>>, vector<1x384x128xf32>
    %2 = vector.shape_cast %1 : vector<1x384x128xf32> to vector<384x128xf32>
    %cst = arith.constant dense<0.000000e+00> : vector<384x128xf32>
    %3 = tpu.matmul %2, %0, %cst {dimension_numbers = #tpu.dot_dimension_numbers<[1], [0], [0], [1], [0, 0, 1, 1], [], []>} : vector<384x128xf32>, vector<128x128xf32>, vector<384x128xf32> -> vector<384x128xf32>
    %c1 = arith.constant 1 : index
    %c0_4 = arith.constant 0 : index
    %c0_5 = arith.constant 0 : index
    %4 = vector.load %arg0[%c1, %c0_4, %c0_5] : memref<4x384x128xf32, #tpu.memory_space<vmem>>, vector<1x384x128xf32>
    %5 = vector.shape_cast %4 : vector<1x384x128xf32> to vector<384x128xf32>
    %cst_6 = arith.constant dense<0.000000e+00> : vector<384x128xf32>
    %6 = tpu.matmul %5, %0, %cst_6 {dimension_numbers = #tpu.dot_dimension_numbers<[1], [0], [0], [1], [0, 0, 1, 1], [], []>} : vector<384x128xf32>, vector<128x128xf32>, vector<384x128xf32> -> vector<384x128xf32>
    %7 = arith.maximumf %3, %6 : vector<384x128xf32>
    %c2 = arith.constant 2 : index
    %c0_7 = arith.constant 0 : index
    %c0_8 = arith.constant 0 : index
    %8 = vector.load %arg0[%c2, %c0_7, %c0_8] : memref<4x384x128xf32, #tpu.memory_space<vmem>>, vector<1x384x128xf32>
    %9 = vector.shape_cast %8 : vector<1x384x128xf32> to vector<384x128xf32>
    %cst_9 = arith.constant dense<0.000000e+00> : vector<384x128xf32>
    %10 = tpu.matmul %9, %0, %cst_9 {dimension_numbers = #tpu.dot_dimension_numbers<[1], [0], [0], [1], [0, 0, 1, 1], [], []>} : vector<384x128xf32>, vector<128x128xf32>, vector<384x128xf32> -> vector<384x128xf32>
    %11 = arith.maximumf %7, %10 : vector<384x128xf32>
    %c3 = arith.constant 3 : index
    %c0_10 = arith.constant 0 : index
    %c0_11 = arith.constant 0 : index
    %12 = vector.load %arg0[%c3, %c0_10, %c0_11] : memref<4x384x128xf32, #tpu.memory_space<vmem>>, vector<1x384x128xf32>
    %13 = vector.shape_cast %12 : vector<1x384x128xf32> to vector<384x128xf32>
    %cst_12 = arith.constant dense<0.000000e+00> : vector<384x128xf32>
    %14 = tpu.matmul %13, %0, %cst_12 {dimension_numbers = #tpu.dot_dimension_numbers<[1], [0], [0], [1], [0, 0, 1, 1], [], []>} : vector<384x128xf32>, vector<128x128xf32>, vector<384x128xf32> -> vector<384x128xf32>
    %15 = arith.maximumf %11, %14 : vector<384x128xf32>
    %c0_13 = arith.constant 0 : index
    %c0_14 = arith.constant 0 : index
    %16 = vector.load %arg2[%c0_13, %c0_14] : memref<1x128xf32, #tpu.memory_space<vmem>>, vector<1x128xf32>
    %17 = vector.broadcast %16 : vector<1x128xf32> to vector<384x128xf32>
    %18 = arith.addf %15, %17 : vector<384x128xf32>
    %cst_15 = arith.constant 0.000000e+00 : f32
    %19 = vector.broadcast %cst_15 : f32 to vector<384x128xf32>
    %20 = arith.maximumf %18, %19 : vector<384x128xf32>
    %21 = vector.shape_cast %20 : vector<384x128xf32> to vector<2x12x16x128xf32>
    %c0_16 = arith.constant 0 : index
    %c0_17 = arith.constant 0 : index
    %c0_18 = arith.constant 0 : index
    %c0_19 = arith.constant 0 : index
    %22 = vector.load %arg11[%c0_16, %c0_17, %c0_18, %c0_19] : memref<2x12x16x128xf32, #tpu.memory_space<vmem>>, vector<2x12x16x128xf32>
    tpu.vector_store %arg11[%c0_16, %c0_17, %c0_18, %c0_19], %21 {strides = array<i32>} : memref<2x12x16x128xf32, #tpu.memory_space<vmem>>, vector<2x12x16x128xf32>,
    %c0_20 = arith.constant 0 : index
    %c0_21 = arith.constant 0 : index
    %c0_22 = arith.constant 0 : index
    %c0_23 = arith.constant 0 : index
    %23 = vector.load %arg11[%c0_20, %c0_21, %c0_22, %c0_23] : memref<2x12x16x128xf32, #tpu.memory_space<vmem>>, vector<2x8x8x128xf32>
    %24 = vector.shape_cast %23 : vector<2x8x8x128xf32> to vector<128x128xf32>
    %c0_24 = arith.constant 0 : index
    %c0_25 = arith.constant 0 : index
    %c0_26 = arith.constant 0 : index
    %25 = vector.load %arg3[%c0_24, %c0_25, %c0_26] : memref<25x128x128xf32, #tpu.memory_space<vmem>>, vector<1x128x128xf32>
    %26 = vector.shape_cast %25 : vector<1x128x128xf32> to vector<128x128xf32>
    %cst_27 = arith.constant dense<0.000000e+00> : vector<128x128xf32>
    %27 = tpu.matmul %24, %26, %cst_27 {dimension_numbers = #tpu.dot_dimension_numbers<[1], [0], [0], [1], [0, 0, 1, 1], [], []>} : vector<128x128xf32>, vector<128x128xf32>, vector<128x128xf32> -> vector<128x128xf32>
    %c0_28 = arith.constant 0 : index
    %c0_29 = arith.constant 0 : index
    %c1_30 = arith.constant 1 : index
    %c0_31 = arith.constant 0 : index
    %28 = vector.load %arg11[%c0_28, %c0_29, %c1_30, %c0_31] : memref<2x12x16x128xf32, #tpu.memory_space<vmem>>, vector<2x8x8x128xf32>
    %29 = vector.shape_cast %28 : vector<2x8x8x128xf32> to vector<128x128xf32>
    %c1_32 = arith.constant 1 : index
    %c0_33 = arith.constant 0 : index
    %c0_34 = arith.constant 0 : index
    %30 = vector.load %arg3[%c1_32, %c0_33, %c0_34] : memref<25x128x128xf32, #tpu.memory_space<vmem>>, vector<1x128x128xf32>
    %31 = vector.shape_cast %30 : vector<1x128x128xf32> to vector<128x128xf32>
    %cst_35 = arith.constant dense<0.000000e+00> : vector<128x128xf32>
    %32 = tpu.matmul %29, %31, %cst_35 {dimension_numbers = #tpu.dot_dimension_numbers<[1], [0], [0], [1], [0, 0, 1, 1], [], []>} : vector<128x128xf32>, vector<128x128xf32>, vector<128x128xf32> -> vector<128x128xf32>
    %33 = arith.addf %27, %32 : vector<128x128xf32>
    %c0_36 = arith.constant 0 : index
    %c0_37 = arith.constant 0 : index
    %c2_38 = arith.constant 2 : index
    %c0_39 = arith.constant 0 : index
    %34 = vector.load %arg11[%c0_36, %c0_37, %c2_38, %c0_39] : memref<2x12x16x128xf32, #tpu.memory_space<vmem>>, vector<2x8x8x128xf32>
    %35 = vector.shape_cast %34 : vector<2x8x8x128xf32> to vector<128x128xf32>
    %c2_40 = arith.constant 2 : index
    %c0_41 = arith.constant 0 : index
    %c0_42 = arith.constant 0 : index
    %36 = vector.load %arg3[%c2_40, %c0_41, %c0_42] : memref<25x128x128xf32, #tpu.memory_space<vmem>>, vector<1x128x128xf32>
    %37 = vector.shape_cast %36 : vector<1x128x128xf32> to vector<128x128xf32>
    %cst_43 = arith.constant dense<0.000000e+00> : vector<128x128xf32>
    %38 = tpu.matmul %35, %37, %cst_43 {dimension_numbers = #tpu.dot_dimension_numbers<[1], [0], [0], [1], [0, 0, 1, 1], [], []>} : vector<128x128xf32>, vector<128x128xf32>, vector<128x128xf32> -> vector<128x128xf32>
    %39 = arith.addf %33, %38 : vector<128x128xf32>
    %c0_44 = arith.constant 0 : index
    %c0_45 = arith.constant 0 : index
    %c3_46 = arith.constant 3 : index
    %c0_47 = arith.constant 0 : index
    %40 = vector.load %arg11[%c0_44, %c0_45, %c3_46, %c0_47] : memref<2x12x16x128xf32, #tpu.memory_space<vmem>>, vector<2x8x8x128xf32>
    %41 = vector.shape_cast %40 : vector<2x8x8x128xf32> to vector<128x128xf32>
    %c3_48 = arith.constant 3 : index
    %c0_49 = arith.constant 0 : index
    %c0_50 = arith.constant 0 : index
    %42 = vector.load %arg3[%c3_48, %c0_49, %c0_50] : memref<25x128x128xf32, #tpu.memory_space<vmem>>, vector<1x128x128xf32>
    %43 = vector.shape_cast %42 : vector<1x128x128xf32> to vector<128x128xf32>
    %cst_51 = arith.constant dense<0.000000e+00> : vector<128x128xf32>
    %44 = tpu.matmul %41, %43, %cst_51 {dimension_numbers = #tpu.dot_dimension_numbers<[1], [0], [0], [1], [0, 0, 1, 1], [], []>} : vector<128x128xf32>, vector<128x128xf32>, vector<128x128xf32> -> vector<128x128xf32>
    %45 = arith.addf %39, %44 : vector<128x128xf32>
    %c0_52 = arith.constant 0 : index
    %c0_53 = arith.constant 0 : index
    %c4 = arith.constant 4 : index
    %c0_54 = arith.constant 0 : index
    %46 = vector.load %arg11[%c0_52, %c0_53, %c4, %c0_54] : memref<2x12x16x128xf32, #tpu.memory_space<vmem>>, vector<2x8x8x128xf32>
    %47 = vector.shape_cast %46 : vector<2x8x8x128xf32> to vector<128x128xf32>
    %c4_55 = arith.constant 4 : index
    %c0_56 = arith.constant 0 : index
    %c0_57 = arith.constant 0 : index
    %48 = vector.load %arg3[%c4_55, %c0_56, %c0_57] : memref<25x128x128xf32, #tpu.memory_space<vmem>>, vector<1x128x128xf32>
    %49 = vector.shape_cast %48 : vector<1x128x128xf32> to vector<128x128xf32>
    %cst_58 = arith.constant dense<0.000000e+00> : vector<128x128xf32>
    %50 = tpu.matmul %47, %49, %cst_58 {dimension_numbers = #tpu.dot_dimension_numbers<[1], [0], [0], [1], [0, 0, 1, 1], [], []>} : vector<128x128xf32>, vector<128x128xf32>, vector<128x128xf32> -> vector<128x128xf32>
    %51 = arith.addf %45, %50 : vector<128x128xf32>
    %c0_59 = arith.constant 0 : index
    %c1_60 = arith.constant 1 : index
    %c0_61 = arith.constant 0 : index
    %c0_62 = arith.constant 0 : index
    %52 = vector.load %arg11[%c0_59, %c1_60, %c0_61, %c0_62] : memref<2x12x16x128xf32, #tpu.memory_space<vmem>>, vector<2x8x8x128xf32>
    %53 = vector.shape_cast %52 : vector<2x8x8x128xf32> to vector<128x128xf32>
    %c5 = arith.constant 5 : index
    %c0_63 = arith.constant 0 : index
    %c0_64 = arith.constant 0 : index
    %54 = vector.load %arg3[%c5, %c0_63, %c0_64] : memref<25x128x128xf32, #tpu.memory_space<vmem>>, vector<1x128x128xf32>
    %55 = vector.shape_cast %54 : vector<1x128x128xf32> to vector<128x128xf32>
    %cst_65 = arith.constant dense<0.000000e+00> : vector<128x128xf32>
    %56 = tpu.matmul %53, %55, %cst_65 {dimension_numbers = #tpu.dot_dimension_numbers<[1], [0], [0], [1], [0, 0, 1, 1], [], []>} : vector<128x128xf32>, vector<128x128xf32>, vector<128x128xf32> -> vector<128x128xf32>
    %57 = arith.addf %51, %56 : vector<128x128xf32>
    %c0_66 = arith.constant 0 : index
    %c1_67 = arith.constant 1 : index
    %c1_68 = arith.constant 1 : index
    %c0_69 = arith.constant 0 : index
    %58 = vector.load %arg11[%c0_66, %c1_67, %c1_68, %c0_69] : memref<2x12x16x128xf32, #tpu.memory_space<vmem>>, vector<2x8x8x128xf32>
    %59 = vector.shape_cast %58 : vector<2x8x8x128xf32> to vector<128x128xf32>
    %c6 = arith.constant 6 : index
    %c0_70 = arith.constant 0 : index
    %c0_71 = arith.constant 0 : index
    %60 = vector.load %arg3[%c6, %c0_70, %c0_71] : memref<25x128x128xf32, #tpu.memory_space<vmem>>, vector<1x128x128xf32>
    %61 = vector.shape_cast %60 : vector<1x128x128xf32> to vector<128x128xf32>
    %cst_72 = arith.constant dense<0.000000e+00> : vector<128x128xf32>
    %62 = tpu.matmul %59, %61, %cst_72 {dimension_numbers = #tpu.dot_dimension_numbers<[1], [0], [0], [1], [0, 0, 1, 1], [], []>} : vector<128x128xf32>, vector<128x128xf32>, vector<128x128xf32> -> vector<128x128xf32>
    %63 = arith.addf %57, %62 : vector<128x128xf32>
    %c0_73 = arith.constant 0 : index
    %c1_74 = arith.constant 1 : index
    %c2_75 = arith.constant 2 : index
    %c0_76 = arith.constant 0 : index
    %64 = vector.load %arg11[%c0_73, %c1_74, %c2_75, %c0_76] : memref<2x12x16x128xf32, #tpu.memory_space<vmem>>, vector<2x8x8x128xf32>
    %65 = vector.shape_cast %64 : vector<2x8x8x128xf32> to vector<128x128xf32>
    %c7 = arith.constant 7 : index
    %c0_77 = arith.constant 0 : index
    %c0_78 = arith.constant 0 : index
    %66 = vector.load %arg3[%c7, %c0_77, %c0_78] : memref<25x128x128xf32, #tpu.memory_space<vmem>>, vector<1x128x128xf32>
    %67 = vector.shape_cast %66 : vector<1x128x128xf32> to vector<128x128xf32>
    %cst_79 = arith.constant dense<0.000000e+00> : vector<128x128xf32>
    %68 = tpu.matmul %65, %67, %cst_79 {dimension_numbers = #tpu.dot_dimension_numbers<[1], [0], [0], [1], [0, 0, 1, 1], [], []>} : vector<128x128xf32>, vector<128x128xf32>, vector<128x128xf32> -> vector<128x128xf32>
    %69 = arith.addf %63, %68 : vector<128x128xf32>
    %c0_80 = arith.constant 0 : index
    %c1_81 = arith.constant 1 : index
    %c3_82 = arith.constant 3 : index
    %c0_83 = arith.constant 0 : index
    %70 = vector.load %arg11[%c0_80, %c1_81, %c3_82, %c0_83] : memref<2x12x16x128xf32, #tpu.memory_space<vmem>>, vector<2x8x8x128xf32>
    %71 = vector.shape_cast %70 : vector<2x8x8x128xf32> to vector<128x128xf32>
    %c8 = arith.constant 8 : index
    %c0_84 = arith.constant 0 : index
    %c0_85 = arith.constant 0 : index
    %72 = vector.load %arg3[%c8, %c0_84, %c0_85] : memref<25x128x128xf32, #tpu.memory_space<vmem>>, vector<1x128x128xf32>
    %73 = vector.shape_cast %72 : vector<1x128x128xf32> to vector<128x128xf32>
    %cst_86 = arith.constant dense<0.000000e+00> : vector<128x128xf32>
    %74 = tpu.matmul %71, %73, %cst_86 {dimension_numbers = #tpu.dot_dimension_numbers<[1], [0], [0], [1], [0, 0, 1, 1], [], []>} : vector<128x128xf32>, vector<128x128xf32>, vector<128x128xf32> -> vector<128x128xf32>
    %75 = arith.addf %69, %74 : vector<128x128xf32>
    %c0_87 = arith.constant 0 : index
    %c1_88 = arith.constant 1 : index
    %c4_89 = arith.constant 4 : index
    %c0_90 = arith.constant 0 : index
    %76 = vector.load %arg11[%c0_87, %c1_88, %c4_89, %c0_90] : memref<2x12x16x128xf32, #tpu.memory_space<vmem>>, vector<2x8x8x128xf32>
    %77 = vector.shape_cast %76 : vector<2x8x8x128xf32> to vector<128x128xf32>
    %c9 = arith.constant 9 : index
    %c0_91 = arith.constant 0 : index
    %c0_92 = arith.constant 0 : index
    %78 = vector.load %arg3[%c9, %c0_91, %c0_92] : memref<25x128x128xf32, #tpu.memory_space<vmem>>, vector<1x128x128xf32>
    %79 = vector.shape_cast %78 : vector<1x128x128xf32> to vector<128x128xf32>
    %cst_93 = arith.constant dense<0.000000e+00> : vector<128x128xf32>
    %80 = tpu.matmul %77, %79, %cst_93 {dimension_numbers = #tpu.dot_dimension_numbers<[1], [0], [0], [1], [0, 0, 1, 1], [], []>} : vector<128x128xf32>, vector<128x128xf32>, vector<128x128xf32> -> vector<128x128xf32>
    %81 = arith.addf %75, %80 : vector<128x128xf32>
    %c0_94 = arith.constant 0 : index
    %c2_95 = arith.constant 2 : index
    %c0_96 = arith.constant 0 : index
    %c0_97 = arith.constant 0 : index
    %82 = vector.load %arg11[%c0_94, %c2_95, %c0_96, %c0_97] : memref<2x12x16x128xf32, #tpu.memory_space<vmem>>, vector<2x8x8x128xf32>
    %83 = vector.shape_cast %82 : vector<2x8x8x128xf32> to vector<128x128xf32>
    %c10 = arith.constant 10 : index
    %c0_98 = arith.constant 0 : index
    %c0_99 = arith.constant 0 : index
    %84 = vector.load %arg3[%c10, %c0_98, %c0_99] : memref<25x128x128xf32, #tpu.memory_space<vmem>>, vector<1x128x128xf32>
    %85 = vector.shape_cast %84 : vector<1x128x128xf32> to vector<128x128xf32>
    %cst_100 = arith.constant dense<0.000000e+00> : vector<128x128xf32>
    %86 = tpu.matmul %83, %85, %cst_100 {dimension_numbers = #tpu.dot_dimension_numbers<[1], [0], [0], [1], [0, 0, 1, 1], [], []>} : vector<128x128xf32>, vector<128x128xf32>, vector<128x128xf32> -> vector<128x128xf32>
    %87 = arith.addf %81, %86 : vector<128x128xf32>
    %c0_101 = arith.constant 0 : index
    %c2_102 = arith.constant 2 : index
    %c1_103 = arith.constant 1 : index
    %c0_104 = arith.constant 0 : index
    %88 = vector.load %arg11[%c0_101, %c2_102, %c1_103, %c0_104] : memref<2x12x16x128xf32, #tpu.memory_space<vmem>>, vector<2x8x8x128xf32>
    %89 = vector.shape_cast %88 : vector<2x8x8x128xf32> to vector<128x128xf32>
    %c11 = arith.constant 11 : index
    %c0_105 = arith.constant 0 : index
    %c0_106 = arith.constant 0 : index
    %90 = vector.load %arg3[%c11, %c0_105, %c0_106] : memref<25x128x128xf32, #tpu.memory_space<vmem>>, vector<1x128x128xf32>
    %91 = vector.shape_cast %90 : vector<1x128x128xf32> to vector<128x128xf32>
    %cst_107 = arith.constant dense<0.000000e+00> : vector<128x128xf32>
    %92 = tpu.matmul %89, %91, %cst_107 {dimension_numbers = #tpu.dot_dimension_numbers<[1], [0], [0], [1], [0, 0, 1, 1], [], []>} : vector<128x128xf32>, vector<128x128xf32>, vector<128x128xf32> -> vector<128x128xf32>
    %93 = arith.addf %87, %92 : vector<128x128xf32>
    %c0_108 = arith.constant 0 : index
    %c2_109 = arith.constant 2 : index
    %c2_110 = arith.constant 2 : index
    %c0_111 = arith.constant 0 : index
    %94 = vector.load %arg11[%c0_108, %c2_109, %c2_110, %c0_111] : memref<2x12x16x128xf32, #tpu.memory_space<vmem>>, vector<2x8x8x128xf32>
    %95 = vector.shape_cast %94 : vector<2x8x8x128xf32> to vector<128x128xf32>
    %c12 = arith.constant 12 : index
    %c0_112 = arith.constant 0 : index
    %c0_113 = arith.constant 0 : index
    %96 = vector.load %arg3[%c12, %c0_112, %c0_113] : memref<25x128x128xf32, #tpu.memory_space<vmem>>, vector<1x128x128xf32>
    %97 = vector.shape_cast %96 : vector<1x128x128xf32> to vector<128x128xf32>
    %cst_114 = arith.constant dense<0.000000e+00> : vector<128x128xf32>
    %98 = tpu.matmul %95, %97, %cst_114 {dimension_numbers = #tpu.dot_dimension_numbers<[1], [0], [0], [1], [0, 0, 1, 1], [], []>} : vector<128x128xf32>, vector<128x128xf32>, vector<128x128xf32> -> vector<128x128xf32>
    %99 = arith.addf %93, %98 : vector<128x128xf32>
    %c0_115 = arith.constant 0 : index
    %c2_116 = arith.constant 2 : index
    %c3_117 = arith.constant 3 : index
    %c0_118 = arith.constant 0 : index
    %100 = vector.load %arg11[%c0_115, %c2_116, %c3_117, %c0_118] : memref<2x12x16x128xf32, #tpu.memory_space<vmem>>, vector<2x8x8x128xf32>
    %101 = vector.shape_cast %100 : vector<2x8x8x128xf32> to vector<128x128xf32>
    %c13 = arith.constant 13 : index
    %c0_119 = arith.constant 0 : index
    %c0_120 = arith.constant 0 : index
    %102 = vector.load %arg3[%c13, %c0_119, %c0_120] : memref<25x128x128xf32, #tpu.memory_space<vmem>>, vector<1x128x128xf32>
    %103 = vector.shape_cast %102 : vector<1x128x128xf32> to vector<128x128xf32>
    %cst_121 = arith.constant dense<0.000000e+00> : vector<128x128xf32>
    %104 = tpu.matmul %101, %103, %cst_121 {dimension_numbers = #tpu.dot_dimension_numbers<[1], [0], [0], [1], [0, 0, 1, 1], [], []>} : vector<128x128xf32>, vector<128x128xf32>, vector<128x128xf32> -> vector<128x128xf32>
    %105 = arith.addf %99, %104 : vector<128x128xf32>
    %c0_122 = arith.constant 0 : index
    %c2_123 = arith.constant 2 : index
    %c4_124 = arith.constant 4 : index
    %c0_125 = arith.constant 0 : index
    %106 = vector.load %arg11[%c0_122, %c2_123, %c4_124, %c0_125] : memref<2x12x16x128xf32, #tpu.memory_space<vmem>>, vector<2x8x8x128xf32>
    %107 = vector.shape_cast %106 : vector<2x8x8x128xf32> to vector<128x128xf32>
    %c14 = arith.constant 14 : index
    %c0_126 = arith.constant 0 : index
    %c0_127 = arith.constant 0 : index
    %108 = vector.load %arg3[%c14, %c0_126, %c0_127] : memref<25x128x128xf32, #tpu.memory_space<vmem>>, vector<1x128x128xf32>
    %109 = vector.shape_cast %108 : vector<1x128x128xf32> to vector<128x128xf32>
    %cst_128 = arith.constant dense<0.000000e+00> : vector<128x128xf32>
    %110 = tpu.matmul %107, %109, %cst_128 {dimension_numbers = #tpu.dot_dimension_numbers<[1], [0], [0], [1], [0, 0, 1, 1], [], []>} : vector<128x128xf32>, vector<128x128xf32>, vector<128x128xf32> -> vector<128x128xf32>
    %111 = arith.addf %105, %110 : vector<128x128xf32>
    %c0_129 = arith.constant 0 : index
    %c3_130 = arith.constant 3 : index
    %c0_131 = arith.constant 0 : index
    %c0_132 = arith.constant 0 : index
    %112 = vector.load %arg11[%c0_129, %c3_130, %c0_131, %c0_132] : memref<2x12x16x128xf32, #tpu.memory_space<vmem>>, vector<2x8x8x128xf32>
    %113 = vector.shape_cast %112 : vector<2x8x8x128xf32> to vector<128x128xf32>
    %c15 = arith.constant 15 : index
    %c0_133 = arith.constant 0 : index
    %c0_134 = arith.constant 0 : index
    %114 = vector.load %arg3[%c15, %c0_133, %c0_134] : memref<25x128x128xf32, #tpu.memory_space<vmem>>, vector<1x128x128xf32>
    %115 = vector.shape_cast %114 : vector<1x128x128xf32> to vector<128x128xf32>
    %cst_135 = arith.constant dense<0.000000e+00> : vector<128x128xf32>
    %116 = tpu.matmul %113, %115, %cst_135 {dimension_numbers = #tpu.dot_dimension_numbers<[1], [0], [0], [1], [0, 0, 1, 1], [], []>} : vector<128x128xf32>, vector<128x128xf32>, vector<128x128xf32> -> vector<128x128xf32>
    %117 = arith.addf %111, %116 : vector<128x128xf32>
    %c0_136 = arith.constant 0 : index
    %c3_137 = arith.constant 3 : index
    %c1_138 = arith.constant 1 : index
    %c0_139 = arith.constant 0 : index
    %118 = vector.load %arg11[%c0_136, %c3_137, %c1_138, %c0_139] : memref<2x12x16x128xf32, #tpu.memory_space<vmem>>, vector<2x8x8x128xf32>
    %119 = vector.shape_cast %118 : vector<2x8x8x128xf32> to vector<128x128xf32>
    %c16 = arith.constant 16 : index
    %c0_140 = arith.constant 0 : index
    %c0_141 = arith.constant 0 : index
    %120 = vector.load %arg3[%c16, %c0_140, %c0_141] : memref<25x128x128xf32, #tpu.memory_space<vmem>>, vector<1x128x128xf32>
    %121 = vector.shape_cast %120 : vector<1x128x128xf32> to vector<128x128xf32>
    %cst_142 = arith.constant dense<0.000000e+00> : vector<128x128xf32>
    %122 = tpu.matmul %119, %121, %cst_142 {dimension_numbers = #tpu.dot_dimension_numbers<[1], [0], [0], [1], [0, 0, 1, 1], [], []>} : vector<128x128xf32>, vector<128x128xf32>, vector<128x128xf32> -> vector<128x128xf32>
    %123 = arith.addf %117, %122 : vector<128x128xf32>
    %c0_143 = arith.constant 0 : index
    %c3_144 = arith.constant 3 : index
    %c2_145 = arith.constant 2 : index
    %c0_146 = arith.constant 0 : index
    %124 = vector.load %arg11[%c0_143, %c3_144, %c2_145, %c0_146] : memref<2x12x16x128xf32, #tpu.memory_space<vmem>>, vector<2x8x8x128xf32>
    %125 = vector.shape_cast %124 : vector<2x8x8x128xf32> to vector<128x128xf32>
    %c17 = arith.constant 17 : index
    %c0_147 = arith.constant 0 : index
    %c0_148 = arith.constant 0 : index
    %126 = vector.load %arg3[%c17, %c0_147, %c0_148] : memref<25x128x128xf32, #tpu.memory_space<vmem>>, vector<1x128x128xf32>
    %127 = vector.shape_cast %126 : vector<1x128x128xf32> to vector<128x128xf32>
    %cst_149 = arith.constant dense<0.000000e+00> : vector<128x128xf32>
    %128 = tpu.matmul %125, %127, %cst_149 {dimension_numbers = #tpu.dot_dimension_numbers<[1], [0], [0], [1], [0, 0, 1, 1], [], []>} : vector<128x128xf32>, vector<128x128xf32>, vector<128x128xf32> -> vector<128x128xf32>
    %129 = arith.addf %123, %128 : vector<128x128xf32>
    %c0_150 = arith.constant 0 : index
    %c3_151 = arith.constant 3 : index
    %c3_152 = arith.constant 3 : index
    %c0_153 = arith.constant 0 : index
    %130 = vector.load %arg11[%c0_150, %c3_151, %c3_152, %c0_153] : memref<2x12x16x128xf32, #tpu.memory_space<vmem>>, vector<2x8x8x128xf32>
    %131 = vector.shape_cast %130 : vector<2x8x8x128xf32> to vector<128x128xf32>
    %c18 = arith.constant 18 : index
    %c0_154 = arith.constant 0 : index
    %c0_155 = arith.constant 0 : index
    %132 = vector.load %arg3[%c18, %c0_154, %c0_155] : memref<25x128x128xf32, #tpu.memory_space<vmem>>, vector<1x128x128xf32>
    %133 = vector.shape_cast %132 : vector<1x128x128xf32> to vector<128x128xf32>
    %cst_156 = arith.constant dense<0.000000e+00> : vector<128x128xf32>
    %134 = tpu.matmul %131, %133, %cst_156 {dimension_numbers = #tpu.dot_dimension_numbers<[1], [0], [0], [1], [0, 0, 1, 1], [], []>} : vector<128x128xf32>, vector<128x128xf32>, vector<128x128xf32> -> vector<128x128xf32>
    %135 = arith.addf %129, %134 : vector<128x128xf32>
    %c0_157 = arith.constant 0 : index
    %c3_158 = arith.constant 3 : index
    %c4_159 = arith.constant 4 : index
    %c0_160 = arith.constant 0 : index
    %136 = vector.load %arg11[%c0_157, %c3_158, %c4_159, %c0_160] : memref<2x12x16x128xf32, #tpu.memory_space<vmem>>, vector<2x8x8x128xf32>
    %137 = vector.shape_cast %136 : vector<2x8x8x128xf32> to vector<128x128xf32>
    %c19 = arith.constant 19 : index
    %c0_161 = arith.constant 0 : index
    %c0_162 = arith.constant 0 : index
    %138 = vector.load %arg3[%c19, %c0_161, %c0_162] : memref<25x128x128xf32, #tpu.memory_space<vmem>>, vector<1x128x128xf32>
    %139 = vector.shape_cast %138 : vector<1x128x128xf32> to vector<128x128xf32>
    %cst_163 = arith.constant dense<0.000000e+00> : vector<128x128xf32>
    %140 = tpu.matmul %137, %139, %cst_163 {dimension_numbers = #tpu.dot_dimension_numbers<[1], [0], [0], [1], [0, 0, 1, 1], [], []>} : vector<128x128xf32>, vector<128x128xf32>, vector<128x128xf32> -> vector<128x128xf32>
    %141 = arith.addf %135, %140 : vector<128x128xf32>
    %c0_164 = arith.constant 0 : index
    %c4_165 = arith.constant 4 : index
    %c0_166 = arith.constant 0 : index
    %c0_167 = arith.constant 0 : index
    %142 = vector.load %arg11[%c0_164, %c4_165, %c0_166, %c0_167] : memref<2x12x16x128xf32, #tpu.memory_space<vmem>>, vector<2x8x8x128xf32>
    %143 = vector.shape_cast %142 : vector<2x8x8x128xf32> to vector<128x128xf32>
    %c20 = arith.constant 20 : index
    %c0_168 = arith.constant 0 : index
    %c0_169 = arith.constant 0 : index
    %144 = vector.load %arg3[%c20, %c0_168, %c0_169] : memref<25x128x128xf32, #tpu.memory_space<vmem>>, vector<1x128x128xf32>
    %145 = vector.shape_cast %144 : vector<1x128x128xf32> to vector<128x128xf32>
    %cst_170 = arith.constant dense<0.000000e+00> : vector<128x128xf32>
    %146 = tpu.matmul %143, %145, %cst_170 {dimension_numbers = #tpu.dot_dimension_numbers<[1], [0], [0], [1], [0, 0, 1, 1], [], []>} : vector<128x128xf32>, vector<128x128xf32>, vector<128x128xf32> -> vector<128x128xf32>
    %147 = arith.addf %141, %146 : vector<128x128xf32>
    %c0_171 = arith.constant 0 : index
    %c4_172 = arith.constant 4 : index
    %c1_173 = arith.constant 1 : index
    %c0_174 = arith.constant 0 : index
    %148 = vector.load %arg11[%c0_171, %c4_172, %c1_173, %c0_174] : memref<2x12x16x128xf32, #tpu.memory_space<vmem>>, vector<2x8x8x128xf32>
    %149 = vector.shape_cast %148 : vector<2x8x8x128xf32> to vector<128x128xf32>
    %c21 = arith.constant 21 : index
    %c0_175 = arith.constant 0 : index
    %c0_176 = arith.constant 0 : index
    %150 = vector.load %arg3[%c21, %c0_175, %c0_176] : memref<25x128x128xf32, #tpu.memory_space<vmem>>, vector<1x128x128xf32>
    %151 = vector.shape_cast %150 : vector<1x128x128xf32> to vector<128x128xf32>
    %cst_177 = arith.constant dense<0.000000e+00> : vector<128x128xf32>
    %152 = tpu.matmul %149, %151, %cst_177 {dimension_numbers = #tpu.dot_dimension_numbers<[1], [0], [0], [1], [0, 0, 1, 1], [], []>} : vector<128x128xf32>, vector<128x128xf32>, vector<128x128xf32> -> vector<128x128xf32>
    %153 = arith.addf %147, %152 : vector<128x128xf32>
    %c0_178 = arith.constant 0 : index
    %c4_179 = arith.constant 4 : index
    %c2_180 = arith.constant 2 : index
    %c0_181 = arith.constant 0 : index
    %154 = vector.load %arg11[%c0_178, %c4_179, %c2_180, %c0_181] : memref<2x12x16x128xf32, #tpu.memory_space<vmem>>, vector<2x8x8x128xf32>
    %155 = vector.shape_cast %154 : vector<2x8x8x128xf32> to vector<128x128xf32>
    %c22 = arith.constant 22 : index
    %c0_182 = arith.constant 0 : index
    %c0_183 = arith.constant 0 : index
    %156 = vector.load %arg3[%c22, %c0_182, %c0_183] : memref<25x128x128xf32, #tpu.memory_space<vmem>>, vector<1x128x128xf32>
    %157 = vector.shape_cast %156 : vector<1x128x128xf32> to vector<128x128xf32>
    %cst_184 = arith.constant dense<0.000000e+00> : vector<128x128xf32>
    %158 = tpu.matmul %155, %157, %cst_184 {dimension_numbers = #tpu.dot_dimension_numbers<[1], [0], [0], [1], [0, 0, 1, 1], [], []>} : vector<128x128xf32>, vector<128x128xf32>, vector<128x128xf32> -> vector<128x128xf32>
    %159 = arith.addf %153, %158 : vector<128x128xf32>
    %c0_185 = arith.constant 0 : index
    %c4_186 = arith.constant 4 : index
    %c3_187 = arith.constant 3 : index
    %c0_188 = arith.constant 0 : index
    %160 = vector.load %arg11[%c0_185, %c4_186, %c3_187, %c0_188] : memref<2x12x16x128xf32, #tpu.memory_space<vmem>>, vector<2x8x8x128xf32>
    %161 = vector.shape_cast %160 : vector<2x8x8x128xf32> to vector<128x128xf32>
    %c23 = arith.constant 23 : index
    %c0_189 = arith.constant 0 : index
    %c0_190 = arith.constant 0 : index
    %162 = vector.load %arg3[%c23, %c0_189, %c0_190] : memref<25x128x128xf32, #tpu.memory_space<vmem>>, vector<1x128x128xf32>
    %163 = vector.shape_cast %162 : vector<1x128x128xf32> to vector<128x128xf32>
    %cst_191 = arith.constant dense<0.000000e+00> : vector<128x128xf32>
    %164 = tpu.matmul %161, %163, %cst_191 {dimension_numbers = #tpu.dot_dimension_numbers<[1], [0], [0], [1], [0, 0, 1, 1], [], []>} : vector<128x128xf32>, vector<128x128xf32>, vector<128x128xf32> -> vector<128x128xf32>
    %165 = arith.addf %159, %164 : vector<128x128xf32>
    %c0_192 = arith.constant 0 : index
    %c4_193 = arith.constant 4 : index
    %c4_194 = arith.constant 4 : index
    %c0_195 = arith.constant 0 : index
    %166 = vector.load %arg11[%c0_192, %c4_193, %c4_194, %c0_195] : memref<2x12x16x128xf32, #tpu.memory_space<vmem>>, vector<2x8x8x128xf32>
    %167 = vector.shape_cast %166 : vector<2x8x8x128xf32> to vector<128x128xf32>
    %c24 = arith.constant 24 : index
    %c0_196 = arith.constant 0 : index
    %c0_197 = arith.constant 0 : index
    %168 = vector.load %arg3[%c24, %c0_196, %c0_197] : memref<25x128x128xf32, #tpu.memory_space<vmem>>, vector<1x128x128xf32>
    %169 = vector.shape_cast %168 : vector<1x128x128xf32> to vector<128x128xf32>
    %cst_198 = arith.constant dense<0.000000e+00> : vector<128x128xf32>
    %170 = tpu.matmul %167, %169, %cst_198 {dimension_numbers = #tpu.dot_dimension_numbers<[1], [0], [0], [1], [0, 0, 1, 1], [], []>} : vector<128x128xf32>, vector<128x128xf32>, vector<128x128xf32> -> vector<128x128xf32>
    %171 = arith.addf %165, %170 : vector<128x128xf32>
    %c0_199 = arith.constant 0 : index
    %c0_200 = arith.constant 0 : index
    %c0_201 = arith.constant 0 : index
    %172 = vector.load %arg5[%c0_199, %c0_200, %c0_201] : memref<4x32x128xf32, #tpu.memory_space<vmem>>, vector<1x32x128xf32>
    %173 = vector.shape_cast %172 : vector<1x32x128xf32> to vector<32x128xf32>
    %cst_202 = arith.constant dense<0.000000e+00> : vector<32x128xf32>
    %174 = tpu.matmul %173, %171, %cst_202 {dimension_numbers = #tpu.dot_dimension_numbers<[1], [0], [0], [1], [0, 0, 1, 1], [], []>} : vector<32x128xf32>, vector<128x128xf32>, vector<32x128xf32> -> vector<32x128xf32>
    %c1_203 = arith.constant 1 : index
    %c0_204 = arith.constant 0 : index
    %c0_205 = arith.constant 0 : index
    %175 = vector.load %arg5[%c1_203, %c0_204, %c0_205] : memref<4x32x128xf32, #tpu.memory_space<vmem>>, vector<1x32x128xf32>
    %176 = vector.shape_cast %175 : vector<1x32x128xf32> to vector<32x128xf32>
    %cst_206 = arith.constant dense<0.000000e+00> : vector<32x128xf32>
    %177 = tpu.matmul %176, %171, %cst_206 {dimension_numbers = #tpu.dot_dimension_numbers<[1], [0], [0], [1], [0, 0, 1, 1], [], []>} : vector<32x128xf32>, vector<128x128xf32>, vector<32x128xf32> -> vector<32x128xf32>
    %178 = arith.maximumf %174, %177 : vector<32x128xf32>
    %c2_207 = arith.constant 2 : index
    %c0_208 = arith.constant 0 : index
    %c0_209 = arith.constant 0 : index
    %179 = vector.load %arg5[%c2_207, %c0_208, %c0_209] : memref<4x32x128xf32, #tpu.memory_space<vmem>>, vector<1x32x128xf32>
    %180 = vector.shape_cast %179 : vector<1x32x128xf32> to vector<32x128xf32>
    %cst_210 = arith.constant dense<0.000000e+00> : vector<32x128xf32>
    %181 = tpu.matmul %180, %171, %cst_210 {dimension_numbers = #tpu.dot_dimension_numbers<[1], [0], [0], [1], [0, 0, 1, 1], [], []>} : vector<32x128xf32>, vector<128x128xf32>, vector<32x128xf32> -> vector<32x128xf32>
    %182 = arith.maximumf %178, %181 : vector<32x128xf32>
    %c3_211 = arith.constant 3 : index
    %c0_212 = arith.constant 0 : index
    %c0_213 = arith.constant 0 : index
    %183 = vector.load %arg5[%c3_211, %c0_212, %c0_213] : memref<4x32x128xf32, #tpu.memory_space<vmem>>, vector<1x32x128xf32>
    %184 = vector.shape_cast %183 : vector<1x32x128xf32> to vector<32x128xf32>
    %cst_214 = arith.constant dense<0.000000e+00> : vector<32x128xf32>
    %185 = tpu.matmul %184, %171, %cst_214 {dimension_numbers = #tpu.dot_dimension_numbers<[1], [0], [0], [1], [0, 0, 1, 1], [], []>} : vector<32x128xf32>, vector<128x128xf32>, vector<32x128xf32> -> vector<32x128xf32>
    %186 = arith.maximumf %182, %185 : vector<32x128xf32>
    %c0_215 = arith.constant 0 : index
    %c0_216 = arith.constant 0 : index
    %187 = vector.load %arg4[%c0_215, %c0_216] : memref<1x128xf32, #tpu.memory_space<vmem>>, vector<1x128xf32>
    %188 = vector.broadcast %187 : vector<1x128xf32> to vector<32x128xf32>
    %189 = arith.addf %186, %188 : vector<32x128xf32>
    %cst_217 = arith.constant 0.000000e+00 : f32
    %190 = vector.broadcast %cst_217 : f32 to vector<32x128xf32>
    %191 = arith.maximumf %189, %190 : vector<32x128xf32>
    %192 = vector.shape_cast %191 : vector<32x128xf32> to vector<2x16x128xf32>
    %193 = vector.extract_strided_slice %192 {offsets = [0, 0, 0], sizes = [2, 1, 128], strides = [1, 1, 1]} : vector<2x16x128xf32> to vector<2x1x128xf32>
    %194 = vector.shape_cast %193 : vector<2x1x128xf32> to vector<2x128xf32>
    %c0_218 = arith.constant 0 : index
    %c0_219 = arith.constant 0 : index
    %195 = vector.load %arg12[%c0_218, %c0_219] : memref<2x2048xf32, #tpu.memory_space<vmem>>, vector<2x128xf32>
    tpu.vector_store %arg12[%c0_218, %c0_219], %194 {strides = array<i32>} : memref<2x2048xf32, #tpu.memory_space<vmem>>, vector<2x128xf32>,
    %196 = vector.extract_strided_slice %192 {offsets = [0, 1, 0], sizes = [2, 1, 128], strides = [1, 1, 1]} : vector<2x16x128xf32> to vector<2x1x128xf32>
    %197 = vector.shape_cast %196 : vector<2x1x128xf32> to vector<2x128xf32>
    %c0_220 = arith.constant 0 : index
    %c128 = arith.constant 128 : index
    %198 = vector.load %arg12[%c0_220, %c128] : memref<2x2048xf32, #tpu.memory_space<vmem>>, vector<2x128xf32>
    tpu.vector_store %arg12[%c0_220, %c128], %197 {strides = array<i32>} : memref<2x2048xf32, #tpu.memory_space<vmem>>, vector<2x128xf32>,
    %199 = vector.extract_strided_slice %192 {offsets = [0, 2, 0], sizes = [2, 1, 128], strides = [1, 1, 1]} : vector<2x16x128xf32> to vector<2x1x128xf32>
    %200 = vector.shape_cast %199 : vector<2x1x128xf32> to vector<2x128xf32>
    %c0_221 = arith.constant 0 : index
    %c256 = arith.constant 256 : index
    %201 = vector.load %arg12[%c0_221, %c256] : memref<2x2048xf32, #tpu.memory_space<vmem>>, vector<2x128xf32>
    tpu.vector_store %arg12[%c0_221, %c256], %200 {strides = array<i32>} : memref<2x2048xf32, #tpu.memory_space<vmem>>, vector<2x128xf32>,
    %202 = vector.extract_strided_slice %192 {offsets = [0, 3, 0], sizes = [2, 1, 128], strides = [1, 1, 1]} : vector<2x16x128xf32> to vector<2x1x128xf32>
    %203 = vector.shape_cast %202 : vector<2x1x128xf32> to vector<2x128xf32>
    %c0_222 = arith.constant 0 : index
    %c384 = arith.constant 384 : index
    %204 = vector.load %arg12[%c0_222, %c384] : memref<2x2048xf32, #tpu.memory_space<vmem>>, vector<2x128xf32>
    tpu.vector_store %arg12[%c0_222, %c384], %203 {strides = array<i32>} : memref<2x2048xf32, #tpu.memory_space<vmem>>, vector<2x128xf32>,
    %205 = vector.extract_strided_slice %192 {offsets = [0, 4, 0], sizes = [2, 1, 128], strides = [1, 1, 1]} : vector<2x16x128xf32> to vector<2x1x128xf32>
    %206 = vector.shape_cast %205 : vector<2x1x128xf32> to vector<2x128xf32>
    %c0_223 = arith.constant 0 : index
    %c512 = arith.constant 512 : index
    %207 = vector.load %arg12[%c0_223, %c512] : memref<2x2048xf32, #tpu.memory_space<vmem>>, vector<2x128xf32>
    tpu.vector_store %arg12[%c0_223, %c512], %206 {strides = array<i32>} : memref<2x2048xf32, #tpu.memory_space<vmem>>, vector<2x128xf32>,
    %208 = vector.extract_strided_slice %192 {offsets = [0, 5, 0], sizes = [2, 1, 128], strides = [1, 1, 1]} : vector<2x16x128xf32> to vector<2x1x128xf32>
    %209 = vector.shape_cast %208 : vector<2x1x128xf32> to vector<2x128xf32>
    %c0_224 = arith.constant 0 : index
    %c640 = arith.constant 640 : index
    %210 = vector.load %arg12[%c0_224, %c640] : memref<2x2048xf32, #tpu.memory_space<vmem>>, vector<2x128xf32>
    tpu.vector_store %arg12[%c0_224, %c640], %209 {strides = array<i32>} : memref<2x2048xf32, #tpu.memory_space<vmem>>, vector<2x128xf32>,
    %211 = vector.extract_strided_slice %192 {offsets = [0, 6, 0], sizes = [2, 1, 128], strides = [1, 1, 1]} : vector<2x16x128xf32> to vector<2x1x128xf32>
    %212 = vector.shape_cast %211 : vector<2x1x128xf32> to vector<2x128xf32>
    %c0_225 = arith.constant 0 : index
    %c768 = arith.constant 768 : index
    %213 = vector.load %arg12[%c0_225, %c768] : memref<2x2048xf32, #tpu.memory_space<vmem>>, vector<2x128xf32>
    tpu.vector_store %arg12[%c0_225, %c768], %212 {strides = array<i32>} : memref<2x2048xf32, #tpu.memory_space<vmem>>, vector<2x128xf32>,
    %214 = vector.extract_strided_slice %192 {offsets = [0, 7, 0], sizes = [2, 1, 128], strides = [1, 1, 1]} : vector<2x16x128xf32> to vector<2x1x128xf32>
    %215 = vector.shape_cast %214 : vector<2x1x128xf32> to vector<2x128xf32>
    %c0_226 = arith.constant 0 : index
    %c896 = arith.constant 896 : index
    %216 = vector.load %arg12[%c0_226, %c896] : memref<2x2048xf32, #tpu.memory_space<vmem>>, vector<2x128xf32>
    tpu.vector_store %arg12[%c0_226, %c896], %215 {strides = array<i32>} : memref<2x2048xf32, #tpu.memory_space<vmem>>, vector<2x128xf32>,
    %217 = vector.extract_strided_slice %192 {offsets = [0, 8, 0], sizes = [2, 1, 128], strides = [1, 1, 1]} : vector<2x16x128xf32> to vector<2x1x128xf32>
    %218 = vector.shape_cast %217 : vector<2x1x128xf32> to vector<2x128xf32>
    %c0_227 = arith.constant 0 : index
    %c1024 = arith.constant 1024 : index
    %219 = vector.load %arg12[%c0_227, %c1024] : memref<2x2048xf32, #tpu.memory_space<vmem>>, vector<2x128xf32>
    tpu.vector_store %arg12[%c0_227, %c1024], %218 {strides = array<i32>} : memref<2x2048xf32, #tpu.memory_space<vmem>>, vector<2x128xf32>,
    %220 = vector.extract_strided_slice %192 {offsets = [0, 9, 0], sizes = [2, 1, 128], strides = [1, 1, 1]} : vector<2x16x128xf32> to vector<2x1x128xf32>
    %221 = vector.shape_cast %220 : vector<2x1x128xf32> to vector<2x128xf32>
    %c0_228 = arith.constant 0 : index
    %c1152 = arith.constant 1152 : index
    %222 = vector.load %arg12[%c0_228, %c1152] : memref<2x2048xf32, #tpu.memory_space<vmem>>, vector<2x128xf32>
    tpu.vector_store %arg12[%c0_228, %c1152], %221 {strides = array<i32>} : memref<2x2048xf32, #tpu.memory_space<vmem>>, vector<2x128xf32>,
    %223 = vector.extract_strided_slice %192 {offsets = [0, 10, 0], sizes = [2, 1, 128], strides = [1, 1, 1]} : vector<2x16x128xf32> to vector<2x1x128xf32>
    %224 = vector.shape_cast %223 : vector<2x1x128xf32> to vector<2x128xf32>
    %c0_229 = arith.constant 0 : index
    %c1280 = arith.constant 1280 : index
    %225 = vector.load %arg12[%c0_229, %c1280] : memref<2x2048xf32, #tpu.memory_space<vmem>>, vector<2x128xf32>
    tpu.vector_store %arg12[%c0_229, %c1280], %224 {strides = array<i32>} : memref<2x2048xf32, #tpu.memory_space<vmem>>, vector<2x128xf32>,
    %226 = vector.extract_strided_slice %192 {offsets = [0, 11, 0], sizes = [2, 1, 128], strides = [1, 1, 1]} : vector<2x16x128xf32> to vector<2x1x128xf32>
    %227 = vector.shape_cast %226 : vector<2x1x128xf32> to vector<2x128xf32>
    %c0_230 = arith.constant 0 : index
    %c1408 = arith.constant 1408 : index
    %228 = vector.load %arg12[%c0_230, %c1408] : memref<2x2048xf32, #tpu.memory_space<vmem>>, vector<2x128xf32>
    tpu.vector_store %arg12[%c0_230, %c1408], %227 {strides = array<i32>} : memref<2x2048xf32, #tpu.memory_space<vmem>>, vector<2x128xf32>,
    %229 = vector.extract_strided_slice %192 {offsets = [0, 12, 0], sizes = [2, 1, 128], strides = [1, 1, 1]} : vector<2x16x128xf32> to vector<2x1x128xf32>
    %230 = vector.shape_cast %229 : vector<2x1x128xf32> to vector<2x128xf32>
    %c0_231 = arith.constant 0 : index
    %c1536 = arith.constant 1536 : index
    %231 = vector.load %arg12[%c0_231, %c1536] : memref<2x2048xf32, #tpu.memory_space<vmem>>, vector<2x128xf32>
    tpu.vector_store %arg12[%c0_231, %c1536], %230 {strides = array<i32>} : memref<2x2048xf32, #tpu.memory_space<vmem>>, vector<2x128xf32>,
    %232 = vector.extract_strided_slice %192 {offsets = [0, 13, 0], sizes = [2, 1, 128], strides = [1, 1, 1]} : vector<2x16x128xf32> to vector<2x1x128xf32>
    %233 = vector.shape_cast %232 : vector<2x1x128xf32> to vector<2x128xf32>
    %c0_232 = arith.constant 0 : index
    %c1664 = arith.constant 1664 : index
    %234 = vector.load %arg12[%c0_232, %c1664] : memref<2x2048xf32, #tpu.memory_space<vmem>>, vector<2x128xf32>
    tpu.vector_store %arg12[%c0_232, %c1664], %233 {strides = array<i32>} : memref<2x2048xf32, #tpu.memory_space<vmem>>, vector<2x128xf32>,
    %235 = vector.extract_strided_slice %192 {offsets = [0, 14, 0], sizes = [2, 1, 128], strides = [1, 1, 1]} : vector<2x16x128xf32> to vector<2x1x128xf32>
    %236 = vector.shape_cast %235 : vector<2x1x128xf32> to vector<2x128xf32>
    %c0_233 = arith.constant 0 : index
    %c1792 = arith.constant 1792 : index
    %237 = vector.load %arg12[%c0_233, %c1792] : memref<2x2048xf32, #tpu.memory_space<vmem>>, vector<2x128xf32>
    tpu.vector_store %arg12[%c0_233, %c1792], %236 {strides = array<i32>} : memref<2x2048xf32, #tpu.memory_space<vmem>>, vector<2x128xf32>,
    %238 = vector.extract_strided_slice %192 {offsets = [0, 15, 0], sizes = [2, 1, 128], strides = [1, 1, 1]} : vector<2x16x128xf32> to vector<2x1x128xf32>
    %239 = vector.shape_cast %238 : vector<2x1x128xf32> to vector<2x128xf32>
    %c0_234 = arith.constant 0 : index
    %c1920 = arith.constant 1920 : index
    %240 = vector.load %arg12[%c0_234, %c1920] : memref<2x2048xf32, #tpu.memory_space<vmem>>, vector<2x128xf32>
    tpu.vector_store %arg12[%c0_234, %c1920], %239 {strides = array<i32>} : memref<2x2048xf32, #tpu.memory_space<vmem>>, vector<2x128xf32>,
    %c0_235 = arith.constant 0 : index
    %c0_236 = arith.constant 0 : index
    %241 = vector.load %arg12[%c0_235, %c0_236] : memref<2x2048xf32, #tpu.memory_space<vmem>>, vector<2x2048xf32>
    %c0_237 = arith.constant 0 : index
    %c0_238 = arith.constant 0 : index
    %242 = vector.load %arg6[%c0_237, %c0_238] : memref<2048x128xf32, #tpu.memory_space<vmem>>, vector<2048x128xf32>
    %cst_239 = arith.constant dense<0.000000e+00> : vector<2x128xf32>
    %243 = tpu.matmul %241, %242, %cst_239 {dimension_numbers = #tpu.dot_dimension_numbers<[1], [0], [0], [1], [0, 0, 1, 1], [], []>} : vector<2x2048xf32>, vector<2048x128xf32>, vector<2x128xf32> -> vector<2x128xf32>
    %c0_240 = arith.constant 0 : index
    %c0_241 = arith.constant 0 : index
    %244 = vector.load %arg7[%c0_240, %c0_241] : memref<1x128xf32, #tpu.memory_space<vmem>>, vector<1x128xf32>
    %245 = vector.broadcast %244 : vector<1x128xf32> to vector<2x128xf32>
    %246 = arith.addf %243, %245 : vector<2x128xf32>
    %cst_242 = arith.constant 0.000000e+00 : f32
    %247 = vector.broadcast %cst_242 : f32 to vector<2x128xf32>
    %248 = arith.maximumf %246, %247 : vector<2x128xf32>
    %c0_243 = arith.constant 0 : index
    %c0_244 = arith.constant 0 : index
    %249 = vector.load %arg8[%c0_243, %c0_244] : memref<128x128xf32, #tpu.memory_space<vmem>>, vector<128x128xf32>
    %cst_245 = arith.constant dense<0.000000e+00> : vector<2x128xf32>
    %250 = tpu.matmul %248, %249, %cst_245 {dimension_numbers = #tpu.dot_dimension_numbers<[1], [0], [0], [1], [0, 0, 1, 1], [], []>} : vector<2x128xf32>, vector<128x128xf32>, vector<2x128xf32> -> vector<2x128xf32>
    %c0_246 = arith.constant 0 : index
    %c0_247 = arith.constant 0 : index
    %251 = vector.load %arg9[%c0_246, %c0_247] : memref<1x128xf32, #tpu.memory_space<vmem>>, vector<1x128xf32>
    %252 = vector.broadcast %251 : vector<1x128xf32> to vector<2x128xf32>
    %253 = arith.addf %250, %252 : vector<2x128xf32>
    %cst_248 = arith.constant dense<0xFF800000> : vector<2xf32>
    %254 = vector.multi_reduction <maximumf>, %253, %cst_248 [1] : vector<2x128xf32> to vector<2xf32>
    %255 = vector.shape_cast %254 : vector<2xf32> to vector<2x1xf32>
    %256 = vector.broadcast %255 : vector<2x1xf32> to vector<2x128xf32>
    %257 = arith.subf %253, %256 : vector<2x128xf32>
    %258 = math.exp %257 : vector<2x128xf32>
    %cst_249 = arith.constant dense<0.000000e+00> : vector<2xf32>
    %259 = vector.multi_reduction <add>, %258, %cst_249 [1] : vector<2x128xf32> to vector<2xf32>
    %260 = vector.shape_cast %259 : vector<2xf32> to vector<2x1xf32>
    %261 = math.log %260 : vector<2x1xf32>
    %262 = vector.broadcast %261 : vector<2x1xf32> to vector<2x128xf32>
    %263 = arith.subf %257, %262 : vector<2x128xf32>
    %264 = vector.extract_strided_slice %263 {offsets = [0, 0], sizes = [2, 10], strides = [1, 1]} : vector<2x128xf32> to vector<2x10xf32>
    %c0_250 = arith.constant 0 : index
    %c0_251 = arith.constant 0 : index
    %265 = vector.load %arg10[%c0_250, %c0_251] : memref<2x10xf32, #tpu.memory_space<vmem>>, vector<2x10xf32>
    tpu.vector_store %arg10[%c0_250, %c0_251], %264 {strides = array<i32>} : memref<2x10xf32, #tpu.memory_space<vmem>>, vector<2x10xf32>,
    return
  }
}

</mosaic_0001>

<bundles_post_ra>
// kernel: mnist_forward.1
= control target key start
LH: loop header
LB: loop body
LE: loop exit
PB: predicated region body
PF: predicated region fallthrough
CT: control target
= control target key end

     0   :  { %s18404_s0 = inlined_call_operand.vmem [shape: f32[4,384,128], index: 0, kind: input, shape index: {}]   ;;  %s18405_s1 = inlined_call_operand.vmem [shape: f32[128,128], index: 1, kind: input, shape index: {}]   ;;  %s18406_s2 = inlined_call_operand.vmem [shape: f32[1,128], index: 2, kind: input, shape index: {}]   ;;  %s18407_s3 = inlined_call_operand.vmem [shape: f32[25,128,128], index: 3, kind: input, shape index: {}]   ;;  %s18408_s4 = inlined_call_operand.vmem [shape: f32[1,128], index: 4, kind: input, shape index: {}]   ;;  %s18409_s5 = inlined_call_operand.vmem [shape: f32[4,32,128], index: 5, kind: input, shape index: {}]   ;;  %s18410_s6 = inlined_call_operand.vmem [shape: f32[2048,128], index: 6, kind: input, shape index: {}]   ;;  %s18411_s7 = inlined_call_operand.vmem [shape: f32[1,128], index: 7, kind: input, shape index: {}]   ;;  %s18412_s8 = inlined_call_operand.vmem [shape: f32[128,128], index: 8, kind: input, shape index: {}]   ;;  %s18413_s9 = inlined_call_operand.vmem [shape: f32[1,128], index: 9, kind: input, shape index: {}]   ;;  %s18414_s10 = inlined_call_operand.hbm [shape: f32[2,10], index: 10, kind: output, shape index: {}]  }
   0x1   :  { %v36_v0 = vld [vmem:[%s18405_s1] sm:$0xff]  ;;  %v37_v1 = vld [vmem:[%s18405_s1 + $0x8] sm:$0xff]  ;;  %v38_v2 = vld [vmem:[%s18405_s1 + $0x10] sm:$0xff] }
   0x2   :  { %v14035_v3 = vpack.c.bf16 %v37_v1, %v36_v0  ;;  %v39_v4 = vld [vmem:[%s18405_s1 + $0x18] sm:$0xff]  ;;  %v40_v6 = vld [vmem:[%s18405_s1 + $0x20] sm:$0xff]  ;;  %v41_v7 = vld [vmem:[%s18405_s1 + $0x28] sm:$0xff] }
   0x3   :  { %v14040_v5 = vpack.c.bf16 %v39_v4, %v38_v2  ;;  %v14051_v8 = vpack.c.bf16 %v41_v7, %v40_v6  ;;  %v52_v9 = vld [vmem:[%s18404_s0] sm:$0xff]  ;;  %v42_v10 = vld [vmem:[%s18405_s1 + $0x30] sm:$0xff]  ;;  %v43_v11 = vld [vmem:[%s18405_s1 + $0x38] sm:$0xff] }
   0x4   :  { %12210 = vmatprep.subr.bf16.mxu1 %v14035_v3  ;;  %10238 = vmatprep.mubr.f32.mxu1 %v52_v9  ;;  %v14064_v12 = vpack.c.bf16 %v43_v11, %v42_v10  ;;  %v44_v13 = vld [vmem:[%s18405_s1 + $0x40] sm:$0xff]  ;;  %v45_v14 = vld [vmem:[%s18405_s1 + $0x48] sm:$0xff]  ;;  %v46_v16 = vld [vmem:[%s18405_s1 + $0x50] sm:$0xff] }
   0x5   :  { %12212 = vmatpush3.bf16.msra.mxu1 %v14035_v3  ;;  %v14074_v15 = vpack.c.bf16 %v45_v14, %v44_v13  ;;  %v47_v17 = vld [vmem:[%s18405_s1 + $0x58] sm:$0xff]  ;;  %v48_v19 = vld [vmem:[%s18405_s1 + $0x60] sm:$0xff]  ;;  %v49_v20 = vld [vmem:[%s18405_s1 + $0x68] sm:$0xff] }
   0x6   :  { %12214 = vmatprep.subr.bf16.mxu1 %v14040_v5  ;;  %v14084_v18 = vpack.c.bf16 %v47_v17, %v46_v16  ;;  %v14094_v21 = vpack.c.bf16 %v49_v20, %v48_v19  ;;  %v50_v22 = vld [vmem:[%s18405_s1 + $0x70] sm:$0xff]  ;;  %v51_v23 = vld [vmem:[%s18405_s1 + $0x78] sm:$0xff] }
   0x7   :  { %v14104_v24 = vpack.c.bf16 %v51_v23, %v50_v22 }
   0x9   :  { %12216 = vmatpush3.bf16.msra.mxu1 %v14040_v5 }
   0xa   :  { %12218 = vmatprep.subr.bf16.mxu1 %v14051_v8 }
   0xd   :  { %12220 = vmatpush3.bf16.msra.mxu1 %v14051_v8 }
   0xe   :  { %12222 = vmatprep.subr.bf16.mxu1 %v14064_v12 }
  0x11   :  { %12224 = vmatpush3.bf16.msra.mxu1 %v14064_v12 }
  0x12   :  { %12226 = vmatprep.subr.bf16.mxu1 %v14074_v15 }
  0x15   :  { %12228 = vmatpush3.bf16.msra.mxu1 %v14074_v15 }
  0x16   :  { %12230 = vmatprep.subr.bf16.mxu1 %v14084_v18 }
  0x19   :  { %12232 = vmatpush3.bf16.msra.mxu1 %v14084_v18 }
  0x1a   :  { %12234 = vmatprep.subr.bf16.mxu1 %v14094_v21 }
  0x1b   :  { %15 = vsyncpa [#allocation5], 0  ;;  %v53_v25 = vld [vmem:[%s18404_s0 + $0x8] sm:$0xff]  ;;  %v54_v26 = vld [vmem:[%s18404_s0 + $0x10] sm:$0xff]  ;;  %vm6990_vm0 = vcmask 1041409   ;;  %vm6992_vm1 = vcmask 1043459  }
  0x1c   :  { %v55_v27 = vld [vmem:[%s18404_s0 + $0x18] sm:$0xff]  ;;  %v56_v28 = vld [vmem:[%s18404_s0 + $0x20] sm:$0xff]  ;;  %v57_v29 = vld [vmem:[%s18404_s0 + $0x28] sm:$0xff]  ;;  %vm6994_vm2 = vcmask 1045509   ;;  %vm6996_vm3 = vcmask 1047559   ;;  %vm13968_vm4 = vmmov 0  }
  0x1d   :  { %12236 = vmatpush3.bf16.msra.mxu1 %v14094_v21  ;;  %v58_v30 = vld [vmem:[%s18404_s0 + $0x30] sm:$0xff]  ;;  %v59_v31 = vld [vmem:[%s18404_s0 + $0x38] sm:$0xff]  ;;  %v60_v32 = vld [vmem:[%s18404_s0 + $0x40] sm:$0xff]  ;;  %vm8200_vm5 = vcmask 1041408   ;;  %s13970_s17 = smov [#allocation4]   ;;  %vm8213_vm6 = vcmask 74752  }
  0x1e   :  { %12238 = vmatprep.subr.bf16.mxu1 %v14104_v24  ;;  %v61_v33 = vld [vmem:[%s18404_s0 + $0x48] sm:$0xff]  ;;  %v62_v34 = vld [vmem:[%s18404_s0 + $0x50] sm:$0xff]  ;;  %v63_v35 = vld [vmem:[%s18404_s0 + $0x58] sm:$0xff] }
  0x1f   :  { %v64_v36 = vld [vmem:[%s18404_s0 + $0x60] sm:$0xff]  ;;  %v65_v37 = vld [vmem:[%s18404_s0 + $0x68] sm:$0xff]  ;;  %v66_v38 = vld [vmem:[%s18404_s0 + $0x70] sm:$0xff] }
  0x20   :  { %v67_v39 = vld [vmem:[%s18404_s0 + $0x78] sm:$0xff]  ;;  %v68_v40 = vld [vmem:[%s18404_s0 + $0x80] sm:$0xff]  ;;  %v69_v41 = vld [vmem:[%s18404_s0 + $0x88] sm:$0xff] }
  0x21   :  { %12240 = vmatpush3.bf16.msra.mxu1 %v14104_v24  ;;  %v70_v42 = vld [vmem:[%s18404_s0 + $0x90] sm:$0xff]  ;;  %v71_v43 = vld [vmem:[%s18404_s0 + $0x98] sm:$0xff]  ;;  %v72_v44 = vld [vmem:[%s18404_s0 + $0xa0] sm:$0xff] }
  0x22   :  { %12242 = vmatprep.subr.bf16.mxu1 %v14035_v3  ;;  %v73_v45 = vld [vmem:[%s18404_s0 + $0xa8] sm:$0xff]  ;;  %v74_v46 = vld [vmem:[%s18404_s0 + $0xb0] sm:$0xff]  ;;  %v75_v47 = vld [vmem:[%s18404_s0 + $0xb8] sm:$0xff] }
  0x23   :  { %v76_v48 = vld [vmem:[%s18404_s0 + $0xc0] sm:$0xff]  ;;  %v77_v49 = vld [vmem:[%s18404_s0 + $0xc8] sm:$0xff]  ;;  %v78_v50 = vld [vmem:[%s18404_s0 + $0xd0] sm:$0xff] }
  0x24   :  { %10239 = vmatmul.mubr.f32.vlgmr.msra.gmra.mrb[0].mxu1 %v53_v25  ;;  %v79_v51 = vld [vmem:[%s18404_s0 + $0xd8] sm:$0xff]  ;;  %v80_v52 = vld [vmem:[%s18404_s0 + $0xe0] sm:$0xff]  ;;  %v81_v53 = vld [vmem:[%s18404_s0 + $0xe8] sm:$0xff] }
  0x25   :  { %10241 = vmatprep.mubr.f32.mxu1 %v54_v26  ;;  %12244 = vmatpush3.bf16.msra.mxu1 %v14035_v3  ;;  %v82_v54 = vld [vmem:[%s18404_s0 + $0xf0] sm:$0xff]  ;;  %v83_v55 = vld [vmem:[%s18404_s0 + $0xf8] sm:$0xff]  ;;  %v84_v56 = vld [vmem:[%s18404_s0 + $0x100] sm:$0xff] }
  0x26   :  { %12246 = vmatprep.subr.bf16.mxu1 %v14040_v5  ;;  %v85_v57 = vld [vmem:[%s18404_s0 + $0x108] sm:$0xff]  ;;  %v86_v58 = vld [vmem:[%s18404_s0 + $0x110] sm:$0xff]  ;;  %v87_v59 = vld [vmem:[%s18404_s0 + $0x118] sm:$0xff] }
  0x27   :  { %v88_v60 = vld [vmem:[%s18404_s0 + $0x120] sm:$0xff]  ;;  %v89_v61 = vld [vmem:[%s18404_s0 + $0x128] sm:$0xff]  ;;  %v90_v62 = vld [vmem:[%s18404_s0 + $0x130] sm:$0xff] }
  0x28   :  { %10242 = vmatmul.mubr.f32.gmra.mrb[2].mxu1 %v55_v27  ;;  %v91_v63 = vld [vmem:[%s18404_s0 + $0x138] sm:$0xff]  ;;  %v92_v0 = vld [vmem:[%s18404_s0 + $0x140] sm:$0xff]  ;;  %v93_v1 = vld [vmem:[%s18404_s0 + $0x148] sm:$0xff] }
  0x29   :  { %10244 = vmatprep.mubr.f32.mxu1 %v56_v28  ;;  %12248 = vmatpush3.bf16.msra.mxu1 %v14040_v5  ;;  %v94_v2 = vld [vmem:[%s18404_s0 + $0x150] sm:$0xff]  ;;  %v95_v4 = vld [vmem:[%s18404_s0 + $0x158] sm:$0xff]  ;;  %v96_v6 = vld [vmem:[%s18404_s0 + $0x160] sm:$0xff] }
  0x2a   :  { %12250 = vmatprep.subr.bf16.mxu1 %v14051_v8  ;;  %v97_v7 = vld [vmem:[%s18404_s0 + $0x168] sm:$0xff]  ;;  %v98_v9 = vld [vmem:[%s18404_s0 + $0x170] sm:$0xff]  ;;  %v99_v10 = vld [vmem:[%s18404_s0 + $0x178] sm:$0xff] }
  0x2b   :  { %v8229_v11 = vld [vmem:[%s18404_s0 + $0x180] sm:$0xff]  ;;  %v8230_v13 = vld [vmem:[%s18404_s0 + $0x188] sm:$0xff]  ;;  %v8231_v14 = vld [vmem:[%s18404_s0 + $0x190] sm:$0xff] }
  0x2c   :  { %10245 = vmatmul.mubr.f32.gmra.mrb[4].mxu1 %v57_v29  ;;  %v8232_v16 = vld [vmem:[%s18404_s0 + $0x198] sm:$0xff]  ;;  %v8233_v17 = vld [vmem:[%s18404_s0 + $0x1a0] sm:$0xff]  ;;  %v8234_v19 = vld [vmem:[%s18404_s0 + $0x1a8] sm:$0xff] }
  0x2d   :  { %10247 = vmatprep.mubr.f32.mxu1 %v58_v30  ;;  %12252 = vmatpush3.bf16.msra.mxu1 %v14051_v8  ;;  %v8235_v20 = vld [vmem:[%s18404_s0 + $0x1b0] sm:$0xff]  ;;  %v8236_v22 = vld [vmem:[%s18404_s0 + $0x1b8] sm:$0xff]  ;;  %v8237_v23 = vld [vmem:[%s18404_s0 + $0x1c0] sm:$0xff] }
  0x2e   :  { %12254 = vmatprep.subr.bf16.mxu1 %v14064_v12  ;;  %v8238_v25 = vld [vmem:[%s18404_s0 + $0x1c8] sm:$0xff]  ;;  %v8239_v26 = vld [vmem:[%s18404_s0 + $0x1d0] sm:$0xff]  ;;  %v8240_v27 = vld [vmem:[%s18404_s0 + $0x1d8] sm:$0xff] }
  0x2f   :  { %v8241_v28 = vld [vmem:[%s18404_s0 + $0x1e0] sm:$0xff]  ;;  %v8242_v29 = vld [vmem:[%s18404_s0 + $0x1e8] sm:$0xff]  ;;  %v8243_v30 = vld [vmem:[%s18404_s0 + $0x1f0] sm:$0xff] }
  0x30   :  { %10248 = vmatmul.mubr.f32.gmra.mrb[6].mxu1 %v59_v31  ;;  %v8244_v31 = vld [vmem:[%s18404_s0 + $0x1f8] sm:$0xff] }
  0x31   :  { %10250 = vmatprep.mubr.f32.mxu1 %v60_v32  ;;  %12256 = vmatpush3.bf16.msra.mxu1 %v14064_v12  ;;  %v8245_v32 = vld [vmem:[%s18404_s0 + $0x200] sm:$0xff] }
  0x32   :  { %12258 = vmatprep.subr.bf16.mxu1 %v14074_v15 }
  0x34   :  { %10251 = vmatmul.mubr.f32.gmra.mrb[8].mxu1 %v61_v33  ;;  %v8246_v33 = vld [vmem:[%s18404_s0 + $0x208] sm:$0xff] }
  0x35   :  { %10253 = vmatprep.mubr.f32.mxu1 %v62_v34  ;;  %12260 = vmatpush3.bf16.msra.mxu1 %v14074_v15  ;;  %v8247_v34 = vld [vmem:[%s18404_s0 + $0x210] sm:$0xff] }
  0x36   :  { %12262 = vmatprep.subr.bf16.mxu1 %v14084_v18 }
  0x38   :  { %10254 = vmatmul.mubr.f32.gmra.mrb[10].mxu1 %v63_v35  ;;  %v8248_v35 = vld [vmem:[%s18404_s0 + $0x218] sm:$0xff] }
  0x39   :  { %10256 = vmatprep.mubr.f32.mxu1 %v64_v36  ;;  %12264 = vmatpush3.bf16.msra.mxu1 %v14084_v18  ;;  %v8249_v36 = vld [vmem:[%s18404_s0 + $0x220] sm:$0xff] }
  0x3a   :  { %12266 = vmatprep.subr.bf16.mxu1 %v14094_v21 }
  0x3c   :  { %10257 = vmatmul.mubr.f32.gmra.mrb[12].mxu1 %v65_v37  ;;  %v8250_v37 = vld [vmem:[%s18404_s0 + $0x228] sm:$0xff] }
  0x3d   :  { %10259 = vmatprep.mubr.f32.mxu1 %v66_v38  ;;  %12268 = vmatpush3.bf16.msra.mxu1 %v14094_v21  ;;  %v8251_v38 = vld [vmem:[%s18404_s0 + $0x230] sm:$0xff] }
  0x3e   :  { %12270 = vmatprep.subr.bf16.mxu1 %v14104_v24 }
  0x40   :  { %10260 = vmatmul.mubr.f32.gmra.mrb[14].mxu1 %v67_v39  ;;  %v8252_v39 = vld [vmem:[%s18404_s0 + $0x238] sm:$0xff] }
  0x41   :  { %10262 = vmatprep.mubr.f32.mxu1 %v68_v40  ;;  %12272 = vmatpush3.bf16.msra.mxu1 %v14104_v24  ;;  %v8253_v40 = vld [vmem:[%s18404_s0 + $0x240] sm:$0xff] }
  0x42   :  { %12274 = vmatprep.subr.bf16.mxu1 %v14035_v3 }
  0x44   :  { %10263 = vmatmul.mubr.f32.gmra.mrb[16].mxu1 %v69_v41  ;;  %v8254_v41 = vld [vmem:[%s18404_s0 + $0x248] sm:$0xff] }
  0x45   :  { %10265 = vmatprep.mubr.f32.mxu1 %v70_v42  ;;  %v8255_v42 = vld [vmem:[%s18404_s0 + $0x250] sm:$0xff] }
  0x48   :  { %10266 = vmatmul.mubr.f32.gmra.mrb[18].mxu1 %v71_v43  ;;  %v8256_v43 = vld [vmem:[%s18404_s0 + $0x258] sm:$0xff] }
  0x49   :  { %10268 = vmatprep.mubr.f32.mxu1 %v72_v44  ;;  %v8257_v44 = vld [vmem:[%s18404_s0 + $0x260] sm:$0xff] }
  0x4c   :  { %10269 = vmatmul.mubr.f32.gmra.mrb[20].mxu1 %v73_v45  ;;  %v8258_v45 = vld [vmem:[%s18404_s0 + $0x268] sm:$0xff] }
  0x4d   :  { %10271 = vmatprep.mubr.f32.mxu1 %v74_v46  ;;  %v8259_v46 = vld [vmem:[%s18404_s0 + $0x270] sm:$0xff] }
  0x50   :  { %10272 = vmatmul.mubr.f32.gmra.mrb[22].mxu1 %v75_v47  ;;  %v8260_v47 = vld [vmem:[%s18404_s0 + $0x278] sm:$0xff] }
  0x51   :  { %10274 = vmatprep.mubr.f32.mxu1 %v76_v48  ;;  %v8261_v48 = vld [vmem:[%s18404_s0 + $0x280] sm:$0xff] }
  0x54   :  { %10275 = vmatmul.mubr.f32.gmra.mrb[24].mxu1 %v77_v49  ;;  %v8262_v49 = vld [vmem:[%s18404_s0 + $0x288] sm:$0xff] }
  0x55   :  { %10277 = vmatprep.mubr.f32.mxu1 %v78_v50  ;;  %v8263_v50 = vld [vmem:[%s18404_s0 + $0x290] sm:$0xff] }
  0x58   :  { %10278 = vmatmul.mubr.f32.gmra.mrb[26].mxu1 %v79_v51  ;;  %v8264_v51 = vld [vmem:[%s18404_s0 + $0x298] sm:$0xff] }
  0x59   :  { %10280 = vmatprep.mubr.f32.mxu1 %v80_v52  ;;  %v8265_v52 = vld [vmem:[%s18404_s0 + $0x2a0] sm:$0xff] }
  0x5c   :  { %10281 = vmatmul.mubr.f32.gmra.mrb[28].mxu1 %v81_v53  ;;  %v8266_v53 = vld [vmem:[%s18404_s0 + $0x2a8] sm:$0xff] }
  0x5d   :  { %10283 = vmatprep.mubr.f32.mxu1 %v82_v54  ;;  %v8267_v54 = vld [vmem:[%s18404_s0 + $0x2b0] sm:$0xff] }
  0x60   :  { %10284 = vmatmul.mubr.f32.gmra.mrb[30].mxu1 %v83_v55  ;;  %v8268_v55 = vld [vmem:[%s18404_s0 + $0x2b8] sm:$0xff] }
  0x61   :  { %10286 = vmatprep.mubr.f32.mxu1 %v84_v56  ;;  %v8269_v56 = vld [vmem:[%s18404_s0 + $0x2c0] sm:$0xff] }
  0x64   :  { %10287 = vmatmul.mubr.f32.gmra.mrb[32].mxu1 %v85_v57  ;;  %v8270_v57 = vld [vmem:[%s18404_s0 + $0x2c8] sm:$0xff] }
  0x65   :  { %10289 = vmatprep.mubr.f32.mxu1 %v86_v58  ;;  %v8271_v58 = vld [vmem:[%s18404_s0 + $0x2d0] sm:$0xff] }
  0x68   :  { %10290 = vmatmul.mubr.f32.gmra.mrb[34].mxu1 %v87_v59  ;;  %v8272_v59 = vld [vmem:[%s18404_s0 + $0x2d8] sm:$0xff] }
  0x69   :  { %10292 = vmatprep.mubr.f32.mxu1 %v88_v60  ;;  %v8273_v60 = vld [vmem:[%s18404_s0 + $0x2e0] sm:$0xff] }
  0x6c   :  { %10293 = vmatmul.mubr.f32.gmra.mrb[36].mxu1 %v89_v61  ;;  %v8274_v61 = vld [vmem:[%s18404_s0 + $0x2e8] sm:$0xff] }
  0x6d   :  { %10295 = vmatprep.mubr.f32.mxu1 %v90_v62  ;;  %v8275_v62 = vld [vmem:[%s18404_s0 + $0x2f0] sm:$0xff] }
  0x70   :  { %10296 = vmatmul.mubr.f32.gmra.mrb[38].mxu1 %v91_v63  ;;  %v8276_v63 = vld [vmem:[%s18404_s0 + $0x2f8] sm:$0xff] }
  0x71   :  { %10298 = vmatprep.mubr.f32.mxu1 %v92_v0  ;;  %v8277_v0 = vld [vmem:[%s18404_s0 + $0x300] sm:$0xff] }
  0x74   :  { %10299 = vmatmul.mubr.f32.gmra.mrb[40].mxu1 %v93_v1  ;;  %v8278_v1 = vld [vmem:[%s18404_s0 + $0x308] sm:$0xff] }
  0x75   :  { %10301 = vmatprep.mubr.f32.mxu1 %v94_v2  ;;  %v8279_v2 = vld [vmem:[%s18404_s0 + $0x310] sm:$0xff] }
  0x78   :  { %10302 = vmatmul.mubr.f32.gmra.mrb[42].mxu1 %v95_v4  ;;  %v8280_v4 = vld [vmem:[%s18404_s0 + $0x318] sm:$0xff] }
  0x79   :  { %10304 = vmatprep.mubr.f32.mxu1 %v96_v6  ;;  %v8281_v6 = vld [vmem:[%s18404_s0 + $0x320] sm:$0xff] }
  0x7c   :  { %10305 = vmatmul.mubr.f32.gmra.mrb[44].mxu1 %v97_v7  ;;  %v8282_v7 = vld [vmem:[%s18404_s0 + $0x328] sm:$0xff] }
  0x7d   :  { %10307 = vmatprep.mubr.f32.mxu1 %v98_v9  ;;  %v8283_v9 = vld [vmem:[%s18404_s0 + $0x330] sm:$0xff] }
  0x80   :  { %10308 = vmatmul.mubr.f32.gmra.mrb[46].mxu1 %v99_v10  ;;  %v8285_v10 = vld [vmem:[%s18404_s0 + $0x340] sm:$0xff] }
  0x81   :  { %10342 = vmatprep.mubr.f32.mxu1 %v8229_v11  ;;  %v8287_v11 = vld [vmem:[%s18404_s0 + $0x350] sm:$0xff] }
  0x84   :  { %10343 = vmatmul.mubr.f32.vlgmr.msra.gmra.mrb[48].mxu1 %v8230_v13  ;;  %v8289_v13 = vld [vmem:[%s18404_s0 + $0x360] sm:$0xff] }
  0x85   :  { %10345 = vmatprep.mubr.f32.mxu1 %v8231_v14  ;;  %12276 = vmatpush3.bf16.msra.mxu1 %v14035_v3 }
  0x86   :  { %12278 = vmatprep.subr.bf16.mxu1 %v14040_v5 }
  0x88   :  { %10346 = vmatmul.mubr.f32.gmra.mrb[50].mxu1 %v8232_v16  ;;  %v8290_v16 = vld [vmem:[%s18404_s0 + $0x368] sm:$0xff] }
  0x89   :  { %10348 = vmatprep.mubr.f32.mxu1 %v8233_v17  ;;  %12280 = vmatpush3.bf16.msra.mxu1 %v14040_v5 }
  0x8a   :  { %12282 = vmatprep.subr.bf16.mxu1 %v14051_v8 }
  0x8c   :  { %10349 = vmatmul.mubr.f32.gmra.mrb[52].mxu1 %v8234_v19 }
  0x8d   :  { %10351 = vmatprep.mubr.f32.mxu1 %v8235_v20  ;;  %12284 = vmatpush3.bf16.msra.mxu1 %v14051_v8  ;;  %v8292_v20 = vld [vmem:[%s18404_s0 + $0x378] sm:$0xff] }
  0x8e   :  { %12286 = vmatprep.subr.bf16.mxu1 %v14064_v12 }
  0x90   :  { %10352 = vmatmul.mubr.f32.gmra.mrb[54].mxu1 %v8236_v22 }
  0x91   :  { %10354 = vmatprep.mubr.f32.mxu1 %v8237_v23  ;;  %12288 = vmatpush3.bf16.msra.mxu1 %v14064_v12 }
  0x92   :  { %12290 = vmatprep.subr.bf16.mxu1 %v14074_v15 }
  0x94   :  { %10355 = vmatmul.mubr.f32.gmra.mrb[56].mxu1 %v8238_v25  ;;  %v8294_v25 = vld [vmem:[%s18404_s0 + $0x388] sm:$0xff] }
  0x95   :  { %10357 = vmatprep.mubr.f32.mxu1 %v8239_v26  ;;  %12292 = vmatpush3.bf16.msra.mxu1 %v14074_v15 }
  0x96   :  { %12294 = vmatprep.subr.bf16.mxu1 %v14084_v18 }
  0x98   :  { %10358 = vmatmul.mubr.f32.gmra.mrb[58].mxu1 %v8240_v27 }
  0x99   :  { %10360 = vmatprep.mubr.f32.mxu1 %v8241_v28  ;;  %12296 = vmatpush3.bf16.msra.mxu1 %v14084_v18  ;;  %v8296_v28 = vld [vmem:[%s18404_s0 + $0x398] sm:$0xff] }
  0x9a   :  { %12298 = vmatprep.subr.bf16.mxu1 %v14094_v21 }
  0x9c   :  { %10361 = vmatmul.mubr.f32.gmra.mrb[60].mxu1 %v8242_v29  ;;  %v8297_v29 = vld [vmem:[%s18404_s0 + $0x3a0] sm:$0xff] }
  0x9d   :  { %10363 = vmatprep.mubr.f32.mxu1 %v8243_v30  ;;  %12300 = vmatpush3.bf16.msra.mxu1 %v14094_v21 }
  0x9e   :  { %12302 = vmatprep.subr.bf16.mxu1 %v14104_v24 }
  0xa0   :  { %10364 = vmatmul.mubr.f32.gmra.mrb[62].mxu1 %v8244_v31  ;;  %v8298_v31 = vld [vmem:[%s18404_s0 + $0x3a8] sm:$0xff] }
  0xa1   :  { %10366 = vmatprep.mubr.f32.mxu1 %v8245_v32  ;;  %12304 = vmatpush3.bf16.msra.mxu1 %v14104_v24  ;;  %v8299_v32 = vld [vmem:[%s18404_s0 + $0x3b0] sm:$0xff] }
  0xa2   :  { %12306 = vmatprep.subr.bf16.mxu1 %v14035_v3 }
  0xa4   :  { %10367 = vmatmul.mubr.f32.gmra.mrb[64].mxu1 %v8246_v33 }
  0xa5   :  { %10369 = vmatprep.mubr.f32.mxu1 %v8247_v34 }
  0xa8   :  { %10370 = vmatmul.mubr.f32.gmra.mrb[66].mxu1 %v8248_v35  ;;  %v8300_v35 = vld [vmem:[%s18404_s0 + $0x3b8] sm:$0xff] }
  0xa9   :  { %10372 = vmatprep.mubr.f32.mxu1 %v8249_v36  ;;  %v8301_v36 = vld [vmem:[%s18404_s0 + $0x3c0] sm:$0xff] }
  0xac   :  { %10373 = vmatmul.mubr.f32.gmra.mrb[68].mxu1 %v8250_v37 }
  0xad   :  { %10375 = vmatprep.mubr.f32.mxu1 %v8251_v38 }
  0xb0   :  { %10376 = vmatmul.mubr.f32.gmra.mrb[70].mxu1 %v8252_v39  ;;  %v8302_v39 = vld [vmem:[%s18404_s0 + $0x3c8] sm:$0xff] }
  0xb1   :  { %10378 = vmatprep.mubr.f32.mxu1 %v8253_v40  ;;  %v8303_v40 = vld [vmem:[%s18404_s0 + $0x3d0] sm:$0xff] }
  0xb4   :  { %10379 = vmatmul.mubr.f32.gmra.mrb[72].mxu1 %v8254_v41 }
  0xb5   :  { %10381 = vmatprep.mubr.f32.mxu1 %v8255_v42 }
  0xb8   :  { %10382 = vmatmul.mubr.f32.gmra.mrb[74].mxu1 %v8256_v43  ;;  %v8304_v43 = vld [vmem:[%s18404_s0 + $0x3d8] sm:$0xff] }
  0xb9   :  { %10384 = vmatprep.mubr.f32.mxu1 %v8257_v44  ;;  %v8305_v44 = vld [vmem:[%s18404_s0 + $0x3e0] sm:$0xff] }
  0xbc   :  { %10385 = vmatmul.mubr.f32.gmra.mrb[76].mxu1 %v8258_v45 }
  0xbd   :  { %10387 = vmatprep.mubr.f32.mxu1 %v8259_v46 }
  0xc0   :  { %10388 = vmatmul.mubr.f32.gmra.mrb[78].mxu1 %v8260_v47  ;;  %v8306_v47 = vld [vmem:[%s18404_s0 + $0x3e8] sm:$0xff] }
  0xc1   :  { %10390 = vmatprep.mubr.f32.mxu1 %v8261_v48  ;;  %v8307_v48 = vld [vmem:[%s18404_s0 + $0x3f0] sm:$0xff] }
  0xc4   :  { %10391 = vmatmul.mubr.f32.gmra.mrb[80].mxu1 %v8262_v49 }
  0xc5   :  { %10393 = vmatprep.mubr.f32.mxu1 %v8263_v50 }
  0xc8   :  { %10394 = vmatmul.mubr.f32.gmra.mrb[82].mxu1 %v8264_v51  ;;  %v8308_v51 = vld [vmem:[%s18404_s0 + $0x3f8] sm:$0xff] }
  0xc9   :  { %10396 = vmatprep.mubr.f32.mxu1 %v8265_v52  ;;  %v8309_v52 = vld [vmem:[%s18404_s0 + $0x400] sm:$0xff] }
  0xcc   :  { %10397 = vmatmul.mubr.f32.gmra.mrb[84].mxu1 %v8266_v53 }
  0xcd   :  { %10399 = vmatprep.mubr.f32.mxu1 %v8267_v54 }
  0xd0   :  { %10400 = vmatmul.mubr.f32.gmra.mrb[86].mxu1 %v8268_v55  ;;  %v8310_v55 = vld [vmem:[%s18404_s0 + $0x408] sm:$0xff] }
  0xd1   :  { %10402 = vmatprep.mubr.f32.mxu1 %v8269_v56  ;;  %v8311_v56 = vld [vmem:[%s18404_s0 + $0x410] sm:$0xff] }
  0xd4   :  { %10403 = vmatmul.mubr.f32.gmra.mrb[88].mxu1 %v8270_v57 }
  0xd5   :  { %10405 = vmatprep.mubr.f32.mxu1 %v8271_v58 }
  0xd8   :  { %10406 = vmatmul.mubr.f32.gmra.mrb[90].mxu1 %v8272_v59  ;;  %v8312_v59 = vld [vmem:[%s18404_s0 + $0x418] sm:$0xff] }
  0xd9   :  { %10408 = vmatprep.mubr.f32.mxu1 %v8273_v60  ;;  %v8313_v60 = vld [vmem:[%s18404_s0 + $0x420] sm:$0xff] }
  0xdc   :  { %10409 = vmatmul.mubr.f32.gmra.mrb[92].mxu1 %v8274_v61 }
  0xdd   :  { %10411 = vmatprep.mubr.f32.mxu1 %v8275_v62 }
  0xe0   :  { %10412 = vmatmul.mubr.f32.gmra.mrb[94].mxu1 %v8276_v63  ;;  %v8314_v63 = vld [vmem:[%s18404_s0 + $0x428] sm:$0xff] }
  0xe1   :  { %10446 = vmatprep.mubr.f32.mxu1 %v8277_v0  ;;  %v8315_v0 = vld [vmem:[%s18404_s0 + $0x430] sm:$0xff] }
  0xe4   :  { %10447 = vmatmul.mubr.f32.vlgmr.msra.gmra.mrb[96].mxu1 %v8278_v1 }
  0xe5   :  { %10449 = vmatprep.mubr.f32.mxu1 %v8279_v2  ;;  %12308 = vmatpush3.bf16.msra.mxu1 %v14035_v3  ;;  %v8284_v3 = vld [vmem:[%s18404_s0 + $0x338] sm:$0xff] }
  0xe6   :  { %12310 = vmatprep.subr.bf16.mxu1 %v14040_v5 }
  0xe8   :  { %10450 = vmatmul.mubr.f32.gmra.mrb[98].mxu1 %v8280_v4  ;;  %v8316_v4 = vld [vmem:[%s18404_s0 + $0x438] sm:$0xff] }
  0xe9   :  { %10452 = vmatprep.mubr.f32.mxu1 %v8281_v6  ;;  %12312 = vmatpush3.bf16.msra.mxu1 %v14040_v5  ;;  %v8286_v5 = vld [vmem:[%s18404_s0 + $0x348] sm:$0xff]  ;;  %v8317_v6 = vld [vmem:[%s18404_s0 + $0x440] sm:$0xff] }
  0xea   :  { %12314 = vmatprep.subr.bf16.mxu1 %v14051_v8 }
  0xec   :  { %10453 = vmatmul.mubr.f32.gmra.mrb[100].mxu1 %v8282_v7 }
  0xed   :  { %10455 = vmatprep.mubr.f32.mxu1 %v8283_v9  ;;  %12316 = vmatpush3.bf16.msra.mxu1 %v14051_v8  ;;  %v8288_v8 = vld [vmem:[%s18404_s0 + $0x358] sm:$0xff] }
  0xee   :  { %12318 = vmatprep.subr.bf16.mxu1 %v14064_v12 }
  0xf0   :  { %10456 = vmatmul.mubr.f32.gmra.mrb[102].mxu1 %v8284_v3  ;;  %v8318_v3 = vld [vmem:[%s18404_s0 + $0x448] sm:$0xff] }
  0xf1   :  { %10458 = vmatprep.mubr.f32.mxu1 %v8285_v10  ;;  %12320 = vmatpush3.bf16.msra.mxu1 %v14064_v12  ;;  %v8319_v10 = vld [vmem:[%s18404_s0 + $0x450] sm:$0xff] }
  0xf2   :  { %12322 = vmatprep.subr.bf16.mxu1 %v14074_v15 }
  0xf4   :  { %10459 = vmatmul.mubr.f32.gmra.mrb[104].mxu1 %v8286_v5 }
  0xf5   :  { %10461 = vmatprep.mubr.f32.mxu1 %v8287_v11  ;;  %12324 = vmatpush3.bf16.msra.mxu1 %v14074_v15  ;;  %v8291_v15 = vld [vmem:[%s18404_s0 + $0x370] sm:$0xff] }
  0xf6   :  { %12326 = vmatprep.subr.bf16.mxu1 %v14084_v18 }
  0xf7   :  { %v14476_v12 = vpop.f32.mrb[0].mxu1 }
  0xf8   :  { %v14478_v14 = vpop.f32.mrb[1].mxu1  ;;  %10462 = vmatmul.mubr.f32.gmra.mrb[106].mxu1 %v8288_v8  ;;  %v8320_v8 = vld [vmem:[%s18404_s0 + $0x458] sm:$0xff] }
  0xf9   :  { %10464 = vmatprep.mubr.f32.mxu1 %v8289_v13  ;;  %12328 = vmatpush3.bf16.msra.mxu1 %v14084_v18  ;;  %v8293_v18 = vld [vmem:[%s18404_s0 + $0x380] sm:$0xff] }
  0xfa   :  { %12330 = vmatprep.subr.bf16.mxu1 %v14094_v21  ;;  %v8321_v13 = vld [vmem:[%s18404_s0 + $0x460] sm:$0xff] }
  0xfb   :  { %v14488_v17 = vpop.f32.mrb[2].mxu1 }
  0xfc   :  { %v14490_v19 = vpop.f32.mrb[3].mxu1  ;;  %10465 = vmatmul.mubr.f32.gmra.mrb[108].mxu1 %v8290_v16 }
  0xfd   :  { %10467 = vmatprep.mubr.f32.mxu1 %v8291_v15  ;;  %12332 = vmatpush3.bf16.msra.mxu1 %v14094_v21  ;;  %v8295_v21 = vld [vmem:[%s18404_s0 + $0x390] sm:$0xff] }
  0xfe   :  { %12334 = vmatprep.subr.bf16.mxu1 %v14104_v24 }
  0xff   :  { %v14500_v22 = vpop.f32.mrb[4].mxu1 }
 0x100   :  { %v14502_v23 = vpop.f32.mrb[5].mxu1  ;;  %10468 = vmatmul.mubr.f32.gmra.mrb[110].mxu1 %v8292_v20  ;;  %v8322_v20 = vld [vmem:[%s18404_s0 + $0x468] sm:$0xff] }
 0x101   :  { %10470 = vmatprep.mubr.f32.mxu1 %v8293_v18  ;;  %12336 = vmatpush3.bf16.msra.mxu1 %v14104_v24  ;;  %v8323_v18 = vld [vmem:[%s18404_s0 + $0x470] sm:$0xff] }
 0x103   :  { %v14511_v26 = vpop.f32.mrb[6].mxu1 }
 0x104   :  { %v14513_v27 = vpop.f32.mrb[7].mxu1  ;;  %10471 = vmatmul.mubr.f32.gmra.mrb[112].mxu1 %v8294_v25 }
 0x105   :  { %10473 = vmatprep.mubr.f32.mxu1 %v8295_v21 }
 0x107   :  { %v14521_v30 = vpop.f32.mrb[8].mxu1 }
 0x108   :  { %v14523_v24 = vpop.f32.mrb[9].mxu1  ;;  %10474 = vmatmul.mubr.f32.gmra.mrb[114].mxu1 %v8296_v28  ;;  %v8324_v28 = vld [vmem:[%s18404_s0 + $0x478] sm:$0xff] }
 0x109   :  { %10476 = vmatprep.mubr.f32.mxu1 %v8297_v29  ;;  %v8325_v29 = vld [vmem:[%s18404_s0 + $0x480] sm:$0xff] }
 0x10b   :  { %v14531_v33 = vpop.f32.mrb[10].mxu1 }
 0x10c   :  { %v14533_v34 = vpop.f32.mrb[11].mxu1  ;;  %10477 = vmatmul.mubr.f32.gmra.mrb[116].mxu1 %v8298_v31 }
 0x10d   :  { %10479 = vmatprep.mubr.f32.mxu1 %v8299_v32 }
 0x10f   :  { %v14541_v37 = vpop.f32.mrb[12].mxu1 }
 0x110   :  { %v14543_v38 = vpop.f32.mrb[13].mxu1  ;;  %10480 = vmatmul.mubr.f32.gmra.mrb[118].mxu1 %v8300_v35  ;;  %v8326_v35 = vld [vmem:[%s18404_s0 + $0x488] sm:$0xff] }
 0x111   :  { %10482 = vmatprep.mubr.f32.mxu1 %v8301_v36  ;;  %v8327_v36 = vld [vmem:[%s18404_s0 + $0x490] sm:$0xff] }
 0x113   :  { %v14551_v41 = vpop.f32.mrb[14].mxu1 }
 0x114   :  { %v14553_v42 = vpop.f32.mrb[15].mxu1  ;;  %10483 = vmatmul.mubr.f32.gmra.mrb[120].mxu1 %v8302_v39 }
 0x115   :  { %10485 = vmatprep.mubr.f32.mxu1 %v8303_v40 }
 0x117   :  { %v14561_v45 = vpop.f32.mrb[16].mxu1 }
 0x118   :  { %v14563_v46 = vpop.f32.mrb[17].mxu1  ;;  %10486 = vmatmul.mubr.f32.gmra.mrb[122].mxu1 %v8304_v43  ;;  %v8328_v43 = vld [vmem:[%s18404_s0 + $0x498] sm:$0xff] }
 0x119   :  { %10488 = vmatprep.mubr.f32.mxu1 %v8305_v44  ;;  %v8329_v44 = vld [vmem:[%s18404_s0 + $0x4a0] sm:$0xff] }
 0x11b   :  { %v14571_v49 = vpop.f32.mrb[18].mxu1 }
 0x11c   :  { %v14573_v50 = vpop.f32.mrb[19].mxu1  ;;  %10489 = vmatmul.mubr.f32.gmra.mrb[124].mxu1 %v8306_v47 }
 0x11d   :  { %10491 = vmatprep.mubr.f32.mxu1 %v8307_v48 }
 0x11f   :  { %v14581_v53 = vpop.f32.mrb[20].mxu1 }
 0x120   :  { %v14583_v54 = vpop.f32.mrb[21].mxu1  ;;  %10492 = vmatmul.mubr.f32.gmra.mrb[126].mxu1 %v8308_v51  ;;  %v8330_v51 = vld [vmem:[%s18404_s0 + $0x4a8] sm:$0xff] }
 0x121   :  { %10494 = vmatprep.mubr.f32.mxu1 %v8309_v52  ;;  %v8331_v52 = vld [vmem:[%s18404_s0 + $0x4b0] sm:$0xff] }
 0x123   :  { %v14591_v57 = vpop.f32.mrb[22].mxu1 }
 0x124   :  { %v14593_v58 = vpop.f32.mrb[23].mxu1  ;;  %10495 = vmatmul.mubr.f32.gmra.mrb[128].mxu1 %v8310_v55 }
 0x125   :  { %18468 = vst [vmem:[#allocation7_spill] sm:$0xff] %v14593_v58  ;;  %10497 = vmatprep.mubr.f32.mxu1 %v8311_v56 }
 0x127   :  { %v14601_v61 = vpop.f32.mrb[24].mxu1 }
 0x128   :  { %18469 = vst [vmem:[#allocation8_spill] sm:$0xff] %v14601_v61  ;;  %v14603_v62 = vpop.f32.mrb[25].mxu1  ;;  %10498 = vmatmul.mubr.f32.gmra.mrb[130].mxu1 %v8312_v59  ;;  %v8332_v59 = vld [vmem:[%s18404_s0 + $0x4b8] sm:$0xff] }
 0x129   :  { %10500 = vmatprep.mubr.f32.mxu1 %v8313_v60  ;;  %v8333_v60 = vld [vmem:[%s18404_s0 + $0x4c0] sm:$0xff]  ;;  %v8364_v61 = vld [vmem:[%s18404_s0 + $0x5b8] sm:$0xff] }
 0x12b   :  { %v14611_v1 = vpop.f32.mrb[26].mxu1 }
 0x12c   :  { %18470 = vst [vmem:[#allocation9_spill] sm:$0xff] %v14611_v1  ;;  %v14613_v2 = vpop.f32.mrb[27].mxu1  ;;  %10501 = vmatmul.mubr.f32.gmra.mrb[132].mxu1 %v8314_v63 }
 0x12d   :  { %10503 = vmatprep.mubr.f32.mxu1 %v8315_v0 }
 0x12f   :  { %v14621_v7 = vpop.f32.mrb[28].mxu1 }
 0x130   :  { %18471 = vst [vmem:[#allocation10_spill] sm:$0xff] %v14621_v7  ;;  %v14623_v9 = vpop.f32.mrb[29].mxu1  ;;  %10504 = vmatmul.mubr.f32.gmra.mrb[134].mxu1 %v8316_v4  ;;  %v8334_v4 = vld [vmem:[%s18404_s0 + $0x4c8] sm:$0xff] }
 0x131   :  { %10506 = vmatprep.mubr.f32.mxu1 %v8317_v6  ;;  %v8335_v6 = vld [vmem:[%s18404_s0 + $0x4d0] sm:$0xff] }
 0x133   :  { %v14631_v5 = vpop.f32.mrb[30].mxu1 }
 0x134   :  { %18472 = vst [vmem:[#allocation11_spill] sm:$0xff] %v14631_v5  ;;  %v14633_v11 = vpop.f32.mrb[31].mxu1  ;;  %10507 = vmatmul.mubr.f32.gmra.mrb[136].mxu1 %v8318_v3 }
 0x135   :  { %10509 = vmatprep.mubr.f32.mxu1 %v8319_v10 }
 0x137   :  { %v14641_v16 = vpop.f32.mrb[32].mxu1 }
 0x138   :  { %18473 = vst [vmem:[#allocation12_spill] sm:$0xff] %v14641_v16  ;;  %v14643_v15 = vpop.f32.mrb[33].mxu1  ;;  %10510 = vmatmul.mubr.f32.gmra.mrb[138].mxu1 %v8320_v8  ;;  %v8336_v8 = vld [vmem:[%s18404_s0 + $0x4d8] sm:$0xff] }
 0x139   :  { %10512 = vmatprep.mubr.f32.mxu1 %v8321_v13  ;;  %v8337_v13 = vld [vmem:[%s18404_s0 + $0x4e0] sm:$0xff] }
 0x13b   :  { %v14651_v25 = vpop.f32.mrb[34].mxu1 }
 0x13c   :  { %v14653_v21 = vpop.f32.mrb[35].mxu1  ;;  %10513 = vmatmul.mubr.f32.gmra.mrb[140].mxu1 %v8322_v20 }
 0x13d   :  { %10515 = vmatprep.mubr.f32.mxu1 %v8323_v18 }
 0x13f   :  { %v14661_v31 = vpop.f32.mrb[36].mxu1 }
 0x140   :  { %v14663_v32 = vpop.f32.mrb[37].mxu1  ;;  %10516 = vmatmul.mubr.f32.gmra.mrb[142].mxu1 %v8324_v28 }
 0x141   :  { %18474 = vst [vmem:[#allocation13_spill] sm:$0xff] %v14663_v32  ;;  %10550 = vmatprep.mubr.f32.mxu1 %v8325_v29 }
 0x143   :  { %v14671_v39 = vpop.f32.mrb[38].mxu1 }
 0x144   :  { %18475 = vst [vmem:[#allocation14_spill] sm:$0xff] %v14671_v39  ;;  %v14673_v40 = vpop.f32.mrb[39].mxu1  ;;  %10551 = vmatmul.mubr.f32.vlgmr.msra.gmra.mrb[144].mxu1 %v8326_v35  ;;  %v8338_v35 = vld [vmem:[%s18404_s0 + $0x4e8] sm:$0xff] }
 0x145   :  { %10553 = vmatprep.mubr.f32.mxu1 %v8327_v36  ;;  %v8339_v36 = vld [vmem:[%s18404_s0 + $0x4f0] sm:$0xff] }
 0x147   :  { %v14681_v47 = vpop.f32.mrb[40].mxu1 }
 0x148   :  { %v14683_v48 = vpop.f32.mrb[41].mxu1  ;;  %10554 = vmatmul.mubr.f32.gmra.mrb[146].mxu1 %v8328_v43 }
 0x149   :  { %10556 = vmatprep.mubr.f32.mxu1 %v8329_v44 }
 0x14b   :  { %v14691_v55 = vpop.f32.mrb[42].mxu1 }
 0x14c   :  { %v14693_v56 = vpop.f32.mrb[43].mxu1  ;;  %10557 = vmatmul.mubr.f32.gmra.mrb[148].mxu1 %v8330_v51 }
 0x14d   :  { %18476 = vst [vmem:[#allocation15_spill] sm:$0xff] %v14693_v56  ;;  %10559 = vmatprep.mubr.f32.mxu1 %v8331_v52 }
 0x14f   :  { %v14701_v63 = vpop.f32.mrb[44].mxu1 }
 0x150   :  { %v14703_v0 = vpop.f32.mrb[45].mxu1  ;;  %10560 = vmatmul.mubr.f32.gmra.mrb[150].mxu1 %v8332_v59  ;;  %v8340_v59 = vld [vmem:[%s18404_s0 + $0x4f8] sm:$0xff] }
 0x151   :  { %18477 = vst [vmem:[#allocation16_spill] sm:$0xff] %v14703_v0  ;;  %10562 = vmatprep.mubr.f32.mxu1 %v8333_v60  ;;  %v8341_v60 = vld [vmem:[%s18404_s0 + $0x500] sm:$0xff] }
 0x153   :  { %v14711_v3 = vpop.f32.mrb[46].mxu1 }
 0x154   :  { %18478 = vst [vmem:[#allocation17_spill] sm:$0xff] %v14711_v3  ;;  %v14713_v10 = vpop.f32.mrb[47].mxu1  ;;  %10563 = vmatmul.mubr.f32.gmra.mrb[152].mxu1 %v8334_v4 }
 0x155   :  { %10565 = vmatprep.mubr.f32.mxu1 %v8335_v6 }
 0x157   :  { %v14721_v20 = vpop.f32.mrb[48].mxu1 }
 0x158   :  { %v14725_v28 = vpop.f32.mrb[49].mxu1  ;;  %10566 = vmatmul.mubr.f32.gmra.mrb[154].mxu1 %v8336_v8  ;;  %v18512_v56 = vmax.f32 %v14476_v12, %v14721_v20 }
 0x159   :  { %10568 = vmatprep.mubr.f32.mxu1 %v8337_v13  ;;  %v8345_v13 = vld [vmem:[%s18404_s0 + $0x520] sm:$0xff] }
 0x15b   :  { %v14735_v43 = vpop.f32.mrb[50].mxu1 }
 0x15c   :  { %v14739_v51 = vpop.f32.mrb[51].mxu1  ;;  %10569 = vmatmul.mubr.f32.gmra.mrb[156].mxu1 %v8338_v35  ;;  %v8342_v35 = vld [vmem:[%s18404_s0 + $0x508] sm:$0xff] }
 0x15d   :  { %10571 = vmatprep.mubr.f32.mxu1 %v8339_v36  ;;  %v8343_v36 = vld [vmem:[%s18404_s0 + $0x510] sm:$0xff] }
 0x15f   :  { %v14749_v4 = vpop.f32.mrb[52].mxu1 }
 0x160   :  { %v14753_v8 = vpop.f32.mrb[53].mxu1  ;;  %10572 = vmatmul.mubr.f32.gmra.mrb[158].mxu1 %v8340_v59  ;;  %v8347_v59 = vld [vmem:[%s18404_s0 + $0x530] sm:$0xff] }
 0x161   :  { %10574 = vmatprep.mubr.f32.mxu1 %v8341_v60  ;;  %v8344_v60 = vld [vmem:[%s18404_s0 + $0x518] sm:$0xff]  ;;  %v18517_v20 = vmax.f32 %v14502_v23, %v14753_v8 }
 0x163   :  { %v14763_v52 = vpop.f32.mrb[54].mxu1 }
 0x164   :  { %v14767_v44 = vpop.f32.mrb[55].mxu1  ;;  %10575 = vmatmul.mubr.f32.gmra.mrb[160].mxu1 %v8342_v35  ;;  %v8349_v35 = vld [vmem:[%s18404_s0 + $0x540] sm:$0xff] }
 0x165   :  { %18479 = vst [vmem:[#allocation18_spill] sm:$0xff] %v14767_v44  ;;  %10577 = vmatprep.mubr.f32.mxu1 %v8343_v36  ;;  %v8346_v36 = vld [vmem:[%s18404_s0 + $0x528] sm:$0xff] }
 0x167   :  { %v14777_v29 = vpop.f32.mrb[56].mxu1 }
 0x168   :  { %18480 = vst [vmem:[#allocation19_spill] sm:$0xff] %v14777_v29  ;;  %v14781_v18 = vpop.f32.mrb[57].mxu1  ;;  %10578 = vmatmul.mubr.f32.gmra.mrb[162].mxu1 %v8344_v60  ;;  %v8351_v60 = vld [vmem:[%s18404_s0 + $0x550] sm:$0xff] }
 0x169   :  { %18481 = vst [vmem:[#allocation20_spill] sm:$0xff] %v14781_v18  ;;  %10580 = vmatprep.mubr.f32.mxu1 %v8345_v13  ;;  %v8348_v13 = vld [vmem:[%s18404_s0 + $0x538] sm:$0xff] }
 0x16b   :  { %v14791_v44 = vpop.f32.mrb[58].mxu1 }
 0x16c   :  { %18482 = vst [vmem:[#allocation21_spill] sm:$0xff] %v14791_v44  ;;  %v14795_v29 = vpop.f32.mrb[59].mxu1  ;;  %10581 = vmatmul.mubr.f32.gmra.mrb[164].mxu1 %v8346_v36  ;;  %v8353_v36 = vld [vmem:[%s18404_s0 + $0x560] sm:$0xff] }
 0x16d   :  { %18483 = vst [vmem:[#allocation22_spill] sm:$0xff] %v14795_v29  ;;  %10583 = vmatprep.mubr.f32.mxu1 %v8347_v59  ;;  %v8350_v59 = vld [vmem:[%s18404_s0 + $0x548] sm:$0xff] }
 0x16f   :  { %v14805_v18 = vpop.f32.mrb[60].mxu1 }
 0x170   :  { %18484 = vst [vmem:[#allocation23_spill] sm:$0xff] %v14805_v18  ;;  %v14809_v44 = vpop.f32.mrb[61].mxu1  ;;  %10584 = vmatmul.mubr.f32.gmra.mrb[166].mxu1 %v8348_v13  ;;  %v8355_v13 = vld [vmem:[%s18404_s0 + $0x570] sm:$0xff] }
 0x171   :  { %18485 = vst [vmem:[#allocation24_spill] sm:$0xff] %v14809_v44  ;;  %10586 = vmatprep.mubr.f32.mxu1 %v8349_v35  ;;  %v8352_v35 = vld [vmem:[%s18404_s0 + $0x558] sm:$0xff]  ;;  %v18523_v8 = vld [vmem:[#allocation20_spill] sm:$0xff] }
 0x173   :  { %v14819_v29 = vpop.f32.mrb[62].mxu1 }
 0x174   :  { %18486 = vst [vmem:[#allocation25_spill] sm:$0xff] %v14819_v29  ;;  %v14823_v18 = vpop.f32.mrb[63].mxu1  ;;  %10587 = vmatmul.mubr.f32.gmra.mrb[168].mxu1 %v8350_v59  ;;  %v8357_v59 = vld [vmem:[%s18404_s0 + $0x580] sm:$0xff] }
 0x175   :  { %18487 = vst [vmem:[#allocation26_spill] sm:$0xff] %v14823_v18  ;;  %10589 = vmatprep.mubr.f32.mxu1 %v8351_v60  ;;  %v8354_v60 = vld [vmem:[%s18404_s0 + $0x568] sm:$0xff] }
 0x177   :  { %v14833_v44 = vpop.f32.mrb[64].mxu1 }
 0x178   :  { %18488 = vst [vmem:[#allocation27_spill] sm:$0xff] %v14833_v44  ;;  %v14837_v29 = vpop.f32.mrb[65].mxu1  ;;  %10590 = vmatmul.mubr.f32.gmra.mrb[170].mxu1 %v8352_v35  ;;  %v8359_v35 = vld [vmem:[%s18404_s0 + $0x590] sm:$0xff] }
 0x179   :  { %18489 = vst [vmem:[#allocation28_spill] sm:$0xff] %v14837_v29  ;;  %10592 = vmatprep.mubr.f32.mxu1 %v8353_v36  ;;  %v8356_v36 = vld [vmem:[%s18404_s0 + $0x578] sm:$0xff] }
 0x17b   :  { %v14847_v18 = vpop.f32.mrb[66].mxu1 }
 0x17c   :  { %18490 = vst [vmem:[#allocation29_spill] sm:$0xff] %v14847_v18  ;;  %v14851_v44 = vpop.f32.mrb[67].mxu1  ;;  %10593 = vmatmul.mubr.f32.gmra.mrb[172].mxu1 %v8354_v60  ;;  %v8361_v60 = vld [vmem:[%s18404_s0 + $0x5a0] sm:$0xff] }
 0x17d   :  { %18491 = vst [vmem:[#allocation30_spill] sm:$0xff] %v14851_v44  ;;  %10595 = vmatprep.mubr.f32.mxu1 %v8355_v13  ;;  %v8358_v13 = vld [vmem:[%s18404_s0 + $0x588] sm:$0xff] }
 0x17f   :  { %v14861_v29 = vpop.f32.mrb[68].mxu1 }
 0x180   :  { %18492 = vst [vmem:[#allocation31_spill] sm:$0xff] %v14861_v29  ;;  %v14865_v18 = vpop.f32.mrb[69].mxu1  ;;  %10596 = vmatmul.mubr.f32.gmra.mrb[174].mxu1 %v8356_v36 }
 0x181   :  { %18493 = vst [vmem:[#allocation32_spill] sm:$0xff] %v14865_v18  ;;  %10598 = vmatprep.mubr.f32.mxu1 %v8357_v59  ;;  %v8360_v59 = vld [vmem:[%s18404_s0 + $0x598] sm:$0xff] }
 0x183   :  { %v14875_v44 = vpop.f32.mrb[70].mxu1 }
 0x184   :  { %18494 = vst [vmem:[#allocation33_spill] sm:$0xff] %v14875_v44  ;;  %v14879_v29 = vpop.f32.mrb[71].mxu1  ;;  %10599 = vmatmul.mubr.f32.gmra.mrb[176].mxu1 %v8358_v13  ;;  %v8375_v13 = vld [vmem:[%s18407_s3 + $0x88] sm:$0xff] }
 0x185   :  { %18495 = vst [vmem:[#allocation34_spill] sm:$0xff] %v14879_v29  ;;  %10601 = vmatprep.mubr.f32.mxu1 %v8359_v35  ;;  %v8374_v35 = vld [vmem:[%s18407_s3 + $0x80] sm:$0xff]  ;;  %v8362_v29 = vld [vmem:[%s18404_s0 + $0x5a8] sm:$0xff] }
 0x186   :  { %v12337_v6 = vpack.c.bf16 %v8375_v13, %v8374_v35  ;;  %v8377_v35 = vld [vmem:[%s18407_s3 + $0x98] sm:$0xff] }
 0x187   :  { %v14889_v18 = vpop.f32.mrb[72].mxu1 }
 0x188   :  { %18496 = vst [vmem:[#allocation35_spill] sm:$0xff] %v14889_v18  ;;  %v14893_v44 = vpop.f32.mrb[73].mxu1  ;;  %10602 = vmatmul.mubr.f32.gmra.mrb[178].mxu1 %v8360_v59  ;;  %v8363_v59 = vld [vmem:[%s18404_s0 + $0x5b0] sm:$0xff]  ;;  %12338 = vmatprep.subr.bf16.mxu0 %v12337_v6 }
 0x189   :  { %10604 = vmatprep.mubr.f32.mxu1 %v8361_v60  ;;  %12340 = vmatpush3.bf16.msra.mxu0 %v12337_v6  ;;  %v8376_v60 = vld [vmem:[%s18407_s3 + $0x90] sm:$0xff] }
 0x18a   :  { %v12341_v36 = vpack.c.bf16 %v8377_v35, %v8376_v60  ;;  %v8379_v60 = vld [vmem:[%s18407_s3 + $0xa8] sm:$0xff] }
 0x18b   :  { %v14909_v18 = vpop.f32.mrb[74].mxu1 }
 0x18c   :  { %18497 = vst [vmem:[#allocation36_spill] sm:$0xff] %v14909_v18  ;;  %v14913_v58 = vpop.f32.mrb[75].mxu1  ;;  %10605 = vmatmul.mubr.f32.gmra.mrb[180].mxu1 %v8362_v29  ;;  %v8365_v29 = vld [vmem:[%s18404_s0 + $0x5c0] sm:$0xff]  ;;  %12342 = vmatprep.subr.bf16.mxu0 %v12341_v36  ;;  %v8366_v18 = vld [vmem:[%s18404_s0 + $0x5c8] sm:$0xff] }
 0x18d   :  { %10607 = vmatprep.mubr.f32.mxu1 %v8363_v59  ;;  %12344 = vmatpush3.bf16.msra.mxu0 %v12341_v36  ;;  %v8378_v59 = vld [vmem:[%s18407_s3 + $0xa0] sm:$0xff] }
 0x18e   :  { %v12345_v13 = vpack.c.bf16 %v8379_v60, %v8378_v59  ;;  %v8381_v59 = vld [vmem:[%s18407_s3 + $0xb8] sm:$0xff] }
 0x18f   :  { %v14929_v6 = vpop.f32.mrb[76].mxu1 }
 0x190   :  { %18498 = vst [vmem:[#allocation37_spill] sm:$0xff] %v14929_v6  ;;  %v14933_v1 = vpop.f32.mrb[77].mxu1  ;;  %10608 = vmatmul.mubr.f32.gmra.mrb[182].mxu1 %v8364_v61  ;;  %v8367_v61 = vld [vmem:[%s18404_s0 + $0x5d0] sm:$0xff]  ;;  %12346 = vmatprep.subr.bf16.mxu0 %v12345_v13  ;;  %v8368_v6 = vld [vmem:[%s18404_s0 + $0x5d8] sm:$0xff] }
 0x191   :  { %10610 = vmatprep.mubr.f32.mxu1 %v8365_v29  ;;  %12348 = vmatpush3.bf16.msra.mxu0 %v12345_v13  ;;  %v8380_v29 = vld [vmem:[%s18407_s3 + $0xb0] sm:$0xff] }
 0x192   :  { %v12349_v35 = vpack.c.bf16 %v8381_v59, %v8380_v29  ;;  %v8383_v29 = vld [vmem:[%s18407_s3 + $0xc8] sm:$0xff] }
 0x193   :  { %v14949_v36 = vpop.f32.mrb[78].mxu1 }
 0x194   :  { %18499 = vst [vmem:[#allocation38_spill] sm:$0xff] %v14949_v36  ;;  %v14953_v7 = vpop.f32.mrb[79].mxu1  ;;  %10611 = vmatmul.mubr.f32.gmra.mrb[184].mxu1 %v8366_v18  ;;  %v8369_v18 = vld [vmem:[%s18404_s0 + $0x5e0] sm:$0xff]  ;;  %12350 = vmatprep.subr.bf16.mxu0 %v12349_v35  ;;  %v8370_v36 = vld [vmem:[%s18404_s0 + $0x5e8] sm:$0xff] }
 0x195   :  { %10613 = vmatprep.mubr.f32.mxu1 %v8367_v61  ;;  %12352 = vmatpush3.bf16.msra.mxu0 %v12349_v35  ;;  %v8382_v61 = vld [vmem:[%s18407_s3 + $0xc0] sm:$0xff] }
 0x196   :  { %v12353_v60 = vpack.c.bf16 %v8383_v29, %v8382_v61  ;;  %v8385_v61 = vld [vmem:[%s18407_s3 + $0xd8] sm:$0xff]  ;;  %v8386_v29 = vld [vmem:[%s18407_s3 + $0xe0] sm:$0xff] }
 0x197   :  { %v14969_v13 = vpop.f32.mrb[80].mxu1 }
 0x198   :  { %18500 = vst [vmem:[#allocation39_spill] sm:$0xff] %v14969_v13  ;;  %v14973_v5 = vpop.f32.mrb[81].mxu1  ;;  %10614 = vmatmul.mubr.f32.gmra.mrb[186].mxu1 %v8368_v6  ;;  %v8371_v6 = vld [vmem:[%s18404_s0 + $0x5f0] sm:$0xff]  ;;  %12354 = vmatprep.subr.bf16.mxu0 %v12353_v60  ;;  %v8372_v13 = vld [vmem:[%s18404_s0 + $0x5f8] sm:$0xff] }
 0x199   :  { %10616 = vmatprep.mubr.f32.mxu1 %v8369_v18  ;;  %12356 = vmatpush3.bf16.msra.mxu0 %v12353_v60  ;;  %v8384_v18 = vld [vmem:[%s18407_s3 + $0xd0] sm:$0xff] }
 0x19a   :  { %v12357_v59 = vpack.c.bf16 %v8385_v61, %v8384_v18 }
 0x19b   :  { %v14989_v35 = vpop.f32.mrb[82].mxu1 }
 0x19c   :  { %18501 = vst [vmem:[#allocation40_spill] sm:$0xff] %v14989_v35  ;;  %v14993_v16 = vpop.f32.mrb[83].mxu1  ;;  %10617 = vmatmul.mubr.f32.gmra.mrb[188].mxu1 %v8370_v36  ;;  %12358 = vmatprep.subr.bf16.mxu0 %v12357_v59 }
 0x19d   :  { %18502 = vst [vmem:[#allocation41_spill] sm:$0xff] %v14993_v16  ;;  %10619 = vmatprep.mubr.f32.mxu1 %v8371_v6  ;;  %12360 = vmatpush3.bf16.msra.mxu0 %v12357_v59  ;;  %v8387_v6 = vld [vmem:[%s18407_s3 + $0xe8] sm:$0xff]  ;;  %v8388_v59 = vld [vmem:[%s18407_s3 + $0xf0] sm:$0xff] }
 0x19e   :  { %v12361_v61 = vpack.c.bf16 %v8387_v6, %v8386_v29 }
 0x19f   :  { %v15006_v35 = vpop.f32.mrb[84].mxu1 }
 0x1a0   :  { %18503 = vst [vmem:[#allocation42_spill] sm:$0xff] %v15006_v35  ;;  %v15010_v60 = vpop.f32.mrb[85].mxu1  ;;  %10620 = vmatmul.mubr.f32.gmra.mrb[190].mxu1 %v8372_v13  ;;  %12362 = vmatprep.subr.bf16.mxu0 %v12361_v61  ;;  %v8389_v35 = vld [vmem:[%s18407_s3 + $0xf8] sm:$0xff] }
 0x1a1   :  { %18504 = vst [vmem:[#allocation43_spill] sm:$0xff] %v15010_v60  ;;  %12364 = vmatpush3.bf16.msra.mxu0 %v12361_v61  ;;  %v12365_v6 = vpack.c.bf16 %v8389_v35, %v8388_v59  ;;  %v18514_v60 = vmax.f32 %v14488_v17, %v14735_v43  ;;  %v18515_v35 = vmax.f32 %v14490_v19, %v14739_v51 }
 0x1a3   :  { %v15020_v16 = vpop.f32.mrb[86].mxu1  ;;  %12366 = vmatprep.subr.bf16.mxu0 %v12365_v6 }
 0x1a4   :  { %18505 = vst [vmem:[#allocation44_spill] sm:$0xff] %v15020_v16  ;;  %v15024_v13 = vpop.f32.mrb[87].mxu1 }
 0x1a5   :  { %12368 = vmatpush3.bf16.msra.mxu0 %v12365_v6  ;;  %v18513_v6 = vmax.f32 %v14478_v14, %v14725_v28 }
 0x1a7   :  { %v15034_v18 = vpop.f32.mrb[88].mxu1 }
 0x1a8   :  { %v15038_v16 = vpop.f32.mrb[89].mxu1 }
 0x1ab   :  { %v15042_v39 = vpop.f32.mrb[90].mxu1 }
 0x1ac   :  { %18506 = vst [vmem:[#allocation45_spill] sm:$0xff] %v15042_v39  ;;  %v15046_v32 = vpop.f32.mrb[91].mxu1 }
 0x1ad   :  { %18507 = vst [vmem:[#allocation46_spill] sm:$0xff] %v15046_v32 }
 0x1af   :  { %v15050_v59 = vpop.f32.mrb[92].mxu1 }
 0x1b0   :  { %18508 = vst [vmem:[#allocation47_spill] sm:$0xff] %v15050_v59  ;;  %v15054_v29 = vpop.f32.mrb[93].mxu1 }
 0x1b1   :  { %18509 = vst [vmem:[#allocation48_spill] sm:$0xff] %v15054_v29 }
 0x1b3   :  { %v15058_v61 = vpop.f32.mrb[94].mxu1 }
 0x1b4   :  { %18510 = vst [vmem:[#allocation49_spill] sm:$0xff] %v15058_v61  ;;  %v15062_v39 = vpop.f32.mrb[95].mxu1 }
 0x1b5   :  { %18511 = vst [vmem:[#allocation50_spill] sm:$0xff] %v15062_v39 }
 0x1b7   :  { %v10448_v32 = vpop.f32.mrb[96].mxu1 }
 0x1b8   :  { %v15069_v36 = vmax.f32 %v18512_v56, %v10448_v32  ;;  %v922_v59 = vpop.f32.mrb[97].mxu1  ;;  %v18516_v32 = vmax.f32 %v14500_v22, %v14749_v4  ;;  %v18521_v4 = vld [vmem:[#allocation19_spill] sm:$0xff] }
 0x1b9   :  { %v15074_v29 = vmax.f32 %v18513_v6, %v922_v59  ;;  %v18524_v6 = vmax.f32 %v14523_v24, %v18523_v8 }
 0x1bb   :  { %v10451_v0 = vpop.f32.mrb[98].mxu1 }
 0x1bc   :  { %v15079_v61 = vmax.f32 %v18514_v60, %v10451_v0  ;;  %v932_v3 = vpop.f32.mrb[99].mxu1  ;;  %v18518_v0 = vmax.f32 %v14511_v26, %v14763_v52  ;;  %v18525_v52 = vld [vmem:[#allocation21_spill] sm:$0xff] }
 0x1bd   :  { %v15084_v39 = vmax.f32 %v18515_v35, %v932_v3  ;;  %v18519_v3 = vld [vmem:[#allocation18_spill] sm:$0xff]  ;;  %v18522_v35 = vmax.f32 %v14521_v30, %v18521_v4 }
 0x1be   :  { %v18520_v51 = vmax.f32 %v14513_v27, %v18519_v3 }
 0x1bf   :  { %v10454_v12 = vpop.f32.mrb[100].mxu1 }
 0x1c0   :  { %v15089_v56 = vmax.f32 %v18516_v32, %v10454_v12  ;;  %v942_v14 = vpop.f32.mrb[101].mxu1  ;;  %v18526_v32 = vmax.f32 %v14531_v33, %v18525_v52  ;;  %v18535_v52 = vld [vmem:[#allocation26_spill] sm:$0xff] }
 0x1c1   :  { %v15094_v28 = vmax.f32 %v18517_v20, %v942_v14  ;;  %v18527_v20 = vld [vmem:[#allocation22_spill] sm:$0xff] }
 0x1c3   :  { %v10457_v17 = vpop.f32.mrb[102].mxu1 }
 0x1c4   :  { %v15099_v43 = vmax.f32 %v18518_v0, %v10457_v17  ;;  %v952_v19 = vpop.f32.mrb[103].mxu1  ;;  %v18528_v17 = vmax.f32 %v14533_v34, %v18527_v20 }
 0x1c5   :  { %v15104_v60 = vmax.f32 %v18520_v51, %v952_v19  ;;  %v18529_v19 = vld [vmem:[#allocation23_spill] sm:$0xff] }
 0x1c6   :  { %v18530_v3 = vmax.f32 %v14541_v37, %v18529_v19  ;;  %v1779_v37 = vld [vmem:[%s18407_s3 + $0x8] sm:$0xff] }
 0x1c7   :  { %v10460_v22 = vpop.f32.mrb[104].mxu1 }
 0x1c8   :  { %v15109_v59 = vmax.f32 %v18522_v35, %v10460_v22  ;;  %v962_v23 = vpop.f32.mrb[105].mxu1  ;;  %v18531_v22 = vld [vmem:[#allocation24_spill] sm:$0xff] }
 0x1c9   :  { %v15114_v12 = vmax.f32 %v18524_v6, %v962_v23  ;;  %v18532_v4 = vmax.f32 %v14543_v38, %v18531_v22  ;;  %v18533_v23 = vld [vmem:[#allocation25_spill] sm:$0xff]  ;;  %v18536_v38 = vmax.f32 %v14553_v42, %v18535_v52  ;;  %v18545_v52 = vld [vmem:[#allocation31_spill] sm:$0xff] }
 0x1ca   :  { %v18534_v8 = vmax.f32 %v14551_v41, %v18533_v23  ;;  %v18537_v41 = vld [vmem:[#allocation27_spill] sm:$0xff]  ;;  %v18541_v42 = vld [vmem:[#allocation29_spill] sm:$0xff] }
 0x1cb   :  { %v10463_v26 = vpop.f32.mrb[106].mxu1 }
 0x1cc   :  { %v15119_v14 = vmax.f32 %v18526_v32, %v10463_v26  ;;  %v972_v27 = vpop.f32.mrb[107].mxu1  ;;  %v1778_v26 = vld [vmem:[%s18407_s3] sm:$0xff] }
 0x1cd   :  { %v15124_v0 = vmax.f32 %v18528_v17, %v972_v27  ;;  %v15152_v27 = vpack.c.bf16 %v1779_v37, %v1778_v26  ;;  %v18538_v17 = vmax.f32 %v14561_v45, %v18537_v41  ;;  %v18547_v41 = vld [vmem:[#allocation32_spill] sm:$0xff] }
 0x1cf   :  { %v10466_v30 = vpop.f32.mrb[108].mxu1  ;;  %12370 = vmatprep.subr.bf16.mxu0 %v15152_v27 }
 0x1d0   :  { %v15129_v51 = vmax.f32 %v18530_v3, %v10466_v30  ;;  %v982_v24 = vpop.f32.mrb[109].mxu1  ;;  %v18539_v3 = vld [vmem:[#allocation28_spill] sm:$0xff] }
 0x1d1   :  { %v15134_v35 = vmax.f32 %v18532_v4, %v982_v24  ;;  %v18540_v24 = vmax.f32 %v14563_v46, %v18539_v3  ;;  %v18549_v3 = vld [vmem:[#allocation33_spill] sm:$0xff] }
 0x1d3   :  { %v10469_v33 = vpop.f32.mrb[110].mxu1 }
 0x1d4   :  { %v15139_v6 = vmax.f32 %v18534_v8, %v10469_v33  ;;  %v992_v34 = vpop.f32.mrb[111].mxu1  ;;  %v18542_v33 = vmax.f32 %v14571_v49, %v18541_v42  ;;  %v18551_v42 = vld [vmem:[#allocation7_spill] sm:$0xff] }
 0x1d5   :  { %v15150_v32 = vmax.f32 %v18536_v38, %v992_v34  ;;  %v18543_v34 = vld [vmem:[#allocation30_spill] sm:$0xff]  ;;  %v18546_v38 = vmax.f32 %v14581_v53, %v18545_v52 }
 0x1d6   :  { %v18544_v26 = vmax.f32 %v14573_v50, %v18543_v34 }
 0x1d7   :  { %v10472_v20 = vpop.f32.mrb[112].mxu1 }
 0x1d8   :  { %v15158_v30 = vmax.f32 %v18538_v17, %v10472_v20  ;;  %v1002_v19 = vpop.f32.mrb[113].mxu1  ;;  %v18548_v17 = vmax.f32 %v14583_v54, %v18547_v41 }
 0x1d9   :  { %v15163_v22 = vmax.f32 %v18540_v24, %v1002_v19  ;;  %v18550_v24 = vmax.f32 %v14591_v57, %v18549_v3 }
 0x1db   :  { %v10475_v4 = vpop.f32.mrb[114].mxu1 }
 0x1dc   :  { %v15168_v23 = vmax.f32 %v18542_v33, %v10475_v4  ;;  %v1012_v8 = vpop.f32.mrb[115].mxu1  ;;  %v18552_v33 = vld [vmem:[#allocation34_spill] sm:$0xff] }
 0x1dd   :  { %v15173_v37 = vmax.f32 %v18544_v26, %v1012_v8  ;;  %v18553_v8 = vmax.f32 %v18551_v42, %v18552_v33  ;;  %v18554_v26 = vld [vmem:[#allocation8_spill] sm:$0xff]  ;;  %v18561_v42 = vmax.f32 %v14613_v2, %v14913_v58  ;;  %v18569_v2 = vmax.f32 %v14633_v11, %v14953_v7  ;;  %v18577_v11 = vld [vmem:[#allocation41_spill] sm:$0xff] }
 0x1df   :  { %v10478_v45 = vpop.f32.mrb[116].mxu1 }
 0x1e0   :  { %v15178_v20 = vmax.f32 %v18546_v38, %v10478_v45  ;;  %v1022_v46 = vpop.f32.mrb[117].mxu1  ;;  %v18555_v45 = vld [vmem:[#allocation35_spill] sm:$0xff] }
 0x1e1   :  { %v15183_v19 = vmax.f32 %v18548_v17, %v1022_v46  ;;  %v18556_v52 = vmax.f32 %v18554_v26, %v18555_v45  ;;  %v18557_v46 = vmax.f32 %v14603_v62, %v14893_v44  ;;  %v18558_v17 = vld [vmem:[#allocation9_spill] sm:$0xff]  ;;  %v18565_v44 = vmax.f32 %v14623_v9, %v14933_v1 }
 0x1e2   :  { %v18563_v26 = vld [vmem:[#allocation37_spill] sm:$0xff]  ;;  %v18573_v9 = vmax.f32 %v14643_v15, %v14973_v5 }
 0x1e3   :  { %v10481_v49 = vpop.f32.mrb[118].mxu1  ;;  %v18581_v15 = vld [vmem:[#allocation13_spill] sm:$0xff] }
 0x1e4   :  { %v15188_v4 = vmax.f32 %v18550_v24, %v10481_v49  ;;  %v1032_v50 = vpop.f32.mrb[119].mxu1  ;;  %v18559_v49 = vld [vmem:[#allocation36_spill] sm:$0xff] }
 0x1e5   :  { %v15193_v34 = vmax.f32 %v18553_v8, %v1032_v50  ;;  %v18560_v3 = vmax.f32 %v18558_v17, %v18559_v49  ;;  %v18567_v17 = vld [vmem:[#allocation38_spill] sm:$0xff] }
 0x1e7   :  { %v10484_v53 = vpop.f32.mrb[120].mxu1 }
 0x1e8   :  { %v15198_v38 = vmax.f32 %v18556_v52, %v10484_v53  ;;  %v1042_v54 = vpop.f32.mrb[121].mxu1  ;;  %v18562_v53 = vld [vmem:[#allocation10_spill] sm:$0xff] }
 0x1e9   :  { %v15203_v41 = vmax.f32 %v18557_v46, %v1042_v54  ;;  %v18564_v45 = vmax.f32 %v18562_v53, %v18563_v26  ;;  %v18571_v53 = vld [vmem:[#allocation39_spill] sm:$0xff] }
 0x1eb   :  { %v10487_v57 = vpop.f32.mrb[122].mxu1 }
 0x1ec   :  { %v15208_v24 = vmax.f32 %v18560_v3, %v10487_v57  ;;  %v1052_v50 = vpop.f32.mrb[123].mxu1  ;;  %v18566_v57 = vld [vmem:[#allocation11_spill] sm:$0xff] }
 0x1ed   :  { %v15213_v33 = vmax.f32 %v18561_v42, %v1052_v50  ;;  %v18568_v49 = vmax.f32 %v18566_v57, %v18567_v17 }
 0x1ef   :  { %v10490_v8 = vpop.f32.mrb[124].mxu1 }
 0x1f0   :  { %v15218_v52 = vmax.f32 %v18564_v45, %v10490_v8  ;;  %v1062_v62 = vpop.f32.mrb[125].mxu1  ;;  %v18570_v8 = vld [vmem:[#allocation12_spill] sm:$0xff] }
 0x1f1   :  { %v15223_v54 = vmax.f32 %v18565_v44, %v1062_v62  ;;  %v18572_v26 = vmax.f32 %v18570_v8, %v18571_v53 }
 0x1f3   :  { %v10493_v46 = vpop.f32.mrb[126].mxu1 }
 0x1f4   :  { %v15228_v3 = vmax.f32 %v18568_v49, %v10493_v46  ;;  %v1072_v58 = vpop.f32.mrb[127].mxu1  ;;  %v18574_v46 = vld [vmem:[#allocation40_spill] sm:$0xff]  ;;  %v18578_v49 = vmax.f32 %v14653_v21, %v18577_v11 }
 0x1f5   :  { %v15233_v50 = vmax.f32 %v18569_v2, %v1072_v58  ;;  %v18575_v57 = vmax.f32 %v14651_v25, %v18574_v46  ;;  %v18585_v46 = vld [vmem:[#allocation44_spill] sm:$0xff] }
 0x1f7   :  { %v10496_v42 = vpop.f32.mrb[128].mxu1 }
 0x1f8   :  { %v15238_v45 = vmax.f32 %v18572_v26, %v10496_v42  ;;  %v1082_v1 = vpop.f32.mrb[129].mxu1  ;;  %v18579_v42 = vld [vmem:[#allocation42_spill] sm:$0xff]  ;;  %v18582_v26 = vld [vmem:[#allocation43_spill] sm:$0xff] }
 0x1f9   :  { %v15243_v62 = vmax.f32 %v18573_v9, %v1082_v1  ;;  %v18580_v8 = vmax.f32 %v14661_v31, %v18579_v42  ;;  %v18583_v1 = vmax.f32 %v18581_v15, %v18582_v26  ;;  %v18590_v26 = vld [vmem:[#allocation45_spill] sm:$0xff] }
 0x1fb   :  { %v10499_v44 = vpop.f32.mrb[130].mxu1 }
 0x1fc   :  { %v15248_v17 = vmax.f32 %v18575_v57, %v10499_v44  ;;  %v1092_v7 = vpop.f32.mrb[131].mxu1  ;;  %v18584_v44 = vld [vmem:[#allocation14_spill] sm:$0xff] }
 0x1fd   :  { %v15253_v58 = vmax.f32 %v18578_v49, %v1092_v7  ;;  %v18586_v57 = vmax.f32 %v18584_v44, %v18585_v46  ;;  %v18587_v7 = vmax.f32 %v14673_v40, %v15024_v13  ;;  %v18588_v49 = vmax.f32 %v14681_v47, %v15034_v18  ;;  %v18592_v13 = vld [vmem:[#allocation15_spill] sm:$0xff]  ;;  %v18593_v44 = vld [vmem:[#allocation46_spill] sm:$0xff] }
 0x1fe   :  { %18576 = vst [vmem:[#allocation18_spill] sm:$0xff] %v15248_v17  ;;  %v18594_v46 = vmax.f32 %v18592_v13, %v18593_v44  ;;  %v18595_v18 = vld [vmem:[#allocation47_spill] sm:$0xff]  ;;  %v18603_v13 = vld [vmem:[#allocation50_spill] sm:$0xff] }
 0x1ff   :  { %v10502_v2 = vpop.f32.mrb[132].mxu1  ;;  %v18604_v44 = vmax.f32 %v14713_v10, %v18603_v13 }
 0x200   :  { %v15258_v53 = vmax.f32 %v18580_v8, %v10502_v2  ;;  %v1102_v5 = vpop.f32.mrb[133].mxu1  ;;  %v18589_v8 = vmax.f32 %v14683_v48, %v15038_v16  ;;  %v18597_v48 = vld [vmem:[#allocation16_spill] sm:$0xff] }
 0x201   :  { %v15263_v9 = vmax.f32 %v18583_v1, %v1102_v5  ;;  %v18591_v1 = vmax.f32 %v14691_v55, %v18590_v26 }
 0x203   :  { %v10505_v25 = vpop.f32.mrb[134].mxu1 }
 0x204   :  { %v15268_v17 = vmax.f32 %v18586_v57, %v10505_v25  ;;  %v1112_v21 = vpop.f32.mrb[135].mxu1 }
 0x205   :  { %v15273_v11 = vmax.f32 %v18587_v7, %v1112_v21  ;;  %v18596_v21 = vmax.f32 %v14701_v63, %v18595_v18 }
 0x207   :  { %v10508_v31 = vpop.f32.mrb[136].mxu1 }
 0x208   :  { %v15278_v2 = vmax.f32 %v18588_v49, %v10508_v31  ;;  %v1122_v42 = vpop.f32.mrb[137].mxu1  ;;  %v18598_v31 = vld [vmem:[#allocation48_spill] sm:$0xff] }
 0x209   :  { %v15283_v5 = vmax.f32 %v18589_v8, %v1122_v42  ;;  %v18599_v49 = vmax.f32 %v18597_v48, %v18598_v31  ;;  %v18600_v8 = vld [vmem:[#allocation17_spill] sm:$0xff] }
 0x20b   :  { %v10511_v15 = vpop.f32.mrb[138].mxu1 }
 0x20c   :  { %v15288_v25 = vmax.f32 %v18591_v1, %v10511_v15  ;;  %v1132_v40 = vpop.f32.mrb[139].mxu1  ;;  %v18601_v15 = vld [vmem:[#allocation49_spill] sm:$0xff] }
 0x20d   :  { %v15293_v57 = vmax.f32 %v18594_v46, %v1132_v40  ;;  %v18602_v26 = vmax.f32 %v18600_v8, %v18601_v15 }
 0x20f   :  { %v10514_v47 = vpop.f32.mrb[140].mxu1 }
 0x210   :  { %v15298_v7 = vmax.f32 %v18596_v21, %v10514_v47  ;;  %v1142_v16 = vpop.f32.mrb[141].mxu1  ;;  %v15318_v47 = vld [vmem:[%s18406_s2] ss:$0 sm:$0xff] }
 0x211   :  { %v15303_v42 = vmax.f32 %v18599_v49, %v1142_v16 }
 0x213   :  { %v10517_v55 = vpop.f32.mrb[142].mxu1 }
 0x214   :  { %v15308_v1 = vmax.f32 %v18602_v26, %v10517_v55  ;;  %v1152_v40 = vpop.f32.mrb[143].mxu1 }
 0x215   :  { %v15313_v46 = vmax.f32 %v18604_v44, %v1152_v40 }
 0x217   :  { %v10552_v63 = vpop.f32.mrb[144].mxu1 }
 0x218   :  { %v1564_v18 = vmax.f32 %v15069_v36, %v10552_v63  ;;  %v1324_v21 = vpop.f32.mrb[145].mxu1 }
 0x219   :  { %v1563_v16 = vmax.f32 %v15074_v29, %v1324_v21 }
 0x21a   :  { %v1619_v48 = vadd.f32 %v15318_v47, %v1564_v18 }
 0x21b   :  { %v15324_v31 = vadd.f32 %v15318_v47, %v1563_v16  ;;  %v10555_v49 = vpop.f32.mrb[146].mxu1 }
 0x21c   :  { %v1667_v10 = vmax.f32 %v1619_v48, 0.0  ;;  %v1566_v55 = vmax.f32 %v15079_v61, %v10555_v49  ;;  %v1334_v8 = vpop.f32.mrb[147].mxu1 }
 0x21d   :  { %v1666_v15 = vmax.f32 %v15324_v31, 0.0  ;;  %v1565_v26 = vmax.f32 %v15084_v39, %v1334_v8 }
 0x21e   :  { %1715 = vst [vmem:[#allocation2 + $0x8] sm:$0xff] %v1667_v10  ;;  %v1621_v36 = vadd.f32 %v15318_v47, %v1566_v55 }
 0x21f   :  { %1714 = vst [vmem:[#allocation2] sm:$0xff] %v1666_v15  ;;  %v15333_v29 = vadd.f32 %v15318_v47, %v1565_v26  ;;  %v10558_v40 = vpop.f32.mrb[148].mxu1  ;;  %v1780_v26 = vld [vmem:[%s18407_s3 + $0x10] sm:$0xff] }
 0x220   :  { %v1669_v13 = vmax.f32 %v1621_v36, 0.0  ;;  %v1568_v44 = vmax.f32 %v15089_v56, %v10558_v40  ;;  %v1344_v63 = vpop.f32.mrb[149].mxu1  ;;  %v1781_v36 = vld [vmem:[%s18407_s3 + $0x18] sm:$0xff] }
 0x221   :  { %v1668_v61 = vmax.f32 %v15333_v29, 0.0  ;;  %v1567_v18 = vmax.f32 %v15094_v28, %v1344_v63 }
 0x222   :  { %1717 = vst [vmem:[#allocation2 + $0x18] sm:$0xff] %v1669_v13  ;;  %v1623_v39 = vadd.f32 %v15318_v47, %v1568_v44 }
 0x223   :  { %1716 = vst [vmem:[#allocation2 + $0x10] sm:$0xff] %v1668_v61  ;;  %v15342_v21 = vadd.f32 %v15318_v47, %v1567_v18  ;;  %v10561_v16 = vpop.f32.mrb[150].mxu1 }
 0x224   :  { %v1671_v48 = vmax.f32 %v1623_v39, 0.0  ;;  %v1570_v49 = vmax.f32 %v15099_v43, %v10561_v16  ;;  %v1354_v10 = vpop.f32.mrb[151].mxu1  ;;  %v12373_v39 = vpack.c.bf16 %v1781_v36, %v1780_v26 }
 0x225   :  { %v1670_v56 = vmax.f32 %v15342_v21, 0.0  ;;  %v1569_v55 = vmax.f32 %v15104_v60, %v1354_v10  ;;  %v1783_v10 = vld [vmem:[%s18407_s3 + $0x28] sm:$0xff] }
 0x226   :  { %1719 = vst [vmem:[#allocation2 + $0x28] sm:$0xff] %v1671_v48  ;;  %v1625_v28 = vadd.f32 %v15318_v47, %v1570_v49  ;;  %v1794_v8 = vld [vmem:[#allocation2 + $0x1] sm:$0xff] }
 0x227   :  { %1718 = vst [vmem:[#allocation2 + $0x20] sm:$0xff] %v1670_v56  ;;  %v15357_v43 = vadd.f32 %v15318_v47, %v1569_v55  ;;  %v10564_v40 = vpop.f32.mrb[152].mxu1  ;;  %10654 = vmatprep.mubr.f32.mxu0 %v1794_v8  ;;  %v1782_v49 = vld [vmem:[%s18407_s3 + $0x20] sm:$0xff]  ;;  %v8399_v21 = vld [vmem:[%s18407_s3 + $0x148] sm:$0xff] }
 0x228   :  { %v1673_v60 = vmax.f32 %v1625_v28, 0.0  ;;  %v1572_v13 = vmax.f32 %v15109_v59, %v10564_v40  ;;  %v1364_v44 = vpop.f32.mrb[153].mxu1  ;;  %v12377_v40 = vpack.c.bf16 %v1783_v10, %v1782_v49 }
 0x229   :  { %v1672_v63 = vmax.f32 %v15357_v43, 0.0  ;;  %v1571_v18 = vmax.f32 %v15114_v12, %v1364_v44  ;;  %v1784_v44 = vld [vmem:[%s18407_s3 + $0x30] sm:$0xff] }
 0x22a   :  { %1721 = vst [vmem:[#allocation2 + $0x38] sm:$0xff] %v1673_v60  ;;  %v1627_v16 = vadd.f32 %v15318_v47, %v1572_v13  ;;  %v1795_v48 = vld [vmem:[#allocation2 + $0x11] sm:$0xff] }
 0x22b   :  { %1720 = vst [vmem:[#allocation2 + $0x30] sm:$0xff] %v1672_v63  ;;  %v15372_v59 = vadd.f32 %v15318_v47, %v1571_v18  ;;  %v10567_v12 = vpop.f32.mrb[154].mxu1  ;;  %10655 = vmatmul.mubr.f32.vlgmr.msra.gmra.mrb[0].mxu0 %v1795_v48  ;;  %v8400_v43 = vld [vmem:[%s18407_s3 + $0x150] sm:$0xff] }
 0x22c   :  { %v1675_v55 = vmax.f32 %v1627_v16, 0.0  ;;  %v1574_v28 = vmax.f32 %v15119_v14, %v10567_v12  ;;  %v1374_v8 = vpop.f32.mrb[155].mxu1  ;;  %12372 = vmatpush3.bf16.msra.mxu0 %v15152_v27  ;;  %v1785_v14 = vld [vmem:[%s18407_s3 + $0x38] sm:$0xff] }
 0x22d   :  { %v1674_v26 = vmax.f32 %v15372_v59, 0.0  ;;  %v1573_v36 = vmax.f32 %v15124_v0, %v1374_v8  ;;  %12374 = vmatprep.subr.bf16.mxu0 %v12373_v39  ;;  %v12381_v12 = vpack.c.bf16 %v1785_v14, %v1784_v44  ;;  %v1786_v8 = vld [vmem:[%s18407_s3 + $0x40] sm:$0xff] }
 0x22e   :  { %1723 = vst [vmem:[#allocation2 + $0x48] sm:$0xff] %v1675_v55  ;;  %v1629_v60 = vadd.f32 %v15318_v47, %v1574_v28  ;;  %v1796_v13 = vld [vmem:[#allocation2 + $0x21] sm:$0xff] }
 0x22f   :  { %1722 = vst [vmem:[#allocation2 + $0x40] sm:$0xff] %v1674_v26  ;;  %v15388_v27 = vadd.f32 %v15318_v47, %v1573_v36  ;;  %v10570_v0 = vpop.f32.mrb[156].mxu1  ;;  %10657 = vmatprep.mubr.f32.mxu0 %v1796_v13 }
 0x230   :  { %v1677_v18 = vmax.f32 %v1629_v60, 0.0  ;;  %v1576_v16 = vmax.f32 %v15129_v51, %v10570_v0  ;;  %v1384_v48 = vpop.f32.mrb[157].mxu1  ;;  %12376 = vmatpush3.bf16.msra.mxu0 %v12373_v39  ;;  %v1787_v51 = vld [vmem:[%s18407_s3 + $0x48] sm:$0xff] }
 0x231   :  { %v1676_v49 = vmax.f32 %v15388_v27, 0.0  ;;  %v1575_v10 = vmax.f32 %v15134_v35, %v1384_v48  ;;  %12378 = vmatprep.subr.bf16.mxu0 %v12377_v40  ;;  %v12385_v0 = vpack.c.bf16 %v1787_v51, %v1786_v8  ;;  %v1788_v48 = vld [vmem:[%s18407_s3 + $0x50] sm:$0xff]  ;;  %v8403_v27 = vld [vmem:[%s18407_s3 + $0x168] sm:$0xff] }
 0x232   :  { %1725 = vst [vmem:[#allocation2 + $0x58] sm:$0xff] %v1677_v18  ;;  %v1631_v55 = vadd.f32 %v15318_v47, %v1576_v16  ;;  %v1797_v28 = vld [vmem:[#allocation2 + $0x31] sm:$0xff] }
 0x233   :  { %1724 = vst [vmem:[#allocation2 + $0x50] sm:$0xff] %v1676_v49  ;;  %v15403_v39 = vadd.f32 %v15318_v47, %v1575_v10  ;;  %v10573_v35 = vpop.f32.mrb[158].mxu1  ;;  %10658 = vmatmul.mubr.f32.gmra.mrb[2].mxu0 %v1797_v28 }
 0x234   :  { %v1679_v36 = vmax.f32 %v1631_v55, 0.0  ;;  %v1578_v60 = vmax.f32 %v15139_v6, %v10573_v35  ;;  %v1394_v13 = vpop.f32.mrb[159].mxu1  ;;  %12380 = vmatpush3.bf16.msra.mxu0 %v12377_v40  ;;  %v1789_v6 = vld [vmem:[%s18407_s3 + $0x58] sm:$0xff] }
 0x235   :  { %v1678_v44 = vmax.f32 %v15403_v39, 0.0  ;;  %v1577_v14 = vmax.f32 %v15150_v32, %v1394_v13  ;;  %12382 = vmatprep.subr.bf16.mxu0 %v12381_v12  ;;  %v12389_v35 = vpack.c.bf16 %v1789_v6, %v1788_v48  ;;  %v1790_v13 = vld [vmem:[%s18407_s3 + $0x60] sm:$0xff]  ;;  %v8404_v39 = vld [vmem:[%s18407_s3 + $0x170] sm:$0xff] }
 0x236   :  { %1727 = vst [vmem:[#allocation2 + $0x68] sm:$0xff] %v1679_v36  ;;  %v1633_v18 = vadd.f32 %v15318_v47, %v1578_v60  ;;  %v1798_v16 = vld [vmem:[#allocation2 + $0x41] sm:$0xff] }
 0x237   :  { %1726 = vst [vmem:[#allocation2 + $0x60] sm:$0xff] %v1678_v44  ;;  %v15418_v40 = vadd.f32 %v15318_v47, %v1577_v14  ;;  %v10576_v32 = vpop.f32.mrb[160].mxu1  ;;  %10660 = vmatprep.mubr.f32.mxu0 %v1798_v16 }
 0x238   :  { %v1681_v10 = vmax.f32 %v1633_v18, 0.0  ;;  %v1580_v55 = vmax.f32 %v15158_v30, %v10576_v32  ;;  %v1404_v28 = vpop.f32.mrb[161].mxu1  ;;  %12384 = vmatpush3.bf16.msra.mxu0 %v12381_v12  ;;  %v1791_v30 = vld [vmem:[%s18407_s3 + $0x68] sm:$0xff] }
 0x239   :  { %v1680_v8 = vmax.f32 %v15418_v40, 0.0  ;;  %v1579_v51 = vmax.f32 %v15163_v22, %v1404_v28  ;;  %12386 = vmatprep.subr.bf16.mxu0 %v12385_v0  ;;  %v12393_v32 = vpack.c.bf16 %v1791_v30, %v1790_v13  ;;  %v1792_v28 = vld [vmem:[%s18407_s3 + $0x70] sm:$0xff] }
 0x23a   :  { %1729 = vst [vmem:[#allocation2 + $0x78] sm:$0xff] %v1681_v10  ;;  %v1635_v36 = vadd.f32 %v15318_v47, %v1580_v55  ;;  %v1799_v60 = vld [vmem:[#allocation2 + $0x51] sm:$0xff] }
 0x23b   :  { %1728 = vst [vmem:[#allocation2 + $0x70] sm:$0xff] %v1680_v8  ;;  %v1634_v12 = vadd.f32 %v15318_v47, %v1579_v51  ;;  %v10579_v22 = vpop.f32.mrb[162].mxu1  ;;  %10661 = vmatmul.mubr.f32.gmra.mrb[4].mxu0 %v1799_v60  ;;  %v1793_v51 = vld [vmem:[%s18407_s3 + $0x78] sm:$0xff] }
 0x23c   :  { %v1683_v14 = vmax.f32 %v1635_v36, 0.0  ;;  %v1582_v18 = vmax.f32 %v15168_v23, %v10579_v22  ;;  %v1414_v16 = vpop.f32.mrb[163].mxu1  ;;  %12388 = vmatpush3.bf16.msra.mxu0 %v12385_v0 }
 0x23d   :  { %v1682_v48 = vmax.f32 %v1634_v12, 0.0  ;;  %v1581_v6 = vmax.f32 %v15173_v37, %v1414_v16  ;;  %12390 = vmatprep.subr.bf16.mxu0 %v12389_v35  ;;  %v12397_v12 = vpack.c.bf16 %v1793_v51, %v1792_v28  ;;  %v8391_v16 = vld [vmem:[%s18407_s3 + $0x108] sm:$0xff] }
 0x23e   :  { %1731 = vst [vmem:[#allocation2 + $0x88] sm:$0xff] %v1683_v14  ;;  %v1637_v10 = vadd.f32 %v15318_v47, %v1582_v18  ;;  %v1800_v55 = vld [vmem:[#allocation2 + $0x61] sm:$0xff] }
 0x23f   :  { %1730 = vst [vmem:[#allocation2 + $0x80] sm:$0xff] %v1682_v48  ;;  %v1636_v23 = vadd.f32 %v15318_v47, %v1581_v6  ;;  %v10582_v0 = vpop.f32.mrb[164].mxu1  ;;  %10663 = vmatprep.mubr.f32.mxu0 %v1800_v55  ;;  %v8390_v18 = vld [vmem:[%s18407_s3 + $0x100] sm:$0xff] }
 0x240   :  { %v1685_v37 = vmax.f32 %v1637_v10, 0.0  ;;  %v1584_v36 = vmax.f32 %v15178_v20, %v10582_v0  ;;  %v1424_v60 = vpop.f32.mrb[165].mxu1  ;;  %12392 = vmatpush3.bf16.msra.mxu0 %v12389_v35  ;;  %v15455_v28 = vpack.c.bf16 %v8391_v16, %v8390_v18 }
 0x241   :  { %v1684_v13 = vmax.f32 %v1636_v23, 0.0  ;;  %v1583_v30 = vmax.f32 %v15183_v19, %v1424_v60  ;;  %12394 = vmatprep.subr.bf16.mxu0 %v12393_v32 }
 0x242   :  { %1733 = vst [vmem:[#allocation2 + $0x98] sm:$0xff] %v1685_v37  ;;  %v1639_v22 = vadd.f32 %v15318_v47, %v1584_v36  ;;  %v1801_v14 = vld [vmem:[#allocation2 + $0x71] sm:$0xff] }
 0x243   :  { %1732 = vst [vmem:[#allocation2 + $0x90] sm:$0xff] %v1684_v13  ;;  %v1638_v20 = vadd.f32 %v15318_v47, %v1583_v30  ;;  %v10585_v35 = vpop.f32.mrb[166].mxu1  ;;  %10664 = vmatmul.mubr.f32.gmra.mrb[6].mxu0 %v1801_v14 }
 0x244   :  { %v1687_v19 = vmax.f32 %v1639_v22, 0.0  ;;  %v1586_v48 = vmax.f32 %v15188_v4, %v10585_v35  ;;  %v1434_v6 = vpop.f32.mrb[167].mxu1  ;;  %12396 = vmatpush3.bf16.msra.mxu0 %v12393_v32 }
 0x245   :  { %v1686_v10 = vmax.f32 %v1638_v20, 0.0  ;;  %v1585_v55 = vmax.f32 %v15193_v34, %v1434_v6  ;;  %12398 = vmatprep.subr.bf16.mxu0 %v12397_v12 }
 0x246   :  { %1735 = vst [vmem:[#allocation2 + $0xa8] sm:$0xff] %v1687_v19  ;;  %v1641_v51 = vadd.f32 %v15318_v47, %v1586_v48 }
 0x247   :  { %1734 = vst [vmem:[#allocation2 + $0xa0] sm:$0xff] %v1686_v10  ;;  %v1640_v23 = vadd.f32 %v15318_v47, %v1585_v55  ;;  %v10588_v0 = vpop.f32.mrb[168].mxu1 }
 0x248   :  { %v1689_v37 = vmax.f32 %v1641_v51, 0.0  ;;  %v1588_v36 = vmax.f32 %v15198_v38, %v10588_v0  ;;  %v1444_v60 = vpop.f32.mrb[169].mxu1  ;;  %12400 = vmatpush3.bf16.msra.mxu0 %v12397_v12 }
 0x249   :  { %v1688_v4 = vmax.f32 %v1640_v23, 0.0  ;;  %v1587_v32 = vmax.f32 %v15203_v41, %v1444_v60  ;;  %12402 = vmatprep.subr.bf16.mxu0 %v15455_v28 }
 0x24a   :  { %1737 = vst [vmem:[#allocation2 + $0xb8] sm:$0xff] %v1689_v37  ;;  %v1643_v34 = vadd.f32 %v15318_v47, %v1588_v36 }
 0x24b   :  { %1736 = vst [vmem:[#allocation2 + $0xb0] sm:$0xff] %v1688_v4  ;;  %v15464_v13 = vadd.f32 %v15318_v47, %v1587_v32  ;;  %v10591_v30 = vpop.f32.mrb[170].mxu1 }
 0x24c   :  { %v1691_v22 = vmax.f32 %v1643_v34, 0.0  ;;  %v1590_v14 = vmax.f32 %v15208_v24, %v10591_v30  ;;  %v1454_v18 = vpop.f32.mrb[171].mxu1 }
 0x24d   :  { %v1690_v38 = vmax.f32 %v15464_v13, 0.0  ;;  %v1589_v12 = vmax.f32 %v15213_v33, %v1454_v18 }
 0x24e   :  { %1739 = vst [vmem:[#allocation2 + $0xc8] sm:$0xff] %v1691_v22  ;;  %v1645_v41 = vadd.f32 %v15318_v47, %v1590_v14 }
 0x24f   :  { %1738 = vst [vmem:[#allocation2 + $0xc0] sm:$0xff] %v1690_v38  ;;  %v1644_v16 = vadd.f32 %v15318_v47, %v1589_v12  ;;  %v10594_v20 = vpop.f32.mrb[172].mxu1 }
 0x250   :  { %v1693_v35 = vmax.f32 %v1645_v41, 0.0  ;;  %v1592_v19 = vmax.f32 %v15218_v52, %v10594_v20  ;;  %v1464_v48 = vpop.f32.mrb[173].mxu1 }
 0x251   :  { %v15474_v6 = vmax.f32 %v1644_v16, 0.0  ;;  %v1591_v24 = vmax.f32 %v15223_v54, %v1464_v48  ;;  %v18605_v16 = vld [vmem:[#allocation18_spill] sm:$0xff] }
 0x252   :  { %1741 = vst [vmem:[#allocation2 + $0xd8] sm:$0xff] %v1693_v35  ;;  %v1647_v33 = vadd.f32 %v15318_v47, %v1592_v19 }
 0x253   :  { %1740 = vst [vmem:[#allocation2 + $0xd0] sm:$0xff] %v15474_v6  ;;  %v1646_v10 = vadd.f32 %v15318_v47, %v1591_v24  ;;  %v10597_v55 = vpop.f32.mrb[174].mxu1 }
 0x254   :  { %v1695_v51 = vmax.f32 %v1647_v33, 0.0  ;;  %v1594_v23 = vmax.f32 %v15228_v3, %v10597_v55  ;;  %v1474_v0 = vpop.f32.mrb[175].mxu1 }
 0x255   :  { %v15481_v37 = vmax.f32 %v1646_v10, 0.0  ;;  %v1593_v52 = vmax.f32 %v15233_v50, %v1474_v0 }
 0x256   :  { %1743 = vst [vmem:[#allocation2 + $0xe8] sm:$0xff] %v1695_v51  ;;  %v1649_v36 = vadd.f32 %v15318_v47, %v1594_v23  ;;  %v1802_v54 = vld [vmem:[#allocation2 + $0xc1] sm:$0xff] }
 0x257   :  { %1742 = vst [vmem:[#allocation2 + $0xe0] sm:$0xff] %v15481_v37  ;;  %v1648_v60 = vadd.f32 %v15318_v47, %v1593_v52  ;;  %v10600_v4 = vpop.f32.mrb[176].mxu1  ;;  %10666 = vmatprep.mubr.f32.mxu0 %v1802_v54 }
 0x258   :  { %v1697_v32 = vmax.f32 %v1649_v36, 0.0  ;;  %v1596_v34 = vmax.f32 %v15238_v45, %v10600_v4  ;;  %v1484_v30 = vpop.f32.mrb[177].mxu1 }
 0x259   :  { %v15488_v3 = vmax.f32 %v1648_v60, 0.0  ;;  %v1595_v22 = vmax.f32 %v15243_v62, %v1484_v30 }
 0x25a   :  { %1745 = vst [vmem:[#allocation2 + $0xf8] sm:$0xff] %v1697_v32  ;;  %v1651_v50 = vadd.f32 %v15318_v47, %v1596_v34  ;;  %v15492_v14 = vld [vmem:[#allocation2 + $0xd1] sm:$0xff] }
 0x25b   :  { %1744 = vst [vmem:[#allocation2 + $0xf0] sm:$0xff] %v15488_v3  ;;  %v1650_v18 = vadd.f32 %v15318_v47, %v1595_v22  ;;  %v10603_v12 = vpop.f32.mrb[178].mxu1  ;;  %10667 = vmatmul.mubr.f32.gmra.mrb[8].mxu0 %v15492_v14 }
 0x25c   :  { %v1699_v41 = vmax.f32 %v1651_v50, 0.0  ;;  %v1598_v45 = vmax.f32 %v18605_v16, %v10603_v12  ;;  %v1494_v20 = vpop.f32.mrb[179].mxu1 }
 0x25d   :  { %v15498_v35 = vmax.f32 %v1650_v18, 0.0  ;;  %v1597_v62 = vmax.f32 %v15253_v58, %v1494_v20 }
 0x25e   :  { %1747 = vst [vmem:[#allocation2 + $0x108] sm:$0xff] %v1699_v41  ;;  %v1653_v19 = vadd.f32 %v15318_v47, %v1598_v45  ;;  %v15502_v48 = vld [vmem:[#allocation2 + $0xe1] sm:$0xff] }
 0x25f   :  { %1746 = vst [vmem:[#allocation2 + $0x100] sm:$0xff] %v15498_v35  ;;  %v1652_v24 = vadd.f32 %v15318_v47, %v1597_v62  ;;  %v10606_v33 = vpop.f32.mrb[180].mxu1  ;;  %10669 = vmatprep.mubr.f32.mxu0 %v15502_v48 }
 0x260   :  { %v1701_v10 = vmax.f32 %v1653_v19, 0.0  ;;  %v1600_v55 = vmax.f32 %v15258_v53, %v10606_v33  ;;  %v1504_v51 = vpop.f32.mrb[181].mxu1 }
 0x261   :  { %v15508_v23 = vmax.f32 %v1652_v24, 0.0  ;;  %v1599_v58 = vmax.f32 %v15263_v9, %v1504_v51 }
 0x262   :  { %1749 = vst [vmem:[#allocation2 + $0x118] sm:$0xff] %v1701_v10  ;;  %v1655_v0 = vadd.f32 %v15318_v47, %v1600_v55  ;;  %v15512_v52 = vld [vmem:[#allocation2 + $0xf1] sm:$0xff] }
 0x263   :  { %1748 = vst [vmem:[#allocation2 + $0x110] sm:$0xff] %v15508_v23  ;;  %v1654_v36 = vadd.f32 %v15318_v47, %v1599_v58  ;;  %v10609_v54 = vpop.f32.mrb[182].mxu1  ;;  %10670 = vmatmul.mubr.f32.gmra.mrb[10].mxu0 %v15512_v52 }
 0x264   :  { %v1703_v60 = vmax.f32 %v1655_v0, 0.0  ;;  %v1602_v53 = vmax.f32 %v15268_v17, %v10609_v54  ;;  %v1514_v4 = vpop.f32.mrb[183].mxu1 }
 0x265   :  { %v15518_v32 = vmax.f32 %v1654_v36, 0.0  ;;  %v1601_v9 = vmax.f32 %v15273_v11, %v1514_v4  ;;  %v8392_v4 = vld [vmem:[%s18407_s3 + $0x110] sm:$0xff] }
 0x266   :  { %1751 = vst [vmem:[#allocation2 + $0x128] sm:$0xff] %v1703_v60  ;;  %v1657_v34 = vadd.f32 %v15318_v47, %v1602_v53  ;;  %v15522_v30 = vld [vmem:[#allocation2 + $0x101] sm:$0xff] }
 0x267   :  { %1750 = vst [vmem:[#allocation2 + $0x120] sm:$0xff] %v15518_v32  ;;  %v1656_v22 = vadd.f32 %v15318_v47, %v1601_v9  ;;  %v10612_v50 = vpop.f32.mrb[184].mxu1  ;;  %10672 = vmatprep.mubr.f32.mxu0 %v15522_v30  ;;  %v8393_v9 = vld [vmem:[%s18407_s3 + $0x118] sm:$0xff] }
 0x268   :  { %v1705_v18 = vmax.f32 %v1657_v34, 0.0  ;;  %v1604_v17 = vmax.f32 %v15278_v2, %v10612_v50  ;;  %v1524_v12 = vpop.f32.mrb[185].mxu1 }
 0x269   :  { %v15528_v41 = vmax.f32 %v1656_v22, 0.0  ;;  %v1603_v11 = vmax.f32 %v15283_v5, %v1524_v12  ;;  %v12405_v12 = vpack.c.bf16 %v8393_v9, %v8392_v4  ;;  %v15664_v9 = vld [vmem:[#allocation2 + $0x52] sm:$0xff] }
 0x26a   :  { %1753 = vst [vmem:[#allocation2 + $0x138] sm:$0xff] %v1705_v18  ;;  %v1659_v16 = vadd.f32 %v15318_v47, %v1604_v17  ;;  %v15532_v45 = vld [vmem:[#allocation2 + $0x111] sm:$0xff] }
 0x26b   :  { %1752 = vst [vmem:[#allocation2 + $0x130] sm:$0xff] %v15528_v41  ;;  %v15536_v20 = vadd.f32 %v15318_v47, %v1603_v11  ;;  %v10615_v62 = vpop.f32.mrb[186].mxu1  ;;  %10673 = vmatmul.mubr.f32.gmra.mrb[12].mxu0 %v15532_v45 }
 0x26c   :  { %v1707_v19 = vmax.f32 %v1659_v16, 0.0  ;;  %v1606_v2 = vmax.f32 %v15288_v25, %v10615_v62  ;;  %v1534_v24 = vpop.f32.mrb[187].mxu1  ;;  %v8394_v16 = vld [vmem:[%s18407_s3 + $0x120] sm:$0xff]  ;;  %v8395_v62 = vld [vmem:[%s18407_s3 + $0x128] sm:$0xff] }
 0x26d   :  { %v18459_v33 = vmax.f32 %v15536_v20, 0.0  ;;  %v1605_v5 = vmax.f32 %v15293_v57, %v1534_v24  ;;  %v2117_v24 = vld [vmem:[#allocation2 + $0x2] sm:$0xff] }
 0x26e   :  { %1755 = vst [vmem:[#allocation2 + $0x148] sm:$0xff] %v1707_v19  ;;  %v1661_v10 = vadd.f32 %v15318_v47, %v1606_v2  ;;  %v15543_v55 = vld [vmem:[#allocation2 + $0x121] sm:$0xff]  ;;  %v8396_v19 = vld [vmem:[%s18407_s3 + $0x130] sm:$0xff]  ;;  %v8409_v2 = vld [vmem:[%s18407_s3 + $0x198] sm:$0xff] }
 0x26f   :  { %1754 = vst [vmem:[#allocation2 + $0x140] sm:$0xff] %v18459_v33  ;;  %v1660_v51 = vadd.f32 %v15318_v47, %v1605_v5  ;;  %v10618_v58 = vpop.f32.mrb[188].mxu1  ;;  %10675 = vmatprep.mubr.f32.mxu0 %v15543_v55  ;;  %v8457_v33 = vld [vmem:[%s18407_s3 + $0x318] sm:$0xff] }
 0x270   :  { %v1709_v0 = vmax.f32 %v1661_v10, 0.0  ;;  %v1608_v25 = vmax.f32 %v15298_v7, %v10618_v58  ;;  %v1544_v36 = vpop.f32.mrb[189].mxu1  ;;  %v15640_v10 = vld [vmem:[#allocation2 + $0x12] sm:$0xff]  ;;  %v8411_v58 = vld [vmem:[%s18407_s3 + $0x1a8] sm:$0xff] }
 0x271   :  { %v1708_v54 = vmax.f32 %v1660_v51, 0.0  ;;  %v1607_v57 = vmax.f32 %v15303_v42, %v1544_v36  ;;  %v8410_v51 = vld [vmem:[%s18407_s3 + $0x1a0] sm:$0xff]  ;;  %v15652_v36 = vld [vmem:[#allocation2 + $0x32] sm:$0xff] }
 0x272   :  { %1757 = vst [vmem:[#allocation2 + $0x158] sm:$0xff] %v1709_v0  ;;  %v1663_v60 = vadd.f32 %v15318_v47, %v1608_v25  ;;  %v15552_v53 = vld [vmem:[#allocation2 + $0x131] sm:$0xff]  ;;  %v15649_v0 = vld [vmem:[#allocation2 + $0x22] sm:$0xff]  ;;  %v12441_v25 = vpack.c.bf16 %v8411_v58, %v8410_v51 }
 0x273   :  { %1756 = vst [vmem:[#allocation2 + $0x150] sm:$0xff] %v1708_v54  ;;  %v1662_v7 = vadd.f32 %v15318_v47, %v1607_v57  ;;  %v10621_v34 = vpop.f32.mrb[190].mxu1  ;;  %10676 = vmatmul.mubr.f32.gmra.mrb[14].mxu0 %v15552_v53  ;;  %v8412_v54 = vld [vmem:[%s18407_s3 + $0x1b0] sm:$0xff]  ;;  %v8413_v57 = vld [vmem:[%s18407_s3 + $0x1b8] sm:$0xff]  ;;  %v15751_v51 = vld [vmem:[#allocation2 + $0x43] sm:$0xff] }
 0x274   :  { %v1711_v42 = vmax.f32 %v1663_v60, 0.0  ;;  %v1610_v22 = vmax.f32 %v15308_v1, %v10621_v34  ;;  %v1554_v50 = vpop.f32.mrb[191].mxu1  ;;  %10710 = vmatprep.mubr.f32.mxu0 %v1666_v15  ;;  %v12409_v15 = vpack.c.bf16 %v8395_v62, %v8394_v16  ;;  %v15661_v60 = vld [vmem:[#allocation2 + $0x42] sm:$0xff]  ;;  %v12445_v4 = vpack.c.bf16 %v8413_v57, %v8412_v54  ;;  %v15685_v16 = vld [vmem:[#allocation2 + $0xd2] sm:$0xff] }
 0x275   :  { %v1710_v18 = vmax.f32 %v1662_v7, 0.0  ;;  %v1609_v17 = vmax.f32 %v15313_v46, %v1554_v50  ;;  %v8414_v7 = vld [vmem:[%s18407_s3 + $0x1c0] sm:$0xff]  ;;  %v8415_v34 = vld [vmem:[%s18407_s3 + $0x1c8] sm:$0xff]  ;;  %v15676_v50 = vld [vmem:[#allocation2 + $0x72] sm:$0xff] }
 0x276   :  { %1759 = vst [vmem:[#allocation2 + $0x168] sm:$0xff] %v1711_v42  ;;  %v1665_v11 = vadd.f32 %v15318_v47, %v1610_v22  ;;  %v15673_v42 = vld [vmem:[#allocation2 + $0x62] sm:$0xff]  ;;  %v12449_v22 = vpack.c.bf16 %v8415_v34, %v8414_v7  ;;  %v15766_v34 = vld [vmem:[#allocation2 + $0x73] sm:$0xff] }
 0x277   :  { %1758 = vst [vmem:[#allocation2 + $0x160] sm:$0xff] %v1710_v18  ;;  %v1664_v1 = vadd.f32 %v15318_v47, %v1609_v17  ;;  %10711 = vmatmul.mubr.f32.vlgmr.msra.gmra.mrb[0].mxu0 %v1668_v61  ;;  %v8397_v47 = vld [vmem:[%s18407_s3 + $0x138] sm:$0xff]  ;;  %v8398_v61 = vld [vmem:[%s18407_s3 + $0x140] sm:$0xff]  ;;  %v8416_v18 = vld [vmem:[%s18407_s3 + $0x1d0] sm:$0xff] }
 0x278   :  { %v1713_v31 = vmax.f32 %v1665_v11, 0.0  ;;  %10713 = vmatprep.mubr.f32.mxu0 %v1670_v56  ;;  %12404 = vmatpush3.bf16.msra.mxu0 %v15455_v28  ;;  %v12413_v29 = vpack.c.bf16 %v8397_v47, %v8396_v19  ;;  %v12417_v56 = vpack.c.bf16 %v8399_v21, %v8398_v61  ;;  %v8407_v28 = vld [vmem:[%s18407_s3 + $0x188] sm:$0xff]  ;;  %v8417_v17 = vld [vmem:[%s18407_s3 + $0x1d8] sm:$0xff]  ;;  %v8418_v62 = vld [vmem:[%s18407_s3 + $0x1e0] sm:$0xff] }
 0x279   :  { %v1712_v46 = vmax.f32 %v1664_v1, 0.0  ;;  %12406 = vmatprep.subr.bf16.mxu0 %v12405_v12  ;;  %v12453_v11 = vpack.c.bf16 %v8417_v17, %v8416_v18  ;;  %v8419_v1 = vld [vmem:[%s18407_s3 + $0x1e8] sm:$0xff]  ;;  %v8420_v19 = vld [vmem:[%s18407_s3 + $0x1f0] sm:$0xff]  ;;  %v8421_v47 = vld [vmem:[%s18407_s3 + $0x1f8] sm:$0xff] }
 0x27a   :  { %1761 = vst [vmem:[#allocation2 + $0x178] sm:$0xff] %v1713_v31  ;;  %v15694_v31 = vld [vmem:[#allocation2 + $0xe2] sm:$0xff]  ;;  %v12461_v61 = vpack.c.bf16 %v8421_v47, %v8420_v19  ;;  %v15709_v21 = vld [vmem:[#allocation2 + $0x112] sm:$0xff] }
 0x27b   :  { %1760 = vst [vmem:[#allocation2 + $0x170] sm:$0xff] %v1712_v46  ;;  %10714 = vmatmul.mubr.f32.gmra.mrb[2].mxu0 %v1672_v63  ;;  %v8401_v63 = vld [vmem:[%s18407_s3 + $0x158] sm:$0xff]  ;;  %v12457_v46 = vpack.c.bf16 %v8419_v1, %v8418_v62  ;;  %v8430_v54 = vld [vmem:[%s18407_s3 + $0x240] sm:$0xff]  ;;  %v8431_v57 = vld [vmem:[%s18407_s3 + $0x248] sm:$0xff] }
 0x27c   :  { %10716 = vmatprep.mubr.f32.mxu0 %v1674_v26  ;;  %12408 = vmatpush3.bf16.msra.mxu0 %v12405_v12  ;;  %v12421_v59 = vpack.c.bf16 %v8401_v63, %v8400_v43  ;;  %v8402_v26 = vld [vmem:[%s18407_s3 + $0x160] sm:$0xff]  ;;  %v8423_v43 = vld [vmem:[%s18407_s3 + $0x208] sm:$0xff]  ;;  %v12481_v7 = vpack.c.bf16 %v8431_v57, %v8430_v54  ;;  %v8433_v18 = vld [vmem:[%s18407_s3 + $0x258] sm:$0xff] }
 0x27d   :  { %12410 = vmatprep.subr.bf16.mxu0 %v12409_v15  ;;  %v2125_v12 = vld [vmem:[#allocation2 + $0xc2] sm:$0xff]  ;;  %v15787_v47 = vld [vmem:[#allocation2 + $0xf3] sm:$0xff] }
 0x27e   :  { %v15718_v63 = vld [vmem:[#allocation2 + $0x122] sm:$0xff]  ;;  %v15820_v54 = vld [vmem:[#allocation2 + $0x14] sm:$0xff] }
 0x27f   :  { %10717 = vmatmul.mubr.f32.gmra.mrb[4].mxu0 %v1676_v49  ;;  %v12425_v49 = vpack.c.bf16 %v8403_v27, %v8402_v26  ;;  %v15721_v26 = vld [vmem:[#allocation2 + $0x132] sm:$0xff]  ;;  %v2319_v17 = vld [vmem:[#allocation2 + $0xc3] sm:$0xff] }
 0x280   :  { %10719 = vmatprep.mubr.f32.mxu0 %v1678_v44  ;;  %12412 = vmatpush3.bf16.msra.mxu0 %v12409_v15  ;;  %v8405_v44 = vld [vmem:[%s18407_s3 + $0x178] sm:$0xff]  ;;  %v8424_v27 = vld [vmem:[%s18407_s3 + $0x210] sm:$0xff]  ;;  %v8434_v62 = vld [vmem:[%s18407_s3 + $0x260] sm:$0xff] }
 0x281   :  { %12414 = vmatprep.subr.bf16.mxu0 %v12413_v29  ;;  %v12429_v40 = vpack.c.bf16 %v8405_v44, %v8404_v39  ;;  %v15697_v15 = vld [vmem:[#allocation2 + $0xf2] sm:$0xff]  ;;  %v2311_v39 = vld [vmem:[#allocation2 + $0x3] sm:$0xff] }
 0x282   :  { %v8435_v1 = vld [vmem:[%s18407_s3 + $0x268] sm:$0xff]  ;;  %v8442_v57 = vld [vmem:[%s18407_s3 + $0x2a0] sm:$0xff] }
 0x283   :  { %10720 = vmatmul.mubr.f32.gmra.mrb[6].mxu0 %v1680_v8  ;;  %v8406_v8 = vld [vmem:[%s18407_s3 + $0x180] sm:$0xff]  ;;  %v12489_v19 = vpack.c.bf16 %v8435_v1, %v8434_v62  ;;  %v8445_v62 = vld [vmem:[%s18407_s3 + $0x2b8] sm:$0xff] }
 0x284   :  { %10722 = vmatprep.mubr.f32.mxu0 %v1690_v38  ;;  %12416 = vmatpush3.bf16.msra.mxu0 %v12413_v29  ;;  %v12433_v13 = vpack.c.bf16 %v8407_v28, %v8406_v8  ;;  %v8408_v38 = vld [vmem:[%s18407_s3 + $0x190] sm:$0xff]  ;;  %v15706_v29 = vld [vmem:[#allocation2 + $0x102] sm:$0xff] }
 0x285   :  { %12418 = vmatprep.subr.bf16.mxu0 %v12417_v56  ;;  %v12437_v5 = vpack.c.bf16 %v8409_v2, %v8408_v38  ;;  %v8426_v8 = vld [vmem:[%s18407_s3 + $0x220] sm:$0xff]  ;;  %v8427_v28 = vld [vmem:[%s18407_s3 + $0x228] sm:$0xff]  ;;  %v15742_v2 = vld [vmem:[#allocation2 + $0x33] sm:$0xff] }
 0x286   :  { %v12473_v38 = vpack.c.bf16 %v8427_v28, %v8426_v8  ;;  %v15811_v28 = vld [vmem:[#allocation2 + $0x133] sm:$0xff]  ;;  %v15841_v1 = vld [vmem:[#allocation2 + $0x44] sm:$0xff] }
 0x287   :  { %10723 = vmatmul.mubr.f32.gmra.mrb[8].mxu0 %v15474_v6 }
 0x288   :  { %10725 = vmatprep.mubr.f32.mxu0 %v15481_v37  ;;  %12420 = vmatpush3.bf16.msra.mxu0 %v12417_v56  ;;  %v8422_v56 = vld [vmem:[%s18407_s3 + $0x200] sm:$0xff] }
 0x289   :  { %12422 = vmatprep.subr.bf16.mxu0 %v12421_v59 }
 0x28b   :  { %10726 = vmatmul.mubr.f32.gmra.mrb[10].mxu0 %v15488_v3 }
 0x28c   :  { %10728 = vmatprep.mubr.f32.mxu0 %v15498_v35  ;;  %12424 = vmatpush3.bf16.msra.mxu0 %v12421_v59  ;;  %v12465_v59 = vpack.c.bf16 %v8423_v43, %v8422_v56  ;;  %v8437_v56 = vld [vmem:[%s18407_s3 + $0x278] sm:$0xff]  ;;  %v15796_v43 = vld [vmem:[#allocation2 + $0x103] sm:$0xff] }
 0x28d   :  { %12426 = vmatprep.subr.bf16.mxu0 %v12425_v49 }
 0x28f   :  { %10729 = vmatmul.mubr.f32.gmra.mrb[12].mxu0 %v15508_v23 }
 0x290   :  { %10731 = vmatprep.mubr.f32.mxu0 %v15518_v32  ;;  %12428 = vmatpush3.bf16.msra.mxu0 %v12425_v49  ;;  %v8425_v49 = vld [vmem:[%s18407_s3 + $0x218] sm:$0xff] }
 0x291   :  { %12430 = vmatprep.subr.bf16.mxu0 %v12429_v40  ;;  %v12469_v44 = vpack.c.bf16 %v8425_v49, %v8424_v27  ;;  %v15799_v27 = vld [vmem:[#allocation2 + $0x113] sm:$0xff]  ;;  %v8438_v49 = vld [vmem:[%s18407_s3 + $0x280] sm:$0xff] }
 0x293   :  { %10732 = vmatmul.mubr.f32.gmra.mrb[14].mxu0 %v15528_v41 }
 0x294   :  { %12432 = vmatpush3.bf16.msra.mxu0 %v12429_v40  ;;  %10766 = vmatprep.mubr.f32.mxu0 %v2117_v24  ;;  %v15730_v40 = vld [vmem:[#allocation2 + $0x13] sm:$0xff] }
 0x295   :  { %12434 = vmatprep.subr.bf16.mxu0 %v12433_v13  ;;  %v8428_v24 = vld [vmem:[%s18407_s3 + $0x230] sm:$0xff] }
 0x297   :  { %10767 = vmatmul.mubr.f32.vlgmr.msra.gmra.mrb[0].mxu0 %v15640_v10 }
 0x298   :  { %10769 = vmatprep.mubr.f32.mxu0 %v15649_v0  ;;  %12436 = vmatpush3.bf16.msra.mxu0 %v12433_v13  ;;  %v15739_v13 = vld [vmem:[#allocation2 + $0x23] sm:$0xff] }
 0x299   :  { %12438 = vmatprep.subr.bf16.mxu0 %v12437_v5 }
 0x29b   :  { %10770 = vmatmul.mubr.f32.gmra.mrb[2].mxu0 %v15652_v36 }
 0x29c   :  { %10772 = vmatprep.mubr.f32.mxu0 %v15661_v60  ;;  %12440 = vmatpush3.bf16.msra.mxu0 %v12437_v5  ;;  %v8429_v5 = vld [vmem:[%s18407_s3 + $0x238] sm:$0xff] }
 0x29d   :  { %12442 = vmatprep.subr.bf16.mxu0 %v12441_v25  ;;  %v12477_v58 = vpack.c.bf16 %v8429_v5, %v8428_v24  ;;  %v8441_v24 = vld [vmem:[%s18407_s3 + $0x298] sm:$0xff]  ;;  %v2505_v5 = vld [vmem:[#allocation2 + $0x4] sm:$0xff] }
 0x29f   :  { %10773 = vmatmul.mubr.f32.gmra.mrb[4].mxu0 %v15664_v9 }
 0x2a0   :  { %10775 = vmatprep.mubr.f32.mxu0 %v15673_v42  ;;  %12444 = vmatpush3.bf16.msra.mxu0 %v12441_v25  ;;  %v15754_v25 = vld [vmem:[#allocation2 + $0x53] sm:$0xff] }
 0x2a1   :  { %12446 = vmatprep.subr.bf16.mxu0 %v12445_v4 }
 0x2a3   :  { %10776 = vmatmul.mubr.f32.gmra.mrb[6].mxu0 %v15676_v50 }
 0x2a4   :  { %10778 = vmatprep.mubr.f32.mxu0 %v2125_v12  ;;  %12448 = vmatpush3.bf16.msra.mxu0 %v12445_v4  ;;  %v15763_v4 = vld [vmem:[#allocation2 + $0x63] sm:$0xff] }
 0x2a5   :  { %12450 = vmatprep.subr.bf16.mxu0 %v12449_v22 }
 0x2a7   :  { %10779 = vmatmul.mubr.f32.gmra.mrb[8].mxu0 %v15685_v16 }
 0x2a8   :  { %10781 = vmatprep.mubr.f32.mxu0 %v15694_v31  ;;  %12452 = vmatpush3.bf16.msra.mxu0 %v12449_v22  ;;  %v8432_v22 = vld [vmem:[%s18407_s3 + $0x250] sm:$0xff] }
 0x2a9   :  { %12454 = vmatprep.subr.bf16.mxu0 %v12453_v11  ;;  %v12485_v12 = vpack.c.bf16 %v8433_v18, %v8432_v22  ;;  %v15829_v22 = vld [vmem:[#allocation2 + $0x24] sm:$0xff] }
 0x2ab   :  { %10782 = vmatmul.mubr.f32.gmra.mrb[10].mxu0 %v15697_v15 }
 0x2ac   :  { %10784 = vmatprep.mubr.f32.mxu0 %v15706_v29  ;;  %12456 = vmatpush3.bf16.msra.mxu0 %v12453_v11  ;;  %v15775_v11 = vld [vmem:[#allocation2 + $0xd3] sm:$0xff] }
 0x2ad   :  { %12458 = vmatprep.subr.bf16.mxu0 %v12457_v46 }
 0x2af   :  { %10785 = vmatmul.mubr.f32.gmra.mrb[12].mxu0 %v15709_v21 }
 0x2b0   :  { %10787 = vmatprep.mubr.f32.mxu0 %v15718_v63  ;;  %12460 = vmatpush3.bf16.msra.mxu0 %v12457_v46  ;;  %v15784_v46 = vld [vmem:[#allocation2 + $0xe3] sm:$0xff] }
 0x2b1   :  { %12462 = vmatprep.subr.bf16.mxu0 %v12461_v61 }
 0x2b3   :  { %10788 = vmatmul.mubr.f32.gmra.mrb[14].mxu0 %v15721_v26 }
 0x2b4   :  { %12464 = vmatpush3.bf16.msra.mxu0 %v12461_v61  ;;  %10822 = vmatprep.mubr.f32.mxu0 %v2311_v39  ;;  %v8436_v61 = vld [vmem:[%s18407_s3 + $0x270] sm:$0xff]  ;;  %v8439_v39 = vld [vmem:[%s18407_s3 + $0x288] sm:$0xff] }
 0x2b5   :  { %12466 = vmatprep.subr.bf16.mxu0 %v12465_v59  ;;  %v12497_v8 = vpack.c.bf16 %v8439_v39, %v8438_v49  ;;  %v15853_v49 = vld [vmem:[#allocation2 + $0x64] sm:$0xff] }
 0x2b7   :  { %10823 = vmatmul.mubr.f32.vlgmr.msra.gmra.mrb[0].mxu0 %v15730_v40 }
 0x2b8   :  { %10825 = vmatprep.mubr.f32.mxu0 %v15739_v13  ;;  %12468 = vmatpush3.bf16.msra.mxu0 %v12465_v59  ;;  %v12493_v59 = vpack.c.bf16 %v8437_v56, %v8436_v61  ;;  %v15844_v61 = vld [vmem:[#allocation2 + $0x54] sm:$0xff]  ;;  %v8446_v56 = vld [vmem:[%s18407_s3 + $0x2c0] sm:$0xff] }
 0x2b9   :  { %12470 = vmatprep.subr.bf16.mxu0 %v12469_v44 }
 0x2bb   :  { %10826 = vmatmul.mubr.f32.gmra.mrb[2].mxu0 %v15742_v2 }
 0x2bc   :  { %10828 = vmatprep.mubr.f32.mxu0 %v15751_v51  ;;  %12472 = vmatpush3.bf16.msra.mxu0 %v12469_v44  ;;  %v15808_v44 = vld [vmem:[#allocation2 + $0x123] sm:$0xff] }
 0x2bd   :  { %12474 = vmatprep.subr.bf16.mxu0 %v12473_v38 }
 0x2bf   :  { %10829 = vmatmul.mubr.f32.gmra.mrb[4].mxu0 %v15754_v25 }
 0x2c0   :  { %10831 = vmatprep.mubr.f32.mxu0 %v15763_v4  ;;  %12476 = vmatpush3.bf16.msra.mxu0 %v12473_v38  ;;  %v8440_v38 = vld [vmem:[%s18407_s3 + $0x290] sm:$0xff] }
 0x2c1   :  { %12478 = vmatprep.subr.bf16.mxu0 %v12477_v58 }
 0x2c3   :  { %10832 = vmatmul.mubr.f32.gmra.mrb[6].mxu0 %v15766_v34 }
 0x2c4   :  { %10834 = vmatprep.mubr.f32.mxu0 %v2319_v17  ;;  %12480 = vmatpush3.bf16.msra.mxu0 %v12477_v58  ;;  %v12501_v58 = vpack.c.bf16 %v8441_v24, %v8440_v38  ;;  %v15832_v17 = vld [vmem:[#allocation2 + $0x34] sm:$0xff] }
 0x2c5   :  { %12482 = vmatprep.subr.bf16.mxu0 %v12481_v7  ;;  %v8448_v38 = vld [vmem:[%s18407_s3 + $0x2d0] sm:$0xff]  ;;  %v8449_v24 = vld [vmem:[%s18407_s3 + $0x2d8] sm:$0xff] }
 0x2c7   :  { %10835 = vmatmul.mubr.f32.gmra.mrb[8].mxu0 %v15775_v11 }
 0x2c8   :  { %10837 = vmatprep.mubr.f32.mxu0 %v15784_v46  ;;  %12484 = vmatpush3.bf16.msra.mxu0 %v12481_v7  ;;  %v8443_v7 = vld [vmem:[%s18407_s3 + $0x2a8] sm:$0xff] }
 0x2c9   :  { %12486 = vmatprep.subr.bf16.mxu0 %v12485_v12  ;;  %v12505_v18 = vpack.c.bf16 %v8443_v7, %v8442_v57  ;;  %v15865_v57 = vld [vmem:[#allocation2 + $0xd4] sm:$0xff]  ;;  %v8450_v7 = vld [vmem:[%s18407_s3 + $0x2e0] sm:$0xff] }
 0x2cb   :  { %10838 = vmatmul.mubr.f32.gmra.mrb[10].mxu0 %v15787_v47 }
 0x2cc   :  { %10840 = vmatprep.mubr.f32.mxu0 %v15796_v43  ;;  %12488 = vmatpush3.bf16.msra.mxu0 %v12485_v12  ;;  %v8444_v12 = vld [vmem:[%s18407_s3 + $0x2b0] sm:$0xff] }
 0x2cd   :  { %12490 = vmatprep.subr.bf16.mxu0 %v12489_v19 }
 0x2cf   :  { %10841 = vmatmul.mubr.f32.gmra.mrb[12].mxu0 %v15799_v27 }
 0x2d0   :  { %10843 = vmatprep.mubr.f32.mxu0 %v15808_v44  ;;  %12492 = vmatpush3.bf16.msra.mxu0 %v12489_v19  ;;  %v12509_v19 = vpack.c.bf16 %v8445_v62, %v8444_v12  ;;  %v15874_v12 = vld [vmem:[#allocation2 + $0xe4] sm:$0xff] }
 0x2d1   :  { %12494 = vmatprep.subr.bf16.mxu0 %v12493_v59 }
 0x2d3   :  { %10844 = vmatmul.mubr.f32.gmra.mrb[14].mxu0 %v15811_v28 }
 0x2d4   :  { %12496 = vmatpush3.bf16.msra.mxu0 %v12493_v59  ;;  %10878 = vmatprep.mubr.f32.mxu0 %v2505_v5  ;;  %v8447_v59 = vld [vmem:[%s18407_s3 + $0x2c8] sm:$0xff] }
 0x2d5   :  { %12498 = vmatprep.subr.bf16.mxu0 %v12497_v8  ;;  %v12513_v39 = vpack.c.bf16 %v8447_v59, %v8446_v56  ;;  %v2513_v5 = vld [vmem:[#allocation2 + $0xc4] sm:$0xff]  ;;  %v8452_v56 = vld [vmem:[%s18407_s3 + $0x2f0] sm:$0xff]  ;;  %v8453_v59 = vld [vmem:[%s18407_s3 + $0x2f8] sm:$0xff] }
 0x2d7   :  { %10879 = vmatmul.mubr.f32.vlgmr.msra.gmra.mrb[0].mxu0 %v15820_v54 }
 0x2d8   :  { %10881 = vmatprep.mubr.f32.mxu0 %v15829_v22  ;;  %12500 = vmatpush3.bf16.msra.mxu0 %v12497_v8  ;;  %v15856_v8 = vld [vmem:[#allocation2 + $0x74] sm:$0xff] }
 0x2d9   :  { %12502 = vmatprep.subr.bf16.mxu0 %v12501_v58 }
 0x2db   :  { %10882 = vmatmul.mubr.f32.gmra.mrb[2].mxu0 %v15832_v17 }
 0x2dc   :  { %10884 = vmatprep.mubr.f32.mxu0 %v15841_v1  ;;  %12504 = vmatpush3.bf16.msra.mxu0 %v12501_v58  ;;  %v12517_v58 = vpack.c.bf16 %v8449_v24, %v8448_v38  ;;  %v15886_v38 = vld [vmem:[#allocation2 + $0x104] sm:$0xff]  ;;  %v15889_v24 = vld [vmem:[#allocation2 + $0x114] sm:$0xff] }
 0x2dd   :  { %12506 = vmatprep.subr.bf16.mxu0 %v12505_v18  ;;  %18606 = vst [vmem:[#allocation19_spill] sm:$0xff] %v15886_v38  ;;  %18607 = vst [vmem:[#allocation20_spill] sm:$0xff] %v15889_v24 }
 0x2df   :  { %10885 = vmatmul.mubr.f32.gmra.mrb[4].mxu0 %v15844_v61 }
 0x2e0   :  { %10887 = vmatprep.mubr.f32.mxu0 %v15853_v49  ;;  %12508 = vmatpush3.bf16.msra.mxu0 %v12505_v18  ;;  %v8451_v18 = vld [vmem:[%s18407_s3 + $0x2e8] sm:$0xff] }
 0x2e1   :  { %12510 = vmatprep.subr.bf16.mxu0 %v12509_v19  ;;  %v12521_v62 = vpack.c.bf16 %v8451_v18, %v8450_v7  ;;  %v8455_v7 = vld [vmem:[%s18407_s3 + $0x308] sm:$0xff] }
 0x2e2   :  { %v15898_v18 = vld [vmem:[#allocation2 + $0x124] sm:$0xff] }
 0x2e3   :  { %10888 = vmatmul.mubr.f32.gmra.mrb[6].mxu0 %v15856_v8  ;;  %18608 = vst [vmem:[#allocation21_spill] sm:$0xff] %v15898_v18 }
 0x2e4   :  { %10890 = vmatprep.mubr.f32.mxu0 %v2513_v5  ;;  %12512 = vmatpush3.bf16.msra.mxu0 %v12509_v19  ;;  %v15877_v19 = vld [vmem:[#allocation2 + $0xf4] sm:$0xff]  ;;  %v8454_v5 = vld [vmem:[%s18407_s3 + $0x300] sm:$0xff] }
 0x2e5   :  { %12514 = vmatprep.subr.bf16.mxu0 %v12513_v39 }
 0x2e7   :  { %10891 = vmatmul.mubr.f32.gmra.mrb[8].mxu0 %v15865_v57 }
 0x2e8   :  { %10893 = vmatprep.mubr.f32.mxu0 %v15874_v12  ;;  %12516 = vmatpush3.bf16.msra.mxu0 %v12513_v39  ;;  %v12525_v39 = vpack.c.bf16 %v8453_v59, %v8452_v56  ;;  %v15901_v56 = vld [vmem:[#allocation2 + $0x134] sm:$0xff] }
 0x2e9   :  { %12518 = vmatprep.subr.bf16.mxu0 %v12517_v58  ;;  %v8456_v59 = vld [vmem:[%s18407_s3 + $0x310] sm:$0xff] }
 0x2eb   :  { %10894 = vmatmul.mubr.f32.gmra.mrb[10].mxu0 %v15877_v19 }
 0x2ec   :  { %10896 = vmatprep.mubr.f32.mxu0 %v15886_v38  ;;  %12520 = vmatpush3.bf16.msra.mxu0 %v12517_v58  ;;  %v12529_v58 = vpack.c.bf16 %v8455_v7, %v8454_v5  ;;  %v8458_v5 = vld [vmem:[%s18407_s3 + $0x320] sm:$0xff]  ;;  %v8459_v7 = vld [vmem:[%s18407_s3 + $0x328] sm:$0xff]  ;;  %v15919_v38 = vld [vmem:[#allocation2 + $0x30] sm:$0xff] }
 0x2ed   :  { %12522 = vmatprep.subr.bf16.mxu0 %v12521_v62  ;;  %18610 = vst [vmem:[#allocation23_spill] sm:$0xff] %v15919_v38 }
 0x2ef   :  { %10897 = vmatmul.mubr.f32.gmra.mrb[12].mxu0 %v15889_v24  ;;  %v2700_v24 = vld [vmem:[#allocation2 + $0x10] sm:$0xff] }
 0x2f0   :  { %10899 = vmatprep.mubr.f32.mxu0 %v15898_v18  ;;  %12524 = vmatpush3.bf16.msra.mxu0 %v12521_v62  ;;  %v12533_v18 = vpack.c.bf16 %v8457_v33, %v8456_v59  ;;  %v15910_v62 = vld [vmem:[#allocation2 + $0x20] sm:$0xff]  ;;  %v8461_v59 = vld [vmem:[%s18407_s3 + $0x338] sm:$0xff] }
 0x2f1   :  { %12526 = vmatprep.subr.bf16.mxu0 %v12525_v39  ;;  %18609 = vst [vmem:[#allocation22_spill] sm:$0xff] %v15910_v62  ;;  %v15922_v33 = vld [vmem:[#allocation2 + $0x40] sm:$0xff] }
 0x2f2   :  { %18611 = vst [vmem:[#allocation24_spill] sm:$0xff] %v15922_v33 }
 0x2f3   :  { %10900 = vmatmul.mubr.f32.gmra.mrb[14].mxu0 %v15901_v56 }
 0x2f4   :  { %12528 = vmatpush3.bf16.msra.mxu0 %v12525_v39  ;;  %10934 = vmatprep.mubr.f32.mxu0 %v2700_v24  ;;  %v12537_v39 = vpack.c.bf16 %v8459_v7, %v8458_v5  ;;  %v8460_v24 = vld [vmem:[%s18407_s3 + $0x330] sm:$0xff]  ;;  %v15934_v5 = vld [vmem:[#allocation2 + $0x60] sm:$0xff] }
 0x2f5   :  { %12530 = vmatprep.subr.bf16.mxu0 %v12529_v58  ;;  %v8462_v7 = vld [vmem:[%s18407_s3 + $0x340] sm:$0xff] }
 0x2f7   :  { %10935 = vmatmul.mubr.f32.vlgmr.msra.gmra.mrb[0].mxu0 %v15910_v62  ;;  %v15931_v62 = vld [vmem:[#allocation2 + $0x50] sm:$0xff] }
 0x2f8   :  { %10937 = vmatprep.mubr.f32.mxu0 %v15919_v38  ;;  %12532 = vmatpush3.bf16.msra.mxu0 %v12529_v58  ;;  %18612 = vst [vmem:[#allocation25_spill] sm:$0xff] %v15931_v62  ;;  %v12541_v58 = vpack.c.bf16 %v8461_v59, %v8460_v24  ;;  %v8463_v38 = vld [vmem:[%s18407_s3 + $0x348] sm:$0xff]  ;;  %v15946_v24 = vld [vmem:[#allocation2 + $0x80] sm:$0xff]  ;;  %v8464_v59 = vld [vmem:[%s18407_s3 + $0x350] sm:$0xff] }
 0x2f9   :  { %12534 = vmatprep.subr.bf16.mxu0 %v12533_v18 }
 0x2fb   :  { %10938 = vmatmul.mubr.f32.gmra.mrb[2].mxu0 %v15922_v33  ;;  %v15943_v33 = vld [vmem:[#allocation2 + $0x70] sm:$0xff] }
 0x2fc   :  { %10940 = vmatprep.mubr.f32.mxu0 %v15931_v62  ;;  %12536 = vmatpush3.bf16.msra.mxu0 %v12533_v18  ;;  %18613 = vst [vmem:[#allocation26_spill] sm:$0xff] %v15943_v33  ;;  %v12545_v18 = vpack.c.bf16 %v8463_v38, %v8462_v7  ;;  %v8465_v62 = vld [vmem:[%s18407_s3 + $0x358] sm:$0xff]  ;;  %v8466_v38 = vld [vmem:[%s18407_s3 + $0x360] sm:$0xff] }
 0x2fd   :  { %12538 = vmatprep.subr.bf16.mxu0 %v12537_v39 }
 0x2ff   :  { %10941 = vmatmul.mubr.f32.gmra.mrb[4].mxu0 %v15934_v5 }
 0x300   :  { %10943 = vmatprep.mubr.f32.mxu0 %v15943_v33  ;;  %12540 = vmatpush3.bf16.msra.mxu0 %v12537_v39  ;;  %v12549_v33 = vpack.c.bf16 %v8465_v62, %v8464_v59  ;;  %v8467_v39 = vld [vmem:[%s18407_s3 + $0x368] sm:$0xff]  ;;  %v8469_v62 = vld [vmem:[%s18407_s3 + $0x378] sm:$0xff] }
 0x301   :  { %12542 = vmatprep.subr.bf16.mxu0 %v12541_v58  ;;  %v12553_v7 = vpack.c.bf16 %v8467_v39, %v8466_v38  ;;  %v2894_v59 = vld [vmem:[#allocation2 + $0x11] sm:$0xff]  ;;  %v8474_v38 = vld [vmem:[%s18407_s3 + $0x3a0] sm:$0xff]  ;;  %v8475_v39 = vld [vmem:[%s18407_s3 + $0x3a8] sm:$0xff] }
 0x303   :  { %10944 = vmatmul.mubr.f32.gmra.mrb[6].mxu0 %v15946_v24 }
 0x304   :  { %10946 = vmatprep.mubr.f32.mxu0 %v15474_v6  ;;  %12544 = vmatpush3.bf16.msra.mxu0 %v12541_v58  ;;  %v8468_v6 = vld [vmem:[%s18407_s3 + $0x370] sm:$0xff]  ;;  %v8471_v58 = vld [vmem:[%s18407_s3 + $0x388] sm:$0xff] }
 0x305   :  { %12546 = vmatprep.subr.bf16.mxu0 %v12545_v18 }
 0x307   :  { %10947 = vmatmul.mubr.f32.gmra.mrb[8].mxu0 %v15481_v37  ;;  %v12557_v37 = vpack.c.bf16 %v8469_v62, %v8468_v6  ;;  %v16000_v6 = vld [vmem:[#allocation2 + $0x41] sm:$0xff]  ;;  %v8476_v62 = vld [vmem:[%s18407_s3 + $0x3b0] sm:$0xff] }
 0x308   :  { %10949 = vmatprep.mubr.f32.mxu0 %v15488_v3  ;;  %12548 = vmatpush3.bf16.msra.mxu0 %v12545_v18  ;;  %v8470_v3 = vld [vmem:[%s18407_s3 + $0x380] sm:$0xff]  ;;  %v18614_v18 = vmax.f32 %v15536_v20, 0.0  ;;  %v12569_v20 = vpack.c.bf16 %v8475_v39, %v8474_v38  ;;  %v8480_v38 = vld [vmem:[%s18407_s3 + $0x3d0] sm:$0xff]  ;;  %v8481_v39 = vld [vmem:[%s18407_s3 + $0x3d8] sm:$0xff] }
 0x309   :  { %12550 = vmatprep.subr.bf16.mxu0 %v12549_v33 }
 0x30b   :  { %10950 = vmatmul.mubr.f32.gmra.mrb[10].mxu0 %v15498_v35  ;;  %v12561_v35 = vpack.c.bf16 %v8471_v58, %v8470_v3  ;;  %v16009_v3 = vld [vmem:[#allocation2 + $0x51] sm:$0xff] }
 0x30c   :  { %10952 = vmatprep.mubr.f32.mxu0 %v15508_v23  ;;  %12552 = vmatpush3.bf16.msra.mxu0 %v12549_v33  ;;  %v8472_v23 = vld [vmem:[%s18407_s3 + $0x390] sm:$0xff]  ;;  %v8473_v33 = vld [vmem:[%s18407_s3 + $0x398] sm:$0xff] }
 0x30d   :  { %12554 = vmatprep.subr.bf16.mxu0 %v12553_v7 }
 0x30f   :  { %10953 = vmatmul.mubr.f32.gmra.mrb[12].mxu0 %v15518_v32  ;;  %v12565_v32 = vpack.c.bf16 %v8473_v33, %v8472_v23  ;;  %v8478_v23 = vld [vmem:[%s18407_s3 + $0x3c0] sm:$0xff]  ;;  %v8479_v33 = vld [vmem:[%s18407_s3 + $0x3c8] sm:$0xff] }
 0x310   :  { %10955 = vmatprep.mubr.f32.mxu0 %v15528_v41  ;;  %12556 = vmatpush3.bf16.msra.mxu0 %v12553_v7  ;;  %v15988_v41 = vld [vmem:[#allocation2 + $0x21] sm:$0xff]  ;;  %v15997_v7 = vld [vmem:[#allocation2 + $0x31] sm:$0xff] }
 0x311   :  { %12558 = vmatprep.subr.bf16.mxu0 %v12557_v37 }
 0x313   :  { %10956 = vmatmul.mubr.f32.gmra.mrb[14].mxu0 %v18614_v18  ;;  %v16021_v18 = vld [vmem:[#allocation2 + $0x71] sm:$0xff] }
 0x314   :  { %12560 = vmatpush3.bf16.msra.mxu0 %v12557_v37  ;;  %10990 = vmatprep.mubr.f32.mxu0 %v2894_v59  ;;  %v8477_v37 = vld [vmem:[%s18407_s3 + $0x3b8] sm:$0xff]  ;;  %v12577_v59 = vpack.c.bf16 %v8479_v33, %v8478_v23  ;;  %v8487_v33 = vld [vmem:[%s18407_s3 + $0x408] sm:$0xff] }
 0x315   :  { %12562 = vmatprep.subr.bf16.mxu0 %v12561_v35  ;;  %v12573_v58 = vpack.c.bf16 %v8477_v37, %v8476_v62  ;;  %v12581_v62 = vpack.c.bf16 %v8481_v39, %v8480_v38  ;;  %v8483_v37 = vld [vmem:[%s18407_s3 + $0x3e8] sm:$0xff]  ;;  %v8489_v38 = vld [vmem:[%s18407_s3 + $0x418] sm:$0xff] }
 0x316   :  { %v8491_v39 = vld [vmem:[%s18407_s3 + $0x428] sm:$0xff] }
 0x317   :  { %10991 = vmatmul.mubr.f32.vlgmr.msra.gmra.mrb[0].mxu0 %v15988_v41 }
 0x318   :  { %10993 = vmatprep.mubr.f32.mxu0 %v15997_v7  ;;  %12564 = vmatpush3.bf16.msra.mxu0 %v12561_v35  ;;  %v16012_v35 = vld [vmem:[#allocation2 + $0x61] sm:$0xff] }
 0x319   :  { %12566 = vmatprep.subr.bf16.mxu0 %v12565_v32 }
 0x31b   :  { %10994 = vmatmul.mubr.f32.gmra.mrb[2].mxu0 %v16000_v6 }
 0x31c   :  { %10996 = vmatprep.mubr.f32.mxu0 %v16009_v3  ;;  %12568 = vmatpush3.bf16.msra.mxu0 %v12565_v32  ;;  %v16024_v32 = vld [vmem:[#allocation2 + $0x81] sm:$0xff] }
 0x31d   :  { %12570 = vmatprep.subr.bf16.mxu0 %v12569_v20 }
 0x31f   :  { %10997 = vmatmul.mubr.f32.gmra.mrb[4].mxu0 %v16012_v35 }
 0x320   :  { %10999 = vmatprep.mubr.f32.mxu0 %v16021_v18  ;;  %12572 = vmatpush3.bf16.msra.mxu0 %v12569_v20  ;;  %v8482_v20 = vld [vmem:[%s18407_s3 + $0x3e0] sm:$0xff] }
 0x321   :  { %12574 = vmatprep.subr.bf16.mxu0 %v12573_v58  ;;  %v12585_v23 = vpack.c.bf16 %v8483_v37, %v8482_v20  ;;  %v8493_v20 = vld [vmem:[%s18407_s3 + $0x438] sm:$0xff]  ;;  %v8495_v37 = vld [vmem:[%s18407_s3 + $0x448] sm:$0xff] }
 0x323   :  { %11000 = vmatmul.mubr.f32.gmra.mrb[6].mxu0 %v16024_v32 }
 0x324   :  { %11002 = vmatprep.mubr.f32.mxu0 %v15492_v14  ;;  %12576 = vmatpush3.bf16.msra.mxu0 %v12573_v58  ;;  %v8484_v14 = vld [vmem:[%s18407_s3 + $0x3f0] sm:$0xff]  ;;  %v8485_v58 = vld [vmem:[%s18407_s3 + $0x3f8] sm:$0xff] }
 0x325   :  { %12578 = vmatprep.subr.bf16.mxu0 %v12577_v59 }
 0x327   :  { %11003 = vmatmul.mubr.f32.gmra.mrb[8].mxu0 %v15502_v48  ;;  %v12589_v48 = vpack.c.bf16 %v8485_v58, %v8484_v14  ;;  %v8497_v14 = vld [vmem:[%s18407_s3 + $0x458] sm:$0xff]  ;;  %v8499_v58 = vld [vmem:[%s18407_s3 + $0x468] sm:$0xff] }
 0x328   :  { %11005 = vmatprep.mubr.f32.mxu0 %v15512_v52  ;;  %12580 = vmatpush3.bf16.msra.mxu0 %v12577_v59  ;;  %v8486_v52 = vld [vmem:[%s18407_s3 + $0x400] sm:$0xff] }
 0x329   :  { %12582 = vmatprep.subr.bf16.mxu0 %v12581_v62  ;;  %v16058_v59 = vld [vmem:[#allocation2 + $0x141] sm:$0xff] }
 0x32b   :  { %11006 = vmatmul.mubr.f32.gmra.mrb[10].mxu0 %v15522_v30  ;;  %v12593_v30 = vpack.c.bf16 %v8487_v33, %v8486_v52  ;;  %v8501_v52 = vld [vmem:[%s18407_s3 + $0x478] sm:$0xff]  ;;  %v8503_v33 = vld [vmem:[%s18407_s3 + $0x488] sm:$0xff] }
 0x32c   :  { %11008 = vmatprep.mubr.f32.mxu0 %v15532_v45  ;;  %12584 = vmatpush3.bf16.msra.mxu0 %v12581_v62  ;;  %v8488_v45 = vld [vmem:[%s18407_s3 + $0x410] sm:$0xff] }
 0x32d   :  { %12586 = vmatprep.subr.bf16.mxu0 %v12585_v23 }
 0x32f   :  { %11009 = vmatmul.mubr.f32.gmra.mrb[12].mxu0 %v15543_v55  ;;  %v12597_v55 = vpack.c.bf16 %v8489_v38, %v8488_v45  ;;  %v8505_v45 = vld [vmem:[%s18407_s3 + $0x498] sm:$0xff]  ;;  %v8507_v38 = vld [vmem:[%s18407_s3 + $0x4a8] sm:$0xff] }
 0x330   :  { %11011 = vmatprep.mubr.f32.mxu0 %v15552_v53  ;;  %12588 = vmatpush3.bf16.msra.mxu0 %v12585_v23  ;;  %v8490_v53 = vld [vmem:[%s18407_s3 + $0x420] sm:$0xff] }
 0x331   :  { %12590 = vmatprep.subr.bf16.mxu0 %v12589_v48  ;;  %v12601_v62 = vpack.c.bf16 %v8491_v39, %v8490_v53  ;;  %v16092_v23 = vld [vmem:[#allocation2 + $0x82] sm:$0xff]  ;;  %v8509_v53 = vld [vmem:[%s18407_s3 + $0x4b8] sm:$0xff] }
 0x332   :  { %v8511_v39 = vld [vmem:[%s18407_s3 + $0x4c8] sm:$0xff] }
 0x333   :  { %11012 = vmatmul.mubr.f32.gmra.mrb[14].mxu0 %v16058_v59 }
 0x334   :  { %12592 = vmatpush3.bf16.msra.mxu0 %v12589_v48  ;;  %11046 = vmatprep.mubr.f32.mxu0 %v15640_v10  ;;  %v8492_v10 = vld [vmem:[%s18407_s3 + $0x430] sm:$0xff] }
 0x335   :  { %12594 = vmatprep.subr.bf16.mxu0 %v12593_v30 }
 0x337   :  { %11047 = vmatmul.mubr.f32.vlgmr.msra.gmra.mrb[0].mxu0 %v15649_v0  ;;  %v12605_v0 = vpack.c.bf16 %v8493_v20, %v8492_v10  ;;  %v8513_v10 = vld [vmem:[%s18407_s3 + $0x4d8] sm:$0xff]  ;;  %v8515_v20 = vld [vmem:[%s18407_s3 + $0x4e8] sm:$0xff] }
 0x338   :  { %11049 = vmatprep.mubr.f32.mxu0 %v15652_v36  ;;  %12596 = vmatpush3.bf16.msra.mxu0 %v12593_v30  ;;  %v8494_v36 = vld [vmem:[%s18407_s3 + $0x440] sm:$0xff] }
 0x339   :  { %12598 = vmatprep.subr.bf16.mxu0 %v12597_v55  ;;  %v16126_v30 = vld [vmem:[#allocation2 + $0x142] sm:$0xff] }
 0x33b   :  { %11050 = vmatmul.mubr.f32.gmra.mrb[2].mxu0 %v15661_v60  ;;  %v12609_v60 = vpack.c.bf16 %v8495_v37, %v8494_v36  ;;  %v8517_v36 = vld [vmem:[%s18407_s3 + $0x4f8] sm:$0xff]  ;;  %v8519_v37 = vld [vmem:[%s18407_s3 + $0x508] sm:$0xff] }
 0x33c   :  { %11052 = vmatprep.mubr.f32.mxu0 %v15664_v9  ;;  %12600 = vmatpush3.bf16.msra.mxu0 %v12597_v55  ;;  %v8496_v9 = vld [vmem:[%s18407_s3 + $0x450] sm:$0xff] }
 0x33d   :  { %12602 = vmatprep.subr.bf16.mxu0 %v12601_v62 }
 0x33f   :  { %11053 = vmatmul.mubr.f32.gmra.mrb[4].mxu0 %v15673_v42  ;;  %v12613_v42 = vpack.c.bf16 %v8497_v14, %v8496_v9  ;;  %v8521_v9 = vld [vmem:[%s18407_s3 + $0x518] sm:$0xff]  ;;  %v8523_v14 = vld [vmem:[%s18407_s3 + $0x528] sm:$0xff] }
 0x340   :  { %11055 = vmatprep.mubr.f32.mxu0 %v15676_v50  ;;  %12604 = vmatpush3.bf16.msra.mxu0 %v12601_v62  ;;  %v8498_v50 = vld [vmem:[%s18407_s3 + $0x460] sm:$0xff] }
 0x341   :  { %12606 = vmatprep.subr.bf16.mxu0 %v12605_v0  ;;  %v12617_v48 = vpack.c.bf16 %v8499_v58, %v8498_v50  ;;  %v16160_v62 = vld [vmem:[#allocation2 + $0x83] sm:$0xff]  ;;  %v8525_v50 = vld [vmem:[%s18407_s3 + $0x538] sm:$0xff] }
 0x342   :  { %v8527_v58 = vld [vmem:[%s18407_s3 + $0x548] sm:$0xff] }
 0x343   :  { %11056 = vmatmul.mubr.f32.gmra.mrb[6].mxu0 %v16092_v23 }
 0x344   :  { %11058 = vmatprep.mubr.f32.mxu0 %v15685_v16  ;;  %12608 = vmatpush3.bf16.msra.mxu0 %v12605_v0  ;;  %v8500_v16 = vld [vmem:[%s18407_s3 + $0x470] sm:$0xff] }
 0x345   :  { %12610 = vmatprep.subr.bf16.mxu0 %v12609_v60 }
 0x347   :  { %11059 = vmatmul.mubr.f32.gmra.mrb[8].mxu0 %v15694_v31  ;;  %v12621_v31 = vpack.c.bf16 %v8501_v52, %v8500_v16  ;;  %v8529_v16 = vld [vmem:[%s18407_s3 + $0x558] sm:$0xff]  ;;  %v8531_v52 = vld [vmem:[%s18407_s3 + $0x568] sm:$0xff] }
 0x348   :  { %11061 = vmatprep.mubr.f32.mxu0 %v15697_v15  ;;  %12612 = vmatpush3.bf16.msra.mxu0 %v12609_v60  ;;  %v8502_v15 = vld [vmem:[%s18407_s3 + $0x480] sm:$0xff] }
 0x349   :  { %12614 = vmatprep.subr.bf16.mxu0 %v12613_v42  ;;  %v16194_v60 = vld [vmem:[#allocation2 + $0x143] sm:$0xff] }
 0x34b   :  { %11062 = vmatmul.mubr.f32.gmra.mrb[10].mxu0 %v15706_v29  ;;  %v12625_v29 = vpack.c.bf16 %v8503_v33, %v8502_v15  ;;  %v8533_v15 = vld [vmem:[%s18407_s3 + $0x578] sm:$0xff]  ;;  %v18615_v33 = vld [vmem:[#allocation19_spill] sm:$0xff] }
 0x34c   :  { %11064 = vmatprep.mubr.f32.mxu0 %v15709_v21  ;;  %12616 = vmatpush3.bf16.msra.mxu0 %v12613_v42  ;;  %v8504_v21 = vld [vmem:[%s18407_s3 + $0x490] sm:$0xff] }
 0x34d   :  { %12618 = vmatprep.subr.bf16.mxu0 %v12617_v48 }
 0x34f   :  { %11065 = vmatmul.mubr.f32.gmra.mrb[12].mxu0 %v15718_v63  ;;  %v12629_v63 = vpack.c.bf16 %v8505_v45, %v8504_v21  ;;  %v8535_v21 = vld [vmem:[%s18407_s3 + $0x588] sm:$0xff]  ;;  %v18617_v45 = vld [vmem:[#allocation21_spill] sm:$0xff] }
 0x350   :  { %11067 = vmatprep.mubr.f32.mxu0 %v15721_v26  ;;  %12620 = vmatpush3.bf16.msra.mxu0 %v12617_v48  ;;  %v8506_v26 = vld [vmem:[%s18407_s3 + $0x4a0] sm:$0xff] }
 0x351   :  { %12622 = vmatprep.subr.bf16.mxu0 %v12621_v31  ;;  %v12633_v55 = vpack.c.bf16 %v8507_v38, %v8506_v26  ;;  %v16228_v48 = vld [vmem:[#allocation2 + $0x84] sm:$0xff]  ;;  %v8536_v38 = vld [vmem:[%s18407_s3 + $0x590] sm:$0xff] }
 0x352   :  { %v16262_v26 = vld [vmem:[#allocation2 + $0x144] sm:$0xff] }
 0x353   :  { %11068 = vmatmul.mubr.f32.gmra.mrb[14].mxu0 %v16126_v30 }
 0x354   :  { %12624 = vmatpush3.bf16.msra.mxu0 %v12621_v31  ;;  %11102 = vmatprep.mubr.f32.mxu0 %v15730_v40  ;;  %v8508_v40 = vld [vmem:[%s18407_s3 + $0x4b0] sm:$0xff] }
 0x355   :  { %12626 = vmatprep.subr.bf16.mxu0 %v12625_v29 }
 0x357   :  { %11103 = vmatmul.mubr.f32.vlgmr.msra.gmra.mrb[0].mxu0 %v15739_v13  ;;  %v12637_v13 = vpack.c.bf16 %v8509_v53, %v8508_v40  ;;  %v18618_v40 = vld [vmem:[#allocation22_spill] sm:$0xff] }
 0x358   :  { %11105 = vmatprep.mubr.f32.mxu0 %v15742_v2  ;;  %12628 = vmatpush3.bf16.msra.mxu0 %v12625_v29  ;;  %v8510_v2 = vld [vmem:[%s18407_s3 + $0x4c0] sm:$0xff]  ;;  %v18616_v29 = vld [vmem:[#allocation20_spill] sm:$0xff] }
 0x359   :  { %12630 = vmatprep.subr.bf16.mxu0 %v12629_v63  ;;  %v8538_v53 = vld [vmem:[%s18407_s3 + $0x5a0] sm:$0xff] }
 0x35b   :  { %11106 = vmatmul.mubr.f32.gmra.mrb[2].mxu0 %v15751_v51  ;;  %v12641_v51 = vpack.c.bf16 %v8511_v39, %v8510_v2  ;;  %v18619_v2 = vld [vmem:[#allocation23_spill] sm:$0xff]  ;;  %v18620_v39 = vld [vmem:[#allocation24_spill] sm:$0xff] }
 0x35c   :  { %11108 = vmatprep.mubr.f32.mxu0 %v15754_v25  ;;  %12632 = vmatpush3.bf16.msra.mxu0 %v12629_v63  ;;  %v8512_v25 = vld [vmem:[%s18407_s3 + $0x4d0] sm:$0xff] }
 0x35d   :  { %12634 = vmatprep.subr.bf16.mxu0 %v12633_v55 }
 0x35f   :  { %11109 = vmatmul.mubr.f32.gmra.mrb[4].mxu0 %v15763_v4  ;;  %v12645_v4 = vpack.c.bf16 %v8513_v10, %v8512_v25  ;;  %v8540_v25 = vld [vmem:[%s18407_s3 + $0x5b0] sm:$0xff]  ;;  %v8541_v10 = vld [vmem:[%s18407_s3 + $0x5b8] sm:$0xff] }
 0x360   :  { %11111 = vmatprep.mubr.f32.mxu0 %v15766_v34  ;;  %12636 = vmatpush3.bf16.msra.mxu0 %v12633_v55  ;;  %v8514_v34 = vld [vmem:[%s18407_s3 + $0x4e0] sm:$0xff]  ;;  %v8537_v55 = vld [vmem:[%s18407_s3 + $0x598] sm:$0xff] }
 0x361   :  { %12638 = vmatprep.subr.bf16.mxu0 %v12637_v13  ;;  %v12649_v0 = vpack.c.bf16 %v8515_v20, %v8514_v34  ;;  %v12701_v34 = vpack.c.bf16 %v8541_v10, %v8540_v25  ;;  %v8542_v20 = vld [vmem:[%s18407_s3 + $0x5c0] sm:$0xff]  ;;  %v8567_v10 = vld [vmem:[%s18407_s3 + $0x688] sm:$0xff] }
 0x362   :  { %v8566_v25 = vld [vmem:[%s18407_s3 + $0x680] sm:$0xff] }
 0x363   :  { %11112 = vmatmul.mubr.f32.gmra.mrb[6].mxu0 %v16160_v62 }
 0x364   :  { %11114 = vmatprep.mubr.f32.mxu0 %v15775_v11  ;;  %12640 = vmatpush3.bf16.msra.mxu0 %v12637_v13  ;;  %v8516_v11 = vld [vmem:[%s18407_s3 + $0x4f0] sm:$0xff]  ;;  %v8539_v13 = vld [vmem:[%s18407_s3 + $0x5a8] sm:$0xff] }
 0x365   :  { %12642 = vmatprep.subr.bf16.mxu0 %v12641_v51 }
 0x367   :  { %11115 = vmatmul.mubr.f32.gmra.mrb[8].mxu0 %v15784_v46  ;;  %v12653_v46 = vpack.c.bf16 %v8517_v36, %v8516_v11  ;;  %v18622_v11 = vld [vmem:[#allocation26_spill] sm:$0xff] }
 0x368   :  { %11117 = vmatprep.mubr.f32.mxu0 %v15787_v47  ;;  %12644 = vmatpush3.bf16.msra.mxu0 %v12641_v51  ;;  %v8518_v47 = vld [vmem:[%s18407_s3 + $0x500] sm:$0xff]  ;;  %v12697_v51 = vpack.c.bf16 %v8539_v13, %v8538_v53  ;;  %v8564_v53 = vld [vmem:[%s18407_s3 + $0x670] sm:$0xff]  ;;  %v8565_v13 = vld [vmem:[%s18407_s3 + $0x678] sm:$0xff] }
 0x369   :  { %12646 = vmatprep.subr.bf16.mxu0 %v12645_v4 }
 0x36b   :  { %11118 = vmatmul.mubr.f32.gmra.mrb[10].mxu0 %v15796_v43  ;;  %v12657_v43 = vpack.c.bf16 %v8519_v37, %v8518_v47  ;;  %v8545_v47 = vld [vmem:[%s18407_s3 + $0x5d8] sm:$0xff]  ;;  %v3679_v37 = vld [vmem:[#allocation2 + $0xe0] sm:$0xff] }
 0x36c   :  { %11120 = vmatprep.mubr.f32.mxu0 %v15799_v27  ;;  %12648 = vmatpush3.bf16.msra.mxu0 %v12645_v4  ;;  %v8520_v27 = vld [vmem:[%s18407_s3 + $0x510] sm:$0xff] }
 0x36d   :  { %12650 = vmatprep.subr.bf16.mxu0 %v12649_v0  ;;  %v18621_v4 = vld [vmem:[#allocation25_spill] sm:$0xff] }
 0x36f   :  { %11121 = vmatmul.mubr.f32.gmra.mrb[12].mxu0 %v15808_v44  ;;  %v12661_v44 = vpack.c.bf16 %v8521_v9, %v8520_v27  ;;  %v8546_v27 = vld [vmem:[%s18407_s3 + $0x5e0] sm:$0xff]  ;;  %v8547_v9 = vld [vmem:[%s18407_s3 + $0x5e8] sm:$0xff] }
 0x370   :  { %11123 = vmatprep.mubr.f32.mxu0 %v15811_v28  ;;  %12652 = vmatpush3.bf16.msra.mxu0 %v12649_v0  ;;  %v8522_v28 = vld [vmem:[%s18407_s3 + $0x520] sm:$0xff]  ;;  %v8543_v0 = vld [vmem:[%s18407_s3 + $0x5c8] sm:$0xff] }
 0x371   :  { %12654 = vmatprep.subr.bf16.mxu0 %v12653_v46  ;;  %v12665_v42 = vpack.c.bf16 %v8523_v14, %v8522_v28  ;;  %v12705_v36 = vpack.c.bf16 %v8543_v0, %v8542_v20  ;;  %v12713_v28 = vpack.c.bf16 %v8547_v9, %v8546_v27  ;;  %v16317_v14 = vld [vmem:[#allocation2 + $0x110] sm:$0xff]  ;;  %v8569_v0 = vld [vmem:[%s18407_s3 + $0x698] sm:$0xff] }
 0x372   :  { %v8568_v20 = vld [vmem:[%s18407_s3 + $0x690] sm:$0xff] }
 0x373   :  { %11124 = vmatmul.mubr.f32.gmra.mrb[14].mxu0 %v16194_v60  ;;  %v16439_v27 = vld [vmem:[#allocation2 + $0x52] sm:$0xff] }
 0x374   :  { %12656 = vmatpush3.bf16.msra.mxu0 %v12653_v46  ;;  %11158 = vmatprep.mubr.f32.mxu0 %v15820_v54  ;;  %v8524_v54 = vld [vmem:[%s18407_s3 + $0x530] sm:$0xff] }
 0x375   :  { %12658 = vmatprep.subr.bf16.mxu0 %v12657_v43  ;;  %v16296_v46 = vld [vmem:[#allocation2 + $0x90] sm:$0xff] }
 0x376   :  { %v8572_v9 = vld [vmem:[%s18407_s3 + $0x6b0] sm:$0xff] }
 0x377   :  { %11159 = vmatmul.mubr.f32.vlgmr.msra.gmra.mrb[0].mxu0 %v15829_v22  ;;  %v12669_v22 = vpack.c.bf16 %v8525_v50, %v8524_v54  ;;  %v8549_v54 = vld [vmem:[%s18407_s3 + $0x5f8] sm:$0xff]  ;;  %v16326_v50 = vld [vmem:[#allocation2 + $0x120] sm:$0xff] }
 0x378   :  { %11161 = vmatprep.mubr.f32.mxu0 %v15832_v17  ;;  %12660 = vmatpush3.bf16.msra.mxu0 %v12657_v43  ;;  %v8526_v17 = vld [vmem:[%s18407_s3 + $0x540] sm:$0xff]  ;;  %v16305_v43 = vld [vmem:[#allocation2 + $0xf0] sm:$0xff] }
 0x379   :  { %12662 = vmatprep.subr.bf16.mxu0 %v12661_v44 }
 0x37b   :  { %11162 = vmatmul.mubr.f32.gmra.mrb[2].mxu0 %v15841_v1  ;;  %v12673_v1 = vpack.c.bf16 %v8527_v58, %v8526_v17  ;;  %v16329_v17 = vld [vmem:[#allocation2 + $0x130] sm:$0xff]  ;;  %v8550_v58 = vld [vmem:[%s18407_s3 + $0x600] sm:$0xff] }
 0x37c   :  { %11164 = vmatprep.mubr.f32.mxu0 %v15844_v61  ;;  %12664 = vmatpush3.bf16.msra.mxu0 %v12661_v44  ;;  %v8528_v61 = vld [vmem:[%s18407_s3 + $0x550] sm:$0xff]  ;;  %v16314_v44 = vld [vmem:[#allocation2 + $0x100] sm:$0xff] }
 0x37d   :  { %12666 = vmatprep.subr.bf16.mxu0 %v12665_v42 }
 0x37f   :  { %11165 = vmatmul.mubr.f32.gmra.mrb[4].mxu0 %v15853_v49  ;;  %v12677_v49 = vpack.c.bf16 %v8529_v16, %v8528_v61  ;;  %v16338_v61 = vld [vmem:[#allocation2 + $0x140] sm:$0xff] }
 0x380   :  { %11167 = vmatprep.mubr.f32.mxu0 %v15856_v8  ;;  %12668 = vmatpush3.bf16.msra.mxu0 %v12665_v42  ;;  %v8530_v8 = vld [vmem:[%s18407_s3 + $0x560] sm:$0xff]  ;;  %v8548_v42 = vld [vmem:[%s18407_s3 + $0x5f0] sm:$0xff] }
 0x381   :  { %12670 = vmatprep.subr.bf16.mxu0 %v12669_v22  ;;  %v12681_v31 = vpack.c.bf16 %v8531_v52, %v8530_v8  ;;  %v8552_v8 = vld [vmem:[%s18407_s3 + $0x610] sm:$0xff]  ;;  %v8553_v52 = vld [vmem:[%s18407_s3 + $0x618] sm:$0xff] }
 0x383   :  { %11168 = vmatmul.mubr.f32.gmra.mrb[6].mxu0 %v16228_v48 }
 0x384   :  { %11170 = vmatprep.mubr.f32.mxu0 %v15865_v57  ;;  %12672 = vmatpush3.bf16.msra.mxu0 %v12669_v22  ;;  %v8532_v57 = vld [vmem:[%s18407_s3 + $0x570] sm:$0xff]  ;;  %v12717_v22 = vpack.c.bf16 %v8549_v54, %v8548_v42  ;;  %v16448_v42 = vld [vmem:[#allocation2 + $0x62] sm:$0xff] }
 0x385   :  { %12674 = vmatprep.subr.bf16.mxu0 %v12673_v1 }
 0x387   :  { %11171 = vmatmul.mubr.f32.gmra.mrb[8].mxu0 %v15874_v12  ;;  %v12685_v12 = vpack.c.bf16 %v8533_v15, %v8532_v57  ;;  %v8554_v57 = vld [vmem:[%s18407_s3 + $0x620] sm:$0xff]  ;;  %v8555_v15 = vld [vmem:[%s18407_s3 + $0x628] sm:$0xff] }
 0x388   :  { %11173 = vmatprep.mubr.f32.mxu0 %v15877_v19  ;;  %12676 = vmatpush3.bf16.msra.mxu0 %v12673_v1  ;;  %v8534_v19 = vld [vmem:[%s18407_s3 + $0x580] sm:$0xff]  ;;  %v8551_v1 = vld [vmem:[%s18407_s3 + $0x608] sm:$0xff] }
 0x389   :  { %12678 = vmatprep.subr.bf16.mxu0 %v12677_v49  ;;  %v12689_v63 = vpack.c.bf16 %v8535_v21, %v8534_v19  ;;  %v12721_v16 = vpack.c.bf16 %v8551_v1, %v8550_v58  ;;  %v16375_v19 = vld [vmem:[#allocation2 + $0x91] sm:$0xff]  ;;  %v8574_v58 = vld [vmem:[%s18407_s3 + $0x6c0] sm:$0xff]  ;;  %v8575_v1 = vld [vmem:[%s18407_s3 + $0x6c8] sm:$0xff] }
 0x38a   :  { %v8561_v21 = vld [vmem:[%s18407_s3 + $0x658] sm:$0xff] }
 0x38b   :  { %11174 = vmatmul.mubr.f32.gmra.mrb[10].mxu0 %v18615_v33  ;;  %v12729_v33 = vpack.c.bf16 %v8555_v15, %v8554_v57  ;;  %v4067_v57 = vld [vmem:[#allocation2 + $0xe2] sm:$0xff]  ;;  %v16470_v15 = vld [vmem:[#allocation2 + $0xf2] sm:$0xff] }
 0x38c   :  { %11176 = vmatprep.mubr.f32.mxu0 %v18616_v29  ;;  %12680 = vmatpush3.bf16.msra.mxu0 %v12677_v49  ;;  %v16341_v49 = vld [vmem:[#allocation2 + $0x150] sm:$0xff]  ;;  %v8557_v29 = vld [vmem:[%s18407_s3 + $0x638] sm:$0xff] }
 0x38d   :  { %12682 = vmatprep.subr.bf16.mxu0 %v12681_v31 }
 0x38f   :  { %11177 = vmatmul.mubr.f32.gmra.mrb[12].mxu0 %v18617_v45  ;;  %v3873_v45 = vld [vmem:[#allocation2 + $0xe1] sm:$0xff] }
 0x390   :  { %11179 = vmatprep.mubr.f32.mxu0 %v15901_v56  ;;  %12684 = vmatpush3.bf16.msra.mxu0 %v12681_v31  ;;  %v12693_v56 = vpack.c.bf16 %v8537_v55, %v8536_v38  ;;  %v12725_v31 = vpack.c.bf16 %v8553_v52, %v8552_v8  ;;  %v8563_v38 = vld [vmem:[%s18407_s3 + $0x668] sm:$0xff]  ;;  %v16461_v8 = vld [vmem:[#allocation2 + $0x92] sm:$0xff] }
 0x391   :  { %12686 = vmatprep.subr.bf16.mxu0 %v12685_v12  ;;  %v16393_v55 = vld [vmem:[#allocation2 + $0x101] sm:$0xff]  ;;  %v8576_v52 = vld [vmem:[%s18407_s3 + $0x6d0] sm:$0xff] }
 0x393   :  { %11180 = vmatmul.mubr.f32.gmra.mrb[14].mxu0 %v16262_v26 }
 0x394   :  { %12688 = vmatpush3.bf16.msra.mxu0 %v12685_v12  ;;  %11214 = vmatprep.mubr.f32.mxu0 %v18618_v40  ;;  %v8559_v12 = vld [vmem:[%s18407_s3 + $0x648] sm:$0xff] }
 0x395   :  { %12690 = vmatprep.subr.bf16.mxu0 %v12689_v63 }
 0x397   :  { %11215 = vmatmul.mubr.f32.vlgmr.msra.gmra.mrb[0].mxu0 %v18619_v2  ;;  %v16405_v2 = vld [vmem:[#allocation2 + $0x121] sm:$0xff] }
 0x398   :  { %11217 = vmatprep.mubr.f32.mxu0 %v18620_v39  ;;  %12692 = vmatpush3.bf16.msra.mxu0 %v12689_v63  ;;  %v8562_v63 = vld [vmem:[%s18407_s3 + $0x660] sm:$0xff]  ;;  %v12749_v39 = vpack.c.bf16 %v8565_v13, %v8564_v53  ;;  %v8584_v53 = vld [vmem:[%s18407_s3 + $0x710] sm:$0xff]  ;;  %v8585_v13 = vld [vmem:[%s18407_s3 + $0x718] sm:$0xff] }
 0x399   :  { %12694 = vmatprep.subr.bf16.mxu0 %v12693_v56  ;;  %v12745_v40 = vpack.c.bf16 %v8563_v38, %v8562_v63  ;;  %v8583_v63 = vld [vmem:[%s18407_s3 + $0x708] sm:$0xff] }
 0x39b   :  { %11218 = vmatmul.mubr.f32.gmra.mrb[2].mxu0 %v18621_v4  ;;  %v12753_v4 = vpack.c.bf16 %v8567_v10, %v8566_v25  ;;  %v16513_v25 = vld [vmem:[#allocation2 + $0x33] sm:$0xff]  ;;  %v8586_v10 = vld [vmem:[%s18407_s3 + $0x720] sm:$0xff] }
 0x39c   :  { %11220 = vmatprep.mubr.f32.mxu0 %v15934_v5  ;;  %12696 = vmatpush3.bf16.msra.mxu0 %v12693_v56  ;;  %v8544_v5 = vld [vmem:[%s18407_s3 + $0x5d0] sm:$0xff] }
 0x39d   :  { %12698 = vmatprep.subr.bf16.mxu0 %v12697_v51  ;;  %v16396_v56 = vld [vmem:[#allocation2 + $0x111] sm:$0xff] }
 0x39f   :  { %11221 = vmatmul.mubr.f32.gmra.mrb[4].mxu0 %v18622_v11  ;;  %v4059_v11 = vld [vmem:[#allocation2 + $0x22] sm:$0xff] }
 0x3a0   :  { %11223 = vmatprep.mubr.f32.mxu0 %v15946_v24  ;;  %12700 = vmatpush3.bf16.msra.mxu0 %v12697_v51  ;;  %v12709_v24 = vpack.c.bf16 %v8545_v47, %v8544_v5  ;;  %v16408_v51 = vld [vmem:[#allocation2 + $0x131] sm:$0xff]  ;;  %v8570_v5 = vld [vmem:[%s18407_s3 + $0x6a0] sm:$0xff]  ;;  %v8571_v47 = vld [vmem:[%s18407_s3 + $0x6a8] sm:$0xff] }
 0x3a1   :  { %12702 = vmatprep.subr.bf16.mxu0 %v12701_v34 }
 0x3a3   :  { %11224 = vmatmul.mubr.f32.gmra.mrb[6].mxu0 %v16296_v46 }
 0x3a4   :  { %11226 = vmatprep.mubr.f32.mxu0 %v3679_v37  ;;  %12704 = vmatpush3.bf16.msra.mxu0 %v12701_v34  ;;  %v16418_v34 = vld [vmem:[#allocation2 + $0x151] sm:$0xff]  ;;  %v16436_v37 = vld [vmem:[#allocation2 + $0x42] sm:$0xff] }
 0x3a5   :  { %12706 = vmatprep.subr.bf16.mxu0 %v12705_v36 }
 0x3a7   :  { %11227 = vmatmul.mubr.f32.gmra.mrb[8].mxu0 %v16305_v43 }
 0x3a8   :  { %11229 = vmatprep.mubr.f32.mxu0 %v16314_v44  ;;  %12708 = vmatpush3.bf16.msra.mxu0 %v12705_v36  ;;  %v16427_v36 = vld [vmem:[#allocation2 + $0x32] sm:$0xff] }
 0x3a9   :  { %12710 = vmatprep.subr.bf16.mxu0 %v12709_v24 }
 0x3ab   :  { %11230 = vmatmul.mubr.f32.gmra.mrb[10].mxu0 %v16317_v14 }
 0x3ac   :  { %11232 = vmatprep.mubr.f32.mxu0 %v16326_v50  ;;  %12712 = vmatpush3.bf16.msra.mxu0 %v12709_v24  ;;  %v12761_v24 = vpack.c.bf16 %v8571_v47, %v8570_v5  ;;  %v8589_v5 = vld [vmem:[%s18407_s3 + $0x738] sm:$0xff]  ;;  %v16534_v47 = vld [vmem:[#allocation2 + $0x63] sm:$0xff] }
 0x3ad   :  { %12714 = vmatprep.subr.bf16.mxu0 %v12713_v28 }
 0x3af   :  { %11233 = vmatmul.mubr.f32.gmra.mrb[12].mxu0 %v16329_v17 }
 0x3b0   :  { %11235 = vmatprep.mubr.f32.mxu0 %v16338_v61  ;;  %12716 = vmatpush3.bf16.msra.mxu0 %v12713_v28  ;;  %v8573_v28 = vld [vmem:[%s18407_s3 + $0x6b8] sm:$0xff] }
 0x3b1   :  { %12718 = vmatprep.subr.bf16.mxu0 %v12717_v22  ;;  %v12765_v54 = vpack.c.bf16 %v8573_v28, %v8572_v9  ;;  %v16537_v9 = vld [vmem:[#allocation2 + $0x73] sm:$0xff]  ;;  %v8590_v28 = vld [vmem:[%s18407_s3 + $0x740] sm:$0xff] }
 0x3b3   :  { %11236 = vmatmul.mubr.f32.gmra.mrb[14].mxu0 %v16341_v49 }
 0x3b4   :  { %12720 = vmatpush3.bf16.msra.mxu0 %v12717_v22  ;;  %11270 = vmatprep.mubr.f32.mxu0 %v15988_v41  ;;  %v8556_v41 = vld [vmem:[%s18407_s3 + $0x630] sm:$0xff] }
 0x3b5   :  { %12722 = vmatprep.subr.bf16.mxu0 %v12721_v16  ;;  %v16451_v22 = vld [vmem:[#allocation2 + $0x72] sm:$0xff] }
 0x3b7   :  { %11271 = vmatmul.mubr.f32.vlgmr.msra.gmra.mrb[0].mxu0 %v15997_v7  ;;  %v12733_v7 = vpack.c.bf16 %v8557_v29, %v8556_v41  ;;  %v8579_v41 = vld [vmem:[%s18407_s3 + $0x6e8] sm:$0xff] }
 0x3b8   :  { %11273 = vmatprep.mubr.f32.mxu0 %v16000_v6  ;;  %12724 = vmatpush3.bf16.msra.mxu0 %v12721_v16  ;;  %v8558_v6 = vld [vmem:[%s18407_s3 + $0x640] sm:$0xff]  ;;  %v12769_v16 = vpack.c.bf16 %v8575_v1, %v8574_v58  ;;  %v16547_v1 = vld [vmem:[#allocation2 + $0x93] sm:$0xff] }
 0x3b9   :  { %12726 = vmatprep.subr.bf16.mxu0 %v12725_v31  ;;  %v16479_v29 = vld [vmem:[#allocation2 + $0x102] sm:$0xff] }
 0x3bb   :  { %11274 = vmatmul.mubr.f32.gmra.mrb[2].mxu0 %v16009_v3  ;;  %v12737_v3 = vpack.c.bf16 %v8559_v12, %v8558_v6  ;;  %v16482_v6 = vld [vmem:[#allocation2 + $0x112] sm:$0xff] }
 0x3bc   :  { %11276 = vmatprep.mubr.f32.mxu0 %v16012_v35  ;;  %12728 = vmatpush3.bf16.msra.mxu0 %v12725_v31  ;;  %v8560_v35 = vld [vmem:[%s18407_s3 + $0x650] sm:$0xff]  ;;  %v8577_v31 = vld [vmem:[%s18407_s3 + $0x6d8] sm:$0xff] }
 0x3bd   :  { %12730 = vmatprep.subr.bf16.mxu0 %v12729_v33  ;;  %v8580_v12 = vld [vmem:[%s18407_s3 + $0x6f0] sm:$0xff] }
 0x3bf   :  { %11277 = vmatmul.mubr.f32.gmra.mrb[4].mxu0 %v16021_v18  ;;  %v12741_v18 = vpack.c.bf16 %v8561_v21, %v8560_v35  ;;  %v16491_v35 = vld [vmem:[#allocation2 + $0x122] sm:$0xff] }
 0x3c0   :  { %11279 = vmatprep.mubr.f32.mxu0 %v16024_v32  ;;  %12732 = vmatpush3.bf16.msra.mxu0 %v12729_v33  ;;  %v16384_v32 = vld [vmem:[#allocation2 + $0xf1] sm:$0xff]  ;;  %v8578_v33 = vld [vmem:[%s18407_s3 + $0x6e0] sm:$0xff] }
 0x3c1   :  { %12734 = vmatprep.subr.bf16.mxu0 %v12733_v7 }
 0x3c3   :  { %11280 = vmatmul.mubr.f32.gmra.mrb[6].mxu0 %v16375_v19 }
 0x3c4   :  { %11282 = vmatprep.mubr.f32.mxu0 %v3873_v45  ;;  %12736 = vmatpush3.bf16.msra.mxu0 %v12733_v7  ;;  %v12777_v7 = vpack.c.bf16 %v8579_v41, %v8578_v33  ;;  %v16494_v45 = vld [vmem:[#allocation2 + $0x132] sm:$0xff]  ;;  %v8595_v33 = vld [vmem:[%s18407_s3 + $0x768] sm:$0xff] }
 0x3c5   :  { %12738 = vmatprep.subr.bf16.mxu0 %v12737_v3  ;;  %v16565_v41 = vld [vmem:[#allocation2 + $0x103] sm:$0xff] }
 0x3c7   :  { %11283 = vmatmul.mubr.f32.gmra.mrb[8].mxu0 %v16384_v32 }
 0x3c8   :  { %11285 = vmatprep.mubr.f32.mxu0 %v16393_v55  ;;  %12740 = vmatpush3.bf16.msra.mxu0 %v12737_v3  ;;  %v8581_v3 = vld [vmem:[%s18407_s3 + $0x6f8] sm:$0xff] }
 0x3c9   :  { %12742 = vmatprep.subr.bf16.mxu0 %v12741_v18  ;;  %v12781_v21 = vpack.c.bf16 %v8581_v3, %v8580_v12  ;;  %v16568_v12 = vld [vmem:[#allocation2 + $0x113] sm:$0xff] }
 0x3ca   :  { %v8596_v3 = vld [vmem:[%s18407_s3 + $0x770] sm:$0xff] }
 0x3cb   :  { %11286 = vmatmul.mubr.f32.gmra.mrb[10].mxu0 %v16396_v56 }
 0x3cc   :  { %11288 = vmatprep.mubr.f32.mxu0 %v16405_v2  ;;  %12744 = vmatpush3.bf16.msra.mxu0 %v12741_v18  ;;  %v8582_v18 = vld [vmem:[%s18407_s3 + $0x700] sm:$0xff] }
 0x3cd   :  { %12746 = vmatprep.subr.bf16.mxu0 %v12745_v40  ;;  %v12785_v38 = vpack.c.bf16 %v8583_v63, %v8582_v18  ;;  %v16577_v18 = vld [vmem:[#allocation2 + $0x123] sm:$0xff] }
 0x3cf   :  { %11289 = vmatmul.mubr.f32.gmra.mrb[12].mxu0 %v16408_v51 }
 0x3d0   :  { %11291 = vmatprep.mubr.f32.mxu0 %v16058_v59  ;;  %12748 = vmatpush3.bf16.msra.mxu0 %v12745_v40  ;;  %v12757_v59 = vpack.c.bf16 %v8569_v0, %v8568_v20  ;;  %v16504_v40 = vld [vmem:[#allocation2 + $0x152] sm:$0xff]  ;;  %v16522_v20 = vld [vmem:[#allocation2 + $0x43] sm:$0xff] }
 0x3d1   :  { %12750 = vmatprep.subr.bf16.mxu0 %v12749_v39 }
 0x3d3   :  { %11292 = vmatmul.mubr.f32.gmra.mrb[14].mxu0 %v16418_v34 }
 0x3d4   :  { %12752 = vmatpush3.bf16.msra.mxu0 %v12749_v39  ;;  %11326 = vmatprep.mubr.f32.mxu0 %v4059_v11  ;;  %v4253_v39 = vld [vmem:[#allocation2 + $0x23] sm:$0xff]  ;;  %v16525_v11 = vld [vmem:[#allocation2 + $0x53] sm:$0xff] }
 0x3d5   :  { %12754 = vmatprep.subr.bf16.mxu0 %v12753_v4 }
 0x3d7   :  { %11327 = vmatmul.mubr.f32.vlgmr.msra.gmra.mrb[0].mxu0 %v16427_v36 }
 0x3d8   :  { %11329 = vmatprep.mubr.f32.mxu0 %v16436_v37  ;;  %12756 = vmatpush3.bf16.msra.mxu0 %v12753_v4  ;;  %v8587_v4 = vld [vmem:[%s18407_s3 + $0x728] sm:$0xff] }
 0x3d9   :  { %12758 = vmatprep.subr.bf16.mxu0 %v12757_v59  ;;  %v12793_v0 = vpack.c.bf16 %v8587_v4, %v8586_v10  ;;  %v8600_v10 = vld [vmem:[%s18407_s3 + $0x790] sm:$0xff]  ;;  %v8601_v4 = vld [vmem:[%s18407_s3 + $0x798] sm:$0xff] }
 0x3db   :  { %11330 = vmatmul.mubr.f32.gmra.mrb[2].mxu0 %v16439_v27 }
 0x3dc   :  { %11332 = vmatprep.mubr.f32.mxu0 %v16448_v42  ;;  %12760 = vmatpush3.bf16.msra.mxu0 %v12757_v59  ;;  %v8588_v59 = vld [vmem:[%s18407_s3 + $0x730] sm:$0xff] }
 0x3dd   :  { %12762 = vmatprep.subr.bf16.mxu0 %v12761_v24 }
 0x3df   :  { %11333 = vmatmul.mubr.f32.gmra.mrb[4].mxu0 %v16451_v22 }
 0x3e0   :  { %11335 = vmatprep.mubr.f32.mxu0 %v16092_v23  ;;  %12764 = vmatpush3.bf16.msra.mxu0 %v12761_v24  ;;  %v12773_v23 = vpack.c.bf16 %v8577_v31, %v8576_v52  ;;  %v12797_v24 = vpack.c.bf16 %v8589_v5, %v8588_v59  ;;  %v8593_v52 = vld [vmem:[%s18407_s3 + $0x758] sm:$0xff]  ;;  %v4261_v31 = vld [vmem:[#allocation2 + $0xe3] sm:$0xff] }
 0x3e1   :  { %12766 = vmatprep.subr.bf16.mxu0 %v12765_v54  ;;  %v16599_v59 = vld [vmem:[#allocation2 + $0x34] sm:$0xff]  ;;  %v8602_v5 = vld [vmem:[%s18407_s3 + $0x7a0] sm:$0xff] }
 0x3e3   :  { %11336 = vmatmul.mubr.f32.gmra.mrb[6].mxu0 %v16461_v8 }
 0x3e4   :  { %11338 = vmatprep.mubr.f32.mxu0 %v4067_v57  ;;  %12768 = vmatpush3.bf16.msra.mxu0 %v12765_v54  ;;  %v8591_v54 = vld [vmem:[%s18407_s3 + $0x748] sm:$0xff]  ;;  %v16556_v57 = vld [vmem:[#allocation2 + $0xf3] sm:$0xff] }
 0x3e5   :  { %12770 = vmatprep.subr.bf16.mxu0 %v12769_v16  ;;  %v12801_v58 = vpack.c.bf16 %v8591_v54, %v8590_v28  ;;  %v16608_v28 = vld [vmem:[#allocation2 + $0x44] sm:$0xff] }
 0x3e7   :  { %11339 = vmatmul.mubr.f32.gmra.mrb[8].mxu0 %v16470_v15 }
 0x3e8   :  { %11341 = vmatprep.mubr.f32.mxu0 %v16479_v29  ;;  %12772 = vmatpush3.bf16.msra.mxu0 %v12769_v16  ;;  %v8592_v16 = vld [vmem:[%s18407_s3 + $0x750] sm:$0xff] }
 0x3e9   :  { %12774 = vmatprep.subr.bf16.mxu0 %v12773_v23 }
 0x3eb   :  { %11342 = vmatmul.mubr.f32.gmra.mrb[10].mxu0 %v16482_v6 }
 0x3ec   :  { %11344 = vmatprep.mubr.f32.mxu0 %v16491_v35  ;;  %12776 = vmatpush3.bf16.msra.mxu0 %v12773_v23  ;;  %v8594_v23 = vld [vmem:[%s18407_s3 + $0x760] sm:$0xff] }
 0x3ed   :  { %12778 = vmatprep.subr.bf16.mxu0 %v12777_v7 }
 0x3ef   :  { %11345 = vmatmul.mubr.f32.gmra.mrb[12].mxu0 %v16494_v45 }
 0x3f0   :  { %11347 = vmatprep.mubr.f32.mxu0 %v16126_v30  ;;  %12780 = vmatpush3.bf16.msra.mxu0 %v12777_v7  ;;  %v12789_v30 = vpack.c.bf16 %v8585_v13, %v8584_v53  ;;  %v12809_v7 = vpack.c.bf16 %v8595_v33, %v8594_v23  ;;  %v8598_v53 = vld [vmem:[%s18407_s3 + $0x780] sm:$0xff]  ;;  %v8599_v13 = vld [vmem:[%s18407_s3 + $0x788] sm:$0xff]  ;;  %v16623_v23 = vld [vmem:[#allocation2 + $0x74] sm:$0xff] }
 0x3f1   :  { %12782 = vmatprep.subr.bf16.mxu0 %v12781_v21  ;;  %v8606_v33 = vld [vmem:[%s18407_s3 + $0x7c0] sm:$0xff] }
 0x3f3   :  { %11348 = vmatmul.mubr.f32.gmra.mrb[14].mxu0 %v16504_v40 }
 0x3f4   :  { %12784 = vmatpush3.bf16.msra.mxu0 %v12781_v21  ;;  %11382 = vmatprep.mubr.f32.mxu0 %v4253_v39  ;;  %v8597_v21 = vld [vmem:[%s18407_s3 + $0x778] sm:$0xff]  ;;  %v12817_v39 = vpack.c.bf16 %v8599_v13, %v8598_v53  ;;  %v4455_v13 = vld [vmem:[#allocation2 + $0xe4] sm:$0xff] }
 0x3f5   :  { %12786 = vmatprep.subr.bf16.mxu0 %v12785_v38  ;;  %v12813_v63 = vpack.c.bf16 %v8597_v21, %v8596_v3  ;;  %v16633_v21 = vld [vmem:[#allocation2 + $0x94] sm:$0xff] }
 0x3f6   :  { %v8609_v53 = vld [vmem:[%s18407_s3 + $0x7d8] sm:$0xff] }
 0x3f7   :  { %11383 = vmatmul.mubr.f32.vlgmr.msra.gmra.mrb[0].mxu0 %v16513_v25 }
 0x3f8   :  { %11385 = vmatprep.mubr.f32.mxu0 %v16522_v20  ;;  %12788 = vmatpush3.bf16.msra.mxu0 %v12785_v38  ;;  %v16580_v38 = vld [vmem:[#allocation2 + $0x133] sm:$0xff] }
 0x3f9   :  { %12790 = vmatprep.subr.bf16.mxu0 %v12789_v30 }
 0x3fb   :  { %11386 = vmatmul.mubr.f32.gmra.mrb[2].mxu0 %v16525_v11 }
 0x3fc   :  { %11388 = vmatprep.mubr.f32.mxu0 %v16534_v47  ;;  %12792 = vmatpush3.bf16.msra.mxu0 %v12789_v30  ;;  %v16590_v30 = vld [vmem:[#allocation2 + $0x153] sm:$0xff] }
 0x3fd   :  { %12794 = vmatprep.subr.bf16.mxu0 %v12793_v0 }
 0x3ff   :  { %11389 = vmatmul.mubr.f32.gmra.mrb[4].mxu0 %v16537_v9 }
 0x400   :  { %11391 = vmatprep.mubr.f32.mxu0 %v16160_v62  ;;  %12796 = vmatpush3.bf16.msra.mxu0 %v12793_v0  ;;  %v12805_v62 = vpack.c.bf16 %v8593_v52, %v8592_v16  ;;  %v4447_v0 = vld [vmem:[#allocation2 + $0x24] sm:$0xff]  ;;  %v8604_v16 = vld [vmem:[%s18407_s3 + $0x7b0] sm:$0xff]  ;;  %v8605_v52 = vld [vmem:[%s18407_s3 + $0x7b8] sm:$0xff] }
 0x401   :  { %12798 = vmatprep.subr.bf16.mxu0 %v12797_v24 }
 0x403   :  { %11392 = vmatmul.mubr.f32.gmra.mrb[6].mxu0 %v16547_v1 }
 0x404   :  { %11394 = vmatprep.mubr.f32.mxu0 %v4261_v31  ;;  %12800 = vmatpush3.bf16.msra.mxu0 %v12797_v24  ;;  %v8603_v24 = vld [vmem:[%s18407_s3 + $0x7a8] sm:$0xff] }
 0x405   :  { %12802 = vmatprep.subr.bf16.mxu0 %v12801_v58  ;;  %v12825_v54 = vpack.c.bf16 %v8603_v24, %v8602_v5  ;;  %v16620_v31 = vld [vmem:[#allocation2 + $0x64] sm:$0xff]  ;;  %v16654_v5 = vld [vmem:[#allocation2 + $0x114] sm:$0xff] }
 0x406   :  { %v8612_v24 = vld [vmem:[%s18407_s3 + $0x7f0] sm:$0xff] }
 0x407   :  { %11395 = vmatmul.mubr.f32.gmra.mrb[8].mxu0 %v16556_v57 }
 0x408   :  { %11397 = vmatprep.mubr.f32.mxu0 %v16565_v41  ;;  %12804 = vmatpush3.bf16.msra.mxu0 %v12801_v58  ;;  %v16611_v58 = vld [vmem:[#allocation2 + $0x54] sm:$0xff] }
 0x409   :  { %12806 = vmatprep.subr.bf16.mxu0 %v12805_v62 }
 0x40b   :  { %11398 = vmatmul.mubr.f32.gmra.mrb[10].mxu0 %v16568_v12 }
 0x40c   :  { %11400 = vmatprep.mubr.f32.mxu0 %v16577_v18  ;;  %12808 = vmatpush3.bf16.msra.mxu0 %v12805_v62  ;;  %v12829_v62 = vpack.c.bf16 %v8605_v52, %v8604_v16  ;;  %v16663_v16 = vld [vmem:[#allocation2 + $0x124] sm:$0xff] }
 0x40d   :  { %12810 = vmatprep.subr.bf16.mxu0 %v12809_v7 }
 0x40f   :  { %11401 = vmatmul.mubr.f32.gmra.mrb[12].mxu0 %v16580_v38 }
 0x410   :  { %11403 = vmatprep.mubr.f32.mxu0 %v16194_v60  ;;  %12812 = vmatpush3.bf16.msra.mxu0 %v12809_v7  ;;  %v12821_v60 = vpack.c.bf16 %v8601_v4, %v8600_v10  ;;  %v8607_v7 = vld [vmem:[%s18407_s3 + $0x7c8] sm:$0xff]  ;;  %v8610_v10 = vld [vmem:[%s18407_s3 + $0x7e0] sm:$0xff] }
 0x411   :  { %12814 = vmatprep.subr.bf16.mxu0 %v12813_v63  ;;  %v12833_v3 = vpack.c.bf16 %v8607_v7, %v8606_v33  ;;  %v8611_v4 = vld [vmem:[%s18407_s3 + $0x7e8] sm:$0xff]  ;;  %v8614_v33 = vld [vmem:[%s18407_s3 + $0x800] sm:$0xff] }
 0x412   :  { %v8615_v7 = vld [vmem:[%s18407_s3 + $0x808] sm:$0xff] }
 0x413   :  { %11404 = vmatmul.mubr.f32.gmra.mrb[14].mxu0 %v16590_v30 }
 0x414   :  { %12816 = vmatpush3.bf16.msra.mxu0 %v12813_v63  ;;  %11438 = vmatprep.mubr.f32.mxu0 %v4447_v0  ;;  %v8608_v63 = vld [vmem:[%s18407_s3 + $0x7d0] sm:$0xff]  ;;  %v16651_v0 = vld [vmem:[#allocation2 + $0x104] sm:$0xff] }
 0x415   :  { %12818 = vmatprep.subr.bf16.mxu0 %v12817_v39 }
 0x417   :  { %11439 = vmatmul.mubr.f32.vlgmr.msra.gmra.mrb[0].mxu0 %v16599_v59 }
 0x418   :  { %11441 = vmatprep.mubr.f32.mxu0 %v16608_v28  ;;  %12820 = vmatpush3.bf16.msra.mxu0 %v12817_v39  ;;  %v16642_v39 = vld [vmem:[#allocation2 + $0xf4] sm:$0xff] }
 0x419   :  { %12822 = vmatprep.subr.bf16.mxu0 %v12821_v60 }
 0x41b   :  { %11442 = vmatmul.mubr.f32.gmra.mrb[2].mxu0 %v16611_v58 }
 0x41c   :  { %11444 = vmatprep.mubr.f32.mxu0 %v16620_v31  ;;  %12824 = vmatpush3.bf16.msra.mxu0 %v12821_v60  ;;  %v12841_v60 = vpack.c.bf16 %v8611_v4, %v8610_v10  ;;  %v16685_v10 = vld [vmem:[#allocation2 + $0x40] sm:$0xff] }
 0x41d   :  { %12826 = vmatprep.subr.bf16.mxu0 %v12825_v54  ;;  %v8618_v4 = vld [vmem:[%s18407_s3 + $0x820] sm:$0xff] }
 0x41f   :  { %11445 = vmatmul.mubr.f32.gmra.mrb[4].mxu0 %v16623_v23 }
 0x420   :  { %11447 = vmatprep.mubr.f32.mxu0 %v16228_v48  ;;  %12828 = vmatpush3.bf16.msra.mxu0 %v12825_v54  ;;  %v12837_v48 = vpack.c.bf16 %v8609_v53, %v8608_v63  ;;  %v8613_v54 = vld [vmem:[%s18407_s3 + $0x7f8] sm:$0xff]  ;;  %v8616_v53 = vld [vmem:[%s18407_s3 + $0x810] sm:$0xff] }
 0x421   :  { %12830 = vmatprep.subr.bf16.mxu0 %v12829_v62  ;;  %v12845_v52 = vpack.c.bf16 %v8613_v54, %v8612_v24  ;;  %v16676_v63 = vld [vmem:[#allocation2 + $0x154] sm:$0xff] }
 0x422   :  { %v16694_v24 = vld [vmem:[#allocation2 + $0x50] sm:$0xff] }
 0x423   :  { %11448 = vmatmul.mubr.f32.gmra.mrb[6].mxu0 %v16633_v21 }
 0x424   :  { %11450 = vmatprep.mubr.f32.mxu0 %v4455_v13  ;;  %12832 = vmatpush3.bf16.msra.mxu0 %v12829_v62  ;;  %v16666_v62 = vld [vmem:[#allocation2 + $0x134] sm:$0xff] }
 0x425   :  { %12834 = vmatprep.subr.bf16.mxu0 %v12833_v3  ;;  %v8617_v13 = vld [vmem:[%s18407_s3 + $0x818] sm:$0xff] }
 0x427   :  { %11451 = vmatmul.mubr.f32.gmra.mrb[8].mxu0 %v16642_v39 }
 0x428   :  { %11453 = vmatprep.mubr.f32.mxu0 %v16651_v0  ;;  %12836 = vmatpush3.bf16.msra.mxu0 %v12833_v3  ;;  %v12849_v3 = vpack.c.bf16 %v8615_v7, %v8614_v33  ;;  %v8620_v33 = vld [vmem:[%s18407_s3 + $0x830] sm:$0xff]  ;;  %v8621_v7 = vld [vmem:[%s18407_s3 + $0x838] sm:$0xff] }
 0x429   :  { %12838 = vmatprep.subr.bf16.mxu0 %v12837_v48 }
 0x42b   :  { %11454 = vmatmul.mubr.f32.gmra.mrb[10].mxu0 %v16654_v5 }
 0x42c   :  { %11456 = vmatprep.mubr.f32.mxu0 %v16663_v16  ;;  %12840 = vmatpush3.bf16.msra.mxu0 %v12837_v48  ;;  %v4642_v48 = vld [vmem:[#allocation2 + $0x30] sm:$0xff] }
 0x42d   :  { %12842 = vmatprep.subr.bf16.mxu0 %v12841_v60 }
 0x42f   :  { %11457 = vmatmul.mubr.f32.gmra.mrb[12].mxu0 %v16666_v62 }
 0x430   :  { %11459 = vmatprep.mubr.f32.mxu0 %v16262_v26  ;;  %12844 = vmatpush3.bf16.msra.mxu0 %v12841_v60  ;;  %v12853_v26 = vpack.c.bf16 %v8617_v13, %v8616_v53  ;;  %v8619_v60 = vld [vmem:[%s18407_s3 + $0x828] sm:$0xff]  ;;  %v16706_v53 = vld [vmem:[#allocation2 + $0x70] sm:$0xff]  ;;  %v16709_v13 = vld [vmem:[#allocation2 + $0x80] sm:$0xff] }
 0x431   :  { %12846 = vmatprep.subr.bf16.mxu0 %v12845_v52  ;;  %v12857_v54 = vpack.c.bf16 %v8619_v60, %v8618_v4  ;;  %v8623_v4 = vld [vmem:[%s18407_s3 + $0x848] sm:$0xff] }
 0x433   :  { %11460 = vmatmul.mubr.f32.gmra.mrb[14].mxu0 %v16676_v63 }
 0x434   :  { %12848 = vmatpush3.bf16.msra.mxu0 %v12845_v52  ;;  %11494 = vmatprep.mubr.f32.mxu0 %v4642_v48  ;;  %v16697_v52 = vld [vmem:[#allocation2 + $0x60] sm:$0xff] }
 0x435   :  { %12850 = vmatprep.subr.bf16.mxu0 %v12849_v3  ;;  %v8622_v48 = vld [vmem:[%s18407_s3 + $0x840] sm:$0xff] }
 0x436   :  { %v12865_v60 = vpack.c.bf16 %v8623_v4, %v8622_v48  ;;  %v8627_v48 = vld [vmem:[%s18407_s3 + $0x868] sm:$0xff] }
 0x437   :  { %11495 = vmatmul.mubr.f32.vlgmr.msra.gmra.mrb[0].mxu0 %v16685_v10 }
 0x438   :  { %11497 = vmatprep.mubr.f32.mxu0 %v16694_v24  ;;  %12852 = vmatpush3.bf16.msra.mxu0 %v12849_v3  ;;  %v12861_v3 = vpack.c.bf16 %v8621_v7, %v8620_v33  ;;  %v8624_v33 = vld [vmem:[%s18407_s3 + $0x850] sm:$0xff]  ;;  %v8625_v7 = vld [vmem:[%s18407_s3 + $0x858] sm:$0xff] }
 0x439   :  { %12854 = vmatprep.subr.bf16.mxu0 %v12853_v26 }
 0x43b   :  { %11498 = vmatmul.mubr.f32.gmra.mrb[2].mxu0 %v16697_v52 }
 0x43c   :  { %11500 = vmatprep.mubr.f32.mxu0 %v16706_v53  ;;  %12856 = vmatpush3.bf16.msra.mxu0 %v12853_v26  ;;  %v16719_v26 = vld [vmem:[#allocation2 + $0xa0] sm:$0xff] }
 0x43d   :  { %12858 = vmatprep.subr.bf16.mxu0 %v12857_v54 }
 0x43f   :  { %11501 = vmatmul.mubr.f32.gmra.mrb[4].mxu0 %v16709_v13 }
 0x440   :  { %11503 = vmatprep.mubr.f32.mxu0 %v16296_v46  ;;  %12860 = vmatpush3.bf16.msra.mxu0 %v12857_v54  ;;  %v12869_v46 = vpack.c.bf16 %v8625_v7, %v8624_v33  ;;  %v8626_v54 = vld [vmem:[%s18407_s3 + $0x860] sm:$0xff]  ;;  %v8633_v7 = vld [vmem:[%s18407_s3 + $0x898] sm:$0xff] }
 0x441   :  { %12862 = vmatprep.subr.bf16.mxu0 %v12861_v3  ;;  %v12873_v4 = vpack.c.bf16 %v8627_v48, %v8626_v54  ;;  %v16753_v33 = vld [vmem:[#allocation2 + $0x160] sm:$0xff]  ;;  %v8635_v48 = vld [vmem:[%s18407_s3 + $0x8a8] sm:$0xff] }
 0x442   :  { %v8634_v54 = vld [vmem:[%s18407_s3 + $0x8a0] sm:$0xff] }
 0x443   :  { %11504 = vmatmul.mubr.f32.gmra.mrb[6].mxu0 %v16719_v26 }
 0x444   :  { %11506 = vmatprep.mubr.f32.mxu0 %v16305_v43  ;;  %12864 = vmatpush3.bf16.msra.mxu0 %v12861_v3  ;;  %v8628_v43 = vld [vmem:[%s18407_s3 + $0x870] sm:$0xff]  ;;  %v8629_v3 = vld [vmem:[%s18407_s3 + $0x878] sm:$0xff] }
 0x445   :  { %12866 = vmatprep.subr.bf16.mxu0 %v12865_v60 }
 0x447   :  { %11507 = vmatmul.mubr.f32.gmra.mrb[8].mxu0 %v16314_v44  ;;  %v12877_v44 = vpack.c.bf16 %v8629_v3, %v8628_v43  ;;  %v12889_v43 = vpack.c.bf16 %v8635_v48, %v8634_v54  ;;  %v16774_v3 = vld [vmem:[#allocation2 + $0x61] sm:$0xff]  ;;  %v8640_v48 = vld [vmem:[%s18407_s3 + $0x8d0] sm:$0xff] }
 0x448   :  { %11509 = vmatprep.mubr.f32.mxu0 %v16317_v14  ;;  %12868 = vmatpush3.bf16.msra.mxu0 %v12865_v60  ;;  %v8630_v14 = vld [vmem:[%s18407_s3 + $0x880] sm:$0xff]  ;;  %v8631_v60 = vld [vmem:[%s18407_s3 + $0x888] sm:$0xff] }
 0x449   :  { %12870 = vmatprep.subr.bf16.mxu0 %v12869_v46 }
 0x44b   :  { %11510 = vmatmul.mubr.f32.gmra.mrb[10].mxu0 %v16326_v50  ;;  %v12881_v50 = vpack.c.bf16 %v8631_v60, %v8630_v14  ;;  %v8637_v14 = vld [vmem:[%s18407_s3 + $0x8b8] sm:$0xff] }
 0x44c   :  { %11512 = vmatprep.mubr.f32.mxu0 %v16329_v17  ;;  %12872 = vmatpush3.bf16.msra.mxu0 %v12869_v46  ;;  %v8632_v17 = vld [vmem:[%s18407_s3 + $0x890] sm:$0xff] }
 0x44d   :  { %12874 = vmatprep.subr.bf16.mxu0 %v12873_v4  ;;  %v4836_v46 = vld [vmem:[#allocation2 + $0x31] sm:$0xff] }
 0x44e   :  { %v16783_v60 = vld [vmem:[#allocation2 + $0x71] sm:$0xff] }
 0x44f   :  { %11513 = vmatmul.mubr.f32.gmra.mrb[12].mxu0 %v16338_v61  ;;  %v12885_v61 = vpack.c.bf16 %v8633_v7, %v8632_v17  ;;  %v16786_v17 = vld [vmem:[#allocation2 + $0x81] sm:$0xff] }
 0x450   :  { %11515 = vmatprep.mubr.f32.mxu0 %v16341_v49  ;;  %12876 = vmatpush3.bf16.msra.mxu0 %v12873_v4  ;;  %v16762_v49 = vld [vmem:[#allocation2 + $0x41] sm:$0xff]  ;;  %v16771_v4 = vld [vmem:[#allocation2 + $0x51] sm:$0xff] }
 0x451   :  { %12878 = vmatprep.subr.bf16.mxu0 %v12877_v44  ;;  %v8638_v7 = vld [vmem:[%s18407_s3 + $0x8c0] sm:$0xff] }
 0x453   :  { %11516 = vmatmul.mubr.f32.gmra.mrb[14].mxu0 %v16753_v33 }
 0x454   :  { %12880 = vmatpush3.bf16.msra.mxu0 %v12877_v44  ;;  %11550 = vmatprep.mubr.f32.mxu0 %v4836_v46  ;;  %v8636_v44 = vld [vmem:[%s18407_s3 + $0x8b0] sm:$0xff]  ;;  %v8639_v46 = vld [vmem:[%s18407_s3 + $0x8c8] sm:$0xff] }
 0x455   :  { %12882 = vmatprep.subr.bf16.mxu0 %v12881_v50  ;;  %v12897_v54 = vpack.c.bf16 %v8639_v46, %v8638_v7  ;;  %v16822_v46 = vld [vmem:[#allocation2 + $0x141] sm:$0xff] }
 0x457   :  { %11551 = vmatmul.mubr.f32.vlgmr.msra.gmra.mrb[0].mxu0 %v16762_v49 }
 0x458   :  { %11553 = vmatprep.mubr.f32.mxu0 %v16771_v4  ;;  %12884 = vmatpush3.bf16.msra.mxu0 %v12881_v50  ;;  %v12893_v50 = vpack.c.bf16 %v8637_v14, %v8636_v44  ;;  %v8641_v44 = vld [vmem:[%s18407_s3 + $0x8d8] sm:$0xff]  ;;  %v8643_v14 = vld [vmem:[%s18407_s3 + $0x8e8] sm:$0xff] }
 0x459   :  { %12886 = vmatprep.subr.bf16.mxu0 %v12885_v61 }
 0x45b   :  { %11554 = vmatmul.mubr.f32.gmra.mrb[2].mxu0 %v16774_v3 }
 0x45c   :  { %11556 = vmatprep.mubr.f32.mxu0 %v16783_v60  ;;  %12888 = vmatpush3.bf16.msra.mxu0 %v12885_v61  ;;  %v16796_v61 = vld [vmem:[#allocation2 + $0xa1] sm:$0xff] }
 0x45d   :  { %12890 = vmatprep.subr.bf16.mxu0 %v12889_v43 }
 0x45f   :  { %11557 = vmatmul.mubr.f32.gmra.mrb[4].mxu0 %v16786_v17 }
 0x460   :  { %11559 = vmatprep.mubr.f32.mxu0 %v16375_v19  ;;  %12892 = vmatpush3.bf16.msra.mxu0 %v12889_v43  ;;  %v12901_v19 = vpack.c.bf16 %v8641_v44, %v8640_v48  ;;  %v8642_v43 = vld [vmem:[%s18407_s3 + $0x8e0] sm:$0xff]  ;;  %v8648_v48 = vld [vmem:[%s18407_s3 + $0x910] sm:$0xff]  ;;  %v8649_v44 = vld [vmem:[%s18407_s3 + $0x918] sm:$0xff] }
 0x461   :  { %12894 = vmatprep.subr.bf16.mxu0 %v12893_v50  ;;  %v12905_v7 = vpack.c.bf16 %v8643_v14, %v8642_v43  ;;  %v8651_v43 = vld [vmem:[%s18407_s3 + $0x928] sm:$0xff] }
 0x463   :  { %11560 = vmatmul.mubr.f32.gmra.mrb[6].mxu0 %v16796_v61 }
 0x464   :  { %11562 = vmatprep.mubr.f32.mxu0 %v16384_v32  ;;  %12896 = vmatpush3.bf16.msra.mxu0 %v12893_v50  ;;  %v8644_v32 = vld [vmem:[%s18407_s3 + $0x8f0] sm:$0xff]  ;;  %v8645_v50 = vld [vmem:[%s18407_s3 + $0x8f8] sm:$0xff] }
 0x465   :  { %12898 = vmatprep.subr.bf16.mxu0 %v12897_v54 }
 0x467   :  { %11563 = vmatmul.mubr.f32.gmra.mrb[8].mxu0 %v16393_v55  ;;  %v12909_v55 = vpack.c.bf16 %v8645_v50, %v8644_v32  ;;  %v16858_v32 = vld [vmem:[#allocation2 + $0x82] sm:$0xff] }
 0x468   :  { %11565 = vmatprep.mubr.f32.mxu0 %v16396_v56  ;;  %12900 = vmatpush3.bf16.msra.mxu0 %v12897_v54  ;;  %v8646_v56 = vld [vmem:[%s18407_s3 + $0x900] sm:$0xff]  ;;  %v8647_v54 = vld [vmem:[%s18407_s3 + $0x908] sm:$0xff] }
 0x469   :  { %12902 = vmatprep.subr.bf16.mxu0 %v12901_v19  ;;  %v8655_v50 = vld [vmem:[%s18407_s3 + $0x948] sm:$0xff] }
 0x46b   :  { %11566 = vmatmul.mubr.f32.gmra.mrb[10].mxu0 %v16405_v2  ;;  %v12913_v2 = vpack.c.bf16 %v8647_v54, %v8646_v56  ;;  %v8657_v56 = vld [vmem:[%s18407_s3 + $0x958] sm:$0xff]  ;;  %v8658_v54 = vld [vmem:[%s18407_s3 + $0x960] sm:$0xff] }
 0x46c   :  { %11568 = vmatprep.mubr.f32.mxu0 %v16408_v51  ;;  %12904 = vmatpush3.bf16.msra.mxu0 %v12901_v19  ;;  %v16832_v51 = vld [vmem:[#allocation2 + $0x161] sm:$0xff] }
 0x46d   :  { %12906 = vmatprep.subr.bf16.mxu0 %v12905_v7  ;;  %v8650_v19 = vld [vmem:[%s18407_s3 + $0x920] sm:$0xff] }
 0x46e   :  { %v12921_v14 = vpack.c.bf16 %v8651_v43, %v8650_v19  ;;  %v8663_v19 = vld [vmem:[%s18407_s3 + $0x988] sm:$0xff]  ;;  %v8664_v43 = vld [vmem:[%s18407_s3 + $0x990] sm:$0xff] }
 0x46f   :  { %11569 = vmatmul.mubr.f32.gmra.mrb[12].mxu0 %v16822_v46 }
 0x470   :  { %11571 = vmatprep.mubr.f32.mxu0 %v16418_v34  ;;  %12908 = vmatpush3.bf16.msra.mxu0 %v12905_v7  ;;  %v12917_v34 = vpack.c.bf16 %v8649_v44, %v8648_v48  ;;  %v8653_v7 = vld [vmem:[%s18407_s3 + $0x938] sm:$0xff] }
 0x471   :  { %12910 = vmatprep.subr.bf16.mxu0 %v12909_v55  ;;  %v8661_v44 = vld [vmem:[%s18407_s3 + $0x978] sm:$0xff] }
 0x473   :  { %11572 = vmatmul.mubr.f32.gmra.mrb[14].mxu0 %v16832_v51 }
 0x474   :  { %12912 = vmatpush3.bf16.msra.mxu0 %v12909_v55  ;;  %11606 = vmatprep.mubr.f32.mxu0 %v16427_v36  ;;  %v8652_v36 = vld [vmem:[%s18407_s3 + $0x930] sm:$0xff] }
 0x475   :  { %12914 = vmatprep.subr.bf16.mxu0 %v12913_v2  ;;  %v8656_v55 = vld [vmem:[%s18407_s3 + $0x950] sm:$0xff] }
 0x477   :  { %11607 = vmatmul.mubr.f32.vlgmr.msra.gmra.mrb[0].mxu0 %v16436_v37  ;;  %v12925_v37 = vpack.c.bf16 %v8653_v7, %v8652_v36  ;;  %v8666_v36 = vld [vmem:[%s18407_s3 + $0x9a0] sm:$0xff]  ;;  %v8667_v7 = vld [vmem:[%s18407_s3 + $0x9a8] sm:$0xff] }
 0x478   :  { %11609 = vmatprep.mubr.f32.mxu0 %v16439_v27  ;;  %12916 = vmatpush3.bf16.msra.mxu0 %v12913_v2  ;;  %v8654_v27 = vld [vmem:[%s18407_s3 + $0x940] sm:$0xff]  ;;  %v8659_v2 = vld [vmem:[%s18407_s3 + $0x968] sm:$0xff] }
 0x479   :  { %12918 = vmatprep.subr.bf16.mxu0 %v12917_v34  ;;  %v12937_v48 = vpack.c.bf16 %v8659_v2, %v8658_v54  ;;  %v8675_v54 = vld [vmem:[%s18407_s3 + $0x9e8] sm:$0xff] }
 0x47b   :  { %11610 = vmatmul.mubr.f32.gmra.mrb[2].mxu0 %v16448_v42  ;;  %v12929_v42 = vpack.c.bf16 %v8655_v50, %v8654_v27  ;;  %v8669_v27 = vld [vmem:[%s18407_s3 + $0x9b8] sm:$0xff]  ;;  %v16930_v50 = vld [vmem:[#allocation2 + $0x83] sm:$0xff] }
 0x47c   :  { %11612 = vmatprep.mubr.f32.mxu0 %v16451_v22  ;;  %12920 = vmatpush3.bf16.msra.mxu0 %v12917_v34  ;;  %v16868_v22 = vld [vmem:[#allocation2 + $0xa2] sm:$0xff] }
 0x47d   :  { %12922 = vmatprep.subr.bf16.mxu0 %v12921_v14  ;;  %v16894_v34 = vld [vmem:[#allocation2 + $0x142] sm:$0xff] }
 0x47f   :  { %11613 = vmatmul.mubr.f32.gmra.mrb[4].mxu0 %v16858_v32 }
 0x480   :  { %11615 = vmatprep.mubr.f32.mxu0 %v16461_v8  ;;  %12924 = vmatpush3.bf16.msra.mxu0 %v12921_v14  ;;  %v12933_v8 = vpack.c.bf16 %v8657_v56, %v8656_v55  ;;  %v8665_v14 = vld [vmem:[%s18407_s3 + $0x998] sm:$0xff]  ;;  %v8672_v55 = vld [vmem:[%s18407_s3 + $0x9d0] sm:$0xff] }
 0x481   :  { %12926 = vmatprep.subr.bf16.mxu0 %v12925_v37  ;;  %v8673_v56 = vld [vmem:[%s18407_s3 + $0x9d8] sm:$0xff] }
 0x483   :  { %11616 = vmatmul.mubr.f32.gmra.mrb[6].mxu0 %v16868_v22 }
 0x484   :  { %11618 = vmatprep.mubr.f32.mxu0 %v16470_v15  ;;  %12928 = vmatpush3.bf16.msra.mxu0 %v12925_v37  ;;  %v8660_v15 = vld [vmem:[%s18407_s3 + $0x970] sm:$0xff]  ;;  %v12953_v37 = vpack.c.bf16 %v8667_v7, %v8666_v36  ;;  %v8687_v36 = vld [vmem:[%s18407_s3 + $0xa48] sm:$0xff] }
 0x485   :  { %12930 = vmatprep.subr.bf16.mxu0 %v12929_v42  ;;  %v8688_v7 = vld [vmem:[%s18407_s3 + $0xa50] sm:$0xff] }
 0x487   :  { %11619 = vmatmul.mubr.f32.gmra.mrb[8].mxu0 %v16479_v29  ;;  %v12941_v29 = vpack.c.bf16 %v8661_v44, %v8660_v15  ;;  %v16966_v15 = vld [vmem:[#allocation2 + $0x143] sm:$0xff] }
 0x488   :  { %11621 = vmatprep.mubr.f32.mxu0 %v16482_v6  ;;  %12932 = vmatpush3.bf16.msra.mxu0 %v12929_v42  ;;  %v8662_v6 = vld [vmem:[%s18407_s3 + $0x980] sm:$0xff]  ;;  %v8671_v42 = vld [vmem:[%s18407_s3 + $0x9c8] sm:$0xff] }
 0x489   :  { %12934 = vmatprep.subr.bf16.mxu0 %v12933_v8  ;;  %v8679_v44 = vld [vmem:[%s18407_s3 + $0xa08] sm:$0xff] }
 0x48b   :  { %11622 = vmatmul.mubr.f32.gmra.mrb[10].mxu0 %v16491_v35  ;;  %v12945_v35 = vpack.c.bf16 %v8663_v19, %v8662_v6  ;;  %v8681_v6 = vld [vmem:[%s18407_s3 + $0xa18] sm:$0xff]  ;;  %v8682_v19 = vld [vmem:[%s18407_s3 + $0xa20] sm:$0xff] }
 0x48c   :  { %11624 = vmatprep.mubr.f32.mxu0 %v16494_v45  ;;  %12936 = vmatpush3.bf16.msra.mxu0 %v12933_v8  ;;  %v16904_v45 = vld [vmem:[#allocation2 + $0x162] sm:$0xff] }
 0x48d   :  { %12938 = vmatprep.subr.bf16.mxu0 %v12937_v48  ;;  %v8674_v8 = vld [vmem:[%s18407_s3 + $0x9e0] sm:$0xff] }
 0x48e   :  { %v12969_v2 = vpack.c.bf16 %v8675_v54, %v8674_v8  ;;  %v8699_v8 = vld [vmem:[%s18407_s3 + $0xaa8] sm:$0xff] }
 0x48f   :  { %11625 = vmatmul.mubr.f32.gmra.mrb[12].mxu0 %v16894_v34 }
 0x490   :  { %11627 = vmatprep.mubr.f32.mxu0 %v16504_v40  ;;  %12940 = vmatpush3.bf16.msra.mxu0 %v12937_v48  ;;  %v12949_v40 = vpack.c.bf16 %v8665_v14, %v8664_v43  ;;  %v8677_v48 = vld [vmem:[%s18407_s3 + $0x9f8] sm:$0xff] }
 0x491   :  { %12942 = vmatprep.subr.bf16.mxu0 %v12941_v29  ;;  %v8685_v14 = vld [vmem:[%s18407_s3 + $0xa38] sm:$0xff] }
 0x493   :  { %11628 = vmatmul.mubr.f32.gmra.mrb[14].mxu0 %v16904_v45 }
 0x494   :  { %12944 = vmatpush3.bf16.msra.mxu0 %v12941_v29  ;;  %11662 = vmatprep.mubr.f32.mxu0 %v16513_v25  ;;  %v8668_v25 = vld [vmem:[%s18407_s3 + $0x9b0] sm:$0xff] }
 0x495   :  { %12946 = vmatprep.subr.bf16.mxu0 %v12945_v35  ;;  %v8680_v29 = vld [vmem:[%s18407_s3 + $0xa10] sm:$0xff] }
 0x497   :  { %11663 = vmatmul.mubr.f32.vlgmr.msra.gmra.mrb[0].mxu0 %v16522_v20  ;;  %v12957_v20 = vpack.c.bf16 %v8669_v27, %v8668_v25  ;;  %v8690_v25 = vld [vmem:[%s18407_s3 + $0xa60] sm:$0xff]  ;;  %v8691_v27 = vld [vmem:[%s18407_s3 + $0xa68] sm:$0xff] }
 0x498   :  { %11665 = vmatprep.mubr.f32.mxu0 %v16525_v11  ;;  %12948 = vmatpush3.bf16.msra.mxu0 %v12945_v35  ;;  %v8670_v11 = vld [vmem:[%s18407_s3 + $0x9c0] sm:$0xff]  ;;  %v8683_v35 = vld [vmem:[%s18407_s3 + $0xa28] sm:$0xff] }
 0x499   :  { %12950 = vmatprep.subr.bf16.mxu0 %v12949_v40  ;;  %v12985_v43 = vpack.c.bf16 %v8683_v35, %v8682_v19  ;;  %v5624_v35 = vld [vmem:[#allocation2 + $0x130] sm:$0xff] }
 0x49b   :  { %11666 = vmatmul.mubr.f32.gmra.mrb[2].mxu0 %v16534_v47  ;;  %v12961_v47 = vpack.c.bf16 %v8671_v42, %v8670_v11  ;;  %v8693_v11 = vld [vmem:[%s18407_s3 + $0xa78] sm:$0xff]  ;;  %v17038_v42 = vld [vmem:[#allocation2 + $0x144] sm:$0xff] }
 0x49c   :  { %11668 = vmatprep.mubr.f32.mxu0 %v16537_v9  ;;  %12952 = vmatpush3.bf16.msra.mxu0 %v12949_v40  ;;  %v16940_v9 = vld [vmem:[#allocation2 + $0xa3] sm:$0xff] }
 0x49d   :  { %12954 = vmatprep.subr.bf16.mxu0 %v12953_v37  ;;  %v17002_v40 = vld [vmem:[#allocation2 + $0x84] sm:$0xff] }
 0x49f   :  { %11669 = vmatmul.mubr.f32.gmra.mrb[4].mxu0 %v16930_v50 }
 0x4a0   :  { %11671 = vmatprep.mubr.f32.mxu0 %v16547_v1  ;;  %12956 = vmatpush3.bf16.msra.mxu0 %v12953_v37  ;;  %v12965_v1 = vpack.c.bf16 %v8673_v56, %v8672_v55  ;;  %v8689_v37 = vld [vmem:[%s18407_s3 + $0xa58] sm:$0xff]  ;;  %v8696_v55 = vld [vmem:[%s18407_s3 + $0xa90] sm:$0xff] }
 0x4a1   :  { %12958 = vmatprep.subr.bf16.mxu0 %v12957_v20  ;;  %v8697_v56 = vld [vmem:[%s18407_s3 + $0xa98] sm:$0xff] }
 0x4a3   :  { %11672 = vmatmul.mubr.f32.gmra.mrb[6].mxu0 %v16940_v9 }
 0x4a4   :  { %11674 = vmatprep.mubr.f32.mxu0 %v16556_v57  ;;  %12960 = vmatpush3.bf16.msra.mxu0 %v12957_v20  ;;  %v8676_v57 = vld [vmem:[%s18407_s3 + $0x9f0] sm:$0xff]  ;;  %v13001_v20 = vpack.c.bf16 %v8691_v27, %v8690_v25  ;;  %v8713_v25 = vld [vmem:[%s18407_s3 + $0xb18] sm:$0xff] }
 0x4a5   :  { %12962 = vmatprep.subr.bf16.mxu0 %v12961_v47 }
 0x4a7   :  { %11675 = vmatmul.mubr.f32.gmra.mrb[8].mxu0 %v16565_v41  ;;  %v12973_v41 = vpack.c.bf16 %v8677_v48, %v8676_v57  ;;  %v5618_v57 = vld [vmem:[#allocation2 + $0x90] sm:$0xff]  ;;  %v8703_v48 = vld [vmem:[%s18407_s3 + $0xac8] sm:$0xff] }
 0x4a8   :  { %11677 = vmatprep.mubr.f32.mxu0 %v16568_v12  ;;  %12964 = vmatpush3.bf16.msra.mxu0 %v12961_v47  ;;  %v8678_v12 = vld [vmem:[%s18407_s3 + $0xa00] sm:$0xff]  ;;  %v8695_v47 = vld [vmem:[%s18407_s3 + $0xa88] sm:$0xff] }
 0x4a9   :  { %12966 = vmatprep.subr.bf16.mxu0 %v12965_v1 }
 0x4ab   :  { %11678 = vmatmul.mubr.f32.gmra.mrb[10].mxu0 %v16577_v18  ;;  %v12977_v18 = vpack.c.bf16 %v8679_v44, %v8678_v12  ;;  %v8705_v12 = vld [vmem:[%s18407_s3 + $0xad8] sm:$0xff]  ;;  %v5621_v44 = vld [vmem:[#allocation2 + $0x100] sm:$0xff] }
 0x4ac   :  { %11680 = vmatprep.mubr.f32.mxu0 %v16580_v38  ;;  %12968 = vmatpush3.bf16.msra.mxu0 %v12965_v1  ;;  %v16976_v38 = vld [vmem:[#allocation2 + $0x163] sm:$0xff] }
 0x4ad   :  { %12970 = vmatprep.subr.bf16.mxu0 %v12969_v2  ;;  %v8698_v1 = vld [vmem:[%s18407_s3 + $0xaa0] sm:$0xff] }
 0x4ae   :  { %v13017_v54 = vpack.c.bf16 %v8699_v8, %v8698_v1  ;;  %v8723_v1 = vld [vmem:[%s18407_s3 + $0xb68] sm:$0xff] }
 0x4af   :  { %11681 = vmatmul.mubr.f32.gmra.mrb[12].mxu0 %v16966_v15  ;;  %v5817_v8 = vld [vmem:[#allocation2 + $0x121] sm:$0xff] }
 0x4b0   :  { %11683 = vmatprep.mubr.f32.mxu0 %v16590_v30  ;;  %12972 = vmatpush3.bf16.msra.mxu0 %v12969_v2  ;;  %v12981_v30 = vpack.c.bf16 %v8681_v6, %v8680_v29  ;;  %v8701_v2 = vld [vmem:[%s18407_s3 + $0xab8] sm:$0xff]  ;;  %v5622_v29 = vld [vmem:[#allocation2 + $0x110] sm:$0xff]  ;;  %v8707_v6 = vld [vmem:[%s18407_s3 + $0xae8] sm:$0xff] }
 0x4b1   :  { %12974 = vmatprep.subr.bf16.mxu0 %v12973_v41 }
 0x4b3   :  { %11684 = vmatmul.mubr.f32.gmra.mrb[14].mxu0 %v16976_v38 }
 0x4b4   :  { %12976 = vmatpush3.bf16.msra.mxu0 %v12973_v41  ;;  %11718 = vmatprep.mubr.f32.mxu0 %v16599_v59  ;;  %v8684_v59 = vld [vmem:[%s18407_s3 + $0xa30] sm:$0xff] }
 0x4b5   :  { %12978 = vmatprep.subr.bf16.mxu0 %v12977_v18  ;;  %v5620_v41 = vld [vmem:[#allocation2 + $0xb0] sm:$0xff] }
 0x4b7   :  { %11719 = vmatmul.mubr.f32.vlgmr.msra.gmra.mrb[0].mxu0 %v16608_v28  ;;  %v12989_v28 = vpack.c.bf16 %v8685_v14, %v8684_v59  ;;  %v8709_v59 = vld [vmem:[%s18407_s3 + $0xaf8] sm:$0xff]  ;;  %v5625_v14 = vld [vmem:[#allocation2 + $0x140] sm:$0xff] }
 0x4b8   :  { %11721 = vmatprep.mubr.f32.mxu0 %v16611_v58  ;;  %12980 = vmatpush3.bf16.msra.mxu0 %v12977_v18  ;;  %v8686_v58 = vld [vmem:[%s18407_s3 + $0xa40] sm:$0xff] }
 0x4b9   :  { %12982 = vmatprep.subr.bf16.mxu0 %v12981_v30 }
 0x4bb   :  { %11722 = vmatmul.mubr.f32.gmra.mrb[2].mxu0 %v16620_v31  ;;  %v12993_v31 = vpack.c.bf16 %v8687_v36, %v8686_v58  ;;  %v5626_v58 = vld [vmem:[#allocation2 + $0x150] sm:$0xff]  ;;  %v8710_v36 = vld [vmem:[%s18407_s3 + $0xb00] sm:$0xff] }
 0x4bc   :  { %11724 = vmatprep.mubr.f32.mxu0 %v16623_v23  ;;  %12984 = vmatpush3.bf16.msra.mxu0 %v12981_v30  ;;  %v17012_v23 = vld [vmem:[#allocation2 + $0xa4] sm:$0xff] }
 0x4bd   :  { %12986 = vmatprep.subr.bf16.mxu0 %v12985_v43  ;;  %v5623_v30 = vld [vmem:[#allocation2 + $0x120] sm:$0xff] }
 0x4bf   :  { %11725 = vmatmul.mubr.f32.gmra.mrb[4].mxu0 %v17002_v40 }
 0x4c0   :  { %11727 = vmatprep.mubr.f32.mxu0 %v16633_v21  ;;  %12988 = vmatpush3.bf16.msra.mxu0 %v12985_v43  ;;  %v12997_v21 = vpack.c.bf16 %v8689_v37, %v8688_v7  ;;  %v8708_v43 = vld [vmem:[%s18407_s3 + $0xaf0] sm:$0xff] }
 0x4c1   :  { %12990 = vmatprep.subr.bf16.mxu0 %v12989_v28  ;;  %v5628_v37 = vld [vmem:[#allocation2 + $0x170] sm:$0xff] }
 0x4c3   :  { %11728 = vmatmul.mubr.f32.gmra.mrb[6].mxu0 %v17012_v23 }
 0x4c4   :  { %11730 = vmatprep.mubr.f32.mxu0 %v16642_v39  ;;  %12992 = vmatpush3.bf16.msra.mxu0 %v12989_v28  ;;  %v8692_v39 = vld [vmem:[%s18407_s3 + $0xa70] sm:$0xff]  ;;  %v13037_v28 = vpack.c.bf16 %v8709_v59, %v8708_v43  ;;  %v8733_v43 = vld [vmem:[%s18407_s3 + $0xbb8] sm:$0xff] }
 0x4c5   :  { %12994 = vmatprep.subr.bf16.mxu0 %v12993_v31 }
 0x4c7   :  { %11731 = vmatmul.mubr.f32.gmra.mrb[8].mxu0 %v16651_v0  ;;  %v13005_v0 = vpack.c.bf16 %v8693_v11, %v8692_v39  ;;  %v8717_v11 = vld [vmem:[%s18407_s3 + $0xb38] sm:$0xff] }
 0x4c8   :  { %11733 = vmatprep.mubr.f32.mxu0 %v16654_v5  ;;  %12996 = vmatpush3.bf16.msra.mxu0 %v12993_v31  ;;  %v8694_v5 = vld [vmem:[%s18407_s3 + $0xa80] sm:$0xff]  ;;  %v8711_v31 = vld [vmem:[%s18407_s3 + $0xb08] sm:$0xff] }
 0x4c9   :  { %12998 = vmatprep.subr.bf16.mxu0 %v12997_v21  ;;  %v13041_v7 = vpack.c.bf16 %v8711_v31, %v8710_v36  ;;  %v6008_v31 = vld [vmem:[#allocation2 + $0xb2] sm:$0xff] }
 0x4cb   :  { %11734 = vmatmul.mubr.f32.gmra.mrb[10].mxu0 %v16663_v16  ;;  %v13009_v16 = vpack.c.bf16 %v8695_v47, %v8694_v5  ;;  %v8719_v5 = vld [vmem:[%s18407_s3 + $0xb48] sm:$0xff]  ;;  %v5814_v47 = vld [vmem:[#allocation2 + $0xb1] sm:$0xff] }
 0x4cc   :  { %11736 = vmatprep.mubr.f32.mxu0 %v16666_v62  ;;  %13000 = vmatpush3.bf16.msra.mxu0 %v12997_v21  ;;  %v17048_v62 = vld [vmem:[#allocation2 + $0x164] sm:$0xff]  ;;  %v8712_v21 = vld [vmem:[%s18407_s3 + $0xb10] sm:$0xff] }
 0x4cd   :  { %13002 = vmatprep.subr.bf16.mxu0 %v13001_v20  ;;  %v13045_v27 = vpack.c.bf16 %v8713_v25, %v8712_v21  ;;  %v6010_v25 = vld [vmem:[#allocation2 + $0x112] sm:$0xff] }
 0x4cf   :  { %11737 = vmatmul.mubr.f32.gmra.mrb[12].mxu0 %v17038_v42 }
 0x4d0   :  { %11739 = vmatprep.mubr.f32.mxu0 %v16676_v63  ;;  %13004 = vmatpush3.bf16.msra.mxu0 %v13001_v20  ;;  %v13013_v63 = vpack.c.bf16 %v8697_v56, %v8696_v55  ;;  %v8715_v20 = vld [vmem:[%s18407_s3 + $0xb28] sm:$0xff] }
 0x4d1   :  { %13006 = vmatprep.subr.bf16.mxu0 %v13005_v0  ;;  %v5815_v55 = vld [vmem:[#allocation2 + $0x101] sm:$0xff] }
 0x4d3   :  { %11740 = vmatmul.mubr.f32.gmra.mrb[14].mxu0 %v17048_v62 }
 0x4d4   :  { %13008 = vmatpush3.bf16.msra.mxu0 %v13005_v0  ;;  %11774 = vmatprep.mubr.f32.mxu0 %v16685_v10  ;;  %v8700_v10 = vld [vmem:[%s18407_s3 + $0xab0] sm:$0xff] }
 0x4d5   :  { %13010 = vmatprep.subr.bf16.mxu0 %v13009_v16  ;;  %v5812_v0 = vld [vmem:[#allocation2 + $0x91] sm:$0xff] }
 0x4d7   :  { %11775 = vmatmul.mubr.f32.vlgmr.msra.gmra.mrb[0].mxu0 %v16694_v24  ;;  %v13021_v24 = vpack.c.bf16 %v8701_v2, %v8700_v10  ;;  %v5818_v10 = vld [vmem:[#allocation2 + $0x131] sm:$0xff] }
 0x4d8   :  { %11777 = vmatprep.mubr.f32.mxu0 %v16697_v52  ;;  %13012 = vmatpush3.bf16.msra.mxu0 %v13009_v16  ;;  %v8702_v52 = vld [vmem:[%s18407_s3 + $0xac0] sm:$0xff]  ;;  %v8721_v16 = vld [vmem:[%s18407_s3 + $0xb58] sm:$0xff]  ;;  %v8724_v2 = vld [vmem:[%s18407_s3 + $0xb70] sm:$0xff] }
 0x4d9   :  { %13014 = vmatprep.subr.bf16.mxu0 %v13013_v63 }
 0x4db   :  { %11778 = vmatmul.mubr.f32.gmra.mrb[2].mxu0 %v16706_v53  ;;  %v13025_v53 = vpack.c.bf16 %v8703_v48, %v8702_v52  ;;  %v5820_v52 = vld [vmem:[#allocation2 + $0x151] sm:$0xff]  ;;  %v8726_v48 = vld [vmem:[%s18407_s3 + $0xb80] sm:$0xff] }
 0x4dc   :  { %11780 = vmatprep.mubr.f32.mxu0 %v16709_v13  ;;  %13016 = vmatpush3.bf16.msra.mxu0 %v13013_v63  ;;  %v8704_v13 = vld [vmem:[%s18407_s3 + $0xad0] sm:$0xff] }
 0x4dd   :  { %13018 = vmatprep.subr.bf16.mxu0 %v13017_v54  ;;  %v13029_v18 = vpack.c.bf16 %v8705_v12, %v8704_v13  ;;  %v5816_v63 = vld [vmem:[#allocation2 + $0x111] sm:$0xff] }
 0x4de   :  { %v5822_v13 = vld [vmem:[#allocation2 + $0x171] sm:$0xff] }
 0x4df   :  { %11781 = vmatmul.mubr.f32.gmra.mrb[4].mxu0 %v5618_v57  ;;  %v8729_v12 = vld [vmem:[%s18407_s3 + $0xb98] sm:$0xff] }
 0x4e0   :  { %11783 = vmatprep.mubr.f32.mxu0 %v16719_v26  ;;  %13020 = vmatpush3.bf16.msra.mxu0 %v13017_v54  ;;  %v8706_v26 = vld [vmem:[%s18407_s3 + $0xae0] sm:$0xff] }
 0x4e1   :  { %13022 = vmatprep.subr.bf16.mxu0 %v13021_v24  ;;  %v13033_v19 = vpack.c.bf16 %v8707_v6, %v8706_v26  ;;  %v8731_v26 = vld [vmem:[%s18407_s3 + $0xba8] sm:$0xff] }
 0x4e2   :  { %v6003_v6 = vld [vmem:[#allocation2 + $0x62] sm:$0xff] }
 0x4e3   :  { %11784 = vmatmul.mubr.f32.gmra.mrb[6].mxu0 %v5620_v41 }
 0x4e4   :  { %11786 = vmatprep.mubr.f32.mxu0 %v5621_v44  ;;  %13024 = vmatpush3.bf16.msra.mxu0 %v13021_v24  ;;  %v8725_v24 = vld [vmem:[%s18407_s3 + $0xb78] sm:$0xff]  ;;  %v6001_v44 = vld [vmem:[#allocation2 + $0x42] sm:$0xff] }
 0x4e5   :  { %13026 = vmatprep.subr.bf16.mxu0 %v13025_v53  ;;  %v13069_v57 = vpack.c.bf16 %v8725_v24, %v8724_v2  ;;  %v6200_v24 = vld [vmem:[#allocation2 + $0x93] sm:$0xff] }
 0x4e7   :  { %11787 = vmatmul.mubr.f32.gmra.mrb[8].mxu0 %v5622_v29  ;;  %v6002_v29 = vld [vmem:[#allocation2 + $0x52] sm:$0xff] }
 0x4e8   :  { %11789 = vmatprep.mubr.f32.mxu0 %v5623_v30  ;;  %13028 = vmatpush3.bf16.msra.mxu0 %v13025_v53  ;;  %v8727_v53 = vld [vmem:[%s18407_s3 + $0xb88] sm:$0xff] }
 0x4e9   :  { %13030 = vmatprep.subr.bf16.mxu0 %v13029_v18  ;;  %v13073_v41 = vpack.c.bf16 %v8727_v53, %v8726_v48  ;;  %v6202_v53 = vld [vmem:[#allocation2 + $0xb3] sm:$0xff] }
 0x4eb   :  { %11790 = vmatmul.mubr.f32.gmra.mrb[10].mxu0 %v5624_v35  ;;  %v8732_v35 = vld [vmem:[%s18407_s3 + $0xbb0] sm:$0xff] }
 0x4ec   :  { %11792 = vmatprep.mubr.f32.mxu0 %v5625_v14  ;;  %13032 = vmatpush3.bf16.msra.mxu0 %v13029_v18  ;;  %v13085_v59 = vpack.c.bf16 %v8733_v43, %v8732_v35  ;;  %v6006_v14 = vld [vmem:[#allocation2 + $0x92] sm:$0xff]  ;;  %v6389_v43 = vld [vmem:[#allocation2 + $0x44] sm:$0xff] }
 0x4ed   :  { %13034 = vmatprep.subr.bf16.mxu0 %v13033_v19  ;;  %v6210_v35 = vld [vmem:[#allocation2 + $0x173] sm:$0xff] }
 0x4ef   :  { %11793 = vmatmul.mubr.f32.gmra.mrb[12].mxu0 %v5626_v58  ;;  %v8735_v58 = vld [vmem:[%s18407_s3 + $0xbc8] sm:$0xff] }
 0x4f0   :  { %11795 = vmatprep.mubr.f32.mxu0 %v16753_v33  ;;  %13036 = vmatpush3.bf16.msra.mxu0 %v13033_v19  ;;  %v8714_v33 = vld [vmem:[%s18407_s3 + $0xb20] sm:$0xff]  ;;  %v6004_v19 = vld [vmem:[#allocation2 + $0x72] sm:$0xff] }
 0x4f1   :  { %13038 = vmatprep.subr.bf16.mxu0 %v13037_v28  ;;  %v13049_v39 = vpack.c.bf16 %v8715_v20, %v8714_v33  ;;  %v6011_v33 = vld [vmem:[#allocation2 + $0x122] sm:$0xff] }
 0x4f3   :  { %11796 = vmatmul.mubr.f32.gmra.mrb[14].mxu0 %v5628_v37  ;;  %v6009_v37 = vld [vmem:[#allocation2 + $0x102] sm:$0xff] }
 0x4f4   :  { %13040 = vmatpush3.bf16.msra.mxu0 %v13037_v28  ;;  %11830 = vmatprep.mubr.f32.mxu0 %v16762_v49  ;;  %v8716_v49 = vld [vmem:[%s18407_s3 + $0xb30] sm:$0xff]  ;;  %v8734_v28 = vld [vmem:[%s18407_s3 + $0xbc0] sm:$0xff] }
 0x4f5   :  { %13042 = vmatprep.subr.bf16.mxu0 %v13041_v7  ;;  %v13089_v36 = vpack.c.bf16 %v8735_v58, %v8734_v28  ;;  %v6392_v28 = vld [vmem:[#allocation2 + $0x74] sm:$0xff]  ;;  %v6397_v58 = vld [vmem:[#allocation2 + $0x104] sm:$0xff] }
 0x4f7   :  { %11831 = vmatmul.mubr.f32.vlgmr.msra.gmra.mrb[0].mxu0 %v16771_v4  ;;  %v13053_v4 = vpack.c.bf16 %v8717_v11, %v8716_v49  ;;  %v8740_v49 = vld [vmem:[%s18407_s3 + $0xbf0] sm:$0xff]  ;;  %v8741_v11 = vld [vmem:[%s18407_s3 + $0xbf8] sm:$0xff] }
 0x4f8   :  { %11833 = vmatprep.mubr.f32.mxu0 %v16774_v3  ;;  %13044 = vmatpush3.bf16.msra.mxu0 %v13041_v7  ;;  %v8718_v3 = vld [vmem:[%s18407_s3 + $0xb40] sm:$0xff]  ;;  %v8737_v7 = vld [vmem:[%s18407_s3 + $0xbd8] sm:$0xff] }
 0x4f9   :  { %13046 = vmatprep.subr.bf16.mxu0 %v13045_v27 }
 0x4fb   :  { %11834 = vmatmul.mubr.f32.gmra.mrb[2].mxu0 %v16783_v60  ;;  %v13057_v60 = vpack.c.bf16 %v8719_v5, %v8718_v3  ;;  %v8742_v3 = vld [vmem:[%s18407_s3 + $0xc00] sm:$0xff]  ;;  %v8743_v5 = vld [vmem:[%s18407_s3 + $0xc08] sm:$0xff] }
 0x4fc   :  { %11836 = vmatprep.mubr.f32.mxu0 %v16786_v17  ;;  %13048 = vmatpush3.bf16.msra.mxu0 %v13045_v27  ;;  %v8720_v17 = vld [vmem:[%s18407_s3 + $0xb50] sm:$0xff]  ;;  %v8739_v27 = vld [vmem:[%s18407_s3 + $0xbe8] sm:$0xff] }
 0x4fd   :  { %13050 = vmatprep.subr.bf16.mxu0 %v13049_v39  ;;  %v13061_v56 = vpack.c.bf16 %v8721_v16, %v8720_v17  ;;  %v8745_v17 = vld [vmem:[%s18407_s3 + $0xc18] sm:$0xff]  ;;  %v6195_v16 = vld [vmem:[#allocation2 + $0x43] sm:$0xff] }
 0x4ff   :  { %11837 = vmatmul.mubr.f32.gmra.mrb[4].mxu0 %v5812_v0  ;;  %v6014_v0 = vld [vmem:[#allocation2 + $0x152] sm:$0xff] }
 0x500   :  { %11839 = vmatprep.mubr.f32.mxu0 %v16796_v61  ;;  %13052 = vmatpush3.bf16.msra.mxu0 %v13049_v39  ;;  %v8722_v61 = vld [vmem:[%s18407_s3 + $0xb60] sm:$0xff]  ;;  %v6012_v39 = vld [vmem:[#allocation2 + $0x132] sm:$0xff] }
 0x501   :  { %13054 = vmatprep.subr.bf16.mxu0 %v13053_v4  ;;  %v13065_v54 = vpack.c.bf16 %v8723_v1, %v8722_v61  ;;  %v6197_v61 = vld [vmem:[#allocation2 + $0x63] sm:$0xff] }
 0x503   :  { %11840 = vmatmul.mubr.f32.gmra.mrb[6].mxu0 %v5814_v47  ;;  %v6016_v47 = vld [vmem:[#allocation2 + $0x172] sm:$0xff] }
 0x504   :  { %11842 = vmatprep.mubr.f32.mxu0 %v5815_v55  ;;  %13056 = vmatpush3.bf16.msra.mxu0 %v13053_v4  ;;  %v13101_v4 = vpack.c.bf16 %v8741_v11, %v8740_v49 }
 0x505   :  { %13058 = vmatprep.subr.bf16.mxu0 %v13057_v60 }
 0x507   :  { %11843 = vmatmul.mubr.f32.gmra.mrb[8].mxu0 %v5816_v63  ;;  %v8747_v63 = vld [vmem:[%s18407_s3 + $0xc28] sm:$0xff] }
 0x508   :  { %11845 = vmatprep.mubr.f32.mxu0 %v5817_v8  ;;  %13060 = vmatpush3.bf16.msra.mxu0 %v13057_v60  ;;  %v13105_v60 = vpack.c.bf16 %v8743_v5, %v8742_v3  ;;  %v6198_v8 = vld [vmem:[#allocation2 + $0x73] sm:$0xff] }
 0x509   :  { %13062 = vmatprep.subr.bf16.mxu0 %v13061_v56 }
 0x50b   :  { %11846 = vmatmul.mubr.f32.gmra.mrb[10].mxu0 %v5818_v10  ;;  %v8749_v10 = vld [vmem:[%s18407_s3 + $0xc38] sm:$0xff] }
 0x50c   :  { %11848 = vmatprep.mubr.f32.mxu0 %v16822_v46  ;;  %13064 = vmatpush3.bf16.msra.mxu0 %v13061_v56  ;;  %v8728_v46 = vld [vmem:[%s18407_s3 + $0xb90] sm:$0xff] }
 0x50d   :  { %13066 = vmatprep.subr.bf16.mxu0 %v13065_v54  ;;  %v13077_v18 = vpack.c.bf16 %v8729_v12, %v8728_v46  ;;  %v6196_v56 = vld [vmem:[#allocation2 + $0x53] sm:$0xff] }
 0x50e   :  { %v6204_v12 = vld [vmem:[#allocation2 + $0x113] sm:$0xff] }
 0x50f   :  { %11849 = vmatmul.mubr.f32.gmra.mrb[12].mxu0 %v5820_v52  ;;  %v8751_v52 = vld [vmem:[%s18407_s3 + $0xc48] sm:$0xff] }
 0x510   :  { %11851 = vmatprep.mubr.f32.mxu0 %v16832_v51  ;;  %13068 = vmatpush3.bf16.msra.mxu0 %v13065_v54  ;;  %v8730_v51 = vld [vmem:[%s18407_s3 + $0xba0] sm:$0xff]  ;;  %v8748_v54 = vld [vmem:[%s18407_s3 + $0xc30] sm:$0xff] }
 0x511   :  { %13070 = vmatprep.subr.bf16.mxu0 %v13069_v57  ;;  %v13081_v30 = vpack.c.bf16 %v8731_v26, %v8730_v51  ;;  %v13117_v2 = vpack.c.bf16 %v8749_v10, %v8748_v54  ;;  %v6206_v51 = vld [vmem:[#allocation2 + $0x133] sm:$0xff]  ;;  %v8759_v54 = vld [vmem:[%s18409_s5 + $0x28] sm:$0xff] }
 0x512   :  { %v8756_v26 = vld [vmem:[%s18407_s3 + $0xc70] sm:$0xff] }
 0x513   :  { %11852 = vmatmul.mubr.f32.gmra.mrb[14].mxu0 %v5822_v13  ;;  %v6203_v13 = vld [vmem:[#allocation2 + $0x103] sm:$0xff]  ;;  %v8760_v10 = vld [vmem:[%s18409_s5 + $0x30] sm:$0xff] }
 0x514   :  { %13072 = vmatpush3.bf16.msra.mxu0 %v13069_v57  ;;  %11886 = vmatprep.mubr.f32.mxu0 %v6001_v44  ;;  %v8750_v57 = vld [vmem:[%s18407_s3 + $0xc40] sm:$0xff]  ;;  %v8755_v44 = vld [vmem:[%s18407_s3 + $0xc68] sm:$0xff] }
 0x515   :  { %13074 = vmatprep.subr.bf16.mxu0 %v13073_v41  ;;  %v13121_v48 = vpack.c.bf16 %v8751_v52, %v8750_v57  ;;  %v8763_v57 = vld [vmem:[%s18409_s5 + $0x48] sm:$0xff]  ;;  %v8764_v52 = vld [vmem:[%s18409_s5 + $0x50] sm:$0xff] }
 0x517   :  { %11887 = vmatmul.mubr.f32.vlgmr.msra.gmra.mrb[0].mxu0 %v6002_v29 }
 0x518   :  { %11889 = vmatprep.mubr.f32.mxu0 %v6003_v6  ;;  %13076 = vmatpush3.bf16.msra.mxu0 %v13073_v41  ;;  %v8753_v41 = vld [vmem:[%s18407_s3 + $0xc58] sm:$0xff] }
 0x519   :  { %13078 = vmatprep.subr.bf16.mxu0 %v13077_v18  ;;  %v8757_v6 = vld [vmem:[%s18407_s3 + $0xc78] sm:$0xff] }
 0x51b   :  { %11890 = vmatmul.mubr.f32.gmra.mrb[2].mxu0 %v6004_v19  ;;  %v6208_v19 = vld [vmem:[#allocation2 + $0x153] sm:$0xff] }
 0x51c   :  { %11892 = vmatprep.mubr.f32.mxu0 %v16858_v32  ;;  %13080 = vmatpush3.bf16.msra.mxu0 %v13077_v18  ;;  %v8736_v32 = vld [vmem:[%s18407_s3 + $0xbd0] sm:$0xff]  ;;  %v6205_v18 = vld [vmem:[#allocation2 + $0x123] sm:$0xff] }
 0x51d   :  { %13082 = vmatprep.subr.bf16.mxu0 %v13081_v30  ;;  %v13093_v21 = vpack.c.bf16 %v8737_v7, %v8736_v32  ;;  %v6400_v32 = vld [vmem:[#allocation2 + $0x134] sm:$0xff] }
 0x51e   :  { %v6402_v7 = vld [vmem:[#allocation2 + $0x154] sm:$0xff] }
 0x51f   :  { %11893 = vmatmul.mubr.f32.gmra.mrb[4].mxu0 %v6006_v14  ;;  %v6391_v14 = vld [vmem:[#allocation2 + $0x64] sm:$0xff] }
 0x520   :  { %11895 = vmatprep.mubr.f32.mxu0 %v16868_v22  ;;  %13084 = vmatpush3.bf16.msra.mxu0 %v13081_v30  ;;  %v8738_v22 = vld [vmem:[%s18407_s3 + $0xbe0] sm:$0xff]  ;;  %v13133_v30 = vpack.c.bf16 %v8757_v6, %v8756_v26  ;;  %v7213_v6 = vld [vmem:[%s18410_s6 + $0x90] sm:$0xff] }
 0x521   :  { %13086 = vmatprep.subr.bf16.mxu0 %v13085_v59  ;;  %v13097_v20 = vpack.c.bf16 %v8739_v27, %v8738_v22 }
 0x523   :  { %11896 = vmatmul.mubr.f32.gmra.mrb[6].mxu0 %v6008_v31  ;;  %v6399_v31 = vld [vmem:[#allocation2 + $0x124] sm:$0xff] }
 0x524   :  { %11898 = vmatprep.mubr.f32.mxu0 %v6009_v37  ;;  %13088 = vmatpush3.bf16.msra.mxu0 %v13085_v59  ;;  %v6390_v59 = vld [vmem:[#allocation2 + $0x54] sm:$0xff] }
 0x525   :  { %13090 = vmatprep.subr.bf16.mxu0 %v13089_v36 }
 0x527   :  { %11899 = vmatmul.mubr.f32.gmra.mrb[8].mxu0 %v6010_v25 }
 0x528   :  { %11901 = vmatprep.mubr.f32.mxu0 %v6011_v33  ;;  %13092 = vmatpush3.bf16.msra.mxu0 %v13089_v36  ;;  %v6398_v36 = vld [vmem:[#allocation2 + $0x114] sm:$0xff] }
 0x529   :  { %13094 = vmatprep.subr.bf16.mxu0 %v13093_v21 }
 0x52b   :  { %11902 = vmatmul.mubr.f32.gmra.mrb[10].mxu0 %v6012_v39 }
 0x52c   :  { %11904 = vmatprep.mubr.f32.mxu0 %v16894_v34  ;;  %13096 = vmatpush3.bf16.msra.mxu0 %v13093_v21  ;;  %v8744_v34 = vld [vmem:[%s18407_s3 + $0xc10] sm:$0xff] }
 0x52d   :  { %13098 = vmatprep.subr.bf16.mxu0 %v13097_v20  ;;  %v13109_v55 = vpack.c.bf16 %v8745_v17, %v8744_v34 }
 0x52f   :  { %11905 = vmatmul.mubr.f32.gmra.mrb[12].mxu0 %v6014_v0 }
 0x530   :  { %11907 = vmatprep.mubr.f32.mxu0 %v16904_v45  ;;  %13100 = vmatpush3.bf16.msra.mxu0 %v13097_v20  ;;  %v8746_v45 = vld [vmem:[%s18407_s3 + $0xc20] sm:$0xff] }
 0x531   :  { %13102 = vmatprep.subr.bf16.mxu0 %v13101_v4  ;;  %v13113_v1 = vpack.c.bf16 %v8747_v63, %v8746_v45  ;;  %v6584_v63 = vld [vmem:[%s18409_s5 + $0x8] sm:$0xff] }
 0x533   :  { %11908 = vmatmul.mubr.f32.gmra.mrb[14].mxu0 %v6016_v47 }
 0x534   :  { %13104 = vmatpush3.bf16.msra.mxu0 %v13101_v4  ;;  %11942 = vmatprep.mubr.f32.mxu0 %v6195_v16 }
 0x535   :  { %13106 = vmatprep.subr.bf16.mxu0 %v13105_v60 }
 0x537   :  { %11943 = vmatmul.mubr.f32.vlgmr.msra.gmra.mrb[0].mxu0 %v6196_v56 }
 0x538   :  { %11945 = vmatprep.mubr.f32.mxu0 %v6197_v61  ;;  %13108 = vmatpush3.bf16.msra.mxu0 %v13105_v60  ;;  %v6585_v61 = vld [vmem:[%s18409_s5 + $0x10] sm:$0xff] }
 0x539   :  { %13110 = vmatprep.subr.bf16.mxu0 %v13109_v55 }
 0x53b   :  { %11946 = vmatmul.mubr.f32.gmra.mrb[2].mxu0 %v6198_v8  ;;  %v8758_v8 = vld [vmem:[%s18409_s5 + $0x20] sm:$0xff] }
 0x53c   :  { %11948 = vmatprep.mubr.f32.mxu0 %v16930_v50  ;;  %13112 = vmatpush3.bf16.msra.mxu0 %v13109_v55  ;;  %v8752_v50 = vld [vmem:[%s18407_s3 + $0xc50] sm:$0xff] }
 0x53d   :  { %13114 = vmatprep.subr.bf16.mxu0 %v13113_v1  ;;  %v13125_v46 = vpack.c.bf16 %v8753_v41, %v8752_v50  ;;  %v8767_v50 = vld [vmem:[%s18409_s5 + $0x68] sm:$0xff]  ;;  %v8768_v41 = vld [vmem:[%s18409_s5 + $0x70] sm:$0xff] }
 0x53f   :  { %11949 = vmatmul.mubr.f32.gmra.mrb[4].mxu0 %v6200_v24  ;;  %v8762_v24 = vld [vmem:[%s18409_s5 + $0x40] sm:$0xff] }
 0x540   :  { %11951 = vmatprep.mubr.f32.mxu0 %v16940_v9  ;;  %13116 = vmatpush3.bf16.msra.mxu0 %v13113_v1  ;;  %v8754_v9 = vld [vmem:[%s18407_s3 + $0xc60] sm:$0xff]  ;;  %v6586_v1 = vld [vmem:[%s18409_s5 + $0x18] sm:$0xff] }
 0x541   :  { %13118 = vmatprep.subr.bf16.mxu0 %v13117_v2  ;;  %v13129_v29 = vpack.c.bf16 %v8755_v44, %v8754_v9  ;;  %v7195_v9 = vld [vmem:[%s18410_s6] sm:$0xff] }
 0x543   :  { %11952 = vmatmul.mubr.f32.gmra.mrb[6].mxu0 %v6202_v53  ;;  %v8766_v53 = vld [vmem:[%s18409_s5 + $0x60] sm:$0xff] }
 0x544   :  { %11954 = vmatprep.mubr.f32.mxu0 %v6203_v13  ;;  %13120 = vmatpush3.bf16.msra.mxu0 %v13117_v2  ;;  %v8761_v2 = vld [vmem:[%s18409_s5 + $0x38] sm:$0xff] }
 0x545   :  { %13122 = vmatprep.subr.bf16.mxu0 %v13121_v48  ;;  %v8769_v13 = vld [vmem:[%s18409_s5 + $0x78] sm:$0xff] }
 0x547   :  { %11955 = vmatmul.mubr.f32.gmra.mrb[8].mxu0 %v6204_v12  ;;  %v7212_v12 = vld [vmem:[%s18410_s6 + $0x88] sm:$0xff] }
 0x548   :  { %11957 = vmatprep.mubr.f32.mxu0 %v6205_v18  ;;  %13124 = vmatpush3.bf16.msra.mxu0 %v13121_v48  ;;  %v8765_v48 = vld [vmem:[%s18409_s5 + $0x58] sm:$0xff]  ;;  %v7196_v18 = vld [vmem:[%s18410_s6 + $0x8] sm:$0xff] }
 0x549   :  { %13126 = vmatprep.subr.bf16.mxu0 %v13125_v46 }
 0x54b   :  { %11958 = vmatmul.mubr.f32.gmra.mrb[10].mxu0 %v6206_v51 }
 0x54c   :  { %11960 = vmatprep.mubr.f32.mxu0 %v16966_v15  ;;  %13128 = vmatpush3.bf16.msra.mxu0 %v13125_v46  ;;  %v6394_v15 = vld [vmem:[#allocation2 + $0x94] sm:$0xff]  ;;  %v7211_v46 = vld [vmem:[%s18410_s6 + $0x80] sm:$0xff] }
 0x54d   :  { %13130 = vmatprep.subr.bf16.mxu0 %v13129_v29  ;;  %v13265_v44 = vpack.c.bf16 %v7212_v12, %v7211_v46 }
 0x54f   :  { %11961 = vmatmul.mubr.f32.gmra.mrb[12].mxu0 %v6208_v19  ;;  %v7197_v19 = vld [vmem:[%s18410_s6 + $0x10] sm:$0xff] }
 0x550   :  { %11963 = vmatprep.mubr.f32.mxu0 %v16976_v38  ;;  %13132 = vmatpush3.bf16.msra.mxu0 %v13129_v29  ;;  %v6396_v38 = vld [vmem:[#allocation2 + $0xb4] sm:$0xff]  ;;  %v13267_v29 = vpack.c.bf16 %v7196_v18, %v7195_v9 }
 0x551   :  { %13134 = vmatprep.subr.bf16.mxu0 %v13133_v30 }
 0x553   :  { %11964 = vmatmul.mubr.f32.gmra.mrb[14].mxu0 %v6210_v35 }
 0x554   :  { %13136 = vmatpush3.bf16.msra.mxu0 %v13133_v30  ;;  %11998 = vmatprep.mubr.f32.mxu0 %v6389_v43  ;;  %v7214_v30 = vld [vmem:[%s18410_s6 + $0x98] sm:$0xff] }
 0x555   :  { %v13269_v43 = vpack.c.bf16 %v7214_v30, %v7213_v6  ;;  %v13966_v30 = vmov 1983009808  }
 0x557   :  { %11999 = vmatmul.mubr.f32.vlgmr.msra.gmra.mrb[0].mxu0 %v6390_v59  ;;  %v7198_v59 = vld [vmem:[%s18410_s6 + $0x18] sm:$0xff] }
 0x558   :  { %12001 = vmatprep.mubr.f32.mxu0 %v6391_v14  ;;  %v7215_v14 = vld [vmem:[%s18410_s6 + $0xa0] sm:$0xff] }
 0x55b   :  { %12002 = vmatmul.mubr.f32.gmra.mrb[2].mxu0 %v6392_v28  ;;  %v7216_v28 = vld [vmem:[%s18410_s6 + $0xa8] sm:$0xff] }
 0x55c   :  { %12004 = vmatprep.mubr.f32.mxu0 %v17002_v40  ;;  %v6404_v40 = vld [vmem:[#allocation2 + $0x174] sm:$0xff] }
 0x55f   :  { %12005 = vmatmul.mubr.f32.gmra.mrb[4].mxu0 %v6394_v15 }
 0x560   :  { %12007 = vmatprep.mubr.f32.mxu0 %v17012_v23  ;;  %v6583_v23 = vld [vmem:[%s18409_s5] sm:$0xff] }
 0x561   :  { %12054 = vmatprep.mubr.f32.mxu1 %v6583_v23 }
 0x563   :  { %12008 = vmatmul.mubr.f32.gmra.mrb[6].mxu0 %v6396_v38  ;;  %v13271_v38 = vpack.c.bf16 %v7198_v59, %v7197_v19  ;;  %v6972_v19 = vunpack.c.l.s4 %v13966_v30 }
 0x564   :  { %12010 = vmatprep.mubr.f32.mxu0 %v6397_v58  ;;  %v13273_v58 = vpack.c.bf16 %v7216_v28, %v7215_v14 }
 0x567   :  { %12011 = vmatmul.mubr.f32.gmra.mrb[8].mxu0 %v6398_v36  ;;  %v7199_v36 = vld [vmem:[%s18410_s6 + $0x20] sm:$0xff] }
 0x568   :  { %12013 = vmatprep.mubr.f32.mxu0 %v6399_v31  ;;  %v7200_v31 = vld [vmem:[%s18410_s6 + $0x28] sm:$0xff] }
 0x56b   :  { %12014 = vmatmul.mubr.f32.gmra.mrb[10].mxu0 %v6400_v32  ;;  %v7217_v32 = vld [vmem:[%s18410_s6 + $0xb0] sm:$0xff] }
 0x56c   :  { %12016 = vmatprep.mubr.f32.mxu0 %v17038_v42 }
 0x56f   :  { %12017 = vmatmul.mubr.f32.gmra.mrb[12].mxu0 %v6402_v7  ;;  %v7218_v7 = vld [vmem:[%s18410_s6 + $0xb8] sm:$0xff] }
 0x570   :  { %12019 = vmatprep.mubr.f32.mxu0 %v17048_v62  ;;  %v13277_v23 = vpack.c.bf16 %v7218_v7, %v7217_v32 }
 0x573   :  { %12020 = vmatmul.mubr.f32.gmra.mrb[14].mxu0 %v6404_v40  ;;  %v13275_v40 = vpack.c.bf16 %v7200_v31, %v7199_v36 }
 0x62a   :  { %v12000_v37 = vpop.f32.mrb[0].mxu0 }
 0x62b   :  { %v6488_v21 = vpop.f32.mrb[1].mxu0 }
 0x62c   :  { %v17267_v25 = vpack.c.bf16 %v12000_v37, %v6488_v21  ;;  %v7201_v37 = vld [vmem:[%s18410_s6 + $0x30] sm:$0xff]  ;;  %v7202_v21 = vld [vmem:[%s18410_s6 + $0x38] sm:$0xff] }
 0x62e   :  { %v12003_v22 = vpop.f32.mrb[2].mxu0  ;;  %13138 = vmatprep.subr.bf16.mxu1 %v17267_v25 }
 0x62f   :  { %v6498_v27 = vpop.f32.mrb[3].mxu0  ;;  %13140 = vmatpush3.bf16.msra.mxu1 %v17267_v25 }
 0x630   :  { %v17271_v42 = vpack.c.bf16 %v12003_v22, %v6498_v27  ;;  %v7220_v22 = vld [vmem:[%s18410_s6 + $0xc8] sm:$0xff]  ;;  %v13279_v27 = vpack.c.bf16 %v7202_v21, %v7201_v37 }
 0x632   :  { %v12006_v62 = vpop.f32.mrb[4].mxu0  ;;  %13142 = vmatprep.subr.bf16.mxu1 %v17271_v42 }
 0x633   :  { %v6508_v33 = vpop.f32.mrb[5].mxu0  ;;  %13144 = vmatpush3.bf16.msra.mxu1 %v17271_v42 }
 0x634   :  { %v17275_v20 = vpack.c.bf16 %v12006_v62, %v6508_v33  ;;  %v7203_v62 = vld [vmem:[%s18410_s6 + $0x40] sm:$0xff]  ;;  %v7204_v33 = vld [vmem:[%s18410_s6 + $0x48] sm:$0xff] }
 0x636   :  { %v12009_v39 = vpop.f32.mrb[6].mxu0  ;;  %13146 = vmatprep.subr.bf16.mxu1 %v17275_v20 }
 0x637   :  { %v6518_v49 = vpop.f32.mrb[7].mxu0  ;;  %13148 = vmatpush3.bf16.msra.mxu1 %v17275_v20 }
 0x638   :  { %v17279_v11 = vpack.c.bf16 %v12009_v39, %v6518_v49  ;;  %v7222_v39 = vld [vmem:[%s18410_s6 + $0xd8] sm:$0xff]  ;;  %v13283_v49 = vpack.c.bf16 %v7204_v33, %v7203_v62 }
 0x63a   :  { %v12012_v4 = vpop.f32.mrb[8].mxu0  ;;  %13150 = vmatprep.subr.bf16.mxu1 %v17279_v11 }
 0x63b   :  { %v6528_v0 = vpop.f32.mrb[9].mxu0  ;;  %13152 = vmatpush3.bf16.msra.mxu1 %v17279_v11 }
 0x63c   :  { %v17283_v3 = vpack.c.bf16 %v12012_v4, %v6528_v0  ;;  %v7205_v4 = vld [vmem:[%s18410_s6 + $0x50] sm:$0xff]  ;;  %v7206_v0 = vld [vmem:[%s18410_s6 + $0x58] sm:$0xff] }
 0x63e   :  { %v12015_v5 = vpop.f32.mrb[10].mxu0  ;;  %13154 = vmatprep.subr.bf16.mxu1 %v17283_v3 }
 0x63f   :  { %v6538_v60 = vpop.f32.mrb[11].mxu0  ;;  %13156 = vmatpush3.bf16.msra.mxu1 %v17283_v3 }
 0x640   :  { %v17287_v47 = vpack.c.bf16 %v12015_v5, %v6538_v60  ;;  %v7224_v5 = vld [vmem:[%s18410_s6 + $0xe8] sm:$0xff]  ;;  %v13287_v60 = vpack.c.bf16 %v7206_v0, %v7205_v4 }
 0x642   :  { %v12018_v34 = vpop.f32.mrb[12].mxu0  ;;  %13158 = vmatprep.subr.bf16.mxu1 %v17287_v47 }
 0x643   :  { %v6548_v17 = vpop.f32.mrb[13].mxu0  ;;  %13160 = vmatpush3.bf16.msra.mxu1 %v17287_v47 }
 0x644   :  { %v17291_v16 = vpack.c.bf16 %v12018_v34, %v6548_v17  ;;  %v7207_v34 = vld [vmem:[%s18410_s6 + $0x60] sm:$0xff]  ;;  %v7208_v17 = vld [vmem:[%s18410_s6 + $0x68] sm:$0xff] }
 0x646   :  { %v12021_v55 = vpop.f32.mrb[14].mxu0  ;;  %13162 = vmatprep.subr.bf16.mxu1 %v17291_v16 }
 0x647   :  { %v6558_v56 = vpop.f32.mrb[15].mxu0  ;;  %13164 = vmatpush3.bf16.msra.mxu1 %v17291_v16 }
 0x648   :  { %v17295_v45 = vpack.c.bf16 %v12021_v55, %v6558_v56  ;;  %v7226_v55 = vld [vmem:[%s18410_s6 + $0xf8] sm:$0xff]  ;;  %v13291_v56 = vpack.c.bf16 %v7208_v17, %v7207_v34 }
 0x64a   :  { %13166 = vmatprep.subr.bf16.mxu1 %v17295_v45 }
 0x64b   :  { %13168 = vmatpush3.bf16.msra.mxu1 %v17295_v45 }
 0x64c   :  { %13170 = vmatprep.subr.bf16.mxu1 %v17267_v25 }
 0x64e   :  { %12055 = vmatmul.mubr.f32.vlgmr.msra.gmra.mrb[192].mxu1 %v6584_v63  ;;  %v7209_v63 = vld [vmem:[%s18410_s6 + $0x70] sm:$0xff] }
 0x64f   :  { %13172 = vmatpush3.bf16.msra.mxu1 %v17267_v25  ;;  %12057 = vmatprep.mubr.f32.mxu1 %v6585_v61  ;;  %v7210_v61 = vld [vmem:[%s18410_s6 + $0x78] sm:$0xff] }
 0x650   :  { %13174 = vmatprep.subr.bf16.mxu1 %v17271_v42 }
 0x652   :  { %12058 = vmatmul.mubr.f32.gmra.mrb[194].mxu1 %v6586_v1  ;;  %v7243_v1 = vld [vmem:[%s18410_s6 + $0x180] sm:$0xff] }
 0x653   :  { %13176 = vmatpush3.bf16.msra.mxu1 %v17271_v42  ;;  %12092 = vmatprep.mubr.f32.mxu1 %v8758_v8  ;;  %v7244_v8 = vld [vmem:[%s18410_s6 + $0x188] sm:$0xff] }
 0x654   :  { %13178 = vmatprep.subr.bf16.mxu1 %v17275_v20 }
 0x657   :  { %13180 = vmatpush3.bf16.msra.mxu1 %v17275_v20 }
 0x658   :  { %13182 = vmatprep.subr.bf16.mxu1 %v17279_v11 }
 0x65b   :  { %13184 = vmatpush3.bf16.msra.mxu1 %v17279_v11 }
 0x65c   :  { %13186 = vmatprep.subr.bf16.mxu1 %v17283_v3 }
 0x65f   :  { %13188 = vmatpush3.bf16.msra.mxu1 %v17283_v3 }
 0x660   :  { %13190 = vmatprep.subr.bf16.mxu1 %v17287_v47 }
 0x663   :  { %13192 = vmatpush3.bf16.msra.mxu1 %v17287_v47 }
 0x664   :  { %13194 = vmatprep.subr.bf16.mxu1 %v17291_v16 }
 0x667   :  { %13196 = vmatpush3.bf16.msra.mxu1 %v17291_v16 }
 0x668   :  { %13198 = vmatprep.subr.bf16.mxu1 %v17295_v45 }
 0x66b   :  { %13200 = vmatpush3.bf16.msra.mxu1 %v17295_v45 }
 0x66c   :  { %13202 = vmatprep.subr.bf16.mxu1 %v17267_v25 }
 0x66e   :  { %12093 = vmatmul.mubr.f32.vlgmr.msra.gmra.mrb[196].mxu1 %v8759_v54  ;;  %v13295_v54 = vpack.c.bf16 %v7210_v61, %v7209_v63 }
 0x66f   :  { %13204 = vmatpush3.bf16.msra.mxu1 %v17267_v25  ;;  %12095 = vmatprep.mubr.f32.mxu1 %v8760_v10  ;;  %v13297_v10 = vpack.c.bf16 %v7244_v8, %v7243_v1 }
 0x670   :  { %13206 = vmatprep.subr.bf16.mxu1 %v17271_v42 }
 0x672   :  { %12096 = vmatmul.mubr.f32.gmra.mrb[198].mxu1 %v8761_v2 }
 0x673   :  { %13208 = vmatpush3.bf16.msra.mxu1 %v17271_v42  ;;  %12130 = vmatprep.mubr.f32.mxu1 %v8762_v24 }
 0x674   :  { %13210 = vmatprep.subr.bf16.mxu1 %v17275_v20 }
 0x677   :  { %13212 = vmatpush3.bf16.msra.mxu1 %v17275_v20 }
 0x678   :  { %13214 = vmatprep.subr.bf16.mxu1 %v17279_v11 }
 0x67b   :  { %13216 = vmatpush3.bf16.msra.mxu1 %v17279_v11 }
 0x67c   :  { %13218 = vmatprep.subr.bf16.mxu1 %v17283_v3 }
 0x67f   :  { %13220 = vmatpush3.bf16.msra.mxu1 %v17283_v3 }
 0x680   :  { %13222 = vmatprep.subr.bf16.mxu1 %v17287_v47 }
 0x683   :  { %13224 = vmatpush3.bf16.msra.mxu1 %v17287_v47 }
 0x684   :  { %13226 = vmatprep.subr.bf16.mxu1 %v17291_v16 }
 0x687   :  { %13228 = vmatpush3.bf16.msra.mxu1 %v17291_v16 }
 0x688   :  { %13230 = vmatprep.subr.bf16.mxu1 %v17295_v45 }
 0x68b   :  { %13232 = vmatpush3.bf16.msra.mxu1 %v17295_v45 }
 0x68c   :  { %13234 = vmatprep.subr.bf16.mxu1 %v17267_v25 }
 0x68e   :  { %12131 = vmatmul.mubr.f32.vlgmr.msra.gmra.mrb[200].mxu1 %v8763_v57 }
 0x68f   :  { %13236 = vmatpush3.bf16.msra.mxu1 %v17267_v25  ;;  %12133 = vmatprep.mubr.f32.mxu1 %v8764_v52  ;;  %v7219_v25 = vld [vmem:[%s18410_s6 + $0xc0] sm:$0xff] }
 0x690   :  { %13238 = vmatprep.subr.bf16.mxu1 %v17271_v42 }
 0x692   :  { %12134 = vmatmul.mubr.f32.gmra.mrb[202].mxu1 %v8765_v48 }
 0x693   :  { %13240 = vmatpush3.bf16.msra.mxu1 %v17271_v42  ;;  %12168 = vmatprep.mubr.f32.mxu1 %v8766_v53  ;;  %v13281_v42 = vpack.c.bf16 %v7220_v22, %v7219_v25 }
 0x694   :  { %13242 = vmatprep.subr.bf16.mxu1 %v17275_v20 }
 0x697   :  { %13244 = vmatpush3.bf16.msra.mxu1 %v17275_v20  ;;  %v7221_v20 = vld [vmem:[%s18410_s6 + $0xd0] sm:$0xff] }
 0x698   :  { %13246 = vmatprep.subr.bf16.mxu1 %v17279_v11 }
 0x69b   :  { %13248 = vmatpush3.bf16.msra.mxu1 %v17279_v11  ;;  %v13285_v11 = vpack.c.bf16 %v7222_v39, %v7221_v20 }
 0x69c   :  { %13250 = vmatprep.subr.bf16.mxu1 %v17283_v3 }
 0x69f   :  { %13252 = vmatpush3.bf16.msra.mxu1 %v17283_v3  ;;  %v7223_v3 = vld [vmem:[%s18410_s6 + $0xe0] sm:$0xff] }
 0x6a0   :  { %13254 = vmatprep.subr.bf16.mxu1 %v17287_v47 }
 0x6a3   :  { %13256 = vmatpush3.bf16.msra.mxu1 %v17287_v47  ;;  %v13289_v47 = vpack.c.bf16 %v7224_v5, %v7223_v3 }
 0x6a4   :  { %13258 = vmatprep.subr.bf16.mxu1 %v17291_v16 }
 0x6a7   :  { %13260 = vmatpush3.bf16.msra.mxu1 %v17291_v16  ;;  %v7225_v16 = vld [vmem:[%s18410_s6 + $0xf0] sm:$0xff] }
 0x6a8   :  { %13262 = vmatprep.subr.bf16.mxu1 %v17295_v45 }
 0x6ab   :  { %13264 = vmatpush3.bf16.msra.mxu1 %v17295_v45  ;;  %v13293_v45 = vpack.c.bf16 %v7226_v55, %v7225_v16 }
 0x6ac   :  { %13266 = vmatprep.subr.bf16.mxu1 %v13265_v44 }
 0x6ae   :  { %12169 = vmatmul.mubr.f32.vlgmr.msra.gmra.mrb[204].mxu1 %v8767_v50 }
 0x6af   :  { %12171 = vmatprep.mubr.f32.mxu1 %v8768_v41  ;;  %13268 = vmatpush3.bf16.msra.mxu1 %v13267_v29 }
 0x6b0   :  { %13270 = vmatprep.subr.bf16.mxu1 %v13269_v43  ;;  %v6973_v43 = vunpack.c.0.s8 %v6972_v19 }
 0x6b2   :  { %12172 = vmatmul.mubr.f32.gmra.mrb[206].mxu1 %v8769_v13 }
 0x6b3   :  { %13272 = vmatpush3.bf16.msra.mxu1 %v13271_v38 }
 0x6b4   :  { %13274 = vmatprep.subr.bf16.mxu1 %v13273_v58 }
 0x6b7   :  { %13276 = vmatpush3.bf16.msra.mxu1 %v13275_v40 }
 0x6b8   :  { %13278 = vmatprep.subr.bf16.mxu1 %v13277_v23 }
 0x6bb   :  { %13280 = vmatpush3.bf16.msra.mxu1 %v13279_v27 }
 0x6bc   :  { %13282 = vmatprep.subr.bf16.mxu1 %v13281_v42 }
 0x6bf   :  { %13284 = vmatpush3.bf16.msra.mxu1 %v13283_v49 }
 0x6c0   :  { %13286 = vmatprep.subr.bf16.mxu1 %v13285_v11 }
 0x6c3   :  { %13288 = vmatpush3.bf16.msra.mxu1 %v13287_v60 }
 0x6c4   :  { %13290 = vmatprep.subr.bf16.mxu1 %v13289_v47 }
 0x6c7   :  { %13292 = vmatpush3.bf16.msra.mxu1 %v13291_v56 }
 0x6c8   :  { %13294 = vmatprep.subr.bf16.mxu1 %v13293_v45 }
 0x6cb   :  { %13296 = vmatpush3.bf16.msra.mxu1 %v13295_v54 }
 0x6cc   :  { %13298 = vmatprep.subr.bf16.mxu1 %v13297_v10 }
 0x721   :  { %v17404_v51 = vpop.f32.mrb[192].mxu1 }
 0x722   :  { %v17406_v26 = vpop.f32.mrb[193].mxu1 }
 0x725   :  { %v17417_v35 = vpop.f32.mrb[194].mxu1 }
 0x726   :  { %v17428_v15 = vpop.f32.mrb[195].mxu1 }
 0x741   :  { %v12094_v2 = vpop.f32.mrb[196].mxu1 }
 0x742   :  { %v6763_v24 = vmax.f32 %v17404_v51, %v12094_v2  ;;  %v6743_v57 = vpop.f32.mrb[197].mxu1  ;;  %v6974_v51 = vlaneseq }
 0x743   :  { %v6762_v52 = vmax.f32 %v17406_v26, %v6743_v57 }
 0x744   :  { %v6975_v59 = vshrl.u32 %v6974_v51, 7 }
 0x745   :  { %v12097_v48 = vpop.f32.mrb[198].mxu1 }
 0x746   :  { %v6765_v53 = vmax.f32 %v17417_v35, %v12097_v48  ;;  %v6753_v50 = vpop.f32.mrb[199].mxu1  ;;  %v8770_v35 = vld [vmem:[%s18408_s4] ss:$0 sm:$0xff]  ;;  %v17509_v58 = vsub.s32 %v6973_v43, %v6975_v59 }
 0x747   :  { %v6764_v41 = vmax.f32 %v17428_v15, %v6753_v50 }
 0x761   :  { %v12132_v13 = vpop.f32.mrb[200].mxu1 }
 0x762   :  { %v6857_v46 = vmax.f32 %v6763_v24, %v12132_v13  ;;  %v6837_v12 = vpop.f32.mrb[201].mxu1 }
 0x763   :  { %v6856_v9 = vmax.f32 %v6762_v52, %v6837_v12 }
 0x765   :  { %v12135_v44 = vpop.f32.mrb[202].mxu1 }
 0x766   :  { %v6859_v18 = vmax.f32 %v6765_v53, %v12135_v44  ;;  %v6847_v29 = vpop.f32.mrb[203].mxu1 }
 0x767   :  { %v6858_v6 = vmax.f32 %v6764_v41, %v6847_v29 }
 0x781   :  { %v12170_v26 = vpop.f32.mrb[204].mxu1 }
 0x782   :  { %v6951_v14 = vmax.f32 %v6857_v46, %v12170_v26  ;;  %v6931_v28 = vpop.f32.mrb[205].mxu1 }
 0x783   :  { %v6950_v15 = vmax.f32 %v6856_v9, %v6931_v28 }
 0x784   :  { %v6962_v38 = vadd.f32 %v8770_v35, %v6951_v14 }
 0x785   :  { %v6961_v36 = vadd.f32 %v8770_v35, %v6950_v15  ;;  %v12173_v31 = vpop.f32.mrb[206].mxu1 }
 0x786   :  { %v6966_v32 = vmax.f32 %v6962_v38, 0.0  ;;  %v6953_v7 = vmax.f32 %v6859_v18, %v12173_v31  ;;  %v6941_v40 = vpop.f32.mrb[207].mxu1 }
 0x787   :  { %v6965_v23 = vmax.f32 %v6961_v36, 0.0  ;;  %v6952_v37 = vmax.f32 %v6858_v6, %v6941_v40 }
 0x788   :  { %v7091_v21 = vrot.slane %v6966_v32, %v17509_v58  ;;  %v7137_v25 = vcombine.high %v6966_v32, %v6966_v32  ;;  %v6964_v22 = vadd.f32 %v8770_v35, %v6953_v7 }
 0x789   :  { %v17513_v27 = vrot.slane %v6965_v23, %v17509_v58  ;;  %v7029_v42 = vcombine.high %v6965_v23, %v6965_v23  ;;  %v6963_v62 = vadd.f32 %v8770_v35, %v6952_v37 }
 0x78a   :  { %v7117_v33 = vcombine.high %v7091_v21, %v7091_v21  ;;  %v7144_v20 = vrot.slane %v7137_v25, %v17509_v58  ;;  %v6968_v39 = vmax.f32 %v6964_v22, 0.0  ;;  %v7108_v0 = vrot.slane %v7091_v21, 1 }
 0x78b   :  { %v17518_v49 = vcombine.high %v17513_v27, %v17513_v27  ;;  %v17521_v11 = vrot.slane %v7029_v42, %v17509_v58  ;;  %v17523_v4 = vmax.f32 %v6963_v62, 0.0  ;;  %v7000_v5 = vrot.slane %v17513_v27, 1 }
 0x78c   :  { %v7171_v3 = vcombine.high %v7144_v20, %v7144_v20  ;;  %v7098_v60 = vrot.slane %v6968_v39, %v17509_v58  ;;  %v7128_v47 = vrot.slane %v7117_v33, 1  ;;  %v7162_v34 = vrot.slane %v7144_v20, 1 }
 0x78d   :  { %v7020_v17 = vrot.slane %v17518_v49, 1  ;;  %v7145_v16 = vcombine.high %v6968_v39, %v6968_v39  ;;  %v17530_v55 = vcombine.high %v17521_v11, %v17521_v11  ;;  %v6984_v54 = vrot.slane %v17523_v4, %v17509_v58 }
 0x78e   :  { %v7101_v56 = vrot.slane %v7098_v60, 7  ;;  %v7111_v45 = vsel %vm6990_vm0, %v7098_v60, %v7108_v0  ;;  %v7118_v63 = vcombine.high %v7098_v60, %v7098_v60  ;;  %v7182_v61 = vrot.slane %v7171_v3, 1 }
 0x78f   :  { %v7112_v1 = vsel %vm6992_vm1, %v7098_v60, %v7111_v45  ;;  %v7152_v8 = vrot.slane %v7145_v16, %v17509_v58  ;;  %v6989_v51 = vrot.slane %v6984_v54, 7  ;;  %v7003_v26 = vsel %vm6990_vm0, %v6984_v54, %v7000_v5 }
 0x790   :  { %v7102_v10 = vsel %vm6990_vm0, %v7101_v56, %v7091_v21  ;;  %v7113_v2 = vsel %vm6994_vm2, %v7098_v60, %v7112_v1  ;;  %v7121_v24 = vrot.slane %v7118_v63, 7  ;;  %v7131_v57 = vsel %vm6990_vm0, %v7118_v63, %v7128_v47 }
 0x791   :  { %v7103_v52 = vsel %vm6992_vm1, %v7101_v56, %v7102_v10  ;;  %v7114_v48 = vsel %vm6996_vm3, %v7098_v60, %v7113_v2  ;;  %v7132_v53 = vsel %vm6992_vm1, %v7118_v63, %v7131_v57  ;;  %v7155_v50 = vrot.slane %v7152_v8, 7 }
 0x792   :  { %v7104_v41 = vsel %vm6994_vm2, %v7101_v56, %v7103_v52  ;;  %7116 = vst [vmem:[#allocation3 + $0x12] sm:$0x3] %v7114_v48  ;;  %v7122_v13 = vsel %vm6990_vm0, %v7121_v24, %v7117_v33  ;;  %v7133_v46 = vsel %vm6994_vm2, %v7118_v63, %v7132_v53  ;;  %v7165_v12 = vsel %vm6990_vm0, %v7152_v8, %v7162_v34 }
 0x793   :  { %v7105_v9 = vsel %vm6996_vm3, %v7101_v56, %v7104_v41  ;;  %v7123_v44 = vsel %vm6992_vm1, %v7121_v24, %v7122_v13  ;;  %v7134_v18 = vsel %vm6996_vm3, %v7118_v63, %v7133_v46  ;;  %v7156_v29 = vsel %vm6990_vm0, %v7155_v50, %v7144_v20 }
 0x794   :  { %7107 = vst [vmem:[#allocation3 + $0x10] sm:$0x3] %v7105_v9  ;;  %7136 = vst [vmem:[#allocation3 + $0x16] sm:$0x3] %v7134_v18  ;;  %v7157_v6 = vsel %vm6992_vm1, %v7155_v50, %v7156_v29  ;;  %v7166_v30 = vsel %vm6992_vm1, %v7152_v8, %v7165_v12  ;;  %v7172_v19 = vcombine.high %v7152_v8, %v7152_v8  ;;  %v7054_v0 = vrot.slane %v17521_v11, 1  ;;  %v7227_v12 = vld [vmem:[%s18410_s6 + $0x100] sm:$0xff] }
 0x795   :  { %v7158_v43 = vsel %vm6994_vm2, %v7155_v50, %v7157_v6  ;;  %v7167_v59 = vsel %vm6994_vm2, %v7152_v8, %v7166_v30  ;;  %v7010_v35 = vcombine.high %v6984_v54, %v6984_v54  ;;  %v6991_v31 = vsel %vm6990_vm0, %v6989_v51, %v17513_v27  ;;  %v7245_v6 = vld [vmem:[%s18410_s6 + $0x190] sm:$0xff]  ;;  %v7246_v30 = vld [vmem:[%s18410_s6 + $0x198] sm:$0xff] }
 0x796   :  { %v7159_v14 = vsel %vm6996_vm3, %v7155_v50, %v7158_v43  ;;  %v7168_v28 = vsel %vm6996_vm3, %v7152_v8, %v7167_v59  ;;  %v17558_v15 = vrot.slane %v7172_v19, 7  ;;  %v7185_v38 = vsel %vm6990_vm0, %v7172_v19, %v7182_v61 }
 0x797   :  { %7161 = vst [vmem:[#allocation3 + $0x18] sm:$0x3] %v7159_v14  ;;  %7170 = vst [vmem:[#allocation3 + $0x1a] sm:$0x3] %v7168_v28  ;;  %v7186_v36 = vsel %vm6992_vm1, %v7172_v19, %v7185_v38  ;;  %v7004_v32 = vsel %vm6992_vm1, %v6984_v54, %v7003_v26  ;;  %v7013_v7 = vrot.slane %v7010_v35, 7  ;;  %v6993_v37 = vsel %vm6992_vm1, %v6989_v51, %v6991_v31  ;;  %v7230_v14 = vld [vmem:[%s18410_s6 + $0x118] sm:$0xff] }
 0x798   :  { %v7176_v40 = vsel %vm6990_vm0, %v17558_v15, %v7171_v3  ;;  %v7187_v23 = vsel %vm6994_vm2, %v7172_v19, %v7186_v36  ;;  %v7005_v21 = vsel %vm6994_vm2, %v6984_v54, %v7004_v32  ;;  %v6995_v22 = vsel %vm6994_vm2, %v6989_v51, %v6993_v37  ;;  %v7247_v36 = vld [vmem:[%s18410_s6 + $0x1a0] sm:$0xff]  ;;  %v7248_v31 = vld [vmem:[%s18410_s6 + $0x1a8] sm:$0xff]  ;;  %v7250_v37 = vld [vmem:[%s18410_s6 + $0x1b8] sm:$0xff] }
 0x799   :  { %v7188_v25 = vsel %vm6996_vm3, %v7172_v19, %v7187_v23  ;;  %v7006_v42 = vsel %vm6996_vm3, %v6984_v54, %v7005_v21  ;;  %v7014_v27 = vsel %vm6990_vm0, %v7013_v7, %v17518_v49  ;;  %v6997_v62 = vsel %vm6996_vm3, %v6989_v51, %v6995_v22  ;;  %v7249_v23 = vld [vmem:[%s18410_s6 + $0x1b0] sm:$0xff] }
 0x79a   :  { %7190 = vst [vmem:[#allocation3 + $0x1e] sm:$0x3] %v7188_v25  ;;  %7008 = vst [vmem:[#allocation3 + $0x2] sm:$0x3] %v7006_v42  ;;  %v7015_v33 = vsel %vm6992_vm1, %v7013_v7, %v7014_v27  ;;  %v7023_v20 = vsel %vm6990_vm0, %v7010_v35, %v7020_v17  ;;  %v7037_v39 = vcombine.high %v17523_v4, %v17523_v4  ;;  %v7074_v16 = vrot.slane %v17530_v55, 1  ;;  %v7233_v22 = vld [vmem:[%s18410_s6 + $0x130] sm:$0xff] }
 0x79b   :  { %6999 = vst [vmem:[#allocation3] sm:$0x3] %v6997_v62  ;;  %v7024_v3 = vsel %vm6992_vm1, %v7010_v35, %v7023_v20  ;;  %v7016_v5 = vsel %vm6994_vm2, %v7013_v7, %v7015_v33  ;;  %v7124_v34 = vsel %vm6994_vm2, %v7121_v24, %v7123_v44  ;;  %v7177_v44 = vsel %vm6992_vm1, %v17558_v15, %v7176_v40  ;;  %v7232_v40 = vld [vmem:[%s18410_s6 + $0x128] sm:$0xff]  ;;  %v7234_v42 = vld [vmem:[%s18410_s6 + $0x138] sm:$0xff]  ;;  %v7251_v27 = vld [vmem:[%s18410_s6 + $0x1c0] sm:$0xff] }
 0x79c   :  { %v7025_v49 = vsel %vm6994_vm2, %v7010_v35, %v7024_v3  ;;  %v7044_v60 = vrot.slane %v7037_v39, %v17509_v58  ;;  %v7017_v47 = vsel %vm6996_vm3, %v7013_v7, %v7016_v5  ;;  %v7125_v4 = vsel %vm6996_vm3, %v7121_v24, %v7124_v34  ;;  %v7252_v62 = vld [vmem:[%s18410_s6 + $0x1c8] sm:$0xff]  ;;  %v7235_v39 = vld [vmem:[%s18410_s6 + $0x140] sm:$0xff]  ;;  %v7253_v3 = vld [vmem:[%s18410_s6 + $0x1d0] sm:$0xff] }
 0x79d   :  { %v7026_v17 = vsel %vm6996_vm3, %v7010_v35, %v7025_v49  ;;  %7019 = vst [vmem:[#allocation3 + $0x4] sm:$0x3] %v7017_v47  ;;  %7127 = vst [vmem:[#allocation3 + $0x14] sm:$0x3] %v7125_v4  ;;  %v7178_v19 = vsel %vm6994_vm2, %v17558_v15, %v7177_v44  ;;  %v13301_v26 = vpack.c.bf16 %v7246_v30, %v7245_v6  ;;  %v7229_v35 = vld [vmem:[%s18410_s6 + $0x110] sm:$0xff]  ;;  %v7254_v5 = vld [vmem:[%s18410_s6 + $0x1d8] sm:$0xff] }
 0x79e   :  { %7028 = vst [vmem:[#allocation3 + $0x6] sm:$0x3] %v7026_v17  ;;  %v7047_v56 = vrot.slane %v7044_v60, 7  ;;  %v7057_v45 = vsel %vm6990_vm0, %v7044_v60, %v7054_v0  ;;  %v7064_v63 = vcombine.high %v7044_v60, %v7044_v60  ;;  %v7179_v28 = vsel %vm6996_vm3, %v17558_v15, %v7178_v19  ;;  %v7231_v15 = vld [vmem:[%s18410_s6 + $0x120] sm:$0xff]  ;;  %v7236_v0 = vld [vmem:[%s18410_s6 + $0x148] sm:$0xff]  ;;  %v7237_v47 = vld [vmem:[%s18410_s6 + $0x150] sm:$0xff] }
 0x79f   :  { %v7058_v61 = vsel %vm6992_vm1, %v7044_v60, %v7057_v45  ;;  %7181 = vst [vmem:[#allocation3 + $0x1c] sm:$0x3] %v7179_v28  ;;  %v13303_v32 = vpack.c.bf16 %v7230_v14, %v7229_v35  ;;  %v13305_v7 = vpack.c.bf16 %v7248_v31, %v7247_v36  ;;  %v13307_v21 = vpack.c.bf16 %v7232_v40, %v7231_v15  ;;  %v7238_v34 = vld [vmem:[%s18410_s6 + $0x158] sm:$0xff]  ;;  %v7255_v17 = vld [vmem:[%s18410_s6 + $0x1e0] sm:$0xff]  ;;  %v7256_v4 = vld [vmem:[%s18410_s6 + $0x1e8] sm:$0xff] }
 0x7a0   :  { %v7048_v1 = vsel %vm6990_vm0, %v7047_v56, %v17521_v11  ;;  %v7059_v8 = vsel %vm6994_vm2, %v7044_v60, %v7058_v61  ;;  %v7067_v54 = vrot.slane %v7064_v63, 7  ;;  %v7077_v10 = vsel %vm6990_vm0, %v7064_v63, %v7074_v16  ;;  %v7239_v45 = vld [vmem:[%s18410_s6 + $0x160] sm:$0xff]  ;;  %v7257_v61 = vld [vmem:[%s18410_s6 + $0x1f0] sm:$0xff]  ;;  %v7262_v44 = vld [vmem:[%s18410_s6 + $0x218] sm:$0xff] }
 0x7a1   :  { %v7049_v2 = vsel %vm6992_vm1, %v7047_v56, %v7048_v1  ;;  %v7060_v24 = vsel %vm6996_vm3, %v7044_v60, %v7059_v8  ;;  %v7078_v57 = vsel %vm6992_vm1, %v7064_v63, %v7077_v10  ;;  %v13309_v25 = vpack.c.bf16 %v7250_v37, %v7249_v23  ;;  %v7258_v1 = vld [vmem:[%s18410_s6 + $0x1f8] sm:$0xff]  ;;  %v7241_v10 = vld [vmem:[%s18410_s6 + $0x170] sm:$0xff]  ;;  %v7280_v6 = vld [vmem:[%s18410_s6 + $0x2a8] sm:$0xff] }
 0x7a2   :  { %v7050_v52 = vsel %vm6994_vm2, %v7047_v56, %v7049_v2  ;;  %7062 = vst [vmem:[#allocation3 + $0xa] sm:$0x3] %v7060_v24  ;;  %v7068_v48 = vsel %vm6990_vm0, %v7067_v54, %v17530_v55  ;;  %v7079_v53 = vsel %vm6994_vm2, %v7064_v63, %v7078_v57  ;;  %v7228_v55 = vld [vmem:[%s18410_s6 + $0x108] sm:$0xff]  ;;  %v13311_v33 = vpack.c.bf16 %v7234_v42, %v7233_v22  ;;  %v7242_v2 = vld [vmem:[%s18410_s6 + $0x178] sm:$0xff]  ;;  %v7275_v24 = vld [vmem:[%s18410_s6 + $0x280] sm:$0xff] }
 0x7a3   :  { %v7051_v11 = vsel %vm6996_vm3, %v7047_v56, %v7050_v52  ;;  %v7080_v50 = vsel %vm6996_vm3, %v7064_v63, %v7079_v53  ;;  %v7069_v41 = vsel %vm6992_vm1, %v7067_v54, %v7068_v48  ;;  %v13299_v43 = vpack.c.bf16 %v7228_v55, %v7227_v12  ;;  %v7240_v63 = vld [vmem:[%s18410_s6 + $0x168] sm:$0xff]  ;;  %v7265_v28 = vld [vmem:[%s18410_s6 + $0x230] sm:$0xff]  ;;  %v7283_v36 = vld [vmem:[%s18410_s6 + $0x2c0] sm:$0xff] }
 0x7a4   :  { %7053 = vst [vmem:[#allocation3 + $0x8] sm:$0x3] %v7051_v11  ;;  %7082 = vst [vmem:[#allocation3 + $0xe] sm:$0x3] %v7080_v50  ;;  %v7070_v13 = vsel %vm6994_vm2, %v7067_v54, %v7069_v41  ;;  %v13313_v20 = vpack.c.bf16 %v7252_v62, %v7251_v27  ;;  %v13315_v49 = vpack.c.bf16 %v7236_v0, %v7235_v39  ;;  %v7276_v57 = vld [vmem:[%s18410_s6 + $0x288] sm:$0xff]  ;;  %v7259_v11 = vld [vmem:[%s18410_s6 + $0x200] sm:$0xff] }
 0x7a5   :  { %v7191_v46 = vld [vmem:[#allocation3] sm:$0xff]  ;;  %v7071_v9 = vsel %vm6996_vm3, %v7067_v54, %v7070_v13  ;;  %v13317_v60 = vpack.c.bf16 %v7254_v5, %v7253_v3  ;;  %v13319_v16 = vpack.c.bf16 %v7238_v34, %v7237_v47  ;;  %v13321_v56 = vpack.c.bf16 %v7256_v4, %v7255_v17  ;;  %v7260_v50 = vld [vmem:[%s18410_s6 + $0x208] sm:$0xff]  ;;  %v7277_v13 = vld [vmem:[%s18410_s6 + $0x290] sm:$0xff] }
 0x7a6   :  { %v7469_v18 = vrot.slane %v7191_v46, %v17509_v58  ;;  %v7462_v29 = vcombine.high %v7191_v46, %v7191_v46  ;;  %7073 = vst [vmem:[#allocation3 + $0xc] sm:$0x3] %v7071_v9  ;;  %v13323_v8 = vpack.c.bf16 %v7240_v63, %v7239_v45  ;;  %v13325_v54 = vpack.c.bf16 %v7258_v1, %v7257_v61  ;;  %v7278_v46 = vld [vmem:[%s18410_s6 + $0x298] sm:$0xff]  ;;  %v7261_v9 = vld [vmem:[%s18410_s6 + $0x210] sm:$0xff]  ;;  %v7284_v31 = vld [vmem:[%s18410_s6 + $0x2c8] sm:$0xff] }
 0x7a7   :  { %v13327_v48 = vpack.c.bf16 %v7242_v2, %v7241_v10  ;;  %v13329_v53 = vpack.c.bf16 %v7276_v57, %v7275_v24  ;;  %v13331_v12 = vpack.c.bf16 %v7260_v50, %v7259_v11  ;;  %v13333_v55 = vpack.c.bf16 %v7278_v46, %v7277_v13  ;;  %v7267_v15 = vld [vmem:[%s18410_s6 + $0x240] sm:$0xff]  ;;  %v7268_v40 = vld [vmem:[%s18410_s6 + $0x248] sm:$0xff]  ;;  %v7285_v23 = vld [vmem:[%s18410_s6 + $0x2d0] sm:$0xff] }
 0x7a8   :  { %v7477_v51 = vcombine.high %v7469_v18, %v7469_v18  ;;  %v17626_v59 = vrot.slane %v7462_v29, %v17509_v58  ;;  %v7279_v29 = vld [vmem:[%s18410_s6 + $0x2a0] sm:$0xff]  ;;  %v13335_v30 = vpack.c.bf16 %v7262_v44, %v7261_v9  ;;  %v7286_v37 = vld [vmem:[%s18410_s6 + $0x2d8] sm:$0xff]  ;;  %v7269_v22 = vld [vmem:[%s18410_s6 + $0x250] sm:$0xff] }
 0x7a9   :  { %v13337_v19 = vpack.c.bf16 %v7280_v6, %v7279_v29  ;;  %v7270_v42 = vld [vmem:[%s18410_s6 + $0x258] sm:$0xff]  ;;  %v7287_v27 = vld [vmem:[%s18410_s6 + $0x2e0] sm:$0xff]  ;;  %v7288_v62 = vld [vmem:[%s18410_s6 + $0x2e8] sm:$0xff] }
 0x7aa   :  { %7610 = vmatprep.mubr.f32.mxu1 %v7477_v51  ;;  %v7478_v38 = vcombine.high %v17626_v59, %v17626_v59  ;;  %v7263_v51 = vld [vmem:[%s18410_s6 + $0x220] sm:$0xff]  ;;  %v7272_v0 = vld [vmem:[%s18410_s6 + $0x268] sm:$0xff]  ;;  %v7289_v3 = vld [vmem:[%s18410_s6 + $0x2f0] sm:$0xff] }
 0x7ab   :  { %7611 = vmatmul.mubr.f32.vlgmr.msra.gmra.mrb[208].mxu1 %v7469_v18  ;;  %v7271_v39 = vld [vmem:[%s18410_s6 + $0x260] sm:$0xff]  ;;  %v7290_v5 = vld [vmem:[%s18410_s6 + $0x2f8] sm:$0xff]  ;;  %v7273_v47 = vld [vmem:[%s18410_s6 + $0x270] sm:$0xff] }
 0x7ac   :  { %13300 = vmatpush3.bf16.msra.mxu1 %v13299_v43  ;;  %7680 = vmatprep.mubr.f32.mxu1 %v7478_v38  ;;  %v7264_v43 = vld [vmem:[%s18410_s6 + $0x228] sm:$0xff]  ;;  %v7266_v38 = vld [vmem:[%s18410_s6 + $0x238] sm:$0xff]  ;;  %v7307_v17 = vld [vmem:[%s18410_s6 + $0x380] sm:$0xff] }
 0x7ad   :  { %13302 = vmatprep.subr.bf16.mxu1 %v13301_v26  ;;  %v17716_v52 = vld [vmem:[#allocation3 + $0x8] sm:$0xff]  ;;  %v7281_v26 = vld [vmem:[%s18410_s6 + $0x2b0] sm:$0xff]  ;;  %v13339_v35 = vpack.c.bf16 %v7264_v43, %v7263_v51  ;;  %v7274_v34 = vld [vmem:[%s18410_s6 + $0x278] sm:$0xff] }
 0x7ae   :  { %v17726_v41 = vrot.slane %v17716_v52, %v17509_v58  ;;  %v7308_v4 = vld [vmem:[%s18410_s6 + $0x388] sm:$0xff]  ;;  %v7291_v63 = vld [vmem:[%s18410_s6 + $0x300] sm:$0xff]  ;;  %v7293_v24 = vld [vmem:[%s18410_s6 + $0x310] sm:$0xff] }
 0x7af   :  { %v13361_v45 = vpack.c.bf16 %v7308_v4, %v7307_v17  ;;  %v7292_v61 = vld [vmem:[%s18410_s6 + $0x308] sm:$0xff]  ;;  %v7294_v57 = vld [vmem:[%s18410_s6 + $0x318] sm:$0xff]  ;;  %v7295_v13 = vld [vmem:[%s18410_s6 + $0x320] sm:$0xff] }
 0x7b0   :  { %13304 = vmatpush3.bf16.msra.mxu1 %v13303_v32  ;;  %v7494_v18 = vcombine.high %v17726_v41, %v17726_v41  ;;  %v13343_v32 = vpack.c.bf16 %v7266_v38, %v7265_v28  ;;  %v13363_v10 = vpack.c.bf16 %v7292_v61, %v7291_v63  ;;  %v13367_v11 = vpack.c.bf16 %v7294_v57, %v7293_v24  ;;  %v7296_v46 = vld [vmem:[%s18410_s6 + $0x328] sm:$0xff]  ;;  %v7297_v44 = vld [vmem:[%s18410_s6 + $0x330] sm:$0xff]  ;;  %v7315_v29 = vld [vmem:[%s18410_s6 + $0x3c0] sm:$0xff] }
 0x7b1   :  { %13306 = vmatprep.subr.bf16.mxu1 %v13305_v7  ;;  %v13345_v7 = vpack.c.bf16 %v7284_v31, %v7283_v36  ;;  %v7316_v6 = vld [vmem:[%s18410_s6 + $0x3c8] sm:$0xff]  ;;  %v7299_v51 = vld [vmem:[%s18410_s6 + $0x340] sm:$0xff]  ;;  %v7301_v28 = vld [vmem:[%s18410_s6 + $0x350] sm:$0xff] }
 0x7b2   :  { %v7300_v43 = vld [vmem:[%s18410_s6 + $0x348] sm:$0xff]  ;;  %v7302_v38 = vld [vmem:[%s18410_s6 + $0x358] sm:$0xff]  ;;  %v7319_v36 = vld [vmem:[%s18410_s6 + $0x3e0] sm:$0xff] }
 0x7b3   :  { %v7320_v31 = vld [vmem:[%s18410_s6 + $0x3e8] sm:$0xff]  ;;  %v7325_v17 = vld [vmem:[%s18410_s6 + $0x410] sm:$0xff]  ;;  %v7326_v4 = vld [vmem:[%s18410_s6 + $0x418] sm:$0xff] }
 0x7b4   :  { %13308 = vmatpush3.bf16.msra.mxu1 %v13307_v21  ;;  %v13347_v21 = vpack.c.bf16 %v7268_v40, %v7267_v15  ;;  %v7303_v15 = vld [vmem:[%s18410_s6 + $0x360] sm:$0xff]  ;;  %v7304_v40 = vld [vmem:[%s18410_s6 + $0x368] sm:$0xff]  ;;  %v13399_v63 = vpack.c.bf16 %v7326_v4, %v7325_v17  ;;  %v7329_v57 = vld [vmem:[%s18410_s6 + $0x430] sm:$0xff] }
 0x7b5   :  { %13310 = vmatprep.subr.bf16.mxu1 %v13309_v25  ;;  %v13349_v25 = vpack.c.bf16 %v7286_v37, %v7285_v23  ;;  %v7321_v23 = vld [vmem:[%s18410_s6 + $0x3f0] sm:$0xff]  ;;  %v7322_v37 = vld [vmem:[%s18410_s6 + $0x3f8] sm:$0xff] }
 0x7b6   :  { %v7361_v4 = vld [vmem:[%s18410_s6 + $0x530] sm:$0xff] }
 0x7b8   :  { %13312 = vmatpush3.bf16.msra.mxu1 %v13311_v33  ;;  %v13351_v33 = vpack.c.bf16 %v7270_v42, %v7269_v22  ;;  %v7305_v22 = vld [vmem:[%s18410_s6 + $0x370] sm:$0xff]  ;;  %v7306_v42 = vld [vmem:[%s18410_s6 + $0x378] sm:$0xff] }
 0x7b9   :  { %13314 = vmatprep.subr.bf16.mxu1 %v13313_v20  ;;  %v13353_v20 = vpack.c.bf16 %v7288_v62, %v7287_v27  ;;  %v7339_v27 = vld [vmem:[%s18410_s6 + $0x480] sm:$0xff]  ;;  %v7340_v62 = vld [vmem:[%s18410_s6 + $0x488] sm:$0xff] }
 0x7bc   :  { %13316 = vmatpush3.bf16.msra.mxu1 %v13315_v49  ;;  %v13355_v49 = vpack.c.bf16 %v7272_v0, %v7271_v39  ;;  %v13393_v39 = vpack.c.bf16 %v7340_v62, %v7339_v27  ;;  %v7323_v0 = vld [vmem:[%s18410_s6 + $0x400] sm:$0xff]  ;;  %v7357_v27 = vld [vmem:[%s18410_s6 + $0x510] sm:$0xff]  ;;  %v7358_v62 = vld [vmem:[%s18410_s6 + $0x518] sm:$0xff] }
 0x7bd   :  { %13318 = vmatprep.subr.bf16.mxu1 %v13317_v60  ;;  %v13357_v60 = vpack.c.bf16 %v7290_v5, %v7289_v3  ;;  %v7324_v3 = vld [vmem:[%s18410_s6 + $0x408] sm:$0xff] }
 0x7c0   :  { %13320 = vmatpush3.bf16.msra.mxu1 %v13319_v16  ;;  %v7479_v16 = vcombine.high %v17716_v52, %v17716_v52 }
 0x7c1   :  { %13322 = vmatprep.subr.bf16.mxu1 %v13321_v56  ;;  %v13359_v56 = vpack.c.bf16 %v7274_v34, %v7273_v47  ;;  %v13395_v47 = vpack.c.bf16 %v7324_v3, %v7323_v0  ;;  %v13431_v0 = vpack.c.bf16 %v7358_v62, %v7357_v27  ;;  %v7393_v62 = vld [vmem:[%s18410_s6 + $0x630] sm:$0xff] }
 0x7c2   :  { %v17830_v1 = vrot.slane %v7479_v16, %v17509_v58 }
 0x7c4   :  { %13324 = vmatpush3.bf16.msra.mxu1 %v13323_v8  ;;  %v7309_v8 = vld [vmem:[%s18410_s6 + $0x390] sm:$0xff]  ;;  %v7495_v52 = vcombine.high %v17830_v1, %v17830_v1 }
 0x7c5   :  { %13326 = vmatprep.subr.bf16.mxu1 %v13325_v54  ;;  %v7310_v54 = vld [vmem:[%s18410_s6 + $0x398] sm:$0xff] }
 0x7c6   :  { %v13365_v2 = vpack.c.bf16 %v7310_v54, %v7309_v8  ;;  %v7327_v8 = vld [vmem:[%s18410_s6 + $0x420] sm:$0xff]  ;;  %v7328_v54 = vld [vmem:[%s18410_s6 + $0x428] sm:$0xff] }
 0x7c8   :  { %13328 = vmatpush3.bf16.msra.mxu1 %v13327_v48  ;;  %v7311_v48 = vld [vmem:[%s18410_s6 + $0x3a0] sm:$0xff] }
 0x7c9   :  { %13330 = vmatprep.subr.bf16.mxu1 %v13329_v53  ;;  %v7312_v53 = vld [vmem:[%s18410_s6 + $0x3a8] sm:$0xff] }
 0x7ca   :  { %v13369_v50 = vpack.c.bf16 %v7312_v53, %v7311_v48  ;;  %v7347_v48 = vld [vmem:[%s18410_s6 + $0x4c0] sm:$0xff]  ;;  %v7348_v53 = vld [vmem:[%s18410_s6 + $0x4c8] sm:$0xff] }
 0x7cb   :  { %7681 = vmatmul.mubr.f32.vlgmr.msra.gmra.mrb[210].mxu1 %v17626_v59  ;;  %v7282_v59 = vld [vmem:[%s18410_s6 + $0x2b8] sm:$0xff] }
 0x7cc   :  { %13332 = vmatpush3.bf16.msra.mxu1 %v13331_v12  ;;  %7750 = vmatprep.mubr.f32.mxu1 %v7494_v18  ;;  %v13341_v14 = vpack.c.bf16 %v7282_v59, %v7281_v26  ;;  %v7313_v12 = vld [vmem:[%s18410_s6 + $0x3b0] sm:$0xff]  ;;  %v7298_v18 = vld [vmem:[%s18410_s6 + $0x338] sm:$0xff] }
 0x7cd   :  { %13334 = vmatprep.subr.bf16.mxu1 %v13333_v55  ;;  %v13371_v55 = vpack.c.bf16 %v7296_v46, %v7295_v13  ;;  %v7317_v26 = vld [vmem:[%s18410_s6 + $0x3d0] sm:$0xff]  ;;  %v7318_v59 = vld [vmem:[%s18410_s6 + $0x3d8] sm:$0xff]  ;;  %v7331_v13 = vld [vmem:[%s18410_s6 + $0x440] sm:$0xff] }
 0x7ce   :  { %v7332_v46 = vld [vmem:[%s18410_s6 + $0x448] sm:$0xff] }
 0x7d0   :  { %13336 = vmatpush3.bf16.msra.mxu1 %v13335_v30  ;;  %v13375_v30 = vpack.c.bf16 %v7298_v18, %v7297_v44  ;;  %v7333_v44 = vld [vmem:[%s18410_s6 + $0x450] sm:$0xff]  ;;  %v7334_v18 = vld [vmem:[%s18410_s6 + $0x458] sm:$0xff] }
 0x7d1   :  { %13338 = vmatprep.subr.bf16.mxu1 %v13337_v19  ;;  %v13377_v19 = vpack.c.bf16 %v7316_v6, %v7315_v29  ;;  %v7351_v29 = vld [vmem:[%s18410_s6 + $0x4e0] sm:$0xff]  ;;  %v7352_v6 = vld [vmem:[%s18410_s6 + $0x4e8] sm:$0xff] }
 0x7d4   :  { %13340 = vmatpush3.bf16.msra.mxu1 %v13339_v35  ;;  %v13379_v35 = vpack.c.bf16 %v7300_v43, %v7299_v51  ;;  %v7335_v51 = vld [vmem:[%s18410_s6 + $0x460] sm:$0xff]  ;;  %v7336_v43 = vld [vmem:[%s18410_s6 + $0x468] sm:$0xff] }
 0x7d5   :  { %13342 = vmatprep.subr.bf16.mxu1 %v13341_v14  ;;  %v13381_v14 = vpack.c.bf16 %v7318_v59, %v7317_v26  ;;  %v7353_v26 = vld [vmem:[%s18410_s6 + $0x4f0] sm:$0xff]  ;;  %v7354_v59 = vld [vmem:[%s18410_s6 + $0x4f8] sm:$0xff] }
 0x7d8   :  { %13344 = vmatpush3.bf16.msra.mxu1 %v13343_v32  ;;  %v13383_v32 = vpack.c.bf16 %v7302_v38, %v7301_v28  ;;  %v7337_v28 = vld [vmem:[%s18410_s6 + $0x470] sm:$0xff]  ;;  %v7338_v38 = vld [vmem:[%s18410_s6 + $0x478] sm:$0xff] }
 0x7d9   :  { %13346 = vmatprep.subr.bf16.mxu1 %v13345_v7  ;;  %v13385_v7 = vpack.c.bf16 %v7320_v31, %v7319_v36  ;;  %v7371_v36 = vld [vmem:[%s18410_s6 + $0x580] sm:$0xff]  ;;  %v7372_v31 = vld [vmem:[%s18410_s6 + $0x588] sm:$0xff] }
 0x7dc   :  { %13348 = vmatpush3.bf16.msra.mxu1 %v13347_v21  ;;  %v13387_v21 = vpack.c.bf16 %v7304_v40, %v7303_v15  ;;  %v13425_v15 = vpack.c.bf16 %v7372_v31, %v7371_v36  ;;  %v7355_v40 = vld [vmem:[%s18410_s6 + $0x500] sm:$0xff]  ;;  %v7389_v36 = vld [vmem:[%s18410_s6 + $0x610] sm:$0xff]  ;;  %v7390_v31 = vld [vmem:[%s18410_s6 + $0x618] sm:$0xff] }
 0x7dd   :  { %13350 = vmatprep.subr.bf16.mxu1 %v13349_v25  ;;  %v13389_v25 = vpack.c.bf16 %v7322_v37, %v7321_v23  ;;  %v7356_v23 = vld [vmem:[%s18410_s6 + $0x508] sm:$0xff] }
 0x7e0   :  { %13352 = vmatpush3.bf16.msra.mxu1 %v13351_v33  ;;  %v17925_v33 = vld [vmem:[#allocation3 + $0x10] sm:$0xff] }
 0x7e1   :  { %13354 = vmatprep.subr.bf16.mxu1 %v13353_v20  ;;  %v13391_v20 = vpack.c.bf16 %v7306_v42, %v7305_v22  ;;  %v17935_v5 = vrot.slane %v17925_v33, %v17509_v58  ;;  %v13427_v22 = vpack.c.bf16 %v7356_v23, %v7355_v40  ;;  %v13463_v40 = vpack.c.bf16 %v7390_v31, %v7389_v36  ;;  %v7425_v36 = vld [vmem:[%s18410_s6 + $0x730] sm:$0xff]  ;;  %v7426_v31 = vld [vmem:[%s18410_s6 + $0x738] sm:$0xff] }
 0x7e3   :  { %v7511_v16 = vcombine.high %v17935_v5, %v17935_v5 }
 0x7e4   :  { %13356 = vmatpush3.bf16.msra.mxu1 %v13355_v49  ;;  %v7341_v49 = vld [vmem:[%s18410_s6 + $0x490] sm:$0xff] }
 0x7e5   :  { %13358 = vmatprep.subr.bf16.mxu1 %v13357_v60  ;;  %v7342_v60 = vld [vmem:[%s18410_s6 + $0x498] sm:$0xff] }
 0x7e6   :  { %v13397_v34 = vpack.c.bf16 %v7342_v60, %v7341_v49  ;;  %v7359_v49 = vld [vmem:[%s18410_s6 + $0x520] sm:$0xff]  ;;  %v7360_v60 = vld [vmem:[%s18410_s6 + $0x528] sm:$0xff] }
 0x7e8   :  { %13360 = vmatpush3.bf16.msra.mxu1 %v13359_v56  ;;  %v7343_v56 = vld [vmem:[%s18410_s6 + $0x4a0] sm:$0xff] }
 0x7e9   :  { %13362 = vmatprep.subr.bf16.mxu1 %v13361_v45  ;;  %v7344_v45 = vld [vmem:[%s18410_s6 + $0x4a8] sm:$0xff] }
 0x7ea   :  { %v13401_v61 = vpack.c.bf16 %v7344_v45, %v7343_v56  ;;  %v7379_v56 = vld [vmem:[%s18410_s6 + $0x5c0] sm:$0xff]  ;;  %v7380_v45 = vld [vmem:[%s18410_s6 + $0x5c8] sm:$0xff] }
 0x7eb   :  { %7751 = vmatmul.mubr.f32.vlgmr.msra.gmra.mrb[212].mxu1 %v17726_v41  ;;  %v7314_v41 = vld [vmem:[%s18410_s6 + $0x3b8] sm:$0xff] }
 0x7ec   :  { %13364 = vmatpush3.bf16.msra.mxu1 %v13363_v10  ;;  %7820 = vmatprep.mubr.f32.mxu1 %v7495_v52  ;;  %v13373_v9 = vpack.c.bf16 %v7314_v41, %v7313_v12  ;;  %v7345_v10 = vld [vmem:[%s18410_s6 + $0x4b0] sm:$0xff]  ;;  %v7330_v52 = vld [vmem:[%s18410_s6 + $0x438] sm:$0xff] }
 0x7ed   :  { %13366 = vmatprep.subr.bf16.mxu1 %v13365_v2  ;;  %v13403_v2 = vpack.c.bf16 %v7328_v54, %v7327_v8  ;;  %v7349_v12 = vld [vmem:[%s18410_s6 + $0x4d0] sm:$0xff]  ;;  %v7350_v41 = vld [vmem:[%s18410_s6 + $0x4d8] sm:$0xff]  ;;  %v7363_v8 = vld [vmem:[%s18410_s6 + $0x540] sm:$0xff] }
 0x7ee   :  { %v7364_v54 = vld [vmem:[%s18410_s6 + $0x548] sm:$0xff] }
 0x7f0   :  { %13368 = vmatpush3.bf16.msra.mxu1 %v13367_v11  ;;  %v13407_v11 = vpack.c.bf16 %v7330_v52, %v7329_v57  ;;  %v7365_v57 = vld [vmem:[%s18410_s6 + $0x550] sm:$0xff]  ;;  %v7366_v52 = vld [vmem:[%s18410_s6 + $0x558] sm:$0xff] }
 0x7f1   :  { %13370 = vmatprep.subr.bf16.mxu1 %v13369_v50  ;;  %v13409_v50 = vpack.c.bf16 %v7348_v53, %v7347_v48  ;;  %v7383_v48 = vld [vmem:[%s18410_s6 + $0x5e0] sm:$0xff]  ;;  %v7384_v53 = vld [vmem:[%s18410_s6 + $0x5e8] sm:$0xff] }
 0x7f4   :  { %13372 = vmatpush3.bf16.msra.mxu1 %v13371_v55  ;;  %v13411_v55 = vpack.c.bf16 %v7332_v46, %v7331_v13  ;;  %v7367_v13 = vld [vmem:[%s18410_s6 + $0x560] sm:$0xff]  ;;  %v7368_v46 = vld [vmem:[%s18410_s6 + $0x568] sm:$0xff] }
 0x7f5   :  { %13374 = vmatprep.subr.bf16.mxu1 %v13373_v9  ;;  %v13413_v9 = vpack.c.bf16 %v7350_v41, %v7349_v12  ;;  %v7385_v12 = vld [vmem:[%s18410_s6 + $0x5f0] sm:$0xff]  ;;  %v7386_v41 = vld [vmem:[%s18410_s6 + $0x5f8] sm:$0xff] }
 0x7f8   :  { %13376 = vmatpush3.bf16.msra.mxu1 %v13375_v30  ;;  %v13415_v30 = vpack.c.bf16 %v7334_v18, %v7333_v44  ;;  %v7369_v44 = vld [vmem:[%s18410_s6 + $0x570] sm:$0xff]  ;;  %v7370_v18 = vld [vmem:[%s18410_s6 + $0x578] sm:$0xff] }
 0x7f9   :  { %13378 = vmatprep.subr.bf16.mxu1 %v13377_v19  ;;  %v13417_v19 = vpack.c.bf16 %v7352_v6, %v7351_v29  ;;  %v7403_v29 = vld [vmem:[%s18410_s6 + $0x680] sm:$0xff]  ;;  %v7404_v6 = vld [vmem:[%s18410_s6 + $0x688] sm:$0xff] }
 0x7fc   :  { %13380 = vmatpush3.bf16.msra.mxu1 %v13379_v35  ;;  %v13419_v35 = vpack.c.bf16 %v7336_v43, %v7335_v51  ;;  %v13457_v51 = vpack.c.bf16 %v7404_v6, %v7403_v29  ;;  %v7387_v43 = vld [vmem:[%s18410_s6 + $0x600] sm:$0xff]  ;;  %v7421_v29 = vld [vmem:[%s18410_s6 + $0x710] sm:$0xff] }
 0x7fd   :  { %13382 = vmatprep.subr.bf16.mxu1 %v13381_v14  ;;  %v13421_v14 = vpack.c.bf16 %v7354_v59, %v7353_v26  ;;  %v7388_v26 = vld [vmem:[%s18410_s6 + $0x608] sm:$0xff] }
 0x800   :  { %13384 = vmatpush3.bf16.msra.mxu1 %v13383_v32  ;;  %v7496_v32 = vcombine.high %v17925_v33, %v17925_v33 }
 0x801   :  { %13386 = vmatprep.subr.bf16.mxu1 %v13385_v7  ;;  %v13423_v7 = vpack.c.bf16 %v7338_v38, %v7337_v28  ;;  %v13459_v28 = vpack.c.bf16 %v7388_v26, %v7387_v43  ;;  %v7423_v26 = vld [vmem:[%s18410_s6 + $0x720] sm:$0xff] }
 0x802   :  { %v18039_v37 = vrot.slane %v7496_v32, %v17509_v58 }
 0x804   :  { %13388 = vmatpush3.bf16.msra.mxu1 %v13387_v21  ;;  %v7373_v21 = vld [vmem:[%s18410_s6 + $0x590] sm:$0xff]  ;;  %v7512_v33 = vcombine.high %v18039_v37, %v18039_v37 }
 0x805   :  { %13390 = vmatprep.subr.bf16.mxu1 %v13389_v25  ;;  %v7374_v25 = vld [vmem:[%s18410_s6 + $0x598] sm:$0xff] }
 0x806   :  { %v13429_v42 = vpack.c.bf16 %v7374_v25, %v7373_v21  ;;  %v7391_v21 = vld [vmem:[%s18410_s6 + $0x620] sm:$0xff]  ;;  %v7392_v25 = vld [vmem:[%s18410_s6 + $0x628] sm:$0xff] }
 0x808   :  { %13392 = vmatpush3.bf16.msra.mxu1 %v13391_v20  ;;  %v7375_v20 = vld [vmem:[%s18410_s6 + $0x5a0] sm:$0xff] }
 0x809   :  { %13394 = vmatprep.subr.bf16.mxu1 %v13393_v39  ;;  %v7376_v39 = vld [vmem:[%s18410_s6 + $0x5a8] sm:$0xff] }
 0x80a   :  { %v13433_v3 = vpack.c.bf16 %v7376_v39, %v7375_v20  ;;  %v7411_v20 = vld [vmem:[%s18410_s6 + $0x6c0] sm:$0xff]  ;;  %v7412_v39 = vld [vmem:[%s18410_s6 + $0x6c8] sm:$0xff] }
 0x80b   :  { %7821 = vmatmul.mubr.f32.vlgmr.msra.gmra.mrb[214].mxu1 %v17830_v1  ;;  %v7346_v1 = vld [vmem:[%s18410_s6 + $0x4b8] sm:$0xff] }
 0x80c   :  { %13396 = vmatpush3.bf16.msra.mxu1 %v13395_v47  ;;  %7890 = vmatprep.mubr.f32.mxu1 %v7511_v16  ;;  %v13405_v24 = vpack.c.bf16 %v7346_v1, %v7345_v10  ;;  %v7377_v47 = vld [vmem:[%s18410_s6 + $0x5b0] sm:$0xff]  ;;  %v7362_v16 = vld [vmem:[%s18410_s6 + $0x538] sm:$0xff] }
 0x80d   :  { %13398 = vmatprep.subr.bf16.mxu1 %v13397_v34  ;;  %v13435_v34 = vpack.c.bf16 %v7360_v60, %v7359_v49  ;;  %v7381_v10 = vld [vmem:[%s18410_s6 + $0x5d0] sm:$0xff]  ;;  %v7382_v1 = vld [vmem:[%s18410_s6 + $0x5d8] sm:$0xff]  ;;  %v7395_v49 = vld [vmem:[%s18410_s6 + $0x640] sm:$0xff] }
 0x80e   :  { %v7396_v60 = vld [vmem:[%s18410_s6 + $0x648] sm:$0xff] }
 0x810   :  { %13400 = vmatpush3.bf16.msra.mxu1 %v13399_v63  ;;  %v13439_v63 = vpack.c.bf16 %v7362_v16, %v7361_v4  ;;  %v7397_v4 = vld [vmem:[%s18410_s6 + $0x650] sm:$0xff]  ;;  %v7398_v16 = vld [vmem:[%s18410_s6 + $0x658] sm:$0xff] }
 0x811   :  { %13402 = vmatprep.subr.bf16.mxu1 %v13401_v61  ;;  %v13441_v61 = vpack.c.bf16 %v7380_v45, %v7379_v56  ;;  %v7415_v56 = vld [vmem:[%s18410_s6 + $0x6e0] sm:$0xff]  ;;  %v7416_v45 = vld [vmem:[%s18410_s6 + $0x6e8] sm:$0xff] }
 0x814   :  { %13404 = vmatpush3.bf16.msra.mxu1 %v13403_v2  ;;  %v13443_v2 = vpack.c.bf16 %v7364_v54, %v7363_v8  ;;  %v7399_v8 = vld [vmem:[%s18410_s6 + $0x660] sm:$0xff]  ;;  %v7400_v54 = vld [vmem:[%s18410_s6 + $0x668] sm:$0xff] }
 0x815   :  { %13406 = vmatprep.subr.bf16.mxu1 %v13405_v24  ;;  %v13445_v24 = vpack.c.bf16 %v7382_v1, %v7381_v10  ;;  %v7417_v10 = vld [vmem:[%s18410_s6 + $0x6f0] sm:$0xff]  ;;  %v7418_v1 = vld [vmem:[%s18410_s6 + $0x6f8] sm:$0xff] }
 0x818   :  { %13408 = vmatpush3.bf16.msra.mxu1 %v13407_v11  ;;  %v13447_v11 = vpack.c.bf16 %v7366_v52, %v7365_v57  ;;  %v7401_v57 = vld [vmem:[%s18410_s6 + $0x670] sm:$0xff]  ;;  %v7402_v52 = vld [vmem:[%s18410_s6 + $0x678] sm:$0xff] }
 0x819   :  { %13410 = vmatprep.subr.bf16.mxu1 %v13409_v50  ;;  %v13449_v50 = vpack.c.bf16 %v7384_v53, %v7383_v48  ;;  %v7435_v48 = vld [vmem:[%s18410_s6 + $0x780] sm:$0xff]  ;;  %v7436_v53 = vld [vmem:[%s18410_s6 + $0x788] sm:$0xff] }
 0x81c   :  { %13412 = vmatpush3.bf16.msra.mxu1 %v13411_v55  ;;  %v13451_v55 = vpack.c.bf16 %v7368_v46, %v7367_v13  ;;  %v13489_v13 = vpack.c.bf16 %v7436_v53, %v7435_v48  ;;  %v7419_v46 = vld [vmem:[%s18410_s6 + $0x700] sm:$0xff] }
 0x81d   :  { %13414 = vmatprep.subr.bf16.mxu1 %v13413_v9  ;;  %v13453_v9 = vpack.c.bf16 %v7386_v41, %v7385_v12  ;;  %v7420_v12 = vld [vmem:[%s18410_s6 + $0x708] sm:$0xff]  ;;  %v8107_v53 = vld [vmem:[%s18412_s8] sm:$0xff] }
 0x820   :  { %13416 = vmatpush3.bf16.msra.mxu1 %v13415_v30  ;;  %v18134_v30 = vld [vmem:[#allocation3 + $0x18] sm:$0xff] }
 0x821   :  { %13418 = vmatprep.subr.bf16.mxu1 %v13417_v19  ;;  %v13455_v19 = vpack.c.bf16 %v7370_v18, %v7369_v44  ;;  %v18144_v59 = vrot.slane %v18134_v30, %v17509_v58  ;;  %v13491_v44 = vpack.c.bf16 %v7420_v12, %v7419_v46  ;;  %v8110_v12 = vld [vmem:[%s18412_s8 + $0x18] sm:$0xff] }
 0x823   :  { %v7528_v32 = vcombine.high %v18144_v59, %v18144_v59 }
 0x824   :  { %13420 = vmatpush3.bf16.msra.mxu1 %v13419_v35  ;;  %v7405_v35 = vld [vmem:[%s18410_s6 + $0x690] sm:$0xff] }
 0x825   :  { %13422 = vmatprep.subr.bf16.mxu1 %v13421_v14  ;;  %v7406_v14 = vld [vmem:[%s18410_s6 + $0x698] sm:$0xff] }
 0x826   :  { %v13461_v38 = vpack.c.bf16 %v7406_v14, %v7405_v35  ;;  %v7424_v35 = vld [vmem:[%s18410_s6 + $0x728] sm:$0xff]  ;;  %v7441_v14 = vld [vmem:[%s18410_s6 + $0x7b0] sm:$0xff] }
 0x828   :  { %13424 = vmatpush3.bf16.msra.mxu1 %v13423_v7  ;;  %v7407_v7 = vld [vmem:[%s18410_s6 + $0x6a0] sm:$0xff] }
 0x829   :  { %13426 = vmatprep.subr.bf16.mxu1 %v13425_v15  ;;  %v7408_v15 = vld [vmem:[%s18410_s6 + $0x6a8] sm:$0xff] }
 0x82a   :  { %v13465_v23 = vpack.c.bf16 %v7408_v15, %v7407_v7  ;;  %v7444_v7 = vld [vmem:[%s18410_s6 + $0x7c8] sm:$0xff]  ;;  %v13503_v15 = vpack.c.bf16 %v7426_v31, %v7425_v36  ;;  %v8121_v31 = vld [vmem:[%s18412_s8 + $0x70] sm:$0xff] }
 0x82b   :  { %7891 = vmatmul.mubr.f32.vlgmr.msra.gmra.mrb[216].mxu1 %v17935_v5  ;;  %v7378_v5 = vld [vmem:[%s18410_s6 + $0x5b8] sm:$0xff]  ;;  %v8120_v36 = vld [vmem:[%s18412_s8 + $0x68] sm:$0xff] }
 0x82c   :  { %13428 = vmatpush3.bf16.msra.mxu1 %v13427_v22  ;;  %7960 = vmatprep.mubr.f32.mxu1 %v7512_v33  ;;  %v13437_v17 = vpack.c.bf16 %v7378_v5, %v7377_v47  ;;  %v7409_v22 = vld [vmem:[%s18410_s6 + $0x6b0] sm:$0xff]  ;;  %v7394_v33 = vld [vmem:[%s18410_s6 + $0x638] sm:$0xff] }
 0x82d   :  { %13430 = vmatprep.subr.bf16.mxu1 %v13429_v42  ;;  %v13467_v42 = vpack.c.bf16 %v7392_v25, %v7391_v21  ;;  %v7413_v47 = vld [vmem:[%s18410_s6 + $0x6d0] sm:$0xff]  ;;  %v7414_v5 = vld [vmem:[%s18410_s6 + $0x6d8] sm:$0xff]  ;;  %v7428_v21 = vld [vmem:[%s18410_s6 + $0x748] sm:$0xff] }
 0x82e   :  { %v7445_v25 = vld [vmem:[%s18410_s6 + $0x7d0] sm:$0xff] }
 0x830   :  { %13432 = vmatpush3.bf16.msra.mxu1 %v13431_v0  ;;  %v13471_v0 = vpack.c.bf16 %v7394_v33, %v7393_v62  ;;  %v7430_v62 = vld [vmem:[%s18410_s6 + $0x758] sm:$0xff]  ;;  %v7447_v33 = vld [vmem:[%s18410_s6 + $0x7e0] sm:$0xff] }
 0x831   :  { %13434 = vmatprep.subr.bf16.mxu1 %v13433_v3  ;;  %v13473_v3 = vpack.c.bf16 %v7412_v39, %v7411_v20  ;;  %v7448_v20 = vld [vmem:[%s18410_s6 + $0x7e8] sm:$0xff] }
 0x834   :  { %13436 = vmatpush3.bf16.msra.mxu1 %v13435_v34  ;;  %v13475_v34 = vpack.c.bf16 %v7396_v60, %v7395_v49  ;;  %v7432_v49 = vld [vmem:[%s18410_s6 + $0x768] sm:$0xff] }
 0x835   :  { %13438 = vmatprep.subr.bf16.mxu1 %v13437_v17  ;;  %v13477_v17 = vpack.c.bf16 %v7414_v5, %v7413_v47  ;;  %v7449_v47 = vld [vmem:[%s18410_s6 + $0x7f0] sm:$0xff]  ;;  %v7450_v5 = vld [vmem:[%s18410_s6 + $0x7f8] sm:$0xff] }
 0x838   :  { %13440 = vmatpush3.bf16.msra.mxu1 %v13439_v63  ;;  %v13479_v63 = vpack.c.bf16 %v7398_v16, %v7397_v4  ;;  %v13517_v16 = vpack.c.bf16 %v7450_v5, %v7449_v47 }
 0x839   :  { %13442 = vmatprep.subr.bf16.mxu1 %v13441_v61  ;;  %v13481_v61 = vpack.c.bf16 %v7416_v45, %v7415_v56  ;;  %v7433_v56 = vld [vmem:[%s18410_s6 + $0x770] sm:$0xff]  ;;  %v7434_v45 = vld [vmem:[%s18410_s6 + $0x778] sm:$0xff] }
 0x83c   :  { %13444 = vmatpush3.bf16.msra.mxu1 %v13443_v2  ;;  %v13483_v2 = vpack.c.bf16 %v7400_v54, %v7399_v8 }
 0x83d   :  { %13446 = vmatprep.subr.bf16.mxu1 %v13445_v24  ;;  %v13485_v24 = vpack.c.bf16 %v7418_v1, %v7417_v10 }
 0x840   :  { %13448 = vmatpush3.bf16.msra.mxu1 %v13447_v11  ;;  %v7513_v11 = vcombine.high %v18134_v30, %v18134_v30  ;;  %v7439_v30 = vld [vmem:[%s18410_s6 + $0x7a0] sm:$0xff] }
 0x841   :  { %13450 = vmatprep.subr.bf16.mxu1 %v13449_v50  ;;  %v13487_v50 = vpack.c.bf16 %v7402_v52, %v7401_v57 }
 0x842   :  { %v18248_v41 = vrot.slane %v7513_v11, %v17509_v58  ;;  %v7422_v58 = vld [vmem:[%s18410_s6 + $0x718] sm:$0xff]  ;;  %v8108_v11 = vld [vmem:[%s18412_s8 + $0x8] sm:$0xff] }
 0x843   :  { %v13522_v46 = vpack.c.bf16 %v8108_v11, %v8107_v53 }
 0x844   :  { %13452 = vmatpush3.bf16.msra.mxu1 %v13451_v55  ;;  %v7437_v55 = vld [vmem:[%s18410_s6 + $0x790] sm:$0xff]  ;;  %v7529_v6 = vcombine.high %v18248_v41, %v18248_v41 }
 0x845   :  { %13454 = vmatprep.subr.bf16.mxu1 %v13453_v9  ;;  %v7438_v9 = vld [vmem:[%s18410_s6 + $0x798] sm:$0xff] }
 0x846   :  { %v13493_v18 = vpack.c.bf16 %v7438_v9, %v7437_v55  ;;  %v8111_v55 = vld [vmem:[%s18412_s8 + $0x20] sm:$0xff]  ;;  %v8112_v9 = vld [vmem:[%s18412_s8 + $0x28] sm:$0xff] }
 0x848   :  { %13456 = vmatpush3.bf16.msra.mxu1 %v13455_v19  ;;  %v7440_v19 = vld [vmem:[%s18410_s6 + $0x7a8] sm:$0xff] }
 0x849   :  { %13458 = vmatprep.subr.bf16.mxu1 %v13457_v51  ;;  %v13495_v51 = vpack.c.bf16 %v7422_v58, %v7421_v29  ;;  %v13497_v43 = vpack.c.bf16 %v7440_v19, %v7439_v30  ;;  %v8114_v29 = vld [vmem:[%s18412_s8 + $0x38] sm:$0xff]  ;;  %v8116_v30 = vld [vmem:[%s18412_s8 + $0x48] sm:$0xff] }
 0x84b   :  { %7961 = vmatmul.mubr.f32.vlgmr.msra.gmra.mrb[218].mxu1 %v18039_v37  ;;  %v7410_v37 = vld [vmem:[%s18410_s6 + $0x6b8] sm:$0xff] }
 0x84c   :  { %13460 = vmatpush3.bf16.msra.mxu1 %v13459_v28  ;;  %8030 = vmatprep.mubr.f32.mxu1 %v7528_v32  ;;  %v13469_v27 = vpack.c.bf16 %v7410_v37, %v7409_v22  ;;  %v13499_v28 = vpack.c.bf16 %v7424_v35, %v7423_v26  ;;  %v7443_v32 = vld [vmem:[%s18410_s6 + $0x7c0] sm:$0xff]  ;;  %v7446_v22 = vld [vmem:[%s18410_s6 + $0x7d8] sm:$0xff] }
 0x84d   :  { %13462 = vmatprep.subr.bf16.mxu1 %v13461_v38 }
 0x850   :  { %13464 = vmatpush3.bf16.msra.mxu1 %v13463_v40  ;;  %v13505_v40 = vpack.c.bf16 %v7444_v7, %v7443_v32  ;;  %v8122_v7 = vld [vmem:[%s18412_s8 + $0x78] sm:$0xff] }
 0x851   :  { %13466 = vmatprep.subr.bf16.mxu1 %v13465_v23  ;;  %v7427_v23 = vld [vmem:[%s18410_s6 + $0x740] sm:$0xff] }
 0x852   :  { %v13507_v37 = vpack.c.bf16 %v7428_v21, %v7427_v23 }
 0x854   :  { %13468 = vmatpush3.bf16.msra.mxu1 %v13467_v42  ;;  %v13509_v42 = vpack.c.bf16 %v7446_v22, %v7445_v25 }
 0x855   :  { %13470 = vmatprep.subr.bf16.mxu1 %v13469_v27  ;;  %v7429_v27 = vld [vmem:[%s18410_s6 + $0x750] sm:$0xff] }
 0x856   :  { %v13511_v39 = vpack.c.bf16 %v7430_v62, %v7429_v27 }
 0x858   :  { %13472 = vmatpush3.bf16.msra.mxu1 %v13471_v0  ;;  %v13513_v0 = vpack.c.bf16 %v7448_v20, %v7447_v33 }
 0x859   :  { %13474 = vmatprep.subr.bf16.mxu1 %v13473_v3  ;;  %v7431_v3 = vld [vmem:[%s18410_s6 + $0x760] sm:$0xff] }
 0x85a   :  { %v13515_v4 = vpack.c.bf16 %v7432_v49, %v7431_v3 }
 0x85c   :  { %13476 = vmatpush3.bf16.msra.mxu1 %v13475_v34 }
 0x85d   :  { %13478 = vmatprep.subr.bf16.mxu1 %v13477_v17 }
 0x860   :  { %13480 = vmatpush3.bf16.msra.mxu1 %v13479_v63  ;;  %v13519_v63 = vpack.c.bf16 %v7434_v45, %v7433_v56 }
 0x861   :  { %13482 = vmatprep.subr.bf16.mxu1 %v13481_v61  ;;  %v8771_v61 = vld [vmem:[%s18411_s7] ss:$0 sm:$0xff]  ;;  %s8221_s7 = sshll.u32 %s13970_s17, 4  ;;  %s8222_s7 = int_to_ptr.vmem [resolvable:$true] %s8221_s7 }
 0x862   :  { %p13947_p1 = scmp.lt.s32.totalorder %s8222_s7, %s8222_s7 }
 0x864   :  { %13484 = vmatpush3.bf16.msra.mxu1 %v13483_v2 }
 0x865   :  { %13486 = vmatprep.subr.bf16.mxu1 %v13485_v24 }
 0x868   :  { %13488 = vmatpush3.bf16.msra.mxu1 %v13487_v50  ;;  %v8109_v50 = vld [vmem:[%s18412_s8 + $0x10] sm:$0xff] }
 0x869   :  { %13490 = vmatprep.subr.bf16.mxu1 %v13489_v13  ;;  %v13967_v13 = vmov 0.0|0.0  }
 0x86b   :  { %8031 = vmatmul.mubr.f32.vlgmr.msra.gmra.mrb[220].mxu1 %v18144_v59  ;;  %v7442_v59 = vld [vmem:[%s18410_s6 + $0x7b8] sm:$0xff] }
 0x86c   :  { %13492 = vmatpush3.bf16.msra.mxu1 %v13491_v44  ;;  %8100 = vmatprep.mubr.f32.mxu1 %v7529_v6  ;;  %v13501_v38 = vpack.c.bf16 %v7442_v59, %v7441_v14  ;;  %v13528_v44 = vpack.c.bf16 %v8112_v9, %v8111_v55  ;;  %v8115_v6 = vld [vmem:[%s18412_s8 + $0x40] sm:$0xff] }
 0x86d   :  { %13494 = vmatprep.subr.bf16.mxu1 %v13493_v18  ;;  %v8113_v18 = vld [vmem:[%s18412_s8 + $0x30] sm:$0xff]  ;;  %v13534_v19 = vpack.c.bf16 %v8116_v30, %v8115_v6 }
 0x86e   :  { %v13531_v58 = vpack.c.bf16 %v8114_v29, %v8113_v18 }
 0x870   :  { %13496 = vmatpush3.bf16.msra.mxu1 %v13495_v51  ;;  %v8117_v51 = vld [vmem:[%s18412_s8 + $0x50] sm:$0xff] }
 0x871   :  { %13498 = vmatprep.subr.bf16.mxu1 %v13497_v43  ;;  %v8118_v43 = vld [vmem:[%s18412_s8 + $0x58] sm:$0xff] }
 0x872   :  { %v13537_v26 = vpack.c.bf16 %v8118_v43, %v8117_v51 }
 0x874   :  { %13500 = vmatpush3.bf16.msra.mxu1 %v13499_v28 }
 0x875   :  { %13502 = vmatprep.subr.bf16.mxu1 %v13501_v38  ;;  %v8119_v38 = vld [vmem:[%s18412_s8 + $0x60] sm:$0xff] }
 0x876   :  { %v13540_v32 = vpack.c.bf16 %v8120_v36, %v8119_v38 }
 0x878   :  { %13504 = vmatpush3.bf16.msra.mxu1 %v13503_v15  ;;  %v13969_v15 = vmov 0.0  }
 0x879   :  { %13506 = vmatprep.subr.bf16.mxu1 %v13505_v40  ;;  %v13543_v40 = vpack.c.bf16 %v8122_v7, %v8121_v31 }
 0x87c   :  { %13508 = vmatpush3.bf16.msra.mxu1 %v13507_v37 }
 0x87d   :  { %13510 = vmatprep.subr.bf16.mxu1 %v13509_v42 }
 0x87e   :  { %v9941_v60 = vpop.f32.mrb[208].mxu1 }
 0x87f   :  { %v9942_v34 = vpop.f32.mrb[209].mxu1 }
 0x880   :  { %v9943_v17 = vadd.f32 %v9942_v34, %v9941_v60  ;;  %13512 = vmatpush3.bf16.msra.mxu1 %v13511_v39  ;;  %v8772_v34 = vld [vmem:[%s18413_s9] ss:$0 sm:$0xff]  ;;  %s13942_s9 = scalar_lea.vmem %s8222_s7, 32 }
 0x881   :  { %13514 = vmatprep.subr.bf16.mxu1 %v13513_v0  ;;  %p13943_p0 = scmp.ne.s32.totalorder %s8222_s7, %s13942_s9  ;;  %p13948_p2 = scmp.lt.s32.totalorder %s13942_s9, %s13942_s9 }
 0x882   :  { %v7613_v10 = vadd.f32 %v9943_v17, %v8771_v61 }
 0x883   :  { %p13949_p3 = por %p13948_p2, %p13947_p1 }
 0x884   :  { %13516 = vmatpush3.bf16.msra.mxu1 %v13515_v4 }
 0x885   :  { %13518 = vmatprep.subr.bf16.mxu1 %v13517_v16  ;;  %p13950_p4 = pnand %p13949_p3, %p13943_p0 }
 0x888   :  { %13520 = vmatpush3.bf16.msra.mxu1 %v13519_v63 }
 0x889   :  { %13521 = vmatprep.subr.bf16.mxu1 %v13967_v13 }
 0x88b   :  { %8101 = vmatmul.mubr.f32.vlgmr.msra.gmra.mrb[222].mxu1 %v18248_v41  ;;  %v13525_v41 = vpack.c.bf16 %v8110_v12, %v8109_v50 }
 0x88c   :  { %13523 = vmatpush3.bf16.msra.mxu1 %v13522_v46  ;;  %12206 = vmatprep.mubr.msk.f32.mxu1 %vm13968_vm4, %v13969_v15 }
 0x88d   :  { %13524 = vmatprep.subr.bf16.mxu1 %v13967_v13 }
 0x890   :  { %13526 = vmatpush3.bf16.msra.mxu1 %v13525_v41 }
 0x891   :  { %13527 = vmatprep.subr.bf16.mxu1 %v13967_v13 }
 0x894   :  { %13529 = vmatpush3.bf16.msra.mxu1 %v13528_v44 }
 0x895   :  { %13530 = vmatprep.subr.bf16.mxu1 %v13967_v13 }
 0x898   :  { %13532 = vmatpush3.bf16.msra.mxu1 %v13531_v58 }
 0x899   :  { %13533 = vmatprep.subr.bf16.mxu1 %v13967_v13 }
 0x89c   :  { %13535 = vmatpush3.bf16.msra.mxu1 %v13534_v19 }
 0x89d   :  { %13536 = vmatprep.subr.bf16.mxu1 %v13967_v13 }
 0x89e   :  { %v9976_v8 = vpop.f32.mrb[210].mxu1 }
 0x89f   :  { %v9977_v54 = vpop.f32.mrb[211].mxu1 }
 0x8a0   :  { %v9978_v1 = vadd.f32 %v9977_v54, %v9976_v8  ;;  %13538 = vmatpush3.bf16.msra.mxu1 %v13537_v26 }
 0x8a1   :  { %13539 = vmatprep.subr.bf16.mxu1 %v13967_v13 }
 0x8a2   :  { %v7683_v2 = vadd.f32 %v9978_v1, %v7613_v10 }
 0x8a4   :  { %13541 = vmatpush3.bf16.msra.mxu1 %v13540_v32 }
 0x8a5   :  { %13542 = vmatprep.subr.bf16.mxu1 %v13967_v13 }
 0x8a8   :  { %13544 = vmatpush3.bf16.msra.mxu1 %v13543_v40 }
 0x8be   :  { %v10011_v24 = vpop.f32.mrb[212].mxu1 }
 0x8bf   :  { %v10012_v57 = vpop.f32.mrb[213].mxu1 }
 0x8c0   :  { %v10013_v52 = vadd.f32 %v10012_v57, %v10011_v24 }
 0x8c2   :  { %v7753_v48 = vadd.f32 %v10013_v52, %v7683_v2 }
 0x8de   :  { %v10046_v35 = vpop.f32.mrb[214].mxu1 }
 0x8df   :  { %v10047_v14 = vpop.f32.mrb[215].mxu1 }
 0x8e0   :  { %v10048_v59 = vadd.f32 %v10047_v14, %v10046_v35 }
 0x8e2   :  { %v7823_v28 = vadd.f32 %v10048_v59, %v7753_v48 }
 0x8fe   :  { %v10081_v23 = vpop.f32.mrb[216].mxu1 }
 0x8ff   :  { %v10082_v21 = vpop.f32.mrb[217].mxu1 }
 0x900   :  { %v10083_v25 = vadd.f32 %v10082_v21, %v10081_v23 }
 0x902   :  { %v7893_v22 = vadd.f32 %v10083_v25, %v7823_v28 }
 0x91e   :  { %v10116_v37 = vpop.f32.mrb[218].mxu1 }
 0x91f   :  { %v10117_v42 = vpop.f32.mrb[219].mxu1 }
 0x920   :  { %v10118_v27 = vadd.f32 %v10117_v42, %v10116_v37 }
 0x922   :  { %v7963_v62 = vadd.f32 %v10118_v27, %v7893_v22 }
 0x93e   :  { %v10151_v33 = vpop.f32.mrb[220].mxu1 }
 0x93f   :  { %v10152_v20 = vpop.f32.mrb[221].mxu1 }
 0x940   :  { %v10153_v39 = vadd.f32 %v10152_v20, %v10151_v33 }
 0x942   :  { %v8033_v0 = vadd.f32 %v10153_v39, %v7963_v62 }
 0x95e   :  { %v10186_v3 = vpop.f32.mrb[222].mxu1 }
 0x95f   :  { %v10187_v49 = vpop.f32.mrb[223].mxu1 }
 0x960   :  { %v10188_v60 = vadd.f32 %v10187_v49, %v10186_v3 }
 0x962   :  { %v8103_v47 = vadd.f32 %v10188_v60, %v8033_v0 }
 0x964   :  { %v8106_v5 = vmax.f32 %v8103_v47, 0.0 }
 0x966   :  { %12207 = vmatmul.mubr.f32.vlgmr.msra.gmra.mrb[224].mxu1 %v8106_v5 }
 0xa39   :  { %v8196_v17 = vpop.f32.mrb[224].mxu1 }
 0xa3a   :  { %v8197_v4 = vadd.f32 %v8772_v34, %v8196_v17  ;;  %v12208_v16 = vpop.f32.mrb[225].mxu1 }
 0xa3c   :  { %v8201_v56 = vsel %vm8200_vm5, %v8197_v4, -inf }
 0xa3d   :  { %8202 = vmax.xlane.f32.xlu0 %v8201_v56 }
 0xaca   :  { %v8203_v45 = vpop.xlane.xlu0 %8202 }
 0xacb   :  { %v8204_v63 = vsub.f32 %v8197_v4, %v8203_v45 }
 0xacd   :  { %v8205_v61 = vmul.f32 1.442695, %v8204_v63 }
 0xacf   :  { %13938 = vpow2.f32 %v8205_v61 }
 0xad9   :  { %v13939_v8 = vpop.eup %13938 }
 0xada   :  { %v8207_v54 = vsel %vm8200_vm5, %v13939_v8, 0.0 }
 0xadb   :  { %8208 = vadd.xlane.f32.xlu0 %v8207_v54 }
 0xb68   :  { %v8209_v10 = vpop.xlane.xlu0 %8208 }
 0xb69   :  { %13940 = vlog2.f32 %v8209_v10 }
 0xb73   :  { %v13941_v1 = vpop.eup %13940 }
 0xb74   :  { %v8211_v2 = vmul.f32 0.6931472, %v13941_v1 }
 0xb76   :  { %v8212_v24 = vsub.f32 %v8204_v63, %v8211_v2 }
 0xb78   :  { %8214 = vst.msk [vmem:[#allocation4] sm:$0x3] %vm8213_vm6, %v8212_v24 }
 0xb79   :  { %13953 = shalt.err (!%p13950_p4)
}
 0xb7a   :  { %s13954_s20 = scalar_lea.hbm %s18414_s10, 32 }
 0xb7b   :  { %p13955_p5 = scmp.ne.s32.totalorder %s18414_s10, %s13954_s20  ;;  %p13958_p6 = scmp.lt.u32.totalorder %s13954_s20, %s18414_s10 }
 0xb7d   :  { %p13960_p7 = pnand %p13958_p6, %p13955_p5 }
 0xb7f   :  { %13963 = shalt.err (!%p13960_p7)
}
 0xb80   :  { %8224 = dma.vmem_to_hbm [thread:$0]  %s8222_s7, 32, %s18414_s10, [#allocation5]  }
 0xb81   :  { %13964 = dma.done.wait [#allocation5], 32  }
 0xb82   :  { %13965 = vsyncadd [#allocation5], 4294967264 }
 0xb83   :  { %8228 = vsyncpa [#allocation5], 1 }

</bundles_post_ra>
